<compile_context>
chip_gen: v5e
topology: v5e:2x2
jax: 0.10.0
libtpu: 0.0.40
codegen_flags: <defaults>
</compile_context>

<pallas_src>
import numpy as np
import jax
import jax.numpy as jnp
from jax.experimental import pallas as pl
from jax.experimental.pallas import tpu as pltpu

# ----- hyperparameters (small shapes) -----
N_NODES = 16            # nodes per graph ("batch_size" of the torch module)
SEQ_LEN = 8             # sequence_length
D_IN = 4                # input_dim_per_step
INPUT_DIM = SEQ_LEN * D_IN           # 32
HIDDEN = 32             # hidden_dim
OUT_DIM = 1             # output_dim
NUM_ST_LAYERS = 3
BN_EPS = 1e-5

K_COLS = SEQ_LEN * HIDDEN            # 256 flat activation columns
TA_COLS = SEQ_LEN * (HIDDEN // 2)    # 128 temporal-attention hidden columns
FA_COLS = HIDDEN * (SEQ_LEN // 2)    # 128 feature-attention hidden columns

GRAPHS_PER_TILE = 16                 # 16 graphs x 16 nodes = 256 rows per grid step
TILE_M = GRAPHS_PER_TILE * N_NODES   # 256 (fills v6e/v7x MXU row tile; 2x128 on v5e)
OUT_COLS = 128                       # lane-dense padded output width
BIAS_ROWS = 16

USE_APPROX_RECIPROCAL = True         # exact-reciprocal fallback switch for the softmaxes

# ----- packed-weight slab row layout (all offsets are multiples of 8) -----
ROW_EMB = 0                          # [INPUT_DIM, K]   block-diag(We^T)
ROW_WTA1 = ROW_EMB + INPUT_DIM       # 32   [K, K] cols < TA_COLS
ROW_WTA2 = ROW_WTA1 + K_COLS         # 288  [K, K] rows < TA_COLS, cols < S
ROW_TEXP = ROW_WTA2 + K_COLS         # 544  [S, K]  step-weight broadcast
ROW_F1 = ROW_TEXP + SEQ_LEN          # 552  [K, K] cols < FA_COLS
ROW_F2 = ROW_F1 + K_COLS             # 808  [K, K] rows < FA_COLS, cols < H
ROW_SUM = ROW_F2 + K_COLS            # 1064 [K, K] cols < H  (sum over S)
ROW_WO1 = ROW_SUM + K_COLS           # 1320 [H, K] cols < H//2
ROW_WO2 = ROW_WO1 + HIDDEN           # 1352 [K, K] rows < H//2, col 0
PACK_ROWS = ROW_WO2 + K_COLS         # 1608


# ----------------------------- the fused Pallas kernel -----------------------------

def _stgcn_fused_kernel(x_ref, a_ref, stw_ref, w_ref, b_ref, o_ref):
    mm_dt = stw_ref.dtype

    def dot(a, b):
        return jnp.dot(a.astype(mm_dt), b.astype(mm_dt),
                       preferred_element_type=jnp.float32)

    def recip(v):
        if USE_APPROX_RECIPROCAL:
            return pl.reciprocal(v, approx=True)
        return 1.0 / v

    # static, aligned views into the packed weight slab
    emb_w = w_ref[ROW_EMB:ROW_EMB + INPUT_DIM, :]
    wta1 = w_ref[ROW_WTA1:ROW_WTA1 + K_COLS, :]
    wta2 = w_ref[ROW_WTA2:ROW_WTA2 + K_COLS, :]
    texp = w_ref[ROW_TEXP:ROW_TEXP + SEQ_LEN, :]
    f1 = w_ref[ROW_F1:ROW_F1 + K_COLS, :]
    f2 = w_ref[ROW_F2:ROW_F2 + K_COLS, :]
    summat = w_ref[ROW_SUM:ROW_SUM + K_COLS, :]
    wo1 = w_ref[ROW_WO1:ROW_WO1 + HIDDEN, :]
    wo2 = w_ref[ROW_WO2:ROW_WO2 + K_COLS, :]

    # --- embedding: relu(Linear) for all S steps via one block-diagonal matmul ---
    slab = jnp.maximum(dot(x_ref[...], emb_w) + b_ref[0:1, :], 0.0)        # [M, K] f32

    # --- 3 SpatioTemporalConv layers: GCNConv + Conv1d(k=3,pad=1) + eval-BN folded
    #     into one column-space operator per layer; identity residual + relu.
    a_big = a_ref[...]                                                     # block-diag A_hat
    for l in range(NUM_ST_LAYERS):
        mixed = dot(a_big, dot(slab, stw_ref[l])) + b_ref[1 + l:2 + l, :]
        slab = jnp.maximum(mixed + slab, 0.0)
        # F.dropout(p=0.2) in eval mode == identity
        # TODO(synk): training-mode dropout / batch-statistics BatchNorm not implemented.

    # --- temporal attention: MLP(H -> H/2 -> 1) per step, softmax over S ---
    h1 = jnp.maximum(dot(slab, wta1) + b_ref[4:5, :], 0.0)                 # [M, K], cols>=128 == 0
    logits = (dot(h1, wta2) + b_ref[5:6, :])[:, :SEQ_LEN]                  # [M, S]
    logits = logits - jnp.max(logits, axis=-1, keepdims=True)
    et = jnp.exp(logits)
    tw = et * recip(jnp.sum(et, axis=-1, keepdims=True))                   # [M, S]
    xw = slab * dot(tw, texp)                                              # [M, K]

    # --- feature attention: MLP(S -> S/2 -> 1) per feature, softmax over H ---
    g1 = jnp.maximum(dot(xw, f1) + b_ref[6:7, :], 0.0)                     # [M, K], cols>=128 == 0
    fl = (dot(g1, f2) + b_ref[7:8, :])[:, :HIDDEN]                         # [M, H]
    fl = fl - jnp.max(fl, axis=-1, keepdims=True)
    ef = jnp.exp(fl)
    fw = ef * recip(jnp.sum(ef, axis=-1, keepdims=True))                   # [M, H]
    x_final = dot(xw, summat)[:, :HIDDEN] * fw                             # [M, H]

    # --- output layer: Linear -> ReLU -> (Dropout = eval identity) -> Linear ---
    z1 = jnp.maximum(dot(x_final, wo1) + b_ref[8:9, :], 0.0)               # [M, K], cols>=16 == 0
    o_ref[...] = (dot(z1, wo2) + b_ref[9:10, :])[:, :OUT_COLS]             # lane-dense [M, 128]


def _cost_estimate(x, a_tile, fp, total_rows):
    m, k = TILE_M, K_COLS
    num_tiles = total_rows // TILE_M
    per_tile_cols = (INPUT_DIM * k
                     + NUM_ST_LAYERS * (k * k + m * k)
                     + 6 * k * k                 # wta1, wta2, f1, f2, summat, wo2 (padded)
                     + SEQ_LEN * k + HIDDEN * k)  # texp, wo1
    flops = 2 * m * per_tile_cols * num_tiles
    transcendentals = total_rows * (SEQ_LEN + HIDDEN + 2)
    itemsize = lambda v: v.size * v.dtype.itemsize
    bytes_accessed = int(itemsize(x) + itemsize(a_tile)
                         + sum(itemsize(v) for v in fp.values())
                         + total_rows * OUT_COLS * 4)
    return pl.CostEstimate(flops=int(flops), transcendentals=int(transcendentals),
                           bytes_accessed=bytes_accessed)


def stgcn_attention_forward(x, a_tile, fp):
    """x: [total_rows, INPUT_DIM] f32, a_tile: [TILE_M, TILE_M] block-diag adjacency."""
    total_rows = x.shape[0]
    assert total_rows % TILE_M == 0, "batch rows must be a multiple of TILE_M"
    num_tiles = total_rows // TILE_M
    a_tile = a_tile.astype(fp['st_w'].dtype)

    out = pl.pallas_call(
        _stgcn_fused_kernel,
        out_shape=jax.ShapeDtypeStruct((total_rows, OUT_COLS), jnp.float32),
        grid_spec=pltpu.PrefetchScalarGridSpec(
            num_scalar_prefetch=0,
            grid=(num_tiles,),
            in_specs=[
                pl.BlockSpec((TILE_M, INPUT_DIM), lambda b: (b, 0)),          # x (pipelined)
                pl.BlockSpec((TILE_M, TILE_M), lambda b: (0, 0)),             # a_tile (resident)
                pl.BlockSpec((NUM_ST_LAYERS, K_COLS, K_COLS), lambda b: (0, 0, 0)),  # st_w
                pl.BlockSpec((PACK_ROWS, K_COLS), lambda b: (0, 0)),          # packed weights
                pl.BlockSpec((BIAS_ROWS, K_COLS), lambda b: (0, 0)),          # packed biases
            ],
            out_specs=pl.BlockSpec((TILE_M, OUT_COLS), lambda b: (b, 0)),
        ),
        compiler_params=pltpu.CompilerParams(dimension_semantics=("parallel",)),
        cost_estimate=_cost_estimate(x, a_tile, fp, total_rows),
    )(x, a_tile, fp['st_w'], fp['wpack'], fp['bias'])
    return out[:, :OUT_DIM]


# ----------------------------- host-side weight folding -----------------------------

def fold_params(raw, matmul_dtype=jnp.bfloat16):
    """Fold torch-style weights into the flat-column operators used by the fused kernel.

    The [M, S*H] slab's column index is interpreted as (s, h) after the embedding / for the
    attention head, and as (c, t) inside the ST layers — exactly PyTorch's row-major .view()
    reinterpretations, with zero data movement.  Unused pack columns/rows are zero so the
    padded contractions are exact.
    """
    S, H, K, Din = SEQ_LEN, HIDDEN, K_COLS, D_IN
    eyeS = np.eye(S)
    f64 = lambda a: np.asarray(a, np.float64)

    # embedding applied to all S steps at once: block-diag(We^T), bias tiled per step
    We, be = f64(raw['W_e']), f64(raw['b_e'])
    emb_w = np.kron(eyeS, We.T)                          # [S*Din, K]
    emb_b = np.tile(be, S)

    # ST layers: spatial GCN (kron) @ temporal Conv1d (banded) * eval-BN scale
    st_w, st_b = [], []
    for lp in raw['st']:
        Wg, bg = f64(lp['W_g']), f64(lp['b_g'])
        Wt, bt = f64(lp['W_t']), f64(lp['b_t'])
        gamma, beta = f64(lp['gamma']), f64(lp['beta'])
        mean, var = f64(lp['running_mean']), f64(lp['running_var'])
        G = np.kron(Wg.T, eyeS)                          # [K, K]: slab @ G == x_t @ Wg^T per t
        T = np.zeros((K, K), np.float64)                 # Conv1d(k=3, pad=1) on (c, t) columns
        for k in range(3):
            for t in range(S):
                u = t + k - 1
                if 0 <= u < S:
                    T[u::S, t::S] = Wt[:, :, k].T
        scale = gamma / np.sqrt(var + BN_EPS)            # eval BN with running stats
        shift = beta - mean * scale
        scale_k, shift_k = np.repeat(scale, S), np.repeat(shift, S)
        bg_k, bt_k = np.repeat(bg, S), np.repeat(bt, S)
        st_w.append((G @ T) * scale_k[None, :])
        st_b.append((bg_k @ T + bt_k) * scale_k + shift_k)

    # packed small-weights slab [PACK_ROWS, K]
    wpack = np.zeros((PACK_ROWS, K), np.float64)
    wpack[ROW_EMB:ROW_EMB + S * Din, :] = emb_w
    Wta1, Wta2 = f64(raw['W_ta1']), f64(raw['W_ta2'])
    wpack[ROW_WTA1:ROW_WTA1 + K, :TA_COLS] = np.kron(eyeS, Wta1.T)
    wpack[ROW_WTA2:ROW_WTA2 + TA_COLS, :S] = np.kron(eyeS, Wta2.T)
    wpack[ROW_TEXP:ROW_TEXP + S, :] = np.kron(eyeS, np.ones((1, H)))
    Wfa1, Wfa2 = f64(raw['W_fa1']), f64(raw['W_fa2'])
    F1 = np.zeros((K, FA_COLS), np.float64)
    for s in range(S):
        for j in range(S // 2):
            F1[s * H + np.arange(H), np.arange(H) * (S // 2) + j] = Wfa1[j, s]
    wpack[ROW_F1:ROW_F1 + K, :FA_COLS] = F1
    wpack[ROW_F2:ROW_F2 + FA_COLS, :H] = np.kron(np.eye(H), Wfa2.T)
    wpack[ROW_SUM:ROW_SUM + K, :H] = np.kron(np.ones((S, 1)), np.eye(H))
    Wo1, Wo2 = f64(raw['W_o1']), f64(raw['W_o2'])
    wpack[ROW_WO1:ROW_WO1 + H, :H // 2] = Wo1.T
    wpack[ROW_WO2:ROW_WO2 + H // 2, :OUT_DIM] = Wo2.T

    # single packed f32 bias slab (one DMA for every 1-D parameter)
    bias = np.zeros((BIAS_ROWS, K), np.float64)
    bias[0, :] = emb_b
    for l in range(NUM_ST_LAYERS):
        bias[1 + l, :] = st_b[l]
    bias[4, :TA_COLS] = np.tile(f64(raw['b_ta1']), S)
    bias[5, :S] = f64(raw['b_ta2'])[0]
    bias[6, :FA_COLS] = np.tile(f64(raw['b_fa1']), H)
    bias[7, :H] = f64(raw['b_fa2'])[0]
    bias[8, :H // 2] = f64(raw['b_o1'])
    bias[9, :OUT_DIM] = f64(raw['b_o2'])

    cast = lambda v: jnp.asarray(np.asarray(v, np.float32)).astype(matmul_dtype)
    return dict(
        st_w=cast(np.stack(st_w, axis=0)),               # [3, K, K] (matmul dtype)
        wpack=cast(wpack),                                # [PACK_ROWS, K] (matmul dtype)
        bias=jnp.asarray(np.asarray(bias, np.float32)),   # [16, K] f32 (elementwise adds)
    )


# ----------------------------- raw parameters & adjacency -----------------------------

def init_params(key):
    keys = jax.random.split(key, 40)
    ki = iter(keys)

    def rnd(shape, scale=0.1):
        return np.asarray(scale * jax.random.normal(next(ki), shape, dtype=jnp.float32))

    raw = {'st': []}
    raw['W_e'] = rnd((HIDDEN, D_IN)); raw['b_e'] = rnd((HIDDEN,))
    for _ in range(NUM_ST_LAYERS):
        raw['st'].append(dict(
            W_g=rnd((HIDDEN, HIDDEN)), b_g=rnd((HIDDEN,)),
            W_t=rnd((HIDDEN, HIDDEN, 3)), b_t=rnd((HIDDEN,)),
            gamma=1.0 + rnd((HIDDEN,)), beta=rnd((HIDDEN,)),
            running_mean=np.zeros((HIDDEN,), np.float32),
            running_var=np.ones((HIDDEN,), np.float32)))
    raw['W_ta1'] = rnd((HIDDEN // 2, HIDDEN)); raw['b_ta1'] = rnd((HIDDEN // 2,))
    raw['W_ta2'] = rnd((1, HIDDEN // 2));      raw['b_ta2'] = rnd((1,))
    raw['W_fa1'] = rnd((SEQ_LEN // 2, SEQ_LEN)); raw['b_fa1'] = rnd((SEQ_LEN // 2,))
    raw['W_fa2'] = rnd((1, SEQ_LEN // 2));       raw['b_fa2'] = rnd((1,))
    raw['W_o1'] = rnd((HIDDEN // 2, HIDDEN));    raw['b_o1'] = rnd((HIDDEN // 2,))
    raw['W_o2'] = rnd((OUT_DIM, HIDDEN // 2));   raw['b_o2'] = rnd((OUT_DIM,))
    return raw


def build_normalized_adjacency(edge_index, num_nodes):
    ei = np.asarray(edge_index)
    mask = (ei[0] < num_nodes) & (ei[1] < num_nodes)          # filter_edge_index
    ei = ei[:, mask]
    src = np.concatenate([ei[0], np.arange(num_nodes)])       # GCNConv add_self_loops
    dst = np.concatenate([ei[1], np.arange(num_nodes)])
    A = np.zeros((num_nodes, num_nodes), np.float32)
    np.add.at(A, (dst, src), 1.0)                             # A[target, source] += 1
    deg = A.sum(axis=1)
    dinv = np.where(deg > 0, 1.0 / np.sqrt(np.maximum(deg, 1e-12)), 0.0).astype(np.float32)
    return (dinv[:, None] * A * dinv[None, :]).astype(np.float32)


# ----------------------------- numpy reference (mirrors the torch code) -----------------------------

def _softmax(x, axis):
    m = x.max(axis=axis, keepdims=True)
    e = np.exp(x - m)
    return e / e.sum(axis=axis, keepdims=True)


def reference_forward(x_in, a_hat, raw):
    f64 = lambda a: np.asarray(a, np.float64)
    x = f64(x_in); A = f64(a_hat)
    N = x.shape[0]
    xr = x.reshape(N, SEQ_LEN, D_IN)
    emb = np.maximum(xr @ f64(raw['W_e']).T + f64(raw['b_e']), 0.0)
    x_st = emb.reshape(N, -1)
    for lp in raw['st']:
        W_g, b_g = f64(lp['W_g']), f64(lp['b_g'])
        W_t, b_t = f64(lp['W_t']), f64(lp['b_t'])
        gamma, beta = f64(lp['gamma']), f64(lp['beta'])
        mean, var = f64(lp['running_mean']), f64(lp['running_var'])
        x3 = x_st.reshape(N, HIDDEN, SEQ_LEN)
        spatial = np.zeros((N, HIDDEN, SEQ_LEN))
        for t in range(SEQ_LEN):
            spatial[:, :, t] = A @ (x3[:, :, t] @ W_g.T) + b_g
        padded = np.pad(spatial, ((0, 0), (0, 0), (1, 1)))
        temporal = np.zeros((N, HIDDEN, SEQ_LEN))
        for s in range(SEQ_LEN):
            temporal[:, :, s] = np.einsum('nck,ock->no', padded[:, :, s:s + 3], W_t) + b_t
        scale = gamma / np.sqrt(var + BN_EPS)                 # eval BN, running stats
        bn = (temporal - mean[None, :, None]) * scale[None, :, None] + beta[None, :, None]
        x_st = np.maximum(bn + x3, 0.0).reshape(N, -1)
    x_att = x_st.reshape(N, SEQ_LEN, HIDDEN)
    tw = np.maximum(x_att @ f64(raw['W_ta1']).T + f64(raw['b_ta1']), 0.0) @ f64(raw['W_ta2']).T \
        + f64(raw['b_ta2'])
    tw = _softmax(tw[..., 0], axis=1)[..., None]
    xwt = x_att * tw
    xt_ = xwt.transpose(0, 2, 1)
    fw = np.maximum(xt_ @ f64(raw['W_fa1']).T + f64(raw['b_fa1']), 0.0) @ f64(raw['W_fa2']).T \
        + f64(raw['b_fa2'])
    fw = _softmax(fw[..., 0], axis=1)[..., None]
    x_final = (xt_ * fw).sum(axis=2)
    z1 = np.maximum(x_final @ f64(raw['W_o1']).T + f64(raw['b_o1']), 0.0)
    return z1 @ f64(raw['W_o2']).T + f64(raw['b_o2'])


# ----------------------------- main -----------------------------

if __name__ == "__main__":
    key = jax.random.PRNGKey(0)
    k_x, k_p = jax.random.split(key)

    n_graphs = 64                              # batch of independent graphs, 4 grid steps
    total_rows = n_graphs * N_NODES            # 1024 node rows
    x = jax.random.normal(k_x, (total_rows, INPUT_DIM), dtype=jnp.float32)

    # simple bidirectional ring graph as edge_index [2, num_edges] (same topology per graph)
    src = np.arange(N_NODES)
    dst = (src + 1) % N_NODES
    edge_index = np.concatenate(
        [np.stack([src, dst]), np.stack([dst, src])], axis=1).astype(np.int32)
    a_hat = build_normalized_adjacency(edge_index, N_NODES)               # [16, 16]

    # per-tile block-diagonal adjacency (16 graphs per 256-row tile)
    a_tile = jnp.asarray(np.kron(np.eye(GRAPHS_PER_TILE, dtype=np.float32), a_hat))

    raw = init_params(k_p)

    # float64 reference over the full batch (block-diagonal adjacency over all graphs)
    a_full = np.kron(np.eye(n_graphs, dtype=np.float64), a_hat.astype(np.float64))
    ref = reference_forward(np.asarray(x), a_full, raw)

    # exact-structure check: f32 matmul operands, tight tolerance
    out_f32 = stgcn_attention_forward(x, a_tile, fold_params(raw, jnp.float32))
    out_f32 = jax.block_until_ready(out_f32)
    np.testing.assert_allclose(np.asarray(out_f32), ref, rtol=2e-3, atol=2e-3)

    # default perf configuration: bf16 matmul operands, f32 accumulation
    out_bf16 = stgcn_attention_forward(x, a_tile, fold_params(raw, jnp.bfloat16))
    out_bf16 = jax.block_until_ready(out_bf16)
    np.testing.assert_allclose(np.asarray(out_bf16), ref, rtol=2e-2, atol=2e-2)

    print("KERNEL_OK")
</pallas_src>

<mosaic_0001>
module attributes {stable_mosaic.version = 11 : i64} {
  func.func @_stgcn_fused_kernel(%arg0: i32, %arg1: memref<256x32xf32, #tpu.memory_space<vmem>>, %arg2: memref<256x256xf32, #tpu.memory_space<vmem>>, %arg3: memref<3x256x256xf32, #tpu.memory_space<vmem>>, %arg4: memref<1608x256xf32, #tpu.memory_space<vmem>>, %arg5: memref<16x256xf32, #tpu.memory_space<vmem>>, %arg6: memref<256x128xf32, #tpu.memory_space<vmem>>) attributes {dimension_semantics = [#tpu.dimension_semantics<parallel>], iteration_bounds = array<i64: 4>, scalar_prefetch = 0 : i64, scratch_operands = 0 : i64, tpu.core_type = #tpu.core_type<tc>, window_params = [{transform_indices = @transform_0, window_bounds = array<i64: 256, 32>}, {pipeline_mode = #tpu.pipeline_mode<synchronous>, transform_indices = @transform_1, window_bounds = array<i64: 256, 256>}, {pipeline_mode = #tpu.pipeline_mode<synchronous>, transform_indices = @transform_2, window_bounds = array<i64: 3, 256, 256>}, {pipeline_mode = #tpu.pipeline_mode<synchronous>, transform_indices = @transform_3, window_bounds = array<i64: 1608, 256>}, {pipeline_mode = #tpu.pipeline_mode<synchronous>, transform_indices = @transform_4, window_bounds = array<i64: 16, 256>}, {transform_indices = @transform_5, window_bounds = array<i64: 256, 128>}]} {
    %c0 = arith.constant 0 : index
    %c0_0 = arith.constant 0 : index
    %0 = vector.load %arg4[%c0, %c0_0] : memref<1608x256xf32, #tpu.memory_space<vmem>>, vector<32x256xf32>
    %c32 = arith.constant 32 : index
    %c0_1 = arith.constant 0 : index
    %1 = vector.load %arg4[%c32, %c0_1] : memref<1608x256xf32, #tpu.memory_space<vmem>>, vector<256x256xf32>
    %c288 = arith.constant 288 : index
    %c0_2 = arith.constant 0 : index
    %2 = vector.load %arg4[%c288, %c0_2] : memref<1608x256xf32, #tpu.memory_space<vmem>>, vector<256x256xf32>
    %c544 = arith.constant 544 : index
    %c0_3 = arith.constant 0 : index
    %3 = vector.load %arg4[%c544, %c0_3] : memref<1608x256xf32, #tpu.memory_space<vmem>>, vector<8x256xf32>
    %c552 = arith.constant 552 : index
    %c0_4 = arith.constant 0 : index
    %4 = vector.load %arg4[%c552, %c0_4] : memref<1608x256xf32, #tpu.memory_space<vmem>>, vector<256x256xf32>
    %c808 = arith.constant 808 : index
    %c0_5 = arith.constant 0 : index
    %5 = vector.load %arg4[%c808, %c0_5] : memref<1608x256xf32, #tpu.memory_space<vmem>>, vector<256x256xf32>
    %c1064 = arith.constant 1064 : index
    %c0_6 = arith.constant 0 : index
    %6 = vector.load %arg4[%c1064, %c0_6] : memref<1608x256xf32, #tpu.memory_space<vmem>>, vector<256x256xf32>
    %c1320 = arith.constant 1320 : index
    %c0_7 = arith.constant 0 : index
    %7 = vector.load %arg4[%c1320, %c0_7] : memref<1608x256xf32, #tpu.memory_space<vmem>>, vector<32x256xf32>
    %c1352 = arith.constant 1352 : index
    %c0_8 = arith.constant 0 : index
    %8 = vector.load %arg4[%c1352, %c0_8] : memref<1608x256xf32, #tpu.memory_space<vmem>>, vector<256x256xf32>
    %c0_9 = arith.constant 0 : index
    %c0_10 = arith.constant 0 : index
    %9 = vector.load %arg1[%c0_9, %c0_10] : memref<256x32xf32, #tpu.memory_space<vmem>>, vector<256x32xf32>
    %cst = arith.constant dense<0.000000e+00> : vector<256x256xf32>
    %10 = tpu.matmul %9, %0, %cst {dimension_numbers = #tpu.dot_dimension_numbers<[1], [0], [0], [1], [0, 0, 1, 1], [], []>} : vector<256x32xf32>, vector<32x256xf32>, vector<256x256xf32> -> vector<256x256xf32>
    %c0_11 = arith.constant 0 : index
    %c0_12 = arith.constant 0 : index
    %11 = vector.load %arg5[%c0_11, %c0_12] : memref<16x256xf32, #tpu.memory_space<vmem>>, vector<1x256xf32>
    %12 = vector.broadcast %11 : vector<1x256xf32> to vector<256x256xf32>
    %13 = arith.addf %10, %12 : vector<256x256xf32>
    %cst_13 = arith.constant 0.000000e+00 : f32
    %14 = vector.broadcast %cst_13 : f32 to vector<256x256xf32>
    %15 = arith.maximumf %13, %14 : vector<256x256xf32>
    %c0_14 = arith.constant 0 : index
    %c0_15 = arith.constant 0 : index
    %16 = vector.load %arg2[%c0_14, %c0_15] : memref<256x256xf32, #tpu.memory_space<vmem>>, vector<256x256xf32>
    %c0_16 = arith.constant 0 : index
    %c0_17 = arith.constant 0 : index
    %c0_18 = arith.constant 0 : index
    %17 = vector.load %arg3[%c0_16, %c0_17, %c0_18] : memref<3x256x256xf32, #tpu.memory_space<vmem>>, vector<1x256x256xf32>
    %18 = vector.shape_cast %17 : vector<1x256x256xf32> to vector<256x256xf32>
    %cst_19 = arith.constant dense<0.000000e+00> : vector<256x256xf32>
    %19 = tpu.matmul %15, %18, %cst_19 {dimension_numbers = #tpu.dot_dimension_numbers<[1], [0], [0], [1], [0, 0, 1, 1], [], []>} : vector<256x256xf32>, vector<256x256xf32>, vector<256x256xf32> -> vector<256x256xf32>
    %cst_20 = arith.constant dense<0.000000e+00> : vector<256x256xf32>
    %20 = tpu.matmul %16, %19, %cst_20 {dimension_numbers = #tpu.dot_dimension_numbers<[1], [0], [0], [1], [0, 0, 1, 1], [], []>} : vector<256x256xf32>, vector<256x256xf32>, vector<256x256xf32> -> vector<256x256xf32>
    %c1 = arith.constant 1 : index
    %c0_21 = arith.constant 0 : index
    %21 = vector.load %arg5[%c1, %c0_21] : memref<16x256xf32, #tpu.memory_space<vmem>>, vector<1x256xf32>
    %22 = vector.broadcast %21 : vector<1x256xf32> to vector<256x256xf32>
    %23 = arith.addf %20, %22 : vector<256x256xf32>
    %24 = arith.addf %23, %15 : vector<256x256xf32>
    %cst_22 = arith.constant 0.000000e+00 : f32
    %25 = vector.broadcast %cst_22 : f32 to vector<256x256xf32>
    %26 = arith.maximumf %24, %25 : vector<256x256xf32>
    %c1_23 = arith.constant 1 : index
    %c0_24 = arith.constant 0 : index
    %c0_25 = arith.constant 0 : index
    %27 = vector.load %arg3[%c1_23, %c0_24, %c0_25] : memref<3x256x256xf32, #tpu.memory_space<vmem>>, vector<1x256x256xf32>
    %28 = vector.shape_cast %27 : vector<1x256x256xf32> to vector<256x256xf32>
    %cst_26 = arith.constant dense<0.000000e+00> : vector<256x256xf32>
    %29 = tpu.matmul %26, %28, %cst_26 {dimension_numbers = #tpu.dot_dimension_numbers<[1], [0], [0], [1], [0, 0, 1, 1], [], []>} : vector<256x256xf32>, vector<256x256xf32>, vector<256x256xf32> -> vector<256x256xf32>
    %cst_27 = arith.constant dense<0.000000e+00> : vector<256x256xf32>
    %30 = tpu.matmul %16, %29, %cst_27 {dimension_numbers = #tpu.dot_dimension_numbers<[1], [0], [0], [1], [0, 0, 1, 1], [], []>} : vector<256x256xf32>, vector<256x256xf32>, vector<256x256xf32> -> vector<256x256xf32>
    %c2 = arith.constant 2 : index
    %c0_28 = arith.constant 0 : index
    %31 = vector.load %arg5[%c2, %c0_28] : memref<16x256xf32, #tpu.memory_space<vmem>>, vector<1x256xf32>
    %32 = vector.broadcast %31 : vector<1x256xf32> to vector<256x256xf32>
    %33 = arith.addf %30, %32 : vector<256x256xf32>
    %34 = arith.addf %33, %26 : vector<256x256xf32>
    %cst_29 = arith.constant 0.000000e+00 : f32
    %35 = vector.broadcast %cst_29 : f32 to vector<256x256xf32>
    %36 = arith.maximumf %34, %35 : vector<256x256xf32>
    %c2_30 = arith.constant 2 : index
    %c0_31 = arith.constant 0 : index
    %c0_32 = arith.constant 0 : index
    %37 = vector.load %arg3[%c2_30, %c0_31, %c0_32] : memref<3x256x256xf32, #tpu.memory_space<vmem>>, vector<1x256x256xf32>
    %38 = vector.shape_cast %37 : vector<1x256x256xf32> to vector<256x256xf32>
    %cst_33 = arith.constant dense<0.000000e+00> : vector<256x256xf32>
    %39 = tpu.matmul %36, %38, %cst_33 {dimension_numbers = #tpu.dot_dimension_numbers<[1], [0], [0], [1], [0, 0, 1, 1], [], []>} : vector<256x256xf32>, vector<256x256xf32>, vector<256x256xf32> -> vector<256x256xf32>
    %cst_34 = arith.constant dense<0.000000e+00> : vector<256x256xf32>
    %40 = tpu.matmul %16, %39, %cst_34 {dimension_numbers = #tpu.dot_dimension_numbers<[1], [0], [0], [1], [0, 0, 1, 1], [], []>} : vector<256x256xf32>, vector<256x256xf32>, vector<256x256xf32> -> vector<256x256xf32>
    %c3 = arith.constant 3 : index
    %c0_35 = arith.constant 0 : index
    %41 = vector.load %arg5[%c3, %c0_35] : memref<16x256xf32, #tpu.memory_space<vmem>>, vector<1x256xf32>
    %42 = vector.broadcast %41 : vector<1x256xf32> to vector<256x256xf32>
    %43 = arith.addf %40, %42 : vector<256x256xf32>
    %44 = arith.addf %43, %36 : vector<256x256xf32>
    %cst_36 = arith.constant 0.000000e+00 : f32
    %45 = vector.broadcast %cst_36 : f32 to vector<256x256xf32>
    %46 = arith.maximumf %44, %45 : vector<256x256xf32>
    %cst_37 = arith.constant dense<0.000000e+00> : vector<256x256xf32>
    %47 = tpu.matmul %46, %1, %cst_37 {dimension_numbers = #tpu.dot_dimension_numbers<[1], [0], [0], [1], [0, 0, 1, 1], [], []>} : vector<256x256xf32>, vector<256x256xf32>, vector<256x256xf32> -> vector<256x256xf32>
    %c4 = arith.constant 4 : index
    %c0_38 = arith.constant 0 : index
    %48 = vector.load %arg5[%c4, %c0_38] : memref<16x256xf32, #tpu.memory_space<vmem>>, vector<1x256xf32>
    %49 = vector.broadcast %48 : vector<1x256xf32> to vector<256x256xf32>
    %50 = arith.addf %47, %49 : vector<256x256xf32>
    %cst_39 = arith.constant 0.000000e+00 : f32
    %51 = vector.broadcast %cst_39 : f32 to vector<256x256xf32>
    %52 = arith.maximumf %50, %51 : vector<256x256xf32>
    %cst_40 = arith.constant dense<0.000000e+00> : vector<256x256xf32>
    %53 = tpu.matmul %52, %2, %cst_40 {dimension_numbers = #tpu.dot_dimension_numbers<[1], [0], [0], [1], [0, 0, 1, 1], [], []>} : vector<256x256xf32>, vector<256x256xf32>, vector<256x256xf32> -> vector<256x256xf32>
    %c5 = arith.constant 5 : index
    %c0_41 = arith.constant 0 : index
    %54 = vector.load %arg5[%c5, %c0_41] : memref<16x256xf32, #tpu.memory_space<vmem>>, vector<1x256xf32>
    %55 = vector.broadcast %54 : vector<1x256xf32> to vector<256x256xf32>
    %56 = arith.addf %53, %55 : vector<256x256xf32>
    %57 = vector.extract_strided_slice %56 {offsets = [0, 0], sizes = [256, 8], strides = [1, 1]} : vector<256x256xf32> to vector<256x8xf32>
    %cst_42 = arith.constant dense<0xFF800000> : vector<256xf32>
    %58 = vector.multi_reduction <maximumf>, %57, %cst_42 [1] : vector<256x8xf32> to vector<256xf32>
    %59 = vector.shape_cast %58 : vector<256xf32> to vector<256x1xf32>
    %60 = vector.broadcast %59 : vector<256x1xf32> to vector<256x8xf32>
    %61 = arith.subf %57, %60 : vector<256x8xf32>
    %62 = math.exp %61 : vector<256x8xf32>
    %cst_43 = arith.constant dense<0.000000e+00> : vector<256xf32>
    %63 = vector.multi_reduction <add>, %62, %cst_43 [1] : vector<256x8xf32> to vector<256xf32>
    %64 = vector.shape_cast %63 : vector<256xf32> to vector<256x1xf32>
    %65 = tpu.reciprocal %64 {approx = true} : vector<256x1xf32> -> vector<256x1xf32>
    %66 = vector.broadcast %65 : vector<256x1xf32> to vector<256x8xf32>
    %67 = arith.mulf %62, %66 : vector<256x8xf32>
    %cst_44 = arith.constant dense<0.000000e+00> : vector<256x256xf32>
    %68 = tpu.matmul %67, %3, %cst_44 {dimension_numbers = #tpu.dot_dimension_numbers<[1], [0], [0], [1], [0, 0, 1, 1], [], []>} : vector<256x8xf32>, vector<8x256xf32>, vector<256x256xf32> -> vector<256x256xf32>
    %69 = arith.mulf %46, %68 : vector<256x256xf32>
    %cst_45 = arith.constant dense<0.000000e+00> : vector<256x256xf32>
    %70 = tpu.matmul %69, %4, %cst_45 {dimension_numbers = #tpu.dot_dimension_numbers<[1], [0], [0], [1], [0, 0, 1, 1], [], []>} : vector<256x256xf32>, vector<256x256xf32>, vector<256x256xf32> -> vector<256x256xf32>
    %c6 = arith.constant 6 : index
    %c0_46 = arith.constant 0 : index
    %71 = vector.load %arg5[%c6, %c0_46] : memref<16x256xf32, #tpu.memory_space<vmem>>, vector<1x256xf32>
    %72 = vector.broadcast %71 : vector<1x256xf32> to vector<256x256xf32>
    %73 = arith.addf %70, %72 : vector<256x256xf32>
    %cst_47 = arith.constant 0.000000e+00 : f32
    %74 = vector.broadcast %cst_47 : f32 to vector<256x256xf32>
    %75 = arith.maximumf %73, %74 : vector<256x256xf32>
    %cst_48 = arith.constant dense<0.000000e+00> : vector<256x256xf32>
    %76 = tpu.matmul %75, %5, %cst_48 {dimension_numbers = #tpu.dot_dimension_numbers<[1], [0], [0], [1], [0, 0, 1, 1], [], []>} : vector<256x256xf32>, vector<256x256xf32>, vector<256x256xf32> -> vector<256x256xf32>
    %c7 = arith.constant 7 : index
    %c0_49 = arith.constant 0 : index
    %77 = vector.load %arg5[%c7, %c0_49] : memref<16x256xf32, #tpu.memory_space<vmem>>, vector<1x256xf32>
    %78 = vector.broadcast %77 : vector<1x256xf32> to vector<256x256xf32>
    %79 = arith.addf %76, %78 : vector<256x256xf32>
    %80 = vector.extract_strided_slice %79 {offsets = [0, 0], sizes = [256, 32], strides = [1, 1]} : vector<256x256xf32> to vector<256x32xf32>
    %cst_50 = arith.constant dense<0xFF800000> : vector<256xf32>
    %81 = vector.multi_reduction <maximumf>, %80, %cst_50 [1] : vector<256x32xf32> to vector<256xf32>
    %82 = vector.shape_cast %81 : vector<256xf32> to vector<256x1xf32>
    %83 = vector.broadcast %82 : vector<256x1xf32> to vector<256x32xf32>
    %84 = arith.subf %80, %83 : vector<256x32xf32>
    %85 = math.exp %84 : vector<256x32xf32>
    %cst_51 = arith.constant dense<0.000000e+00> : vector<256xf32>
    %86 = vector.multi_reduction <add>, %85, %cst_51 [1] : vector<256x32xf32> to vector<256xf32>
    %87 = vector.shape_cast %86 : vector<256xf32> to vector<256x1xf32>
    %88 = tpu.reciprocal %87 {approx = true} : vector<256x1xf32> -> vector<256x1xf32>
    %89 = vector.broadcast %88 : vector<256x1xf32> to vector<256x32xf32>
    %90 = arith.mulf %85, %89 : vector<256x32xf32>
    %cst_52 = arith.constant dense<0.000000e+00> : vector<256x256xf32>
    %91 = tpu.matmul %69, %6, %cst_52 {dimension_numbers = #tpu.dot_dimension_numbers<[1], [0], [0], [1], [0, 0, 1, 1], [], []>} : vector<256x256xf32>, vector<256x256xf32>, vector<256x256xf32> -> vector<256x256xf32>
    %92 = vector.extract_strided_slice %91 {offsets = [0, 0], sizes = [256, 32], strides = [1, 1]} : vector<256x256xf32> to vector<256x32xf32>
    %93 = arith.mulf %92, %90 : vector<256x32xf32>
    %cst_53 = arith.constant dense<0.000000e+00> : vector<256x256xf32>
    %94 = tpu.matmul %93, %7, %cst_53 {dimension_numbers = #tpu.dot_dimension_numbers<[1], [0], [0], [1], [0, 0, 1, 1], [], []>} : vector<256x32xf32>, vector<32x256xf32>, vector<256x256xf32> -> vector<256x256xf32>
    %c8 = arith.constant 8 : index
    %c0_54 = arith.constant 0 : index
    %95 = vector.load %arg5[%c8, %c0_54] : memref<16x256xf32, #tpu.memory_space<vmem>>, vector<1x256xf32>
    %96 = vector.broadcast %95 : vector<1x256xf32> to vector<256x256xf32>
    %97 = arith.addf %94, %96 : vector<256x256xf32>
    %cst_55 = arith.constant 0.000000e+00 : f32
    %98 = vector.broadcast %cst_55 : f32 to vector<256x256xf32>
    %99 = arith.maximumf %97, %98 : vector<256x256xf32>
    %cst_56 = arith.constant dense<0.000000e+00> : vector<256x256xf32>
    %100 = tpu.matmul %99, %8, %cst_56 {dimension_numbers = #tpu.dot_dimension_numbers<[1], [0], [0], [1], [0, 0, 1, 1], [], []>} : vector<256x256xf32>, vector<256x256xf32>, vector<256x256xf32> -> vector<256x256xf32>
    %c9 = arith.constant 9 : index
    %c0_57 = arith.constant 0 : index
    %101 = vector.load %arg5[%c9, %c0_57] : memref<16x256xf32, #tpu.memory_space<vmem>>, vector<1x256xf32>
    %102 = vector.broadcast %101 : vector<1x256xf32> to vector<256x256xf32>
    %103 = arith.addf %100, %102 : vector<256x256xf32>
    %104 = vector.extract_strided_slice %103 {offsets = [0, 0], sizes = [256, 128], strides = [1, 1]} : vector<256x256xf32> to vector<256x128xf32>
    %c0_58 = arith.constant 0 : index
    %c0_59 = arith.constant 0 : index
    %105 = vector.load %arg6[%c0_58, %c0_59] : memref<256x128xf32, #tpu.memory_space<vmem>>, vector<256x128xf32>
    tpu.vector_store %arg6[%c0_58, %c0_59], %104 {strides = array<i32>} : memref<256x128xf32, #tpu.memory_space<vmem>>, vector<256x128xf32>,
    return
  }
  func.func @transform_0(%arg0: i32) -> (i32, i32) {
    %c0_i32 = arith.constant 0 : i32
    %c0_i32_0 = arith.constant 0 : i32
    return %arg0, %c0_i32 : i32, i32
  }
  func.func @transform_1(%arg0: i32) -> (i32, i32) {
    %c0_i32 = arith.constant 0 : i32
    %c0_i32_0 = arith.constant 0 : i32
    %c0_i32_1 = arith.constant 0 : i32
    return %c0_i32, %c0_i32_0 : i32, i32
  }
  func.func @transform_2(%arg0: i32) -> (i32, i32, i32) {
    %c0_i32 = arith.constant 0 : i32
    %c0_i32_0 = arith.constant 0 : i32
    %c0_i32_1 = arith.constant 0 : i32
    %c0_i32_2 = arith.constant 0 : i32
    return %c0_i32, %c0_i32_0, %c0_i32_1 : i32, i32, i32
  }
  func.func @transform_3(%arg0: i32) -> (i32, i32) {
    %c0_i32 = arith.constant 0 : i32
    %c0_i32_0 = arith.constant 0 : i32
    %c0_i32_1 = arith.constant 0 : i32
    return %c0_i32, %c0_i32_0 : i32, i32
  }
  func.func @transform_4(%arg0: i32) -> (i32, i32) {
    %c0_i32 = arith.constant 0 : i32
    %c0_i32_0 = arith.constant 0 : i32
    %c0_i32_1 = arith.constant 0 : i32
    return %c0_i32, %c0_i32_0 : i32, i32
  }
  func.func @transform_5(%arg0: i32) -> (i32, i32) {
    %c0_i32 = arith.constant 0 : i32
    %c0_i32_0 = arith.constant 0 : i32
    return %arg0, %c0_i32 : i32, i32
  }
}

</mosaic_0001>

<bundles_post_ra>
// kernel: tpu_custom_call.1
= control target key start
LH: loop header
LB: loop body
LE: loop exit
PB: predicated region body
PF: predicated region fallthrough
CT: control target
= control target key end

     0   :  { %s14557_s0 = inlined_call_operand.vmem [shape: f32[1024,32], index: 0, kind: input, shape index: {}]   ;;  %s14558_s1 = inlined_call_operand.hbm [shape: f32[256,256], index: 1, kind: input, shape index: {}]   ;;  %s14559_s2 = inlined_call_operand.hbm [shape: f32[3,256,256], index: 2, kind: input, shape index: {}]   ;;  %s14560_s3 = inlined_call_operand.hbm [shape: f32[1608,256], index: 3, kind: input, shape index: {}]   ;;  %s14561_s4 = inlined_call_operand.hbm [shape: f32[16,256], index: 4, kind: input, shape index: {}]   ;;  %s14562_s5 = inlined_call_operand.hbm [shape: f32[1024,128], index: 5, kind: output, shape index: {}]  }
   0x1   :  { %14857 = sst [smem:[#allocation98_spill]] %s14558_s1 }
   0x2   :  { %10 = vsyncpa [#allocation3], 0 }
   0x3   :  { %11 = vsyncpa [#allocation6], 0 }
   0x4   :  { %12 = vsyncpa [#allocation9], 0 }
   0x5   :  { %13 = vsyncpa [#allocation4], 0 }
   0x6   :  { %15 = vsyncpa [#allocation4 + $0x1], 0  ;;  %s8938_s18 = smov 0   ;;  %s8940_s19 = smov 0  }
   0x7   :  { %s8942_s20 = smov 0   ;;  %s8944_s21 = smov 0  }
   0x8 LB: > { %s8959_s22 = sadd.s32 4294967295, %s8898_s21   ;;  %s7999_s23 = sadd.s32 4294967294, %s8898_s21   ;;  %s8898_s21 = sphi %s8944_s21, %s15606_s21   ;;  %s8894_s20 = sphi %s8942_s20, %s15605_s20   ;;  %s8890_s19 = sphi %s8940_s19, %s15604_s19   ;;  %s8886_s18 = sphi %s8938_s18, %s15603_s18  }
   0x9   : > { %s8963_s24 = sadd.s32 1, %s8898_s21   ;;  %s138_s25 = sadd.s32 1, %s8894_s20 }
   0xa   : > { %s135_s26 = ssub.s32 %s8898_s21, %s8963_s24  ;;  %p148_p0 = scmp.ne.s32.totalorder %s8894_s20, %s8890_s19 }
   0xb   : > { %p136_p1 = scmp.eq.s32.totalorder %s135_s26, 0  ;;  %p149_p2 = scmp.eq.s32.totalorder %s8959_s22, 3 }
   0xc   : > { %p154_p3 = scmp.ne.s32.totalorder %s8890_s19, %s8886_s18  ;;  %p155_p4 = scmp.eq.s32.totalorder %s7999_s23, 3 }
   0xd   : > { %s8974_s27 = scalar_select %p136_p1, %s8894_s20, %s138_s25  }
   0xe   : > { %p8976_p5 = por %p149_p2, %p148_p0  ;;  %p8980_p6 = por %p155_p4, %p154_p3 }
   0xf   : > { %p8000_p7 = scmp.ge.s32.totalorder %s8898_s21, 1  ;;  %p162_p8 = scmp.lt.s32.totalorder %s8898_s21, 5 }
  0x10   : > { %p8271_p9 = scmp.eq.s32.totalorder %s8959_s22, 0  ;;  %s187_s8 = sshll.u32 %s14559_s2, 4  ;;  %s188_s8 = int_to_ptr.hbm [resolvable:$true] %s187_s8 }
  0x11   : > { %p8987_p10 = pnand %p8000_p7, %p162_p8  ;;  %s14861_s1 = sld [smem:[#allocation98_spill]] }
  0x12   : > { %s8900_s13 = smov [#allocation5]   ;;  %s8901_s15 = smov 256  }
  0x13   : > { %p8254_p11 = pneg %p8987_p10  ;;  %s189_s14 = sshll.u32 %s8900_s13, 4  ;;  %s190_s14 = int_to_ptr.vmem [resolvable:$true] %s189_s14 }
  0x14   : > { %s8902_s16 = smov 16   ;;  %s8903_s17 = smov [#allocation2]  }
  0x15   : > { %p9001_p12 = pnand %p8271_p9, %p8254_p11  ;;  %s175_s23 = sshll.u32 %s8903_s17, 4  ;;  %s176_s23 = int_to_ptr.vmem [resolvable:$true] %s175_s23 }
  0x16   : > { %s201_s6 = sshll.u32 %s14560_s3, 4  ;;  %s215_s10 = sshll.u32 %s14561_s4, 4  ;;  %s202_s6 = int_to_ptr.hbm [resolvable:$true] %s201_s6  ;;  %s216_s10 = int_to_ptr.hbm [resolvable:$true] %s215_s10 }
  0x17   : > { %s173_s11 = sshll.u32 %s14861_s1, 4  ;;  %s8904_s13 = smov [#allocation7]   ;;  %s174_s11 = int_to_ptr.hbm [resolvable:$true] %s173_s11 }
  0x18   : > { %8260 = dma.hbm_to_vmem [thread:$0]  (!%p9001_p12), %s188_s8, 24576, %s190_s14, [#allocation6], %s8901_s15, %s8901_s15, %s8902_s16  }
  0x19   : > { %8257 = dma.hbm_to_vmem [thread:$0]  (!%p9001_p12), %s174_s11, 8192, %s176_s23, [#allocation3], %s8901_s15, %s8901_s15, %s8902_s16  }
  0x1a   : > { %s203_s1 = sshll.u32 %s8904_s13, 4  ;;  %s8905_s8 = smov [#allocation8]   ;;  %s204_s1 = int_to_ptr.vmem [resolvable:$true] %s203_s1 }
  0x1b   : > { %8263 = dma.hbm_to_vmem [thread:$0]  (!%p9001_p12), %s202_s6, 51456, %s204_s1, [#allocation6], %s8901_s15, %s8901_s15, %s8902_s16  }
  0x1c   : > { %s217_s14 = sshll.u32 %s8905_s8, 4  ;;  %242 = sbr.rel (%p8987_p10) target bundleno = 4560 (0x11d0), region = 40  ;;  %s218_s14 = int_to_ptr.vmem [resolvable:$true] %s217_s14 }
  0x1d   : > { %8266 = dma.hbm_to_vmem [thread:$0]  (!%p9001_p12), %s216_s10, 512, %s218_s14, [#allocation9], %s8901_s15, %s8901_s15, %s8902_s16  }
  0x21   : > { %8869 = dma.done.wait (%p8271_p9), [#allocation3], 8192  }
  0x22   : > { %8871 = vsyncadd (%p8271_p9), [#allocation3], 4294959104 }
  0x23   : > { %8873 = dma.done.wait (%p8271_p9), [#allocation6], 76032  }
  0x24   : > { %8875 = vsyncadd (%p8271_p9), [#allocation6], 4294891264 }
  0x25   : > { %8877 = dma.done.wait (%p8271_p9), [#allocation9], 512  }
  0x26   : > { %8879 = vsyncadd (%p8271_p9), [#allocation9], 4294966784  ;;  %s8012_s1 = sshll.u32 %s8959_s22, 5  ;;  %v299_v0 = vld [vmem:[#allocation7 + $0x30] sm:$0xff]  ;;  %v300_v1 = vld [vmem:[#allocation7 + $0x38] sm:$0xff]  ;;  %vm605_vm0 = vcmask 261120  }
  0x27   : > { %p287_p13 = scmp.lt.s32.totalorder %s8012_s1, 127  ;;  %v297_v2 = vld [vmem:[#allocation7 + $0x20] sm:$0xff]  ;;  %714 = vmatpush.msra.mxu0 %v299_v0  ;;  %827 = vmatpush.msra.mxu1 %v300_v1  ;;  %v298_v3 = vld [vmem:[#allocation7 + $0x28] sm:$0xff]  ;;  %v295_v4 = vld [vmem:[#allocation7 + $0x10] sm:$0xff]  ;;  %vm5121_vm1 = vcmask 64512   ;;  %s283_s16 = sand.u32 1, %s8890_s19  }
  0x28   : > { %8216 = vmatpush.msra.mxu3 %v300_v1  ;;  %v296_v5 = vld [vmem:[#allocation7 + $0x18] sm:$0xff]  ;;  %8212 = vmatpush.msra.mxu2 %v299_v0  ;;  %v293_v6 = vld [vmem:[#allocation7] sm:$0xff]  ;;  %v294_v7 = vld [vmem:[#allocation7 + $0x8] sm:$0xff]  ;;  %s8011_s17 = sshll.u32 %s283_s16, 8  ;;  %s8211_s25 = sshll.u32 %s8959_s22, 8 }
  0x29   : > { %s15608_s1 = smov (!%p287_p13, %s8012_s1), 127  ;;  %715 = vmatpush.msra.mxu0 %v297_v2  ;;  %828 = vmatpush.msra.mxu1 %v298_v3  ;;  %v1086_v27 = vld [vmem:[#allocation5 + $0xf0] sm:$0xff]  ;;  %v1119_v29 = vld [vmem:[#allocation5 + $0x1f8] sm:$0xff]  ;;  %v1084_v30 = vld [vmem:[#allocation5 + $0xe0] sm:$0xff]  ;;  %s14290_s23 = scalar_lea.vmem [#allocation10], %s8011_s17 }
  0x2a   : > { %s8013_s30 = sshll.u32 %s15608_s1, 3  ;;  %8217 = vmatpush.msra.mxu3 %v298_v3  ;;  %8213 = vmatpush.msra.mxu2 %v297_v2  ;;  %v1118_v28 = vld [vmem:[#allocation5 + $0x1f0] sm:$0xff]  ;;  %v1116_v31 = vld [vmem:[#allocation5 + $0x1e0] sm:$0xff]  ;;  %v1117_v32 = vld [vmem:[#allocation5 + $0x1e8] sm:$0xff]  ;;  %s7892_s7 = scalar_lea.hbm %s14562_s5, %s8211_s25 }
  0x2b   : > { %s9037_s15 = scalar_lea.vmem %s14557_s0, %s8013_s30  ;;  %716 = vmatpush.msra.mxu0 %v295_v4  ;;  %829 = vmatpush.msra.mxu1 %v296_v5  ;;  %v1082_v33 = vld [vmem:[#allocation5 + $0xd0] sm:$0xff]  ;;  %v1115_v36 = vld [vmem:[#allocation5 + $0x1d8] sm:$0xff]  ;;  %v1080_v38 = vld [vmem:[#allocation5 + $0xc0] sm:$0xff]  ;;  %s7893_s9 = sshll.u32 %s14290_s23, 4  ;;  %s7894_s9 = int_to_ptr.vmem [resolvable:$true] %s7893_s9 }
  0x2c   : > { %v567_v8 = vld [vmem:[%s9037_s15] sm:$0xff]  ;;  %8218 = vmatpush.msra.mxu3 %v296_v5  ;;  %8214 = vmatpush.msra.mxu2 %v295_v4  ;;  %v584_v10 = vld [vmem:[%s9037_s15 + $0x88] sm:$0xff]  ;;  %v585_v12 = vld [vmem:[%s9037_s15 + $0x90] sm:$0xff]  ;;  %s7895_s10 = sshll.u32 %s7892_s7, 4  ;;  %s7881_s13 = scalar_lea.sflag [#allocation4], %s283_s16  ;;  %s7896_s10 = int_to_ptr.hbm [resolvable:$true] %s7895_s10 }
  0x2d   : > { %717 = vmatpush.msra.mxu0 %v293_v6  ;;  %830 = vmatpush.msra.mxu1 %v294_v7  ;;  %v9041_v9 = vld [vmem:[%s9037_s15 + $0x80] sm:$0xff]  ;;  %v568_v11 = vld [vmem:[%s9037_s15 + $0x8] sm:$0xff]  ;;  %v569_v13 = vld [vmem:[%s9037_s15 + $0x10] sm:$0xff]  ;;  %s8838_s22 = sshra.s32 %s7896_s10, 4  ;;  %s8844_s30 = scalar_lea.hbm %s14562_s5, 1024  ;;  %s8839_s22 = int_to_ptr.hbm [resolvable:$true] %s8838_s22 }
  0x2e   : > { %8014 = vmatmul.msk.f32.vlgmr.msra.gmra.mxu0 %vm605_vm0, %v567_v8  ;;  %8046 = vmatmul.msk.f32.vlgmr.msra.gmra.mxu1 %vm605_vm0, %v567_v8  ;;  %v586_v14 = vld [vmem:[%s9037_s15 + $0x98] sm:$0xff]  ;;  %v587_v16 = vld [vmem:[%s9037_s15 + $0xa0] sm:$0xff]  ;;  %v588_v18 = vld [vmem:[%s9037_s15 + $0xa8] sm:$0xff]  ;;  %s8840_s8 = scalar_lea.hbm %s8839_s22, 256  ;;  %p8845_p3 = scmp.lt.s32.totalorder %s8839_s22, %s14562_s5 }
  0x2f   : > { %8219 = vmatpush.msra.mxu3 %v294_v7  ;;  %8215 = vmatpush.msra.mxu2 %v293_v6  ;;  %v570_v15 = vld [vmem:[%s9037_s15 + $0x18] sm:$0xff]  ;;  %v571_v17 = vld [vmem:[%s9037_s15 + $0x20] sm:$0xff]  ;;  %v572_v19 = vld [vmem:[%s9037_s15 + $0x28] sm:$0xff]  ;;  %p8841_p0 = scmp.ne.s32.totalorder %s8839_s22, %s8840_s8  ;;  %p8846_p4 = scmp.lt.s32.totalorder %s8844_s30, %s8840_s8 }
  0x30   : > { %8062 = vmatmul.msk.f32.vlgmr.msra.gmra.mxu3 %vm605_vm0, %v9041_v9  ;;  %8031 = vmatmul.msk.f32.vlgmr.msra.gmra.mxu2 %vm605_vm0, %v584_v10  ;;  %v589_v20 = vld [vmem:[%s9037_s15 + $0xb0] sm:$0xff]  ;;  %v590_v22 = vld [vmem:[%s9037_s15 + $0xb8] sm:$0xff]  ;;  %v591_v24 = vld [vmem:[%s9037_s15 + $0xc0] sm:$0xff] }
  0x31   : > { %v573_v21 = vld [vmem:[%s9037_s15 + $0x30] sm:$0xff]  ;;  %v574_v23 = vld [vmem:[%s9037_s15 + $0x38] sm:$0xff]  ;;  %v575_v25 = vld [vmem:[%s9037_s15 + $0x40] sm:$0xff]  ;;  %1120 = vmatpush.msrb.mxu2 %v1086_v27  ;;  %1233 = vmatpush.msrb.mxu3 %v1118_v28  ;;  %p8842_p1 = pnand %p8841_p0, %p8976_p5  ;;  %p8847_p7 = por %p8846_p4, %p8845_p3 }
  0x32   : > { %v592_v26 = vld [vmem:[%s9037_s15 + $0xc8] sm:$0xff]  ;;  %1459 = vmatpush.msrb.mxu1 %v1119_v29  ;;  %v1114_v34 = vld [vmem:[#allocation5 + $0x1d0] sm:$0xff]  ;;  %v1112_v39 = vld [vmem:[#allocation5 + $0x1c0] sm:$0xff] }
  0x33   : > { %v576_v35 = vld [vmem:[%s9037_s15 + $0x48] sm:$0xff]  ;;  %1121 = vmatpush.msrb.mxu2 %v1084_v30  ;;  %1234 = vmatpush.msrb.mxu3 %v1116_v31  ;;  %v593_v37 = vld [vmem:[%s9037_s15 + $0xd0] sm:$0xff]  ;;  %v1087_v40 = vld [vmem:[#allocation5 + $0xf8] sm:$0xff]  ;;  %p8843_p2 = pneg %p8842_p1 }
  0x34   : > { %1460 = vmatpush.msrb.mxu1 %v1117_v32  ;;  %v1113_v41 = vld [vmem:[#allocation5 + $0x1c8] sm:$0xff]  ;;  %v1078_v42 = vld [vmem:[#allocation5 + $0xb0] sm:$0xff]  ;;  %1346 = vmatpush.msrb.mxu0 %v1087_v40  ;;  %v1111_v45 = vld [vmem:[#allocation5 + $0x1b8] sm:$0xff] }
  0x35   : > { %1122 = vmatpush.msrb.mxu2 %v1082_v33  ;;  %1235 = vmatpush.msrb.mxu3 %v1114_v34  ;;  %v1110_v43 = vld [vmem:[#allocation5 + $0x1b0] sm:$0xff]  ;;  %v1085_v44 = vld [vmem:[#allocation5 + $0xe8] sm:$0xff]  ;;  %v1076_v46 = vld [vmem:[#allocation5 + $0xa0] sm:$0xff]  ;;  %p8848_p8 = pnand %p8847_p7, %p8843_p2 }
  0x36   : > { %8015 = vmatmul.msk.f32.gmra.mxu0 %vm605_vm0, %v568_v11  ;;  %8047 = vmatmul.msk.f32.gmra.mxu1 %vm605_vm0, %v568_v11  ;;  %v1108_v47 = vld [vmem:[#allocation5 + $0x1a0] sm:$0xff]  ;;  %v1083_v48 = vld [vmem:[#allocation5 + $0xd8] sm:$0xff]  ;;  %v577_v49 = vld [vmem:[%s9037_s15 + $0x50] sm:$0xff] }
  0x37   : > { %1461 = vmatpush.msrb.mxu1 %v1115_v36  ;;  %1123 = vmatpush.msrb.mxu2 %v1080_v38  ;;  %v1109_v50 = vld [vmem:[#allocation5 + $0x1a8] sm:$0xff]  ;;  %v1074_v51 = vld [vmem:[#allocation5 + $0x90] sm:$0xff]  ;;  %v594_v52 = vld [vmem:[%s9037_s15 + $0xd8] sm:$0xff] }
  0x38   : > { %8063 = vmatmul.msk.f32.gmra.mxu3 %vm605_vm0, %v584_v10  ;;  %8032 = vmatmul.msk.f32.gmra.mxu2 %vm605_vm0, %v585_v12  ;;  %v1106_v53 = vld [vmem:[#allocation5 + $0x190] sm:$0xff]  ;;  %v1081_v54 = vld [vmem:[#allocation5 + $0xc8] sm:$0xff]  ;;  %v1107_v55 = vld [vmem:[#allocation5 + $0x198] sm:$0xff] }
  0x39   : > { %1236 = vmatpush.msrb.mxu3 %v1112_v39  ;;  %1462 = vmatpush.msrb.mxu1 %v1113_v41  ;;  %v1072_v56 = vld [vmem:[#allocation5 + $0x80] sm:$0xff]  ;;  %v1079_v58 = vld [vmem:[#allocation5 + $0xb8] sm:$0xff]  ;;  %v1105_v59 = vld [vmem:[#allocation5 + $0x188] sm:$0xff] }
  0x3a   : > { %1124 = vmatpush.msrb.mxu2 %v1078_v42  ;;  %1347 = vmatpush.msrb.mxu0 %v1085_v44  ;;  %v1104_v57 = vld [vmem:[#allocation5 + $0x180] sm:$0xff]  ;;  %v1070_v60 = vld [vmem:[#allocation5 + $0x70] sm:$0xff]  ;;  %v1077_v62 = vld [vmem:[#allocation5 + $0xa8] sm:$0xff] }
  0x3b   : > { %1237 = vmatpush.msrb.mxu3 %v1110_v43  ;;  %1463 = vmatpush.msrb.mxu1 %v1111_v45  ;;  %v1102_v61 = vld [vmem:[#allocation5 + $0x170] sm:$0xff]  ;;  %v578_v63 = vld [vmem:[%s9037_s15 + $0x58] sm:$0xff]  ;;  %v1068_v1 = vld [vmem:[#allocation5 + $0x60] sm:$0xff] }
  0x3c   : > { %1125 = vmatpush.msrb.mxu2 %v1076_v46  ;;  %1348 = vmatpush.msrb.mxu0 %v1083_v48  ;;  %v1103_v0 = vld [vmem:[#allocation5 + $0x178] sm:$0xff]  ;;  %v595_v2 = vld [vmem:[%s9037_s15 + $0xe0] sm:$0xff]  ;;  %v1101_v5 = vld [vmem:[#allocation5 + $0x168] sm:$0xff] }
  0x3d   : > { %1238 = vmatpush.msrb.mxu3 %v1108_v47  ;;  %1464 = vmatpush.msrb.mxu1 %v1109_v50  ;;  %v1100_v3 = vld [vmem:[#allocation5 + $0x160] sm:$0xff]  ;;  %v1075_v4 = vld [vmem:[#allocation5 + $0x98] sm:$0xff]  ;;  %v1066_v6 = vld [vmem:[#allocation5 + $0x50] sm:$0xff] }
  0x3e   : > { %8016 = vmatmul.msk.f32.gmra.mxu0 %vm605_vm0, %v569_v13  ;;  %8048 = vmatmul.msk.f32.gmra.mxu1 %vm605_vm0, %v569_v13  ;;  %v1098_v7 = vld [vmem:[#allocation5 + $0x150] sm:$0xff]  ;;  %v1073_v8 = vld [vmem:[#allocation5 + $0x88] sm:$0xff]  ;;  %v1099_v10 = vld [vmem:[#allocation5 + $0x158] sm:$0xff] }
  0x3f   : > { %1126 = vmatpush.msrb.mxu2 %v1074_v51  ;;  %1239 = vmatpush.msrb.mxu3 %v1106_v53  ;;  %v1064_v11 = vld [vmem:[#allocation5 + $0x40] sm:$0xff]  ;;  %v1071_v13 = vld [vmem:[#allocation5 + $0x78] sm:$0xff]  ;;  %v1065_v27 = vld [vmem:[#allocation5 + $0x48] sm:$0xff] }
  0x40   : > { %8064 = vmatmul.msk.f32.gmra.mxu3 %vm605_vm0, %v585_v12  ;;  %8033 = vmatmul.msk.f32.gmra.mxu2 %vm605_vm0, %v586_v14  ;;  %v1096_v12 = vld [vmem:[#allocation5 + $0x140] sm:$0xff]  ;;  %v580_v28 = vld [vmem:[%s9037_s15 + $0x68] sm:$0xff]  ;;  %v1091_v29 = vld [vmem:[#allocation5 + $0x118] sm:$0xff] }
  0x41   : > { %1349 = vmatpush.msrb.mxu0 %v1081_v54  ;;  %1465 = vmatpush.msrb.mxu1 %v1107_v55  ;;  %v1056_v30 = vld [vmem:[#allocation5] sm:$0xff]  ;;  %v597_v31 = vld [vmem:[%s9037_s15 + $0xf0] sm:$0xff]  ;;  %v1063_v33 = vld [vmem:[#allocation5 + $0x38] sm:$0xff] }
  0x42   : > { %1127 = vmatpush.msrb.mxu2 %v1072_v56  ;;  %1240 = vmatpush.msrb.mxu3 %v1104_v57  ;;  %v1088_v32 = vld [vmem:[#allocation5 + $0x100] sm:$0xff]  ;;  %v1089_v34 = vld [vmem:[#allocation5 + $0x108] sm:$0xff]  ;;  %v1059_v36 = vld [vmem:[#allocation5 + $0x18] sm:$0xff] }
  0x43   : > { %1350 = vmatpush.msrb.mxu0 %v1079_v58  ;;  %1466 = vmatpush.msrb.mxu1 %v1105_v59  ;;  %v1057_v38 = vld [vmem:[#allocation5 + $0x8] sm:$0xff]  ;;  %v598_v39 = vld [vmem:[%s9037_s15 + $0xf8] sm:$0xff] }
  0x44   : > { %1128 = vmatpush.msrb.mxu2 %v1070_v60  ;;  %1241 = vmatpush.msrb.mxu3 %v1102_v61  ;;  %v582_v40 = vld [vmem:[%s9037_s15 + $0x78] sm:$0xff] }
  0x45   : > { %1351 = vmatpush.msrb.mxu0 %v1077_v62  ;;  %1467 = vmatpush.msrb.mxu1 %v1103_v0  ;;  %v599_v41 = vld [vmem:[#allocation8] ss:$8 sm:$0x3] }
  0x46   : > { %8017 = vmatmul.msk.f32.gmra.mxu0 %vm605_vm0, %v570_v15  ;;  %8049 = vmatmul.msk.f32.gmra.mxu1 %vm605_vm0, %v570_v15  ;;  %v1097_v15 = vld [vmem:[#allocation5 + $0x148] sm:$0xff]  ;;  %v9137_v42 = vperm.slane %v599_v41, 0  ;;  %v9139_v43 = vperm.slane %v599_v41, 1 }
  0x47   : > { %1129 = vmatpush.msrb.mxu2 %v1068_v1  ;;  %1242 = vmatpush.msrb.mxu3 %v1100_v3 }
  0x48   : > { %8065 = vmatmul.msk.f32.gmra.mxu3 %vm605_vm0, %v586_v14  ;;  %8034 = vmatmul.msk.f32.gmra.mxu2 %vm605_vm0, %v587_v16  ;;  %v579_v14 = vld [vmem:[%s9037_s15 + $0x60] sm:$0xff] }
  0x49   : > { %1352 = vmatpush.msrb.mxu0 %v1075_v4  ;;  %1468 = vmatpush.msrb.mxu1 %v1101_v5 }
  0x4a   : > { %1130 = vmatpush.msrb.mxu2 %v1066_v6  ;;  %1243 = vmatpush.msrb.mxu3 %v1098_v7 }
  0x4b   : > { %1353 = vmatpush.msrb.mxu0 %v1073_v8  ;;  %1469 = vmatpush.msrb.mxu1 %v1099_v10 }
  0x4c   : > { %1131 = vmatpush.msrb.mxu2 %v1064_v11  ;;  %1244 = vmatpush.msrb.mxu3 %v1096_v12 }
  0x4d   : > { %1354 = vmatpush.msrb.mxu0 %v1071_v13  ;;  %1470 = vmatpush.msrb.mxu1 %v1097_v15 }
  0x4e   : > { %8018 = vmatmul.msk.f32.gmra.mxu0 %vm605_vm0, %v571_v17  ;;  %8050 = vmatmul.msk.f32.gmra.mxu1 %vm605_vm0, %v571_v17  ;;  %v596_v17 = vld [vmem:[%s9037_s15 + $0xe8] sm:$0xff] }
  0x50   : > { %8066 = vmatmul.msk.f32.gmra.mxu3 %vm605_vm0, %v587_v16  ;;  %8035 = vmatmul.msk.f32.gmra.mxu2 %vm605_vm0, %v588_v18  ;;  %v1062_v16 = vld [vmem:[#allocation5 + $0x30] sm:$0xff] }
  0x51   : > { %1132 = vmatpush.msrb.mxu2 %v1062_v16 }
  0x56   : > { %8019 = vmatmul.msk.f32.gmra.mxu0 %vm605_vm0, %v572_v19  ;;  %8051 = vmatmul.msk.f32.gmra.mxu1 %vm605_vm0, %v572_v19  ;;  %v1069_v19 = vld [vmem:[#allocation5 + $0x68] sm:$0xff] }
  0x57   : > { %1355 = vmatpush.msrb.mxu0 %v1069_v19 }
  0x58   : > { %8067 = vmatmul.msk.f32.gmra.mxu3 %vm605_vm0, %v588_v18  ;;  %8036 = vmatmul.msk.f32.gmra.mxu2 %vm605_vm0, %v589_v20  ;;  %v1094_v18 = vld [vmem:[#allocation5 + $0x130] sm:$0xff] }
  0x59   : > { %1245 = vmatpush.msrb.mxu3 %v1094_v18 }
  0x5e   : > { %8020 = vmatmul.msk.f32.gmra.mxu0 %vm605_vm0, %v573_v21  ;;  %8052 = vmatmul.msk.f32.gmra.mxu1 %vm605_vm0, %v573_v21  ;;  %v1060_v21 = vld [vmem:[#allocation5 + $0x20] sm:$0xff] }
  0x5f   : > { %1133 = vmatpush.msrb.mxu2 %v1060_v21 }
  0x60   : > { %8068 = vmatmul.msk.f32.gmra.mxu3 %vm605_vm0, %v589_v20  ;;  %8037 = vmatmul.msk.f32.gmra.mxu2 %vm605_vm0, %v590_v22  ;;  %v1095_v20 = vld [vmem:[#allocation5 + $0x138] sm:$0xff] }
  0x61   : > { %1471 = vmatpush.msrb.mxu1 %v1095_v20 }
  0x66   : > { %8021 = vmatmul.msk.f32.gmra.mxu0 %vm605_vm0, %v574_v23  ;;  %8053 = vmatmul.msk.f32.gmra.mxu1 %vm605_vm0, %v574_v23  ;;  %v1067_v23 = vld [vmem:[#allocation5 + $0x58] sm:$0xff] }
  0x67   : > { %1356 = vmatpush.msrb.mxu0 %v1067_v23 }
  0x68   : > { %8069 = vmatmul.msk.f32.gmra.mxu3 %vm605_vm0, %v590_v22  ;;  %8038 = vmatmul.msk.f32.gmra.mxu2 %vm605_vm0, %v591_v24  ;;  %v1092_v22 = vld [vmem:[#allocation5 + $0x120] sm:$0xff] }
  0x69   : > { %1246 = vmatpush.msrb.mxu3 %v1092_v22  ;;  %1357 = vmatpush.msrb.mxu0 %v1065_v27 }
  0x6b   : > { %1358 = vmatpush.msrb.mxu0 %v1063_v33 }
  0x6e   : > { %8022 = vmatmul.msk.f32.gmra.mxu0 %vm605_vm0, %v575_v25  ;;  %8054 = vmatmul.msk.f32.gmra.mxu1 %vm605_vm0, %v575_v25  ;;  %v1058_v25 = vld [vmem:[#allocation5 + $0x10] sm:$0xff] }
  0x6f   : > { %1134 = vmatpush.msrb.mxu2 %v1058_v25 }
  0x70   : > { %8070 = vmatmul.msk.f32.gmra.mxu3 %vm605_vm0, %v591_v24  ;;  %8039 = vmatmul.msk.f32.gmra.mxu2 %vm605_vm0, %v592_v26  ;;  %v1093_v24 = vld [vmem:[#allocation5 + $0x128] sm:$0xff] }
  0x71   : > { %1472 = vmatpush.msrb.mxu1 %v1093_v24  ;;  %1135 = vmatpush.msrb.mxu2 %v1056_v30 }
  0x73   : > { %1473 = vmatpush.msrb.mxu1 %v1091_v29 }
  0x75   : > { %1474 = vmatpush.msrb.mxu1 %v1089_v34 }
  0x76   : > { %8023 = vmatmul.msk.f32.gmra.mxu0 %vm605_vm0, %v576_v35  ;;  %8055 = vmatmul.msk.f32.gmra.mxu1 %vm605_vm0, %v576_v35  ;;  %v1061_v35 = vld [vmem:[#allocation5 + $0x28] sm:$0xff] }
  0x77   : > { %1359 = vmatpush.msrb.mxu0 %v1061_v35 }
  0x78   : > { %8071 = vmatmul.msk.f32.gmra.mxu3 %vm605_vm0, %v592_v26  ;;  %8040 = vmatmul.msk.f32.gmra.mxu2 %vm605_vm0, %v593_v37  ;;  %v1090_v26 = vld [vmem:[#allocation5 + $0x110] sm:$0xff] }
  0x79   : > { %1247 = vmatpush.msrb.mxu3 %v1090_v26  ;;  %1360 = vmatpush.msrb.mxu0 %v1059_v36 }
  0x7b   : > { %1248 = vmatpush.msrb.mxu3 %v1088_v32  ;;  %1361 = vmatpush.msrb.mxu0 %v1057_v38 }
  0x7e   : > { %8024 = vmatmul.msk.f32.gmra.mxu0 %vm605_vm0, %v577_v49  ;;  %8056 = vmatmul.msk.f32.gmra.mxu1 %vm605_vm0, %v577_v49 }
  0x80   : > { %8072 = vmatmul.msk.f32.gmra.mxu3 %vm605_vm0, %v593_v37  ;;  %8041 = vmatmul.msk.f32.gmra.mxu2 %vm605_vm0, %v594_v52  ;;  %v581_v37 = vld [vmem:[%s9037_s15 + $0x70] sm:$0xff] }
  0x86   : > { %8025 = vmatmul.msk.f32.gmra.mxu0 %vm605_vm0, %v578_v63  ;;  %8057 = vmatmul.msk.f32.gmra.mxu1 %vm605_vm0, %v578_v63 }
  0x88   : > { %8073 = vmatmul.msk.f32.gmra.mxu3 %vm605_vm0, %v594_v52  ;;  %8042 = vmatmul.msk.f32.gmra.mxu2 %vm605_vm0, %v595_v2 }
  0x8e   : > { %8026 = vmatmul.msk.f32.gmra.mxu0 %vm605_vm0, %v579_v14  ;;  %8058 = vmatmul.msk.f32.gmra.mxu1 %vm605_vm0, %v579_v14 }
  0x90   : > { %8074 = vmatmul.msk.f32.gmra.mxu3 %vm605_vm0, %v595_v2  ;;  %8043 = vmatmul.msk.f32.gmra.mxu2 %vm605_vm0, %v596_v17 }
  0x96   : > { %8027 = vmatmul.msk.f32.gmra.mxu0 %vm605_vm0, %v580_v28  ;;  %8059 = vmatmul.msk.f32.gmra.mxu1 %vm605_vm0, %v580_v28 }
  0x98   : > { %8075 = vmatmul.msk.f32.gmra.mxu3 %vm605_vm0, %v596_v17  ;;  %8044 = vmatmul.msk.f32.gmra.mxu2 %vm605_vm0, %v597_v31 }
  0x9e   : > { %8028 = vmatmul.msk.f32.gmra.mxu0 %vm605_vm0, %v581_v37  ;;  %8060 = vmatmul.msk.f32.gmra.mxu1 %vm605_vm0, %v581_v37 }
  0xa0   : > { %8076 = vmatmul.msk.f32.gmra.mxu3 %vm605_vm0, %v597_v31  ;;  %8045 = vmatmul.msk.f32.gmra.mxu2 %vm605_vm0, %v598_v39 }
  0xa6   : > { %8029 = vmatmul.msk.f32.gmra.mxu0 %vm605_vm0, %v582_v40  ;;  %8061 = vmatmul.msk.f32.gmra.mxu1 %vm605_vm0, %v582_v40 }
  0xa8   : > { %8077 = vmatmul.msk.f32.gmra.mxu3 %vm605_vm0, %v598_v39 }
  0xab   : > { %v719_v44 = vpop.f32.mrf.mxu0  ;;  %v832_v45 = vpop.f32.mrf.mxu1 }
  0xac   : > { %v720_v46 = vadd.f32 %v719_v44, %v9137_v42  ;;  %v833_v47 = vadd.f32 %v832_v45, %v9139_v43 }
  0xae   : > { %v9143_v48 = vmax.f32 %v720_v46, 0.0  ;;  %v9145_v49 = vmax.f32 %v833_v47, 0.0  ;;  %8030 = vmatmul.msk.f32.gmra.mxu0 %vm605_vm0, %v9041_v9 }
  0xb0   : > { %14863 = vst [vmem:[#allocation15_spill] sm:$0xff] %v9143_v48  ;;  %1136 = vmatmul.f32.vlgmr.msrb.gmra.mxu2 %v9143_v48  ;;  %1249 = vmatmul.f32.vlgmr.msrb.gmra.mxu3 %v9145_v49 }
  0xb1   : > { %14864 = vst [vmem:[#allocation16_spill] sm:$0xff] %v9145_v49  ;;  %1475 = vmatmul.f32.vlgmr.msrb.gmra.mxu1 %v9145_v49 }
  0xb3   : > { %v722_v50 = vpop.f32.mrf.mxu0  ;;  %v835_v51 = vpop.f32.mrf.mxu1 }
  0xb4   : > { %v723_v52 = vadd.f32 %v722_v50, %v9137_v42  ;;  %v836_v53 = vadd.f32 %v835_v51, %v9139_v43  ;;  %v9154_v54 = vpop.f32.mrf.mxu3  ;;  %v9156_v55 = vpop.f32.mrf.mxu2 }
  0xb6   : > { %v9158_v56 = vmax.f32 %v723_v52, 0.0  ;;  %v9160_v57 = vmax.f32 %v836_v53, 0.0  ;;  %1362 = vmatmul.f32.vlgmr.msrb.gmra.mxu0 %v9143_v48 }
  0xb8   : > { %14865 = vst [vmem:[#allocation17_spill] sm:$0xff] %v9158_v56  ;;  %1139 = vmatmul.f32.gmra.mxu2 %v9158_v56  ;;  %1252 = vmatmul.f32.gmra.mxu3 %v9160_v57 }
  0xb9   : > { %14866 = vst [vmem:[#allocation18_spill] sm:$0xff] %v9160_v57  ;;  %1478 = vmatmul.f32.gmra.mxu1 %v9160_v57 }
  0xbb   : > { %v725_v9 = vpop.f32.mrf.mxu0  ;;  %v838_v58 = vpop.f32.mrf.mxu1 }
  0xbc   : > { %v726_v59 = vadd.f32 %v725_v9, %v9137_v42  ;;  %v839_v60 = vadd.f32 %v838_v58, %v9139_v43  ;;  %v9168_v61 = vpop.f32.mrf.mxu3  ;;  %v9170_v62 = vpop.f32.mrf.mxu2 }
  0xbe   : > { %v9172_v63 = vmax.f32 %v726_v59, 0.0  ;;  %v9174_v0 = vmax.f32 %v839_v60, 0.0  ;;  %1365 = vmatmul.f32.gmra.mxu0 %v9158_v56 }
  0xc0   : > { %14867 = vst [vmem:[#allocation19_spill] sm:$0xff] %v9172_v63  ;;  %1142 = vmatmul.f32.gmra.mxu2 %v9172_v63  ;;  %1255 = vmatmul.f32.gmra.mxu3 %v9174_v0 }
  0xc1   : > { %14868 = vst [vmem:[#allocation20_spill] sm:$0xff] %v9174_v0  ;;  %1481 = vmatmul.f32.gmra.mxu1 %v9174_v0 }
  0xc3   : > { %v728_v1 = vpop.f32.mrf.mxu0  ;;  %v841_v2 = vpop.f32.mrf.mxu1 }
  0xc4   : > { %v729_v3 = vadd.f32 %v728_v1, %v9137_v42  ;;  %v842_v4 = vadd.f32 %v841_v2, %v9139_v43  ;;  %v9182_v5 = vpop.f32.mrf.mxu3  ;;  %v9184_v6 = vpop.f32.mrf.mxu2 }
  0xc6   : > { %v9186_v7 = vmax.f32 %v729_v3, 0.0  ;;  %v9188_v8 = vmax.f32 %v842_v4, 0.0  ;;  %1368 = vmatmul.f32.gmra.mxu0 %v9172_v63 }
  0xc8   : > { %14869 = vst [vmem:[#allocation21_spill] sm:$0xff] %v9186_v7  ;;  %1145 = vmatmul.f32.gmra.mxu2 %v9186_v7  ;;  %1258 = vmatmul.f32.gmra.mxu3 %v9188_v8 }
  0xc9   : > { %14870 = vst [vmem:[#allocation22_spill] sm:$0xff] %v9188_v8  ;;  %1484 = vmatmul.f32.gmra.mxu1 %v9188_v8 }
  0xcb   : > { %v731_v10 = vpop.f32.mrf.mxu0  ;;  %v844_v11 = vpop.f32.mrf.mxu1 }
  0xcc   : > { %v732_v12 = vadd.f32 %v731_v10, %v9137_v42  ;;  %v845_v13 = vadd.f32 %v844_v11, %v9139_v43  ;;  %v9196_v14 = vpop.f32.mrf.mxu3  ;;  %v9198_v15 = vpop.f32.mrf.mxu2 }
  0xce   : > { %v9200_v16 = vmax.f32 %v732_v12, 0.0  ;;  %v9202_v17 = vmax.f32 %v845_v13, 0.0  ;;  %1371 = vmatmul.f32.gmra.mxu0 %v9186_v7 }
  0xd0   : > { %14871 = vst [vmem:[#allocation23_spill] sm:$0xff] %v9200_v16  ;;  %1148 = vmatmul.f32.gmra.mxu2 %v9200_v16  ;;  %1261 = vmatmul.f32.gmra.mxu3 %v9202_v17 }
  0xd1   : > { %14872 = vst [vmem:[#allocation24_spill] sm:$0xff] %v9202_v17  ;;  %1487 = vmatmul.f32.gmra.mxu1 %v9202_v17 }
  0xd3   : > { %v734_v18 = vpop.f32.mrf.mxu0  ;;  %v847_v19 = vpop.f32.mrf.mxu1 }
  0xd4   : > { %v735_v20 = vadd.f32 %v734_v18, %v9137_v42  ;;  %v848_v21 = vadd.f32 %v847_v19, %v9139_v43  ;;  %v9210_v22 = vpop.f32.mrf.mxu3  ;;  %v9212_v23 = vpop.f32.mrf.mxu2 }
  0xd6   : > { %v9214_v24 = vmax.f32 %v735_v20, 0.0  ;;  %v9216_v25 = vmax.f32 %v848_v21, 0.0  ;;  %1374 = vmatmul.f32.gmra.mxu0 %v9200_v16 }
  0xd8   : > { %14873 = vst [vmem:[#allocation25_spill] sm:$0xff] %v9214_v24  ;;  %1151 = vmatmul.f32.gmra.mxu2 %v9214_v24  ;;  %1264 = vmatmul.f32.gmra.mxu3 %v9216_v25 }
  0xd9   : > { %14874 = vst [vmem:[#allocation26_spill] sm:$0xff] %v9216_v25  ;;  %1490 = vmatmul.f32.gmra.mxu1 %v9216_v25 }
  0xdb   : > { %v737_v26 = vpop.f32.mrf.mxu0  ;;  %v850_v27 = vpop.f32.mrf.mxu1 }
  0xdc   : > { %v738_v28 = vadd.f32 %v737_v26, %v9137_v42  ;;  %v851_v29 = vadd.f32 %v850_v27, %v9139_v43  ;;  %v9224_v30 = vpop.f32.mrf.mxu3  ;;  %v9226_v31 = vpop.f32.mrf.mxu2 }
  0xde   : > { %v9228_v32 = vmax.f32 %v738_v28, 0.0  ;;  %v9230_v33 = vmax.f32 %v851_v29, 0.0  ;;  %1377 = vmatmul.f32.gmra.mxu0 %v9214_v24 }
  0xe0   : > { %14875 = vst [vmem:[#allocation27_spill] sm:$0xff] %v9228_v32  ;;  %1154 = vmatmul.f32.gmra.mxu2 %v9228_v32  ;;  %1267 = vmatmul.f32.gmra.mxu3 %v9230_v33 }
  0xe1   : > { %14876 = vst [vmem:[#allocation28_spill] sm:$0xff] %v9230_v33  ;;  %1493 = vmatmul.f32.gmra.mxu1 %v9230_v33 }
  0xe3   : > { %v740_v34 = vpop.f32.mrf.mxu0  ;;  %v853_v35 = vpop.f32.mrf.mxu1 }
  0xe4   : > { %v741_v36 = vadd.f32 %v740_v34, %v9137_v42  ;;  %v854_v37 = vadd.f32 %v853_v35, %v9139_v43  ;;  %v9238_v38 = vpop.f32.mrf.mxu3  ;;  %v9240_v39 = vpop.f32.mrf.mxu2 }
  0xe6   : > { %v9242_v40 = vmax.f32 %v741_v36, 0.0  ;;  %v9244_v41 = vmax.f32 %v854_v37, 0.0  ;;  %1380 = vmatmul.f32.gmra.mxu0 %v9228_v32 }
  0xe8   : > { %14877 = vst [vmem:[#allocation29_spill] sm:$0xff] %v9242_v40  ;;  %1157 = vmatmul.f32.gmra.mxu2 %v9242_v40  ;;  %1270 = vmatmul.f32.gmra.mxu3 %v9244_v41 }
  0xe9   : > { %14878 = vst [vmem:[#allocation30_spill] sm:$0xff] %v9244_v41  ;;  %1496 = vmatmul.f32.gmra.mxu1 %v9244_v41 }
  0xeb   : > { %v743_v44 = vpop.f32.mrf.mxu0  ;;  %v856_v45 = vpop.f32.mrf.mxu1 }
  0xec   : > { %v744_v46 = vadd.f32 %v743_v44, %v9137_v42  ;;  %v857_v47 = vadd.f32 %v856_v45, %v9139_v43  ;;  %v9252_v50 = vpop.f32.mrf.mxu3  ;;  %v9254_v51 = vpop.f32.mrf.mxu2 }
  0xee   : > { %v9256_v52 = vmax.f32 %v744_v46, 0.0  ;;  %v9258_v53 = vmax.f32 %v857_v47, 0.0  ;;  %1383 = vmatmul.f32.gmra.mxu0 %v9242_v40 }
  0xf0   : > { %14879 = vst [vmem:[#allocation31_spill] sm:$0xff] %v9256_v52  ;;  %1160 = vmatmul.f32.gmra.mxu2 %v9256_v52  ;;  %1273 = vmatmul.f32.gmra.mxu3 %v9258_v53 }
  0xf1   : > { %14880 = vst [vmem:[#allocation32_spill] sm:$0xff] %v9258_v53  ;;  %1499 = vmatmul.f32.gmra.mxu1 %v9258_v53 }
  0xf3   : > { %v746_v9 = vpop.f32.mrf.mxu0  ;;  %v859_v58 = vpop.f32.mrf.mxu1 }
  0xf4   : > { %v747_v59 = vadd.f32 %v746_v9, %v9137_v42  ;;  %v860_v60 = vadd.f32 %v859_v58, %v9139_v43  ;;  %v9266_v1 = vpop.f32.mrf.mxu3  ;;  %v9268_v2 = vpop.f32.mrf.mxu2 }
  0xf6   : > { %v9270_v3 = vmax.f32 %v747_v59, 0.0  ;;  %v9272_v4 = vmax.f32 %v860_v60, 0.0  ;;  %1386 = vmatmul.f32.gmra.mxu0 %v9256_v52 }
  0xf8   : > { %14881 = vst [vmem:[#allocation33_spill] sm:$0xff] %v9270_v3  ;;  %1163 = vmatmul.f32.gmra.mxu2 %v9270_v3  ;;  %1276 = vmatmul.f32.gmra.mxu3 %v9272_v4 }
  0xf9   : > { %14882 = vst [vmem:[#allocation34_spill] sm:$0xff] %v9272_v4  ;;  %1502 = vmatmul.f32.gmra.mxu1 %v9272_v4 }
  0xfb   : > { %v749_v10 = vpop.f32.mrf.mxu0  ;;  %v862_v11 = vpop.f32.mrf.mxu1 }
  0xfc   : > { %v750_v12 = vadd.f32 %v749_v10, %v9137_v42  ;;  %v863_v13 = vadd.f32 %v862_v11, %v9139_v43  ;;  %v9280_v18 = vpop.f32.mrf.mxu3  ;;  %v9282_v19 = vpop.f32.mrf.mxu2 }
  0xfe   : > { %v9284_v20 = vmax.f32 %v750_v12, 0.0  ;;  %v9286_v21 = vmax.f32 %v863_v13, 0.0  ;;  %1389 = vmatmul.f32.gmra.mxu0 %v9270_v3 }
 0x100   : > { %14883 = vst [vmem:[#allocation35_spill] sm:$0xff] %v9284_v20  ;;  %1166 = vmatmul.f32.gmra.mxu2 %v9284_v20  ;;  %1279 = vmatmul.f32.gmra.mxu3 %v9286_v21 }
 0x101   : > { %14884 = vst [vmem:[#allocation36_spill] sm:$0xff] %v9286_v21  ;;  %1505 = vmatmul.f32.gmra.mxu1 %v9286_v21 }
 0x103   : > { %v752_v26 = vpop.f32.mrf.mxu0  ;;  %v865_v27 = vpop.f32.mrf.mxu1 }
 0x104   : > { %v753_v28 = vadd.f32 %v752_v26, %v9137_v42  ;;  %v866_v29 = vadd.f32 %v865_v27, %v9139_v43  ;;  %v9294_v34 = vpop.f32.mrf.mxu3  ;;  %v9296_v35 = vpop.f32.mrf.mxu2 }
 0x106   : > { %v9298_v36 = vmax.f32 %v753_v28, 0.0  ;;  %v9300_v37 = vmax.f32 %v866_v29, 0.0  ;;  %1392 = vmatmul.f32.gmra.mxu0 %v9284_v20 }
 0x108   : > { %14885 = vst [vmem:[#allocation37_spill] sm:$0xff] %v9298_v36  ;;  %1169 = vmatmul.f32.gmra.mxu2 %v9298_v36  ;;  %1282 = vmatmul.f32.gmra.mxu3 %v9300_v37 }
 0x109   : > { %14886 = vst [vmem:[#allocation38_spill] sm:$0xff] %v9300_v37  ;;  %1508 = vmatmul.f32.gmra.mxu1 %v9300_v37 }
 0x10b   : > { %v755_v44 = vpop.f32.mrf.mxu0  ;;  %v868_v45 = vpop.f32.mrf.mxu1 }
 0x10c   : > { %v756_v46 = vadd.f32 %v755_v44, %v9137_v42  ;;  %v869_v47 = vadd.f32 %v868_v45, %v9139_v43  ;;  %v9308_v9 = vpop.f32.mrf.mxu3  ;;  %v9310_v58 = vpop.f32.mrf.mxu2 }
 0x10e   : > { %v9312_v59 = vmax.f32 %v756_v46, 0.0  ;;  %v9314_v60 = vmax.f32 %v869_v47, 0.0  ;;  %1395 = vmatmul.f32.gmra.mxu0 %v9298_v36 }
 0x110   : > { %14887 = vst [vmem:[#allocation39_spill] sm:$0xff] %v9312_v59  ;;  %1172 = vmatmul.f32.gmra.mxu2 %v9312_v59  ;;  %1285 = vmatmul.f32.gmra.mxu3 %v9314_v60 }
 0x111   : > { %14888 = vst [vmem:[#allocation40_spill] sm:$0xff] %v9314_v60  ;;  %1511 = vmatmul.f32.gmra.mxu1 %v9314_v60 }
 0x113   : > { %v758_v10 = vpop.f32.mrf.mxu0  ;;  %v871_v11 = vpop.f32.mrf.mxu1 }
 0x114   : > { %v759_v12 = vadd.f32 %v758_v10, %v9137_v42  ;;  %v872_v13 = vadd.f32 %v871_v11, %v9139_v43  ;;  %v9322_v26 = vpop.f32.mrf.mxu3  ;;  %v9324_v27 = vpop.f32.mrf.mxu2 }
 0x116   : > { %v9326_v28 = vmax.f32 %v759_v12, 0.0  ;;  %v9328_v29 = vmax.f32 %v872_v13, 0.0  ;;  %1398 = vmatmul.f32.gmra.mxu0 %v9312_v59 }
 0x118   : > { %14889 = vst [vmem:[#allocation41_spill] sm:$0xff] %v9326_v28  ;;  %1175 = vmatmul.f32.gmra.mxu2 %v9326_v28  ;;  %1288 = vmatmul.f32.gmra.mxu3 %v9328_v29 }
 0x119   : > { %14890 = vst [vmem:[#allocation42_spill] sm:$0xff] %v9328_v29  ;;  %1514 = vmatmul.f32.gmra.mxu1 %v9328_v29 }
 0x11b   : > { %v761_v44 = vpop.f32.mrf.mxu0  ;;  %v874_v45 = vpop.f32.mrf.mxu1 }
 0x11c   : > { %v762_v46 = vadd.f32 %v761_v44, %v9137_v42  ;;  %v875_v47 = vadd.f32 %v874_v45, %v9139_v43  ;;  %v9336_v10 = vpop.f32.mrf.mxu3  ;;  %v9343_v13 = vpop.f32.mrf.mxu2 }
 0x11e   : > { %v9338_v11 = vmax.f32 %v762_v46, 0.0  ;;  %v9340_v12 = vmax.f32 %v875_v47, 0.0  ;;  %1401 = vmatmul.f32.gmra.mxu0 %v9326_v28 }
 0x120   : > { %14891 = vst [vmem:[#allocation43_spill] sm:$0xff] %v9338_v11  ;;  %1178 = vmatmul.f32.gmra.mxu2 %v9338_v11  ;;  %1291 = vmatmul.f32.gmra.mxu3 %v9340_v12 }
 0x121   : > { %14892 = vst [vmem:[#allocation44_spill] sm:$0xff] %v9340_v12  ;;  %1517 = vmatmul.f32.gmra.mxu1 %v9340_v12 }
 0x123   : > { %v764_v29 = vpop.f32.mrf.mxu0  ;;  %v877_v44 = vpop.f32.mrf.mxu1 }
 0x124   : > { %v765_v45 = vadd.f32 %v764_v29, %v9137_v42  ;;  %v878_v60 = vadd.f32 %v877_v44, %v9139_v43  ;;  %v9350_v46 = vpop.f32.mrf.mxu3  ;;  %v9360_v12 = vpop.f32.mrf.mxu2  ;;  %v881_v29 = vadd.f32 %v9154_v54, %v9139_v43  ;;  %v771_v54 = vadd.f32 %v9156_v55, %v9137_v42 }
 0x125   : > { %v774_v55 = vadd.f32 %v9170_v62, %v9137_v42  ;;  %v777_v62 = vadd.f32 %v9184_v6, %v9137_v42  ;;  %v780_v6 = vadd.f32 %v9198_v15, %v9137_v42  ;;  %v783_v15 = vadd.f32 %v9212_v23, %v9137_v42 }
 0x126   : > { %v9352_v47 = vmax.f32 %v765_v45, 0.0  ;;  %v9354_v37 = vmax.f32 %v878_v60, 0.0  ;;  %1404 = vmatmul.f32.gmra.mxu0 %v9338_v11  ;;  %v9367_v60 = vmax.f32 %v881_v29, 0.0  ;;  %v9385_v33 = vmax.f32 %v771_v54, 0.0 }
 0x127   : > { %v786_v23 = vadd.f32 %v9226_v31, %v9137_v42  ;;  %v789_v31 = vadd.f32 %v9240_v39, %v9137_v42  ;;  %v792_v39 = vadd.f32 %v9254_v51, %v9137_v42  ;;  %v795_v51 = vadd.f32 %v9268_v2, %v9137_v42 }
 0x128   : > { %14893 = vst [vmem:[#allocation45_spill] sm:$0xff] %v9352_v47  ;;  %1181 = vmatmul.f32.gmra.mxu2 %v9352_v47  ;;  %1294 = vmatmul.f32.gmra.mxu3 %v9354_v37  ;;  %v798_v2 = vadd.f32 %v9282_v19, %v9137_v42  ;;  %v801_v19 = vadd.f32 %v9296_v35, %v9137_v42 }
 0x129   : > { %14894 = vst [vmem:[#allocation46_spill] sm:$0xff] %v9354_v37  ;;  %1520 = vmatmul.f32.gmra.mxu1 %v9354_v37  ;;  %v804_v35 = vadd.f32 %v9310_v58, %v9137_v42  ;;  %v807_v58 = vadd.f32 %v9324_v27, %v9137_v42  ;;  %v810_v27 = vadd.f32 %v9343_v13, %v9137_v42 }
 0x12a   : > { %14895 = vst [vmem:[#allocation47_spill] sm:$0xff] %v9367_v60  ;;  %v9551_v59 = vmax.f32 %v798_v2, 0.0  ;;  %v9571_v20 = vmax.f32 %v801_v19, 0.0  ;;  %v813_v13 = vadd.f32 %v9360_v12, %v9137_v42 }
 0x12b   : > { %v767_v44 = vpop.f32.mrf.mxu0  ;;  %14899 = vst [vmem:[#allocation51_spill] sm:$0xff] %v9385_v33  ;;  %v9591_v52 = vmax.f32 %v804_v35, 0.0 }
 0x12c   : > { %v768_v21 = vadd.f32 %v767_v44, %v9137_v42  ;;  %v9365_v45 = vpop.f32.mrf.mxu3  ;;  %v884_v44 = vadd.f32 %v9168_v61, %v9139_v43  ;;  %v887_v61 = vadd.f32 %v9182_v5, %v9139_v43  ;;  %v890_v5 = vadd.f32 %v9196_v14, %v9139_v43  ;;  %14918 = vst [vmem:[#allocation70_spill] sm:$0xff] %v9551_v59 }
 0x12d   : > { %v893_v14 = vadd.f32 %v9210_v22, %v9139_v43  ;;  %v896_v22 = vadd.f32 %v9224_v30, %v9139_v43  ;;  %v899_v30 = vadd.f32 %v9238_v38, %v9139_v43  ;;  %v902_v38 = vadd.f32 %v9252_v50, %v9139_v43  ;;  %14920 = vst [vmem:[#allocation72_spill] sm:$0xff] %v9571_v20 }
 0x12e   : > { %v9369_v4 = vmax.f32 %v768_v21, 0.0  ;;  %v9371_v53 = vpop.f32.mrf.mxu1  ;;  %1407 = vmatmul.f32.gmra.mxu0 %v9352_v47  ;;  %v9387_v25 = vmax.f32 %v884_v44, 0.0  ;;  %v9405_v8 = vmax.f32 %v887_v61, 0.0  ;;  %v905_v50 = vadd.f32 %v9266_v1, %v9139_v43  ;;  %14922 = vst [vmem:[#allocation74_spill] sm:$0xff] %v9591_v52 }
 0x12f   : > { %14897 = vst [vmem:[#allocation49_spill] sm:$0xff] %v9371_v53  ;;  %v908_v1 = vadd.f32 %v9280_v18, %v9139_v43  ;;  %v911_v18 = vadd.f32 %v9294_v34, %v9139_v43  ;;  %v914_v34 = vadd.f32 %v9308_v9, %v9139_v43  ;;  %v917_v9 = vadd.f32 %v9322_v26, %v9139_v43 }
 0x130   : > { %14896 = vst [vmem:[#allocation48_spill] sm:$0xff] %v9369_v4  ;;  %1184 = vmatmul.f32.gmra.mxu2 %v9369_v4  ;;  %1297 = vmatmul.f32.gmra.mxu3 %v9367_v60  ;;  %v920_v26 = vadd.f32 %v9336_v10, %v9139_v43  ;;  %v923_v10 = vadd.f32 %v9350_v46, %v9139_v43 }
 0x131   : > { %1523 = vmatmul.f32.gmra.mxu1 %v9367_v60  ;;  %14900 = vst [vmem:[#allocation52_spill] sm:$0xff] %v9387_v25  ;;  %v9403_v60 = vmax.f32 %v774_v55, 0.0  ;;  %v926_v46 = vadd.f32 %v9365_v45, %v9139_v43 }
 0x132   : > { %14903 = vst [vmem:[#allocation55_spill] sm:$0xff] %v9405_v8  ;;  %v9605_v24 = vmax.f32 %v920_v26, 0.0  ;;  %v9615_v26 = vmax.f32 %v810_v27, 0.0  ;;  %v9617_v7 = vmax.f32 %v923_v10, 0.0  ;;  %v9627_v10 = vmax.f32 %v813_v13, 0.0 }
 0x133   : > { %v1137_v29 = vpop.f32.mrf.mxu2  ;;  %v9381_v37 = vpop.f32.mrf.mxu0  ;;  %14902 = vst [vmem:[#allocation54_spill] sm:$0xff] %v9403_v60  ;;  %v9629_v56 = vmax.f32 %v926_v46, 0.0 }
 0x134   : > { %v1250_v21 = vpop.f32.mrf.mxu3  ;;  %14925 = vst [vmem:[#allocation77_spill] sm:$0xff] %v9605_v24 }
 0x135   : > { %v9383_v41 = vadd.f32 %v1250_v21, %v1137_v29  ;;  %14926 = vst [vmem:[#allocation78_spill] sm:$0xff] %v9615_v26 }
 0x136   : > { %v9389_v17 = vpop.f32.mrf.mxu1  ;;  %1410 = vmatmul.f32.gmra.mxu0 %v9369_v4  ;;  %14927 = vst [vmem:[#allocation79_spill] sm:$0xff] %v9617_v7 }
 0x137   : > { %14898 = vst [vmem:[#allocation50_spill] sm:$0xff] %v9383_v41 }
 0x138   : > { %1187 = vmatmul.f32.gmra.mxu2 %v9385_v33  ;;  %1300 = vmatmul.f32.gmra.mxu3 %v9387_v25  ;;  %14928 = vst [vmem:[#allocation80_spill] sm:$0xff] %v9627_v10 }
 0x139   : > { %1526 = vmatmul.f32.gmra.mxu1 %v9387_v25  ;;  %v9421_v25 = vmax.f32 %v777_v62, 0.0  ;;  %14929 = vst [vmem:[#allocation81_spill] sm:$0xff] %v9629_v56 }
 0x13b   : > { %v1140_v54 = vpop.f32.mrf.mxu2  ;;  %v9399_v29 = vpop.f32.mrf.mxu0  ;;  %14904 = vst [vmem:[#allocation56_spill] sm:$0xff] %v9421_v25 }
 0x13c   : > { %v1253_v44 = vpop.f32.mrf.mxu3 }
 0x13d   : > { %v9401_v21 = vadd.f32 %v1253_v44, %v1140_v54 }
 0x13e   : > { %v9407_v0 = vpop.f32.mrf.mxu1  ;;  %1413 = vmatmul.f32.gmra.mxu0 %v9385_v33  ;;  %v9423_v33 = vmax.f32 %v890_v5, 0.0 }
 0x13f   : > { %14901 = vst [vmem:[#allocation53_spill] sm:$0xff] %v9401_v21 }
 0x140   : > { %1190 = vmatmul.f32.gmra.mxu2 %v9403_v60  ;;  %1303 = vmatmul.f32.gmra.mxu3 %v9405_v8  ;;  %14905 = vst [vmem:[#allocation57_spill] sm:$0xff] %v9423_v33 }
 0x141   : > { %1529 = vmatmul.f32.gmra.mxu1 %v9405_v8  ;;  %v9439_v8 = vmax.f32 %v780_v6, 0.0 }
 0x143   : > { %v1143_v55 = vpop.f32.mrf.mxu2  ;;  %v9417_v54 = vpop.f32.mrf.mxu0  ;;  %14906 = vst [vmem:[#allocation58_spill] sm:$0xff] %v9439_v8 }
 0x144   : > { %v1256_v61 = vpop.f32.mrf.mxu3 }
 0x145   : > { %v9419_v44 = vadd.f32 %v1256_v61, %v1143_v55 }
 0x146   : > { %v9425_v4 = vpop.f32.mrf.mxu1  ;;  %1416 = vmatmul.f32.gmra.mxu0 %v9403_v60  ;;  %v9441_v60 = vmax.f32 %v893_v14, 0.0 }
 0x148   : > { %1193 = vmatmul.f32.gmra.mxu2 %v9421_v25  ;;  %1306 = vmatmul.f32.gmra.mxu3 %v9423_v33  ;;  %14907 = vst [vmem:[#allocation59_spill] sm:$0xff] %v9441_v60 }
 0x149   : > { %1532 = vmatmul.f32.gmra.mxu1 %v9423_v33  ;;  %v9457_v33 = vmax.f32 %v783_v15, 0.0 }
 0x14b   : > { %v1146_v62 = vpop.f32.mrf.mxu2  ;;  %v9435_v55 = vpop.f32.mrf.mxu0  ;;  %14908 = vst [vmem:[#allocation60_spill] sm:$0xff] %v9457_v33 }
 0x14c   : > { %v1259_v5 = vpop.f32.mrf.mxu3 }
 0x14d   : > { %v9437_v61 = vadd.f32 %v1259_v5, %v1146_v62 }
 0x14e   : > { %v9443_v57 = vpop.f32.mrf.mxu1  ;;  %1419 = vmatmul.f32.gmra.mxu0 %v9421_v25  ;;  %v9459_v25 = vmax.f32 %v896_v22, 0.0 }
 0x150   : > { %1196 = vmatmul.f32.gmra.mxu2 %v9439_v8  ;;  %1309 = vmatmul.f32.gmra.mxu3 %v9441_v60  ;;  %14909 = vst [vmem:[#allocation61_spill] sm:$0xff] %v9459_v25 }
 0x151   : > { %1535 = vmatmul.f32.gmra.mxu1 %v9441_v60  ;;  %v9475_v60 = vmax.f32 %v786_v23, 0.0 }
 0x153   : > { %v1149_v6 = vpop.f32.mrf.mxu2  ;;  %v9453_v62 = vpop.f32.mrf.mxu0  ;;  %14910 = vst [vmem:[#allocation62_spill] sm:$0xff] %v9475_v60 }
 0x154   : > { %v1262_v14 = vpop.f32.mrf.mxu3 }
 0x155   : > { %v9455_v5 = vadd.f32 %v1262_v14, %v1149_v6 }
 0x156   : > { %v9461_v47 = vpop.f32.mrf.mxu1  ;;  %1422 = vmatmul.f32.gmra.mxu0 %v9439_v8  ;;  %v9477_v8 = vmax.f32 %v899_v30, 0.0 }
 0x158   : > { %1199 = vmatmul.f32.gmra.mxu2 %v9457_v33  ;;  %1312 = vmatmul.f32.gmra.mxu3 %v9459_v25  ;;  %14911 = vst [vmem:[#allocation63_spill] sm:$0xff] %v9477_v8 }
 0x159   : > { %1538 = vmatmul.f32.gmra.mxu1 %v9459_v25  ;;  %v9493_v25 = vmax.f32 %v789_v31, 0.0 }
 0x15b   : > { %v1152_v15 = vpop.f32.mrf.mxu2  ;;  %v9471_v6 = vpop.f32.mrf.mxu0  ;;  %14912 = vst [vmem:[#allocation64_spill] sm:$0xff] %v9493_v25 }
 0x15c   : > { %v1265_v22 = vpop.f32.mrf.mxu3 }
 0x15d   : > { %v9473_v14 = vadd.f32 %v1265_v22, %v1152_v15 }
 0x15e   : > { %v9479_v49 = vpop.f32.mrf.mxu1  ;;  %1425 = vmatmul.f32.gmra.mxu0 %v9457_v33  ;;  %v9495_v33 = vmax.f32 %v902_v38, 0.0 }
 0x160   : > { %1202 = vmatmul.f32.gmra.mxu2 %v9475_v60  ;;  %1315 = vmatmul.f32.gmra.mxu3 %v9477_v8  ;;  %14913 = vst [vmem:[#allocation65_spill] sm:$0xff] %v9495_v33 }
 0x161   : > { %1541 = vmatmul.f32.gmra.mxu1 %v9477_v8  ;;  %v9511_v8 = vmax.f32 %v792_v39, 0.0 }
 0x163   : > { %v1155_v23 = vpop.f32.mrf.mxu2  ;;  %v9489_v15 = vpop.f32.mrf.mxu0  ;;  %14914 = vst [vmem:[#allocation66_spill] sm:$0xff] %v9511_v8 }
 0x164   : > { %v1268_v30 = vpop.f32.mrf.mxu3 }
 0x165   : > { %v9491_v22 = vadd.f32 %v1268_v30, %v1155_v23 }
 0x166   : > { %v9497_v11 = vpop.f32.mrf.mxu1  ;;  %1428 = vmatmul.f32.gmra.mxu0 %v9475_v60  ;;  %v9513_v60 = vmax.f32 %v905_v50, 0.0 }
 0x168   : > { %1205 = vmatmul.f32.gmra.mxu2 %v9493_v25  ;;  %1318 = vmatmul.f32.gmra.mxu3 %v9495_v33  ;;  %14915 = vst [vmem:[#allocation67_spill] sm:$0xff] %v9513_v60 }
 0x169   : > { %1544 = vmatmul.f32.gmra.mxu1 %v9495_v33  ;;  %v9533_v33 = vmax.f32 %v908_v1, 0.0 }
 0x16b   : > { %v1158_v31 = vpop.f32.mrf.mxu2  ;;  %v9507_v23 = vpop.f32.mrf.mxu0  ;;  %14917 = vst [vmem:[#allocation69_spill] sm:$0xff] %v9533_v33 }
 0x16c   : > { %v1271_v38 = vpop.f32.mrf.mxu3 }
 0x16d   : > { %v9509_v30 = vadd.f32 %v1271_v38, %v1158_v31  ;;  %v9531_v38 = vmax.f32 %v795_v51, 0.0 }
 0x16e   : > { %v9515_v28 = vpop.f32.mrf.mxu1  ;;  %1431 = vmatmul.f32.gmra.mxu0 %v9493_v25 }
 0x16f   : > { %14916 = vst [vmem:[#allocation68_spill] sm:$0xff] %v9531_v38 }
 0x170   : > { %1208 = vmatmul.f32.gmra.mxu2 %v9511_v8  ;;  %1321 = vmatmul.f32.gmra.mxu3 %v9513_v60 }
 0x171   : > { %1547 = vmatmul.f32.gmra.mxu1 %v9513_v60 }
 0x173   : > { %v9525_v39 = vpop.f32.mrf.mxu2  ;;  %v9527_v50 = vpop.f32.mrf.mxu0 }
 0x174   : > { %v9529_v31 = vpop.f32.mrf.mxu3 }
 0x176   : > { %v9535_v25 = vpop.f32.mrf.mxu1  ;;  %1434 = vmatmul.f32.gmra.mxu0 %v9511_v8  ;;  %v9553_v8 = vmax.f32 %v911_v18, 0.0 }
 0x178   : > { %1211 = vmatmul.f32.gmra.mxu2 %v9531_v38  ;;  %1324 = vmatmul.f32.gmra.mxu3 %v9533_v33  ;;  %14919 = vst [vmem:[#allocation71_spill] sm:$0xff] %v9553_v8 }
 0x179   : > { %1550 = vmatmul.f32.gmra.mxu1 %v9533_v33 }
 0x17b   : > { %v9545_v51 = vpop.f32.mrf.mxu2  ;;  %v9547_v1 = vpop.f32.mrf.mxu0 }
 0x17c   : > { %v9549_v60 = vpop.f32.mrf.mxu3 }
 0x17e   : > { %v9555_v36 = vpop.f32.mrf.mxu1  ;;  %1437 = vmatmul.f32.gmra.mxu0 %v9531_v38  ;;  %v9573_v38 = vmax.f32 %v914_v34, 0.0 }
 0x180   : > { %1214 = vmatmul.f32.gmra.mxu2 %v9551_v59  ;;  %1327 = vmatmul.f32.gmra.mxu3 %v9553_v8  ;;  %14921 = vst [vmem:[#allocation73_spill] sm:$0xff] %v9573_v38 }
 0x181   : > { %1553 = vmatmul.f32.gmra.mxu1 %v9553_v8 }
 0x183   : > { %v9565_v2 = vpop.f32.mrf.mxu2  ;;  %v9567_v18 = vpop.f32.mrf.mxu0 }
 0x184   : > { %v9569_v33 = vpop.f32.mrf.mxu3 }
 0x186   : > { %v9575_v3 = vpop.f32.mrf.mxu1  ;;  %1440 = vmatmul.f32.gmra.mxu0 %v9551_v59  ;;  %v9593_v59 = vmax.f32 %v917_v9, 0.0  ;;  %v9603_v9 = vmax.f32 %v807_v58, 0.0 }
 0x188   : > { %1217 = vmatmul.f32.gmra.mxu2 %v9571_v20  ;;  %1330 = vmatmul.f32.gmra.mxu3 %v9573_v38  ;;  %14923 = vst [vmem:[#allocation75_spill] sm:$0xff] %v9593_v59 }
 0x189   : > { %1556 = vmatmul.f32.gmra.mxu1 %v9573_v38  ;;  %14924 = vst [vmem:[#allocation76_spill] sm:$0xff] %v9603_v9 }
 0x18b   : > { %v9585_v19 = vpop.f32.mrf.mxu2  ;;  %v9587_v34 = vpop.f32.mrf.mxu0 }
 0x18c   : > { %v9589_v8 = vpop.f32.mrf.mxu3 }
 0x18e   : > { %v1512_v40 = vpop.f32.mrf.mxu1  ;;  %1443 = vmatmul.f32.gmra.mxu0 %v9571_v20 }
 0x190   : > { %1220 = vmatmul.f32.gmra.mxu2 %v9591_v52  ;;  %1333 = vmatmul.f32.gmra.mxu3 %v9593_v59 }
 0x191   : > { %1559 = vmatmul.f32.gmra.mxu1 %v9593_v59 }
 0x193   : > { %v1173_v38 = vpop.f32.mrf.mxu2  ;;  %v1399_v35 = vpop.f32.mrf.mxu0 }
 0x194   : > { %v1286_v32 = vpop.f32.mrf.mxu3  ;;  %v1513_v53 = vadd.f32 %v1512_v40, %v1399_v35  ;;  %v1507_v40 = vadd.f32 %v9555_v36, %v9567_v18  ;;  %v1498_v36 = vadd.f32 %v9497_v11, %v9507_v23 }
 0x195   : > { %v1287_v21 = vadd.f32 %v1286_v32, %v1173_v38  ;;  %v1281_v32 = vadd.f32 %v9569_v33, %v9565_v2  ;;  %v998_v2 = vld [vmem:[#allocation2 + $0x30] sm:$0xff] }
 0x196   : > { %v1515_v20 = vpop.f32.mrf.mxu1  ;;  %1446 = vmatmul.f32.gmra.mxu0 %v9591_v52 }
 0x198   : > { %1223 = vmatmul.f32.gmra.mxu2 %v9603_v9  ;;  %1336 = vmatmul.f32.gmra.mxu3 %v9605_v24 }
 0x199   : > { %1562 = vmatmul.f32.gmra.mxu1 %v9605_v24 }
 0x19b   : > { %v1176_v59 = vpop.f32.mrf.mxu2  ;;  %v1402_v58 = vpop.f32.mrf.mxu0 }
 0x19c   : > { %v1289_v16 = vpop.f32.mrf.mxu3  ;;  %v1516_v41 = vadd.f32 %v1515_v20, %v1402_v58  ;;  %v1000_v58 = vld [vmem:[#allocation2 + $0x40] sm:$0xff] }
 0x19e   : > { %v1518_v52 = vpop.f32.mrf.mxu1  ;;  %1449 = vmatmul.f32.gmra.mxu0 %v9603_v9 }
 0x1a0   : > { %1226 = vmatmul.f32.gmra.mxu2 %v9615_v26  ;;  %1339 = vmatmul.f32.gmra.mxu3 %v9617_v7 }
 0x1a1   : > { %1565 = vmatmul.f32.gmra.mxu1 %v9617_v7 }
 0x1a3   : > { %v1179_v24 = vpop.f32.mrf.mxu2  ;;  %v1405_v27 = vpop.f32.mrf.mxu0 }
 0x1a4   : > { %v1292_v63 = vpop.f32.mrf.mxu3  ;;  %v1519_v46 = vadd.f32 %v1518_v52, %v1405_v27  ;;  %v1275_v52 = vadd.f32 %v9529_v31, %v9525_v39 }
 0x1a5   : > { %v1293_v13 = vadd.f32 %v1292_v63, %v1179_v24  ;;  %v1284_v63 = vadd.f32 %v9589_v8, %v9585_v19  ;;  %v1510_v24 = vadd.f32 %v9575_v3, %v9587_v34  ;;  %v1504_v8 = vadd.f32 %v9535_v25, %v9547_v1 }
 0x1a6   : > { %v1521_v9 = vpop.f32.mrf.mxu1  ;;  %1452 = vmatmul.f32.gmra.mxu0 %v9615_v26  ;;  %v1290_v26 = vadd.f32 %v1289_v16, %v1176_v59  ;;  %v1495_v59 = vadd.f32 %v9479_v49, %v9489_v15  ;;  %v1486_v15 = vadd.f32 %v9425_v4, %v9435_v55  ;;  %v14943_v55 = vld [vmem:[#allocation53_spill] sm:$0xff] }
 0x1a8   : > { %1229 = vmatmul.f32.gmra.mxu2 %v9627_v10  ;;  %1342 = vmatmul.f32.gmra.mxu3 %v9629_v56 }
 0x1a9   : > { %1568 = vmatmul.f32.gmra.mxu1 %v9629_v56 }
 0x1ab   : > { %v1182_v42 = vpop.f32.mrf.mxu2  ;;  %v1408_v12 = vpop.f32.mrf.mxu0 }
 0x1ac   : > { %v1295_v7 = vpop.f32.mrf.mxu3  ;;  %v1522_v43 = vadd.f32 %v1521_v9, %v1408_v12 }
 0x1ad   : > { %v1296_v45 = vadd.f32 %v1295_v7, %v1182_v42 }
 0x1ae   : > { %v9635_v48 = vpop.f32.mrf.mxu1  ;;  %1455 = vmatmul.f32.gmra.mxu0 %v9627_v10 }
 0x1af   : > { %14930 = vst [vmem:[#allocation82_spill] sm:$0xff] %v9635_v48  ;;  %1579 = vmatpush.msra.mxu2 %v1296_v45  ;;  %1805 = vmatpush.msra.mxu0 %v1522_v43  ;;  %v1002_v43 = vld [vmem:[#allocation2 + $0x50] sm:$0xff]  ;;  %v1016_v48 = vld [vmem:[#allocation2 + $0xc0] sm:$0xff] }
 0x1b1   : > { %1580 = vmatpush.msra.mxu2 %v1293_v13  ;;  %1806 = vmatpush.msra.mxu0 %v1519_v46 }
 0x1b3   : > { %1581 = vmatpush.msra.mxu2 %v1290_v26  ;;  %1807 = vmatpush.msra.mxu0 %v1516_v41  ;;  %v9638_v56 = vpop.f32.mrf.mxu2  ;;  %v9640_v9 = vpop.f32.mrf.mxu0  ;;  %v1278_v41 = vadd.f32 %v9549_v60, %v9545_v51  ;;  %v1489_v60 = vadd.f32 %v9443_v57, %v9453_v62  ;;  %v1483_v57 = vadd.f32 %v9407_v0, %v9417_v54  ;;  %v992_v0 = vld [vmem:[#allocation2] sm:$0xff] }
 0x1b4   : > { %14931 = vst [vmem:[#allocation83_spill] sm:$0xff] %v9638_v56  ;;  %v9642_v7 = vpop.f32.mrf.mxu3  ;;  %v1480_v62 = vadd.f32 %v9389_v17, %v9399_v29 }
 0x1b5   : > { %14932 = vst [vmem:[#allocation84_spill] sm:$0xff] %v9640_v9  ;;  %1582 = vmatpush.msra.mxu2 %v1287_v21  ;;  %1808 = vmatpush.msra.mxu0 %v1513_v53  ;;  %v1501_v53 = vadd.f32 %v9515_v28, %v9527_v50  ;;  %v1492_v28 = vadd.f32 %v9461_v47, %v9471_v6  ;;  %v14942_v6 = vld [vmem:[#allocation49_spill] sm:$0xff] }
 0x1b6   : > { %14933 = vst [vmem:[#allocation85_spill] sm:$0xff] %v9642_v7  ;;  %v9648_v16 = vpop.f32.mrf.mxu1  ;;  %v1477_v4 = vadd.f32 %v14942_v6, %v9381_v37  ;;  %v996_v50 = vld [vmem:[#allocation2 + $0x20] sm:$0xff] }
 0x1b7   : > { %14934 = vst [vmem:[#allocation86_spill] sm:$0xff] %v9648_v16  ;;  %1583 = vmatpush.msra.mxu2 %v1284_v63  ;;  %1809 = vmatpush.msra.mxu0 %v1510_v24  ;;  %v1004_v24 = vld [vmem:[#allocation2 + $0x60] sm:$0xff] }
 0x1b9   : > { %1584 = vmatpush.msra.mxu2 %v1281_v32  ;;  %1810 = vmatpush.msra.mxu0 %v1507_v40 }
 0x1bb   : > { %1585 = vmatpush.msra.mxu2 %v1278_v41  ;;  %1811 = vmatpush.msra.mxu0 %v1504_v8  ;;  %v9662_v33 = vpop.f32.mrf.mxu2  ;;  %v9664_v3 = vpop.f32.mrf.mxu0 }
 0x1bc   : > { %14935 = vst [vmem:[#allocation87_spill] sm:$0xff] %v9662_v33  ;;  %v9666_v20 = vpop.f32.mrf.mxu3 }
 0x1bd   : > { %14936 = vst [vmem:[#allocation88_spill] sm:$0xff] %v9664_v3  ;;  %1586 = vmatpush.msra.mxu2 %v1275_v52  ;;  %1812 = vmatpush.msra.mxu0 %v1501_v53  ;;  %v1006_v52 = vld [vmem:[#allocation2 + $0x70] sm:$0xff] }
 0x1be   : > { %14937 = vst [vmem:[#allocation89_spill] sm:$0xff] %v9666_v20  ;;  %v9670_v25 = vpop.f32.mrf.mxu1 }
 0x1bf   : > { %14938 = vst [vmem:[#allocation90_spill] sm:$0xff] %v9670_v25  ;;  %1587 = vmatpush.msra.mxu2 %v9509_v30  ;;  %1813 = vmatpush.msra.mxu0 %v1498_v36 }
 0x1c1   : > { %1588 = vmatpush.msra.mxu2 %v9491_v22  ;;  %1814 = vmatpush.msra.mxu0 %v1495_v59 }
 0x1c3   : > { %1589 = vmatpush.msra.mxu2 %v9473_v14  ;;  %1815 = vmatpush.msra.mxu0 %v1492_v28  ;;  %v9681_v11 = vpop.f32.mrf.mxu2  ;;  %v9683_v21 = vpop.f32.mrf.mxu0 }
 0x1c4   : > { %14939 = vst [vmem:[#allocation91_spill] sm:$0xff] %v9681_v11  ;;  %v9685_v49 = vpop.f32.mrf.mxu3  ;;  %v1018_v11 = vld [vmem:[#allocation2 + $0xd0] sm:$0xff] }
 0x1c5   : > { %14940 = vst [vmem:[#allocation92_spill] sm:$0xff] %v9683_v21  ;;  %1590 = vmatpush.msra.mxu2 %v9455_v5  ;;  %1816 = vmatpush.msra.mxu0 %v1489_v60  ;;  %v1008_v60 = vld [vmem:[#allocation2 + $0x80] sm:$0xff] }
 0x1c6   : > { %14941 = vst [vmem:[#allocation93_spill] sm:$0xff] %v9685_v49  ;;  %v9690_v47 = vpop.f32.mrf.mxu1 }
 0x1c7   : > { %1591 = vmatpush.msra.mxu2 %v9437_v61  ;;  %1817 = vmatpush.msra.mxu0 %v1486_v15  ;;  %v14944_v61 = vld [vmem:[#allocation50_spill] sm:$0xff] }
 0x1c9   : > { %1592 = vmatpush.msra.mxu2 %v9419_v44  ;;  %1818 = vmatpush.msra.mxu0 %v1483_v57  ;;  %v994_v44 = vld [vmem:[#allocation2 + $0x10] sm:$0xff] }
 0x1cb   : > { %1593 = vmatpush.msra.mxu2 %v14943_v55  ;;  %1819 = vmatpush.msra.mxu0 %v1480_v62  ;;  %v9701_v5 = vpop.f32.mrf.mxu2  ;;  %v9703_v14 = vpop.f32.mrf.mxu0 }
 0x1cc   : > { %v9705_v54 = vpop.f32.mrf.mxu3 }
 0x1cd   : > { %1594 = vmatpush.msra.mxu2 %v14944_v61  ;;  %1820 = vmatpush.msra.mxu0 %v1477_v4  ;;  %v1010_v4 = vld [vmem:[#allocation2 + $0x90] sm:$0xff] }
 0x1ce   : > { %v9708_v17 = vpop.f32.mrf.mxu1  ;;  %1595 = vmatmul.f32.vlgmr.msra.gmra.mxu2 %v992_v0  ;;  %1821 = vmatmul.f32.vlgmr.msra.gmra.mxu0 %v992_v0 }
 0x1d3   : > { %v9710_v29 = vpop.f32.mrf.mxu2  ;;  %v9712_v37 = vpop.f32.mrf.mxu0 }
 0x1d4   : > { %v9714_v22 = vpop.f32.mrf.mxu3 }
 0x1d6   : > { %v9716_v23 = vpop.f32.mrf.mxu1  ;;  %1598 = vmatmul.f32.gmra.mxu2 %v994_v44  ;;  %1824 = vmatmul.f32.gmra.mxu0 %v994_v44 }
 0x1db   : > { %v9718_v30 = vpop.f32.mrf.mxu2  ;;  %v9720_v39 = vpop.f32.mrf.mxu0 }
 0x1dc   : > { %v9722_v31 = vpop.f32.mrf.mxu3 }
 0x1de   : > { %v9724_v38 = vpop.f32.mrf.mxu1  ;;  %1601 = vmatmul.f32.gmra.mxu2 %v996_v50  ;;  %1827 = vmatmul.f32.gmra.mxu0 %v996_v50  ;;  %v1012_v50 = vld [vmem:[#allocation2 + $0xa0] sm:$0xff] }
 0x1e3   : > { %v9726_v51 = vpop.f32.mrf.mxu2  ;;  %v9728_v1 = vpop.f32.mrf.mxu0 }
 0x1e4   : > { %v9730_v18 = vpop.f32.mrf.mxu3 }
 0x1e6   : > { %v9732_v19 = vpop.f32.mrf.mxu1  ;;  %1604 = vmatmul.f32.gmra.mxu2 %v998_v2  ;;  %1830 = vmatmul.f32.gmra.mxu0 %v998_v2 }
 0x1eb   : > { %v9734_v34 = vpop.f32.mrf.mxu2  ;;  %v9736_v35 = vpop.f32.mrf.mxu0 }
 0x1ec   : > { %v9738_v26 = vpop.f32.mrf.mxu3 }
 0x1ee   : > { %v9740_v27 = vpop.f32.mrf.mxu1  ;;  %1607 = vmatmul.f32.gmra.mxu2 %v1000_v58  ;;  %1833 = vmatmul.f32.gmra.mxu0 %v1000_v58 }
 0x1f3   : > { %v9742_v42 = vpop.f32.mrf.mxu2  ;;  %v9744_v12 = vpop.f32.mrf.mxu0 }
 0x1f4   : > { %v9746_v45 = vpop.f32.mrf.mxu3 }
 0x1f6   : > { %v9748_v13 = vpop.f32.mrf.mxu1  ;;  %1610 = vmatmul.f32.gmra.mxu2 %v1002_v43  ;;  %1836 = vmatmul.f32.gmra.mxu0 %v1002_v43 }
 0x1fb   : > { %v9750_v46 = vpop.f32.mrf.mxu2  ;;  %v9752_v63 = vpop.f32.mrf.mxu0 }
 0x1fc   : > { %v9754_v32 = vpop.f32.mrf.mxu3 }
 0x1fe   : > { %v9756_v40 = vpop.f32.mrf.mxu1  ;;  %1613 = vmatmul.f32.gmra.mxu2 %v1004_v24  ;;  %1839 = vmatmul.f32.gmra.mxu0 %v1004_v24 }
 0x203   : > { %v9758_v41 = vpop.f32.mrf.mxu2  ;;  %v1441_v8 = vpop.f32.mrf.mxu0 }
 0x204   : > { %v1328_v53 = vpop.f32.mrf.mxu3 }
 0x206   : > { %v1557_v36 = vpop.f32.mrf.mxu1  ;;  %1616 = vmatmul.f32.gmra.mxu2 %v1006_v52  ;;  %1842 = vmatmul.f32.gmra.mxu0 %v1006_v52  ;;  %v1014_v52 = vld [vmem:[#allocation2 + $0xb0] sm:$0xff] }
 0x20b   : > { %v1218_v59 = vpop.f32.mrf.mxu2  ;;  %v1444_v28 = vpop.f32.mrf.mxu0 }
 0x20c   : > { %v1331_v15 = vpop.f32.mrf.mxu3  ;;  %v1558_v25 = vadd.f32 %v1557_v36, %v1444_v28  ;;  %v1028_v36 = vld [vmem:[#allocation2 + $0x120] sm:$0xff] }
 0x20d   : > { %v1332_v21 = vadd.f32 %v1331_v15, %v1218_v59  ;;  %v999_v15 = vld [vmem:[#allocation2 + $0x38] sm:$0xff] }
 0x20e   : > { %v1560_v57 = vpop.f32.mrf.mxu1  ;;  %1619 = vmatmul.f32.gmra.mxu2 %v1008_v60  ;;  %1845 = vmatmul.f32.gmra.mxu0 %v1008_v60 }
 0x213   : > { %v1221_v62 = vpop.f32.mrf.mxu2  ;;  %v1447_v6 = vpop.f32.mrf.mxu0 }
 0x214   : > { %v1334_v55 = vpop.f32.mrf.mxu3  ;;  %v1561_v49 = vadd.f32 %v1560_v57, %v1447_v6  ;;  %v1030_v57 = vld [vmem:[#allocation2 + $0x130] sm:$0xff] }
 0x216   : > { %v1563_v0 = vpop.f32.mrf.mxu1  ;;  %1622 = vmatmul.f32.gmra.mxu2 %v1010_v4  ;;  %1848 = vmatmul.f32.gmra.mxu0 %v1010_v4 }
 0x21b   : > { %v1224_v61 = vpop.f32.mrf.mxu2  ;;  %v1450_v44 = vpop.f32.mrf.mxu0 }
 0x21c   : > { %v1337_v2 = vpop.f32.mrf.mxu3 }
 0x21d   : > { %v1338_v3 = vadd.f32 %v1337_v2, %v1224_v61 }
 0x21e   : > { %1625 = vmatmul.f32.gmra.mxu2 %v1012_v50  ;;  %1851 = vmatmul.f32.gmra.mxu0 %v1012_v50  ;;  %v1566_v58 = vpop.f32.mrf.mxu1  ;;  %v1564_v50 = vadd.f32 %v1563_v0, %v1450_v44  ;;  %v1032_v0 = vld [vmem:[#allocation2 + $0x140] sm:$0xff]  ;;  %v1003_v44 = vld [vmem:[#allocation2 + $0x58] sm:$0xff] }
 0x223   : > { %v1227_v43 = vpop.f32.mrf.mxu2  ;;  %v1453_v24 = vpop.f32.mrf.mxu0 }
 0x224   : > { %v1340_v10 = vpop.f32.mrf.mxu3  ;;  %v1567_v33 = vadd.f32 %v1566_v58, %v1453_v24  ;;  %v1034_v58 = vld [vmem:[#allocation2 + $0x150] sm:$0xff] }
 0x225   : > { %v1341_v16 = vadd.f32 %v1340_v10, %v1227_v43  ;;  %v1329_v10 = vadd.f32 %v1328_v53, %v9758_v41  ;;  %v1026_v41 = vld [vmem:[#allocation2 + $0x110] sm:$0xff]  ;;  %v997_v53 = vld [vmem:[#allocation2 + $0x28] sm:$0xff] }
 0x226   : > { %1628 = vmatmul.f32.gmra.mxu2 %v1014_v52  ;;  %1854 = vmatmul.f32.gmra.mxu0 %v1014_v52  ;;  %v1569_v60 = vpop.f32.mrf.mxu1  ;;  %v1335_v52 = vadd.f32 %v1334_v55, %v1221_v62  ;;  %v1001_v55 = vld [vmem:[#allocation2 + $0x48] sm:$0xff] }
 0x227   : > { %v1005_v43 = vld [vmem:[#allocation2 + $0x68] sm:$0xff] }
 0x22b   : > { %v1230_v7 = vpop.f32.mrf.mxu2  ;;  %v1456_v56 = vpop.f32.mrf.mxu0 }
 0x22c   : > { %v1343_v9 = vpop.f32.mrf.mxu3  ;;  %v1570_v20 = vadd.f32 %v1569_v60, %v1456_v56  ;;  %v1555_v56 = vadd.f32 %v9756_v40, %v1441_v8  ;;  %v1036_v60 = vld [vmem:[#allocation2 + $0x160] sm:$0xff] }
 0x22d   : > { %v1344_v4 = vadd.f32 %v1343_v9, %v1230_v7  ;;  %v1326_v9 = vadd.f32 %v9754_v32, %v9750_v46  ;;  %v1549_v7 = vadd.f32 %v9740_v27, %v9744_v12  ;;  %v993_v27 = vld [vmem:[#allocation2 + $0x8] sm:$0xff]  ;;  %v14956_v12 = vld [vmem:[#allocation85_spill] sm:$0xff]  ;;  %v995_v32 = vld [vmem:[#allocation2 + $0x18] sm:$0xff] }
 0x22e   : > { %1918 = vmatpush.msra.mxu1 %v1570_v20  ;;  %1631 = vmatmul.f32.gmra.mxu2 %v1016_v48  ;;  %v1320_v20 = vadd.f32 %v9738_v26, %v9734_v34  ;;  %v1024_v46 = vld [vmem:[#allocation2 + $0x100] sm:$0xff] }
 0x22f   : > { %1692 = vmatpush.msra.mxu3 %v1344_v4  ;;  %1857 = vmatmul.f32.gmra.mxu0 %v1016_v48  ;;  %v1552_v48 = vadd.f32 %v9748_v13, %v9752_v63 }
 0x230   : > { %1919 = vmatpush.msra.mxu1 %v1567_v33  ;;  %v1020_v33 = vld [vmem:[#allocation2 + $0xe0] sm:$0xff] }
 0x231   : > { %1693 = vmatpush.msra.mxu3 %v1341_v16  ;;  %v1323_v16 = vadd.f32 %v9746_v45, %v9742_v42  ;;  %v14955_v42 = vld [vmem:[#allocation83_spill] sm:$0xff] }
 0x232   : > { %1920 = vmatpush.msra.mxu1 %v1564_v50  ;;  %v1299_v45 = vadd.f32 %v14956_v12, %v14955_v42  ;;  %v1007_v50 = vld [vmem:[#allocation2 + $0x78] sm:$0xff]  ;;  %v1017_v42 = vld [vmem:[#allocation2 + $0xc8] sm:$0xff]  ;;  %v2172_v12 = vld [vmem:[#allocation5 + $0x260] sm:$0xff] }
 0x233   : > { %1694 = vmatpush.msra.mxu3 %v1338_v3  ;;  %v1546_v3 = vadd.f32 %v9732_v19, %v9736_v35  ;;  %v1537_v19 = vadd.f32 %v9708_v17, %v9712_v37  ;;  %v14947_v17 = vld [vmem:[#allocation91_spill] sm:$0xff]  ;;  %v14948_v37 = vld [vmem:[#allocation93_spill] sm:$0xff] }
 0x234   : > { %1921 = vmatpush.msra.mxu1 %v1561_v49  ;;  %v1314_v49 = vadd.f32 %v9722_v31, %v9718_v30  ;;  %v14946_v30 = vld [vmem:[#allocation90_spill] sm:$0xff] }
 0x235   : > { %1695 = vmatpush.msra.mxu3 %v1335_v52  ;;  %v1038_v52 = vld [vmem:[#allocation2 + $0x170] sm:$0xff] }
 0x236   : > { %1922 = vmatpush.msra.mxu1 %v1558_v25  ;;  %1634 = vmatmul.f32.gmra.mxu2 %v1018_v11  ;;  %v1543_v25 = vadd.f32 %v9724_v38, %v9728_v1  ;;  %v1311_v38 = vadd.f32 %v9714_v22, %v9710_v29  ;;  %v1022_v1 = vld [vmem:[#allocation2 + $0xf0] sm:$0xff]  ;;  %v14949_v29 = vld [vmem:[#allocation88_spill] sm:$0xff]  ;;  %v14950_v22 = vld [vmem:[#allocation86_spill] sm:$0xff] }
 0x237   : > { %1696 = vmatpush.msra.mxu3 %v1332_v21  ;;  %1860 = vmatmul.f32.gmra.mxu0 %v1018_v11  ;;  %v1317_v11 = vadd.f32 %v9730_v18, %v9726_v51  ;;  %v1540_v21 = vadd.f32 %v9716_v23, %v9720_v39  ;;  %v1534_v51 = vadd.f32 %v9690_v47, %v9703_v14  ;;  %v14945_v39 = vld [vmem:[#allocation92_spill] sm:$0xff]  ;;  %v14951_v47 = vld [vmem:[#allocation87_spill] sm:$0xff]  ;;  %v14952_v14 = vld [vmem:[#allocation89_spill] sm:$0xff] }
 0x238   : > { %1923 = vmatpush.msra.mxu1 %v1555_v56  ;;  %v1308_v23 = vadd.f32 %v9705_v54, %v9701_v5  ;;  %v1531_v31 = vadd.f32 %v14946_v30, %v14945_v39  ;;  %v1305_v18 = vadd.f32 %v14948_v37, %v14947_v17  ;;  %v1528_v34 = vadd.f32 %v14950_v22, %v14949_v29  ;;  %v14953_v5 = vld [vmem:[#allocation84_spill] sm:$0xff]  ;;  %v14954_v54 = vld [vmem:[#allocation82_spill] sm:$0xff]  ;;  %v2184_v39 = vld [vmem:[#allocation5 + $0x2c0] sm:$0xff] }
 0x239   : > { %1697 = vmatpush.msra.mxu3 %v1329_v10  ;;  %v1302_v35 = vadd.f32 %v14952_v14, %v14951_v47  ;;  %v1525_v26 = vadd.f32 %v14954_v54, %v14953_v5  ;;  %v2185_v30 = vld [vmem:[#allocation5 + $0x2c8] sm:$0xff]  ;;  %v2183_v17 = vld [vmem:[#allocation5 + $0x2b8] sm:$0xff]  ;;  %v2180_v37 = vld [vmem:[#allocation5 + $0x2a0] sm:$0xff] }
 0x23a   : > { %1924 = vmatpush.msra.mxu1 %v1552_v48  ;;  %v1009_v48 = vld [vmem:[#allocation2 + $0x88] sm:$0xff]  ;;  %v1015_v29 = vld [vmem:[#allocation2 + $0xb8] sm:$0xff]  ;;  %v2178_v22 = vld [vmem:[#allocation5 + $0x290] sm:$0xff] }
 0x23b   : > { %1698 = vmatpush.msra.mxu3 %v1326_v9  ;;  %v1040_v9 = vld [vmem:[#allocation2 + $0x180] sm:$0xff]  ;;  %v1046_v47 = vld [vmem:[#allocation2 + $0x1b0] sm:$0xff]  ;;  %v2177_v54 = vld [vmem:[#allocation5 + $0x288] sm:$0xff] }
 0x23c   : > { %1925 = vmatpush.msra.mxu1 %v1549_v7  ;;  %v2176_v5 = vld [vmem:[#allocation5 + $0x280] sm:$0xff] }
 0x23d   : > { %1699 = vmatpush.msra.mxu3 %v1323_v16 }
 0x23e   : > { %1926 = vmatpush.msra.mxu1 %v1546_v3  ;;  %1637 = vmatmul.f32.gmra.mxu2 %v1020_v33  ;;  %v1042_v3 = vld [vmem:[#allocation2 + $0x190] sm:$0xff] }
 0x23f   : > { %1700 = vmatpush.msra.mxu3 %v1320_v20  ;;  %1863 = vmatmul.f32.gmra.mxu0 %v1020_v33  ;;  %v1011_v33 = vld [vmem:[#allocation2 + $0x98] sm:$0xff]  ;;  %v2190_v20 = vld [vmem:[#allocation5 + $0x2f0] sm:$0xff] }
 0x240   : > { %1927 = vmatpush.msra.mxu1 %v1543_v25  ;;  %v2191_v25 = vld [vmem:[#allocation5 + $0x2f8] sm:$0xff]  ;;  %2224 = vmatpush.msrb.mxu2 %v2190_v20  ;;  %v1052_v20 = vld [vmem:[#allocation2 + $0x1e0] sm:$0xff] }
 0x241   : > { %1701 = vmatpush.msra.mxu3 %v1317_v11  ;;  %v2188_v11 = vld [vmem:[#allocation5 + $0x2e0] sm:$0xff]  ;;  %2450 = vmatpush.msrb.mxu0 %v2191_v25  ;;  %v2161_v25 = vld [vmem:[#allocation5 + $0x208] sm:$0xff] }
 0x242   : > { %1928 = vmatpush.msra.mxu1 %v1540_v21  ;;  %v2189_v21 = vld [vmem:[#allocation5 + $0x2e8] sm:$0xff]  ;;  %2225 = vmatpush.msrb.mxu2 %v2188_v11 }
 0x243   : > { %1702 = vmatpush.msra.mxu3 %v1314_v49  ;;  %v2186_v49 = vld [vmem:[#allocation5 + $0x2d0] sm:$0xff]  ;;  %2451 = vmatpush.msrb.mxu0 %v2189_v21 }
 0x244   : > { %1929 = vmatpush.msra.mxu1 %v1537_v19  ;;  %2226 = vmatpush.msrb.mxu2 %v2186_v49  ;;  %v1023_v49 = vld [vmem:[#allocation2 + $0xf8] sm:$0xff] }
 0x245   : > { %1703 = vmatpush.msra.mxu3 %v1311_v38  ;;  %v2187_v38 = vld [vmem:[#allocation5 + $0x2d8] sm:$0xff] }
 0x246   : > { %1930 = vmatpush.msra.mxu1 %v1534_v51  ;;  %1640 = vmatmul.f32.gmra.mxu2 %v1022_v1  ;;  %v1013_v51 = vld [vmem:[#allocation2 + $0xa8] sm:$0xff] }
 0x247   : > { %1704 = vmatpush.msra.mxu3 %v1308_v23  ;;  %1866 = vmatmul.f32.gmra.mxu0 %v1022_v1  ;;  %v1044_v23 = vld [vmem:[#allocation2 + $0x1a0] sm:$0xff] }
 0x248   : > { %1931 = vmatpush.msra.mxu1 %v1531_v31  ;;  %2452 = vmatpush.msrb.mxu0 %v2187_v38  ;;  %v2182_v31 = vld [vmem:[#allocation5 + $0x2b0] sm:$0xff] }
 0x249   : > { %1705 = vmatpush.msra.mxu3 %v1305_v18  ;;  %2227 = vmatpush.msrb.mxu2 %v2184_v39  ;;  %v2181_v18 = vld [vmem:[#allocation5 + $0x2a8] sm:$0xff]  ;;  %v1054_v38 = vld [vmem:[#allocation2 + $0x1f0] sm:$0xff] }
 0x24a   : > { %1932 = vmatpush.msra.mxu1 %v1528_v34  ;;  %2453 = vmatpush.msrb.mxu0 %v2185_v30  ;;  %v1025_v30 = vld [vmem:[#allocation2 + $0x108] sm:$0xff] }
 0x24b   : > { %1706 = vmatpush.msra.mxu3 %v1302_v35  ;;  %v9802_v13 = vpop.f32.mrf.mxu0  ;;  %2228 = vmatpush.msrb.mxu2 %v2182_v31  ;;  %v2179_v35 = vld [vmem:[#allocation5 + $0x298] sm:$0xff] }
 0x24c   : > { %1933 = vmatpush.msra.mxu1 %v1525_v26  ;;  %2454 = vmatpush.msrb.mxu0 %v2183_v17  ;;  %v2174_v26 = vld [vmem:[#allocation5 + $0x270] sm:$0xff] }
 0x24d   : > { %1707 = vmatpush.msra.mxu3 %v1299_v45  ;;  %1934 = vmatmul.f32.vlgmr.msra.gmra.mxu1 %v993_v27  ;;  %v1048_v45 = vld [vmem:[#allocation2 + $0x1c0] sm:$0xff] }
 0x24e   : > { %1708 = vmatmul.f32.vlgmr.msra.gmra.mxu3 %v993_v27  ;;  %1643 = vmatmul.f32.gmra.mxu2 %v1024_v46  ;;  %v2175_v27 = vld [vmem:[#allocation5 + $0x278] sm:$0xff] }
 0x24f   : > { %1869 = vmatmul.f32.gmra.mxu0 %v1024_v46  ;;  %2229 = vmatpush.msrb.mxu2 %v2180_v37  ;;  %v2170_v46 = vld [vmem:[#allocation5 + $0x250] sm:$0xff] }
 0x250   : > { %2455 = vmatpush.msrb.mxu0 %v2181_v18 }
 0x251   : > { %v9804_v63 = vpop.f32.mrf.mxu2  ;;  %2230 = vmatpush.msrb.mxu2 %v2178_v22 }
 0x252   : > { %2456 = vmatpush.msrb.mxu0 %v2179_v35  ;;  %v14957_v35 = vld [vmem:[#allocation15_spill] sm:$0xff] }
 0x253   : > { %v9806_v40 = vpop.f32.mrf.mxu0  ;;  %2231 = vmatpush.msrb.mxu2 %v2176_v5 }
 0x254   : > { %2457 = vmatpush.msrb.mxu0 %v2177_v54 }
 0x255   : > { %1937 = vmatmul.f32.gmra.mxu1 %v995_v32  ;;  %2232 = vmatpush.msrb.mxu2 %v2174_v26 }
 0x256   : > { %1711 = vmatmul.f32.gmra.mxu3 %v995_v32  ;;  %1646 = vmatmul.f32.gmra.mxu2 %v1026_v41 }
 0x257   : > { %1872 = vmatmul.f32.gmra.mxu0 %v1026_v41  ;;  %2233 = vmatpush.msrb.mxu2 %v2172_v12  ;;  %v2173_v41 = vld [vmem:[#allocation5 + $0x268] sm:$0xff] }
 0x258   : > { %2458 = vmatpush.msrb.mxu0 %v2175_v27 }
 0x259   : > { %v9808_v8 = vpop.f32.mrf.mxu2  ;;  %2234 = vmatpush.msrb.mxu2 %v2170_v46  ;;  %v1029_v46 = vld [vmem:[#allocation2 + $0x128] sm:$0xff] }
 0x25a   : > { %2459 = vmatpush.msrb.mxu0 %v2173_v41  ;;  %v14959_v41 = vld [vmem:[#allocation17_spill] sm:$0xff] }
 0x25b   : > { %v9810_v59 = vpop.f32.mrf.mxu0 }
 0x25d   : > { %1940 = vmatmul.f32.gmra.mxu1 %v997_v53 }
 0x25e   : > { %1714 = vmatmul.f32.gmra.mxu3 %v997_v53  ;;  %1649 = vmatmul.f32.gmra.mxu2 %v1028_v36 }
 0x25f   : > { %1875 = vmatmul.f32.gmra.mxu0 %v1028_v36  ;;  %v2168_v36 = vld [vmem:[#allocation5 + $0x240] sm:$0xff] }
 0x260   : > { %2235 = vmatpush.msrb.mxu2 %v2168_v36 }
 0x261   : > { %v9812_v28 = vpop.f32.mrf.mxu2 }
 0x263   : > { %v9814_v62 = vpop.f32.mrf.mxu0 }
 0x265   : > { %1943 = vmatmul.f32.gmra.mxu1 %v999_v15 }
 0x266   : > { %1717 = vmatmul.f32.gmra.mxu3 %v999_v15  ;;  %1652 = vmatmul.f32.gmra.mxu2 %v1030_v57  ;;  %v2171_v15 = vld [vmem:[#allocation5 + $0x258] sm:$0xff] }
 0x267   : > { %1878 = vmatmul.f32.gmra.mxu0 %v1030_v57  ;;  %v2166_v57 = vld [vmem:[#allocation5 + $0x230] sm:$0xff] }
 0x268   : > { %2236 = vmatpush.msrb.mxu2 %v2166_v57  ;;  %2460 = vmatpush.msrb.mxu0 %v2171_v15 }
 0x269   : > { %v9816_v6 = vpop.f32.mrf.mxu2 }
 0x26b   : > { %v9818_v61 = vpop.f32.mrf.mxu0 }
 0x26d   : > { %1946 = vmatmul.f32.gmra.mxu1 %v1001_v55 }
 0x26e   : > { %1720 = vmatmul.f32.gmra.mxu3 %v1001_v55  ;;  %1655 = vmatmul.f32.gmra.mxu2 %v1032_v0  ;;  %v2169_v55 = vld [vmem:[#allocation5 + $0x248] sm:$0xff] }
 0x26f   : > { %1881 = vmatmul.f32.gmra.mxu0 %v1032_v0  ;;  %v1019_v0 = vld [vmem:[#allocation2 + $0xd8] sm:$0xff] }
 0x270   : > { %2461 = vmatpush.msrb.mxu0 %v2169_v55 }
 0x271   : > { %v9820_v2 = vpop.f32.mrf.mxu2 }
 0x273   : > { %v9822_v24 = vpop.f32.mrf.mxu0 }
 0x275   : > { %1949 = vmatmul.f32.gmra.mxu1 %v1003_v44 }
 0x276   : > { %1723 = vmatmul.f32.gmra.mxu3 %v1003_v44  ;;  %1658 = vmatmul.f32.gmra.mxu2 %v1034_v58  ;;  %v2164_v44 = vld [vmem:[#allocation5 + $0x220] sm:$0xff] }
 0x277   : > { %1884 = vmatmul.f32.gmra.mxu0 %v1034_v58  ;;  %v1050_v58 = vld [vmem:[#allocation2 + $0x1d0] sm:$0xff]  ;;  %2237 = vmatpush.msrb.mxu2 %v2164_v44 }
 0x279   : > { %v9824_v4 = vpop.f32.mrf.mxu2 }
 0x27b   : > { %v9826_v56 = vpop.f32.mrf.mxu0 }
 0x27d   : > { %1952 = vmatmul.f32.gmra.mxu1 %v1005_v43 }
 0x27e   : > { %1726 = vmatmul.f32.gmra.mxu3 %v1005_v43  ;;  %1661 = vmatmul.f32.gmra.mxu2 %v1036_v60  ;;  %v2162_v43 = vld [vmem:[#allocation5 + $0x210] sm:$0xff] }
 0x27f   : > { %1887 = vmatmul.f32.gmra.mxu0 %v1036_v60  ;;  %v2167_v60 = vld [vmem:[#allocation5 + $0x238] sm:$0xff]  ;;  %2238 = vmatpush.msrb.mxu2 %v2162_v43 }
 0x280   : > { %2462 = vmatpush.msrb.mxu0 %v2167_v60  ;;  %v1031_v43 = vld [vmem:[#allocation2 + $0x138] sm:$0xff]  ;;  %v14961_v60 = vld [vmem:[#allocation19_spill] sm:$0xff] }
 0x281   : > { %v9828_v10 = vpop.f32.mrf.mxu2 }
 0x283   : > { %v9830_v7 = vpop.f32.mrf.mxu0 }
 0x285   : > { %1955 = vmatmul.f32.gmra.mxu1 %v1007_v50 }
 0x286   : > { %1729 = vmatmul.f32.gmra.mxu3 %v1007_v50  ;;  %1664 = vmatmul.f32.gmra.mxu2 %v1038_v52  ;;  %v2160_v50 = vld [vmem:[#allocation5 + $0x200] sm:$0xff] }
 0x287   : > { %1890 = vmatmul.f32.gmra.mxu0 %v1038_v52  ;;  %2239 = vmatpush.msrb.mxu2 %v2160_v50 }
 0x289   : > { %v9832_v16 = vpop.f32.mrf.mxu2 }
 0x28b   : > { %v9834_v19 = vpop.f32.mrf.mxu0 }
 0x28d   : > { %1958 = vmatmul.f32.gmra.mxu1 %v1009_v48 }
 0x28e   : > { %1732 = vmatmul.f32.gmra.mxu3 %v1009_v48  ;;  %1667 = vmatmul.f32.gmra.mxu2 %v1040_v9  ;;  %v2165_v48 = vld [vmem:[#allocation5 + $0x228] sm:$0xff] }
 0x28f   : > { %1893 = vmatmul.f32.gmra.mxu0 %v1040_v9 }
 0x290   : > { %2463 = vmatpush.msrb.mxu0 %v2165_v48 }
 0x291   : > { %v9836_v1 = vpop.f32.mrf.mxu2 }
 0x293   : > { %v9838_v34 = vpop.f32.mrf.mxu0 }
 0x295   : > { %1961 = vmatmul.f32.gmra.mxu1 %v1011_v33 }
 0x296   : > { %1735 = vmatmul.f32.gmra.mxu3 %v1011_v33  ;;  %1670 = vmatmul.f32.gmra.mxu2 %v1042_v3  ;;  %v2163_v33 = vld [vmem:[#allocation5 + $0x218] sm:$0xff] }
 0x297   : > { %1896 = vmatmul.f32.gmra.mxu0 %v1042_v3  ;;  %v1021_v3 = vld [vmem:[#allocation2 + $0xe8] sm:$0xff] }
 0x298   : > { %2464 = vmatpush.msrb.mxu0 %v2163_v33 }
 0x299   : > { %v9840_v14 = vpop.f32.mrf.mxu2 }
 0x29a   : > { %2465 = vmatpush.msrb.mxu0 %v2161_v25 }
 0x29b   : > { %v9842_v32 = vpop.f32.mrf.mxu0 }
 0x29d   : > { %1964 = vmatmul.f32.gmra.mxu1 %v1013_v51 }
 0x29e   : > { %1738 = vmatmul.f32.gmra.mxu3 %v1013_v51  ;;  %1673 = vmatmul.f32.gmra.mxu2 %v1044_v23  ;;  %v9854_v51 = vld [vmem:[#allocation8 + $0x1] ss:$8 sm:$0x3] }
 0x29f   : > { %1899 = vmatmul.f32.gmra.mxu0 %v1044_v23  ;;  %v9857_v23 = vperm.slane %v9854_v51, 0 }
 0x2a1   : > { %v9844_v53 = vpop.f32.mrf.mxu2  ;;  %v1597_v37 = vadd.f32 %v9804_v63, %v9857_v23  ;;  %v1600_v26 = vadd.f32 %v9808_v8, %v9857_v23  ;;  %v1603_v8 = vadd.f32 %v9812_v28, %v9857_v23  ;;  %v1606_v28 = vadd.f32 %v9816_v6, %v9857_v23 }
 0x2a2   : > { %v1609_v6 = vadd.f32 %v9820_v2, %v9857_v23  ;;  %v1612_v2 = vadd.f32 %v9824_v4, %v9857_v23  ;;  %v1615_v4 = vadd.f32 %v9828_v10, %v9857_v23  ;;  %v1618_v10 = vadd.f32 %v9832_v16, %v9857_v23 }
 0x2a3   : > { %v9846_v52 = vpop.f32.mrf.mxu0  ;;  %v1621_v16 = vadd.f32 %v9836_v1, %v9857_v23 }
 0x2a5   : > { %1967 = vmatmul.f32.gmra.mxu1 %v1015_v29 }
 0x2a6   : > { %1741 = vmatmul.f32.gmra.mxu3 %v1015_v29  ;;  %1676 = vmatmul.f32.gmra.mxu2 %v1046_v47 }
 0x2a7   : > { %1902 = vmatmul.f32.gmra.mxu0 %v1046_v47  ;;  %v1027_v47 = vld [vmem:[#allocation2 + $0x118] sm:$0xff] }
 0x2a9   : > { %v9848_v9 = vpop.f32.mrf.mxu2 }
 0x2ac   : > { %v9850_v11 = vpop.f32.mrf.mxu0 }
 0x2ad   : > { %1970 = vmatmul.f32.gmra.mxu1 %v1017_v42 }
 0x2ae   : > { %1744 = vmatmul.f32.gmra.mxu3 %v1017_v42  ;;  %1679 = vmatmul.f32.gmra.mxu2 %v1048_v45 }
 0x2af   : > { %1905 = vmatmul.f32.gmra.mxu0 %v1048_v45 }
 0x2b1   : > { %v9852_v21 = vpop.f32.mrf.mxu2 }
 0x2b4   : > { %v9861_v31 = vpop.f32.mrf.mxu0 }
 0x2b5   : > { %1973 = vmatmul.f32.gmra.mxu1 %v1019_v0 }
 0x2b6   : > { %1747 = vmatmul.f32.gmra.mxu3 %v1019_v0  ;;  %1682 = vmatmul.f32.gmra.mxu2 %v1050_v58 }
 0x2b7   : > { %1908 = vmatmul.f32.gmra.mxu0 %v1050_v58 }
 0x2b9   : > { %v9863_v17 = vpop.f32.mrf.mxu2 }
 0x2bc   : > { %v9870_v54 = vpop.f32.mrf.mxu0 }
 0x2bd   : > { %1976 = vmatmul.f32.gmra.mxu1 %v1021_v3 }
 0x2be   : > { %1750 = vmatmul.f32.gmra.mxu3 %v1021_v3  ;;  %1685 = vmatmul.f32.gmra.mxu2 %v1052_v20 }
 0x2bf   : > { %1911 = vmatmul.f32.gmra.mxu0 %v1052_v20 }
 0x2c1   : > { %v9874_v27 = vpop.f32.mrf.mxu2 }
 0x2c4   : > { %v9887_v57 = vpop.f32.mrf.mxu0 }
 0x2c5   : > { %1979 = vmatmul.f32.gmra.mxu1 %v1023_v49 }
 0x2c6   : > { %1753 = vmatmul.f32.gmra.mxu3 %v1023_v49  ;;  %1688 = vmatmul.f32.gmra.mxu2 %v1054_v38 }
 0x2c7   : > { %1914 = vmatmul.f32.gmra.mxu0 %v1054_v38  ;;  %v1033_v38 = vld [vmem:[#allocation2 + $0x148] sm:$0xff] }
 0x2c9   : > { %v9889_v55 = vpop.f32.mrf.mxu2 }
 0x2ca   : > { %v9859_v39 = vpop.f32.mrf.mxu1 }
 0x2cc   : > { %v9902_v33 = vpop.f32.mrf.mxu0 }
 0x2cd   : > { %1982 = vmatmul.f32.gmra.mxu1 %v1025_v30 }
 0x2ce   : > { %1756 = vmatmul.f32.gmra.mxu3 %v1025_v30  ;;  %v14963_v30 = vld [vmem:[#allocation21_spill] sm:$0xff] }
 0x2d1   : > { %v1709_v18 = vpop.f32.mrf.mxu3  ;;  %v9904_v20 = vpop.f32.mrf.mxu2 }
 0x2d2   : > { %v1710_v29 = vadd.f32 %v1709_v18, %v1597_v37  ;;  %v9867_v22 = vpop.f32.mrf.mxu1 }
 0x2d4   : > { %v2031_v5 = vadd.f32 %v1710_v29, %v14957_v35 }
 0x2d5   : > { %1985 = vmatmul.f32.gmra.mxu1 %v1027_v47 }
 0x2d6   : > { %v9876_v42 = vmax.f32 %v2031_v5, 0.0  ;;  %1759 = vmatmul.f32.gmra.mxu3 %v1027_v47  ;;  %v1035_v5 = vld [vmem:[#allocation2 + $0x158] sm:$0xff] }
 0x2d8   : > { %14958 = vst [vmem:[#allocation49_spill] sm:$0xff] %v9876_v42  ;;  %2240 = vmatmul.f32.vlgmr.msrb.gmra.mxu2 %v9876_v42  ;;  %2466 = vmatmul.f32.vlgmr.msrb.gmra.mxu0 %v9876_v42  ;;  %v1055_v42 = vld [vmem:[#allocation2 + $0x1f8] sm:$0xff] }
 0x2d9   : > { %v1712_v63 = vpop.f32.mrf.mxu3 }
 0x2da   : > { %v1713_v12 = vadd.f32 %v1712_v63, %v1600_v26  ;;  %v9880_v45 = vpop.f32.mrf.mxu1  ;;  %v9917_v26 = vpop.f32.mrf.mxu0 }
 0x2db   : > { %v9919_v63 = vpop.f32.mrf.mxu2 }
 0x2dc   : > { %v2033_v36 = vadd.f32 %v1713_v12, %v14959_v41  ;;  %v14965_v12 = vld [vmem:[#allocation23_spill] sm:$0xff] }
 0x2dd   : > { %1988 = vmatmul.f32.gmra.mxu1 %v1029_v46 }
 0x2de   : > { %1762 = vmatmul.f32.gmra.mxu3 %v1029_v46  ;;  %v9885_v15 = vmax.f32 %v2033_v36, 0.0 }
 0x2e0   : > { %14960 = vst [vmem:[#allocation53_spill] sm:$0xff] %v9885_v15  ;;  %2243 = vmatmul.f32.gmra.mxu2 %v9885_v15  ;;  %2469 = vmatmul.f32.gmra.mxu0 %v9885_v15 }
 0x2e1   : > { %v1715_v0 = vpop.f32.mrf.mxu3 }
 0x2e2   : > { %v1716_v44 = vadd.f32 %v1715_v0, %v1603_v8  ;;  %v9893_v58 = vpop.f32.mrf.mxu1 }
 0x2e4   : > { %v2035_v50 = vadd.f32 %v1716_v44, %v14961_v60  ;;  %v1037_v44 = vld [vmem:[#allocation2 + $0x168] sm:$0xff] }
 0x2e5   : > { %1991 = vmatmul.f32.gmra.mxu1 %v1031_v43 }
 0x2e6   : > { %1765 = vmatmul.f32.gmra.mxu3 %v1031_v43  ;;  %v9898_v48 = vmax.f32 %v2035_v50, 0.0  ;;  %v14967_v43 = vld [vmem:[#allocation25_spill] sm:$0xff]  ;;  %v9931_v50 = vpop.f32.mrf.mxu0 }
 0x2e8   : > { %14962 = vst [vmem:[#allocation50_spill] sm:$0xff] %v9898_v48  ;;  %2246 = vmatmul.f32.gmra.mxu2 %v9898_v48  ;;  %2472 = vmatmul.f32.gmra.mxu0 %v9898_v48 }
 0x2e9   : > { %v1718_v3 = vpop.f32.mrf.mxu3 }
 0x2ea   : > { %v1719_v25 = vadd.f32 %v1718_v3, %v1606_v28  ;;  %v9906_v49 = vpop.f32.mrf.mxu1  ;;  %v9935_v28 = vpop.f32.mrf.mxu2 }
 0x2ec   : > { %v2037_v37 = vadd.f32 %v1719_v25, %v14963_v30 }
 0x2ed   : > { %1994 = vmatmul.f32.gmra.mxu1 %v1033_v38 }
 0x2ee   : > { %1768 = vmatmul.f32.gmra.mxu3 %v1033_v38  ;;  %v9911_v18 = vmax.f32 %v2037_v37, 0.0  ;;  %v1039_v37 = vld [vmem:[#allocation2 + $0x178] sm:$0xff] }
 0x2f0   : > { %14964 = vst [vmem:[#allocation92_spill] sm:$0xff] %v9911_v18  ;;  %2249 = vmatmul.f32.gmra.mxu2 %v9911_v18  ;;  %2475 = vmatmul.f32.gmra.mxu0 %v9911_v18 }
 0x2f1   : > { %v1721_v29 = vpop.f32.mrf.mxu3 }
 0x2f2   : > { %v1722_v47 = vadd.f32 %v1721_v29, %v1609_v6  ;;  %v9915_v35 = vpop.f32.mrf.mxu1  ;;  %v14969_v6 = vld [vmem:[#allocation27_spill] sm:$0xff] }
 0x2f4   : > { %v2039_v46 = vadd.f32 %v1722_v47, %v14965_v12  ;;  %v9950_v12 = vpop.f32.mrf.mxu2 }
 0x2f5   : > { %1997 = vmatmul.f32.gmra.mxu1 %v1035_v5 }
 0x2f6   : > { %1771 = vmatmul.f32.gmra.mxu3 %v1035_v5  ;;  %v9924_v41 = vmax.f32 %v2039_v46, 0.0  ;;  %v9948_v5 = vpop.f32.mrf.mxu0 }
 0x2f8   : > { %14966 = vst [vmem:[#allocation90_spill] sm:$0xff] %v9924_v41  ;;  %2252 = vmatmul.f32.gmra.mxu2 %v9924_v41  ;;  %2478 = vmatmul.f32.gmra.mxu0 %v9924_v41 }
 0x2f9   : > { %v1724_v36 = vpop.f32.mrf.mxu3 }
 0x2fa   : > { %v1725_v8 = vadd.f32 %v1724_v36, %v1612_v2  ;;  %v9928_v0 = vpop.f32.mrf.mxu1 }
 0x2fc   : > { %v2041_v60 = vadd.f32 %v1725_v8, %v14967_v43  ;;  %v1041_v8 = vld [vmem:[#allocation2 + $0x188] sm:$0xff] }
 0x2fd   : > { %2000 = vmatmul.f32.gmra.mxu1 %v1037_v44 }
 0x2fe   : > { %1774 = vmatmul.f32.gmra.mxu3 %v1037_v44  ;;  %v9937_v3 = vmax.f32 %v2041_v60, 0.0  ;;  %v14971_v44 = vld [vmem:[#allocation29_spill] sm:$0xff] }
 0x300   : > { %14968 = vst [vmem:[#allocation91_spill] sm:$0xff] %v9937_v3  ;;  %2255 = vmatmul.f32.gmra.mxu2 %v9937_v3  ;;  %2481 = vmatmul.f32.gmra.mxu0 %v9937_v3 }
 0x301   : > { %v1727_v25 = vpop.f32.mrf.mxu3 }
 0x302   : > { %v1728_v38 = vadd.f32 %v1727_v25, %v1615_v4  ;;  %v9941_v30 = vpop.f32.mrf.mxu1  ;;  %v2222_v4 = vld [vmem:[#allocation5 + $0x3f0] sm:$0xff]  ;;  %v2223_v25 = vld [vmem:[#allocation5 + $0x3f8] sm:$0xff] }
 0x303   : > { %2337 = vmatpush.msrb.mxu3 %v2222_v4  ;;  %2563 = vmatpush.msrb.mxu1 %v2223_v25  ;;  %v2216_v25 = vld [vmem:[#allocation5 + $0x3c0] sm:$0xff] }
 0x304   : > { %v2043_v29 = vadd.f32 %v1728_v38, %v14969_v6  ;;  %v2220_v38 = vld [vmem:[#allocation5 + $0x3e0] sm:$0xff]  ;;  %v9963_v6 = vpop.f32.mrf.mxu0 }
 0x305   : > { %2003 = vmatmul.f32.gmra.mxu1 %v1039_v37  ;;  %2338 = vmatpush.msrb.mxu3 %v2220_v38  ;;  %v1624_v38 = vadd.f32 %v9840_v14, %v9857_v23  ;;  %v1045_v14 = vld [vmem:[#allocation2 + $0x1a8] sm:$0xff] }
 0x306   : > { %1777 = vmatmul.f32.gmra.mxu3 %v1039_v37  ;;  %v9946_v47 = vmax.f32 %v2043_v29, 0.0  ;;  %v2221_v37 = vld [vmem:[#allocation5 + $0x3e8] sm:$0xff] }
 0x307   : > { %2564 = vmatpush.msrb.mxu1 %v2221_v37 }
 0x308   : > { %14970 = vst [vmem:[#allocation93_spill] sm:$0xff] %v9946_v47  ;;  %2258 = vmatmul.f32.gmra.mxu2 %v9946_v47  ;;  %2484 = vmatmul.f32.gmra.mxu0 %v9946_v47  ;;  %v14975_v47 = vld [vmem:[#allocation33_spill] sm:$0xff] }
 0x309   : > { %v1730_v46 = vpop.f32.mrf.mxu3 }
 0x30a   : > { %v1731_v2 = vadd.f32 %v1730_v46, %v1618_v10  ;;  %v9954_v36 = vpop.f32.mrf.mxu1  ;;  %v9965_v10 = vpop.f32.mrf.mxu2 }
 0x30c   : > { %v2045_v43 = vadd.f32 %v1731_v2, %v14971_v44  ;;  %v1043_v2 = vld [vmem:[#allocation2 + $0x198] sm:$0xff] }
 0x30d   : > { %2006 = vmatmul.f32.gmra.mxu1 %v1041_v8  ;;  %v2219_v44 = vld [vmem:[#allocation5 + $0x3d8] sm:$0xff] }
 0x30e   : > { %1780 = vmatmul.f32.gmra.mxu3 %v1041_v8  ;;  %v9959_v60 = vmax.f32 %v2045_v43, 0.0  ;;  %v2218_v8 = vld [vmem:[#allocation5 + $0x3d0] sm:$0xff]  ;;  %2565 = vmatpush.msrb.mxu1 %v2219_v44 }
 0x30f   : > { %2339 = vmatpush.msrb.mxu3 %v2218_v8  ;;  %v14973_v43 = vld [vmem:[#allocation31_spill] sm:$0xff]  ;;  %v2212_v8 = vld [vmem:[#allocation5 + $0x3a0] sm:$0xff] }
 0x310   : > { %14972 = vst [vmem:[#allocation88_spill] sm:$0xff] %v9959_v60  ;;  %2261 = vmatmul.f32.gmra.mxu2 %v9959_v60  ;;  %2487 = vmatmul.f32.gmra.mxu0 %v9959_v60  ;;  %v2217_v60 = vld [vmem:[#allocation5 + $0x3c8] sm:$0xff] }
 0x311   : > { %v1733_v29 = vpop.f32.mrf.mxu3  ;;  %2340 = vmatpush.msrb.mxu3 %v2216_v25  ;;  %2566 = vmatpush.msrb.mxu1 %v2217_v60  ;;  %v2211_v60 = vld [vmem:[#allocation5 + $0x398] sm:$0xff] }
 0x312   : > { %v1734_v1 = vadd.f32 %v1733_v29, %v1621_v16  ;;  %v9967_v46 = vpop.f32.mrf.mxu1  ;;  %v2214_v16 = vld [vmem:[#allocation5 + $0x3b0] sm:$0xff]  ;;  %v2215_v29 = vld [vmem:[#allocation5 + $0x3b8] sm:$0xff] }
 0x313   : > { %2341 = vmatpush.msrb.mxu3 %v2214_v16  ;;  %2567 = vmatpush.msrb.mxu1 %v2215_v29  ;;  %v9980_v16 = vpop.f32.mrf.mxu2  ;;  %v1627_v29 = vadd.f32 %v9844_v53, %v9857_v23  ;;  %v1047_v53 = vld [vmem:[#allocation2 + $0x1b8] sm:$0xff] }
 0x314   : > { %v2047_v4 = vadd.f32 %v1734_v1, %v14973_v43  ;;  %v2213_v1 = vld [vmem:[#allocation5 + $0x3a8] sm:$0xff] }
 0x315   : > { %2009 = vmatmul.f32.gmra.mxu1 %v1043_v2  ;;  %2342 = vmatpush.msrb.mxu3 %v2212_v8  ;;  %v2209_v8 = vld [vmem:[#allocation5 + $0x388] sm:$0xff] }
 0x316   : > { %1783 = vmatmul.f32.gmra.mxu3 %v1043_v2  ;;  %v9972_v37 = vmax.f32 %v2047_v4, 0.0  ;;  %v2210_v2 = vld [vmem:[#allocation5 + $0x390] sm:$0xff]  ;;  %v9978_v4 = vpop.f32.mrf.mxu0  ;;  %2568 = vmatpush.msrb.mxu1 %v2213_v1  ;;  %v2207_v1 = vld [vmem:[#allocation5 + $0x378] sm:$0xff] }
 0x317   : > { %2343 = vmatpush.msrb.mxu3 %v2210_v2  ;;  %v2204_v2 = vld [vmem:[#allocation5 + $0x360] sm:$0xff] }
 0x318   : > { %14974 = vst [vmem:[#allocation86_spill] sm:$0xff] %v9972_v37  ;;  %2264 = vmatmul.f32.gmra.mxu2 %v9972_v37  ;;  %2490 = vmatmul.f32.gmra.mxu0 %v9972_v37  ;;  %v2208_v37 = vld [vmem:[#allocation5 + $0x380] sm:$0xff] }
 0x319   : > { %v1736_v44 = vpop.f32.mrf.mxu3  ;;  %2344 = vmatpush.msrb.mxu3 %v2208_v37  ;;  %2569 = vmatpush.msrb.mxu1 %v2211_v60  ;;  %v14977_v60 = vld [vmem:[#allocation35_spill] sm:$0xff] }
 0x31a   : > { %v1737_v43 = vadd.f32 %v1736_v44, %v1624_v38  ;;  %v9976_v25 = vpop.f32.mrf.mxu1  ;;  %v2206_v44 = vld [vmem:[#allocation5 + $0x370] sm:$0xff] }
 0x31b   : > { %2345 = vmatpush.msrb.mxu3 %v2206_v44  ;;  %2570 = vmatpush.msrb.mxu1 %v2209_v8  ;;  %v2200_v44 = vld [vmem:[#allocation5 + $0x340] sm:$0xff]  ;;  %v9996_v8 = vpop.f32.mrf.mxu2 }
 0x31c   : > { %v2049_v3 = vadd.f32 %v1737_v43, %v14975_v47 }
 0x31d   : > { %2012 = vmatmul.f32.gmra.mxu1 %v1045_v14  ;;  %2346 = vmatpush.msrb.mxu3 %v2204_v2  ;;  %v2203_v2 = vld [vmem:[#allocation5 + $0x358] sm:$0xff] }
 0x31e   : > { %1786 = vmatmul.f32.gmra.mxu3 %v1045_v14  ;;  %v9985_v38 = vmax.f32 %v2049_v3, 0.0  ;;  %v2202_v14 = vld [vmem:[#allocation5 + $0x350] sm:$0xff]  ;;  %2571 = vmatpush.msrb.mxu1 %v2207_v1  ;;  %v2205_v3 = vld [vmem:[#allocation5 + $0x368] sm:$0xff]  ;;  %v9992_v18 = vpop.f32.mrf.mxu0 }
 0x31f   : > { %2347 = vmatpush.msrb.mxu3 %v2202_v14  ;;  %v2198_v1 = vld [vmem:[#allocation5 + $0x330] sm:$0xff] }
 0x320   : > { %14976 = vst [vmem:[#allocation87_spill] sm:$0xff] %v9985_v38  ;;  %2267 = vmatmul.f32.gmra.mxu2 %v9985_v38  ;;  %2493 = vmatmul.f32.gmra.mxu0 %v9985_v38  ;;  %v1630_v38 = vadd.f32 %v9848_v9, %v9857_v23 }
 0x321   : > { %v1739_v47 = vpop.f32.mrf.mxu3  ;;  %2348 = vmatpush.msrb.mxu3 %v2200_v44  ;;  %2572 = vmatpush.msrb.mxu1 %v2205_v3  ;;  %v1049_v44 = vld [vmem:[#allocation2 + $0x1c8] sm:$0xff]  ;;  %v14979_v3 = vld [vmem:[#allocation37_spill] sm:$0xff] }
 0x322   : > { %v1740_v37 = vadd.f32 %v1739_v47, %v1627_v29  ;;  %v9989_v43 = vpop.f32.mrf.mxu1  ;;  %v2201_v47 = vld [vmem:[#allocation5 + $0x348] sm:$0xff] }
 0x323   : > { %2349 = vmatpush.msrb.mxu3 %v2198_v1  ;;  %2573 = vmatpush.msrb.mxu1 %v2203_v2  ;;  %v2192_v1 = vld [vmem:[#allocation5 + $0x300] sm:$0xff] }
 0x324   : > { %v2051_v41 = vadd.f32 %v1740_v37, %v14977_v60  ;;  %v2196_v37 = vld [vmem:[#allocation5 + $0x320] sm:$0xff] }
 0x325   : > { %2015 = vmatmul.f32.gmra.mxu1 %v1047_v53  ;;  %2350 = vmatpush.msrb.mxu3 %v2196_v37  ;;  %v10011_v37 = vpop.f32.mrf.mxu2 }
 0x326   : > { %1789 = vmatmul.f32.gmra.mxu3 %v1047_v53  ;;  %v9998_v29 = vmax.f32 %v2051_v41, 0.0  ;;  %v2194_v53 = vld [vmem:[#allocation5 + $0x310] sm:$0xff]  ;;  %2574 = vmatpush.msrb.mxu1 %v2201_v47  ;;  %v2199_v41 = vld [vmem:[#allocation5 + $0x338] sm:$0xff]  ;;  %v10009_v2 = vpop.f32.mrf.mxu0 }
 0x327   : > { %2351 = vmatpush.msrb.mxu3 %v2194_v53  ;;  %v2195_v47 = vld [vmem:[#allocation5 + $0x318] sm:$0xff] }
 0x328   : > { %14978 = vst [vmem:[#allocation89_spill] sm:$0xff] %v9998_v29  ;;  %2270 = vmatmul.f32.gmra.mxu2 %v9998_v29  ;;  %2496 = vmatmul.f32.gmra.mxu0 %v9998_v29  ;;  %v1633_v29 = vadd.f32 %v9852_v21, %v9857_v23  ;;  %v1051_v21 = vld [vmem:[#allocation2 + $0x1d8] sm:$0xff] }
 0x329   : > { %v1742_v14 = vpop.f32.mrf.mxu3  ;;  %2352 = vmatpush.msrb.mxu3 %v2192_v1  ;;  %2575 = vmatpush.msrb.mxu1 %v2199_v41 }
 0x32a   : > { %v1743_v60 = vadd.f32 %v1742_v14, %v1630_v38  ;;  %v10002_v9 = vpop.f32.mrf.mxu1  ;;  %v2197_v38 = vld [vmem:[#allocation5 + $0x328] sm:$0xff] }
 0x32b   : > { %2576 = vmatpush.msrb.mxu1 %v2197_v38 }
 0x32c   : > { %v2053_v48 = vadd.f32 %v1743_v60, %v14979_v3  ;;  %v1636_v3 = vadd.f32 %v9863_v17, %v9857_v23  ;;  %v14984_v17 = vld [vmem:[#allocation41_spill] sm:$0xff] }
 0x32d   : > { %2018 = vmatmul.f32.gmra.mxu1 %v1049_v44 }
 0x32e   : > { %1792 = vmatmul.f32.gmra.mxu3 %v1049_v44  ;;  %v10007_v15 = vmax.f32 %v2053_v48, 0.0  ;;  %2577 = vmatpush.msrb.mxu1 %v2195_v47  ;;  %v2193_v48 = vld [vmem:[#allocation5 + $0x308] sm:$0xff]  ;;  %v14981_v44 = vld [vmem:[#allocation39_spill] sm:$0xff] }
 0x330   : > { %14980 = vst [vmem:[#allocation84_spill] sm:$0xff] %v10007_v15  ;;  %2273 = vmatmul.f32.gmra.mxu2 %v10007_v15  ;;  %2499 = vmatmul.f32.gmra.mxu0 %v10007_v15 }
 0x331   : > { %v1745_v14 = vpop.f32.mrf.mxu3  ;;  %2578 = vmatpush.msrb.mxu1 %v2193_v48  ;;  %v1639_v48 = vadd.f32 %v9874_v27, %v9857_v23 }
 0x332   : > { %v1746_v60 = vadd.f32 %v1745_v14, %v1633_v29  ;;  %v10015_v53 = vpop.f32.mrf.mxu1  ;;  %v10024_v29 = vpop.f32.mrf.mxu0 }
 0x333   : > { %14983 = vst [vmem:[#allocation83_spill] sm:$0xff] %v10024_v29  ;;  %v10026_v14 = vpop.f32.mrf.mxu2 }
 0x334   : > { %v2055_v41 = vadd.f32 %v1746_v60, %v14981_v44  ;;  %v1053_v60 = vld [vmem:[#allocation2 + $0x1e8] sm:$0xff]  ;;  %v10031_v44 = vperm.slane %v9854_v51, 1 }
 0x335   : > { %2021 = vmatmul.f32.gmra.mxu1 %v1051_v21 }
 0x336   : > { %1795 = vmatmul.f32.gmra.mxu3 %v1051_v21  ;;  %v10020_v1 = vmax.f32 %v2055_v41, 0.0 }
 0x338   : > { %14982 = vst [vmem:[#allocation82_spill] sm:$0xff] %v10020_v1  ;;  %2276 = vmatmul.f32.gmra.mxu2 %v10020_v1  ;;  %2502 = vmatmul.f32.gmra.mxu0 %v10020_v1  ;;  %v1823_v1 = vadd.f32 %v9802_v13, %v10031_v44  ;;  %v1642_v13 = vadd.f32 %v9889_v55, %v9857_v23 }
 0x339   : > { %v1748_v38 = vpop.f32.mrf.mxu3 }
 0x33a   : > { %v1749_v47 = vadd.f32 %v1748_v38, %v1636_v3  ;;  %v10028_v15 = vpop.f32.mrf.mxu1 }
 0x33b   : > { %v10047_v27 = vpop.f32.mrf.mxu2 }
 0x33c   : > { %v2057_v21 = vadd.f32 %v1749_v47, %v14984_v17  ;;  %v1936_v47 = vadd.f32 %v9859_v39, %v1823_v1  ;;  %v10045_v17 = vpop.f32.mrf.mxu0 }
 0x33d   : > { %2024 = vmatmul.f32.gmra.mxu1 %v1053_v60  ;;  %14986 = vst [vmem:[#allocation15_spill] sm:$0xff] %v10045_v17 }
 0x33e   : > { %1798 = vmatmul.f32.gmra.mxu3 %v1053_v60  ;;  %v10036_v41 = vmax.f32 %v2057_v21, 0.0  ;;  %v14987_v60 = vld [vmem:[#allocation43_spill] sm:$0xff] }
 0x340   : > { %14985 = vst [vmem:[#allocation85_spill] sm:$0xff] %v10036_v41  ;;  %2279 = vmatmul.f32.gmra.mxu2 %v10036_v41  ;;  %2505 = vmatmul.f32.gmra.mxu0 %v10036_v41 }
 0x341   : > { %v1751_v3 = vpop.f32.mrf.mxu3 }
 0x342   : > { %v1752_v38 = vadd.f32 %v1751_v3, %v1639_v48  ;;  %v10042_v51 = vpop.f32.mrf.mxu1  ;;  %v1826_v48 = vadd.f32 %v9806_v40, %v10031_v44  ;;  %v14989_v3 = vld [vmem:[#allocation16_spill] sm:$0xff]  ;;  %v1645_v40 = vadd.f32 %v9904_v20, %v9857_v23 }
 0x343   : > { %v2032_v41 = vadd.f32 %v1936_v47, %v14989_v3  ;;  %v10070_v47 = vpop.f32.mrf.mxu2  ;;  %v14993_v3 = vld [vmem:[#allocation18_spill] sm:$0xff] }
 0x344   : > { %v2059_v21 = vadd.f32 %v1752_v38, %v14987_v60  ;;  %v1939_v55 = vadd.f32 %v9867_v22, %v1826_v48 }
 0x345   : > { %2027 = vmatmul.f32.gmra.mxu1 %v1055_v42  ;;  %v10061_v38 = vmax.f32 %v2032_v41, 0.0  ;;  %v1829_v41 = vadd.f32 %v9810_v59, %v10031_v44  ;;  %v1648_v59 = vadd.f32 %v9919_v63, %v9857_v23 }
 0x346   : > { %1801 = vmatmul.f32.gmra.mxu3 %v1055_v42  ;;  %v10052_v29 = vmax.f32 %v2059_v21, 0.0  ;;  %v14991_v42 = vld [vmem:[#allocation45_spill] sm:$0xff]  ;;  %v10065_v21 = vpop.f32.mrf.mxu0  ;;  %v2034_v22 = vadd.f32 %v1939_v55, %v14993_v3  ;;  %v14997_v3 = vld [vmem:[#allocation20_spill] sm:$0xff] }
 0x347   : > { %14990 = vst [vmem:[#allocation19_spill] sm:$0xff] %v10061_v38  ;;  %v1942_v20 = vadd.f32 %v9880_v45, %v1829_v41 }
 0x348   : > { %14988 = vst [vmem:[#allocation17_spill] sm:$0xff] %v10052_v29  ;;  %2282 = vmatmul.f32.gmra.mxu2 %v10052_v29  ;;  %2508 = vmatmul.f32.gmra.mxu0 %v10052_v29  ;;  %v14995_v29 = vld [vmem:[#allocation48_spill] sm:$0xff] }
 0x349   : > { %v1754_v39 = vpop.f32.mrf.mxu3 }
 0x34a   : > { %v1755_v1 = vadd.f32 %v1754_v39, %v1642_v13  ;;  %v10059_v17 = vpop.f32.mrf.mxu1 }
 0x34b   : > { %v10097_v45 = vpop.f32.mrf.mxu2 }
 0x34c   : > { %v2061_v60 = vadd.f32 %v1755_v1, %v14991_v42  ;;  %v10083_v42 = vmax.f32 %v2034_v22, 0.0 }
 0x34d   : > { %2579 = vmatmul.f32.vlgmr.msrb.gmra.mxu1 %v10061_v38 }
 0x34e   : > { %2353 = vmatmul.f32.vlgmr.msrb.gmra.mxu3 %v10061_v38  ;;  %v10073_v13 = vmax.f32 %v2061_v60, 0.0  ;;  %14994 = vst [vmem:[#allocation23_spill] sm:$0xff] %v10083_v42 }
 0x350   : > { %14992 = vst [vmem:[#allocation21_spill] sm:$0xff] %v10073_v13  ;;  %2285 = vmatmul.f32.gmra.mxu2 %v10073_v13  ;;  %2511 = vmatmul.f32.gmra.mxu0 %v10073_v13  ;;  %v10095_v13 = vpop.f32.mrf.mxu0 }
 0x351   : > { %v1757_v48 = vpop.f32.mrf.mxu3 }
 0x352   : > { %v1758_v39 = vadd.f32 %v1757_v48, %v1645_v40  ;;  %v10080_v1 = vpop.f32.mrf.mxu1  ;;  %v1832_v40 = vadd.f32 %v9814_v62, %v10031_v44  ;;  %v2036_v48 = vadd.f32 %v1942_v20, %v14997_v3  ;;  %v1651_v20 = vadd.f32 %v9935_v28, %v9857_v23 }
 0x354   : > { %v2063_v60 = vadd.f32 %v1758_v39, %v14995_v29  ;;  %v1945_v22 = vadd.f32 %v9893_v58, %v1832_v40  ;;  %v10104_v39 = vmax.f32 %v2036_v48, 0.0  ;;  %v10120_v48 = vpop.f32.mrf.mxu2 }
 0x355   : > { %2582 = vmatmul.f32.gmra.mxu1 %v10083_v42 }
 0x356   : > { %2356 = vmatmul.f32.gmra.mxu3 %v10083_v42  ;;  %v10090_v55 = vmax.f32 %v2063_v60, 0.0  ;;  %14998 = vst [vmem:[#allocation27_spill] sm:$0xff] %v10104_v39  ;;  %v14999_v60 = vld [vmem:[#allocation51_spill] sm:$0xff] }
 0x358   : > { %14996 = vst [vmem:[#allocation25_spill] sm:$0xff] %v10090_v55  ;;  %2288 = vmatmul.f32.gmra.mxu2 %v10090_v55  ;;  %2514 = vmatmul.f32.gmra.mxu0 %v10090_v55  ;;  %v10118_v58 = vpop.f32.mrf.mxu0 }
 0x359   : > { %v1760_v29 = vpop.f32.mrf.mxu3 }
 0x35a   : > { %v1761_v41 = vadd.f32 %v1760_v29, %v1648_v59  ;;  %v10101_v63 = vpop.f32.mrf.mxu1  ;;  %v1835_v59 = vadd.f32 %v9818_v61, %v10031_v44  ;;  %v15001_v29 = vld [vmem:[#allocation22_spill] sm:$0xff] }
 0x35b   : > { %v2038_v55 = vadd.f32 %v1945_v22, %v15001_v29  ;;  %v1654_v22 = vadd.f32 %v9950_v12, %v9857_v23 }
 0x35c   : > { %v2065_v62 = vadd.f32 %v1761_v41, %v14999_v60  ;;  %v1948_v60 = vadd.f32 %v9906_v49, %v1835_v59 }
 0x35d   : > { %2585 = vmatmul.f32.gmra.mxu1 %v10104_v39 }
 0x35e   : > { %2359 = vmatmul.f32.gmra.mxu3 %v10104_v39  ;;  %v10111_v3 = vmax.f32 %v2065_v62, 0.0  ;;  %v10125_v62 = vmax.f32 %v2038_v55, 0.0  ;;  %v15003_v39 = vld [vmem:[#allocation54_spill] sm:$0xff] }
 0x360   : > { %15000 = vst [vmem:[#allocation29_spill] sm:$0xff] %v10111_v3  ;;  %2291 = vmatmul.f32.gmra.mxu2 %v10111_v3  ;;  %2517 = vmatmul.f32.gmra.mxu0 %v10111_v3  ;;  %v10142_v12 = vpop.f32.mrf.mxu0 }
 0x361   : > { %v1763_v40 = vpop.f32.mrf.mxu3  ;;  %15002 = vst [vmem:[#allocation31_spill] sm:$0xff] %v10125_v62 }
 0x362   : > { %v1764_v41 = vadd.f32 %v1763_v40, %v1651_v20  ;;  %v10122_v28 = vpop.f32.mrf.mxu1  ;;  %v1838_v20 = vadd.f32 %v9822_v24, %v10031_v44  ;;  %v15005_v40 = vld [vmem:[#allocation24_spill] sm:$0xff] }
 0x363   : > { %v2040_v3 = vadd.f32 %v1948_v60, %v15005_v40  ;;  %v1657_v60 = vadd.f32 %v9965_v10, %v9857_v23 }
 0x364   : > { %v2067_v61 = vadd.f32 %v1764_v41, %v15003_v39  ;;  %v1951_v59 = vadd.f32 %v9915_v35, %v1838_v20  ;;  %v1841_v35 = vadd.f32 %v9826_v56, %v10031_v44  ;;  %v15009_v20 = vld [vmem:[#allocation26_spill] sm:$0xff]  ;;  %v1660_v56 = vadd.f32 %v9980_v16, %v9857_v23 }
 0x365   : > { %2588 = vmatmul.f32.gmra.mxu1 %v10125_v62  ;;  %v10144_v41 = vmax.f32 %v2040_v3, 0.0 }
 0x366   : > { %2362 = vmatmul.f32.gmra.mxu3 %v10125_v62  ;;  %v10132_v29 = vmax.f32 %v2067_v61, 0.0  ;;  %v10146_v61 = vpop.f32.mrf.mxu2  ;;  %v15007_v62 = vld [vmem:[#allocation56_spill] sm:$0xff]  ;;  %v2042_v40 = vadd.f32 %v1951_v59, %v15009_v20 }
 0x367   : > { %15006 = vst [vmem:[#allocation35_spill] sm:$0xff] %v10144_v41 }
 0x368   : > { %15004 = vst [vmem:[#allocation33_spill] sm:$0xff] %v10132_v29  ;;  %2294 = vmatmul.f32.gmra.mxu2 %v10132_v29  ;;  %2520 = vmatmul.f32.gmra.mxu0 %v10132_v29  ;;  %v10163_v10 = vmax.f32 %v2042_v40, 0.0  ;;  %v15011_v29 = vld [vmem:[#allocation58_spill] sm:$0xff] }
 0x369   : > { %v1766_v49 = vpop.f32.mrf.mxu3 }
 0x36a   : > { %v1767_v55 = vadd.f32 %v1766_v49, %v1654_v22  ;;  %v10139_v39 = vpop.f32.mrf.mxu1  ;;  %15010 = vst [vmem:[#allocation39_spill] sm:$0xff] %v10163_v10 }
 0x36c   : > { %v2069_v24 = vadd.f32 %v1767_v55, %v15007_v62  ;;  %v1954_v55 = vadd.f32 %v9928_v0, %v1841_v35  ;;  %v1844_v0 = vadd.f32 %v9830_v7, %v10031_v44  ;;  %v15013_v35 = vld [vmem:[#allocation28_spill] sm:$0xff]  ;;  %v1663_v7 = vadd.f32 %v9996_v8, %v9857_v23 }
 0x36d   : > { %2591 = vmatmul.f32.gmra.mxu1 %v10144_v41 }
 0x36e   : > { %2365 = vmatmul.f32.gmra.mxu3 %v10144_v41  ;;  %v10153_v22 = vmax.f32 %v2069_v24, 0.0  ;;  %v10166_v41 = vpop.f32.mrf.mxu0  ;;  %v10171_v59 = vpop.f32.mrf.mxu2  ;;  %v2044_v20 = vadd.f32 %v1954_v55, %v15013_v35  ;;  %v1957_v16 = vadd.f32 %v9941_v30, %v1844_v0  ;;  %v15017_v35 = vld [vmem:[#allocation30_spill] sm:$0xff] }
 0x370   : > { %15008 = vst [vmem:[#allocation37_spill] sm:$0xff] %v10153_v22  ;;  %2297 = vmatmul.f32.gmra.mxu2 %v10153_v22  ;;  %2523 = vmatmul.f32.gmra.mxu0 %v10153_v22  ;;  %v15015_v22 = vld [vmem:[#allocation60_spill] sm:$0xff] }
 0x371   : > { %v1769_v3 = vpop.f32.mrf.mxu3 }
 0x372   : > { %v1770_v62 = vadd.f32 %v1769_v3, %v1657_v60  ;;  %v10160_v49 = vpop.f32.mrf.mxu1 }
 0x374   : > { %v2071_v24 = vadd.f32 %v1770_v62, %v15011_v29  ;;  %v10184_v62 = vmax.f32 %v2044_v20, 0.0 }
 0x375   : > { %2594 = vmatmul.f32.gmra.mxu1 %v10163_v10 }
 0x376   : > { %2368 = vmatmul.f32.gmra.mxu3 %v10163_v10  ;;  %v10174_v60 = vmax.f32 %v2071_v24, 0.0  ;;  %15014 = vst [vmem:[#allocation43_spill] sm:$0xff] %v10184_v62  ;;  %v10198_v30 = vpop.f32.mrf.mxu2 }
 0x378   : > { %15012 = vst [vmem:[#allocation41_spill] sm:$0xff] %v10174_v60  ;;  %2300 = vmatmul.f32.gmra.mxu2 %v10174_v60  ;;  %2526 = vmatmul.f32.gmra.mxu0 %v10174_v60  ;;  %v10196_v60 = vpop.f32.mrf.mxu0 }
 0x379   : > { %v1772_v29 = vpop.f32.mrf.mxu3 }
 0x37a   : > { %v1773_v40 = vadd.f32 %v1772_v29, %v1660_v56  ;;  %v10181_v3 = vpop.f32.mrf.mxu1  ;;  %v1847_v56 = vadd.f32 %v9834_v19, %v10031_v44  ;;  %v2046_v29 = vadd.f32 %v1957_v16, %v15017_v35  ;;  %v1666_v16 = vadd.f32 %v10011_v37, %v9857_v23 }
 0x37c   : > { %v2073_v24 = vadd.f32 %v1773_v40, %v15015_v22  ;;  %v1960_v20 = vadd.f32 %v9954_v36, %v1847_v56  ;;  %v10205_v40 = vmax.f32 %v2046_v29, 0.0 }
 0x37d   : > { %2597 = vmatmul.f32.gmra.mxu1 %v10184_v62 }
 0x37e   : > { %2371 = vmatmul.f32.gmra.mxu3 %v10184_v62  ;;  %v10191_v55 = vmax.f32 %v2073_v24, 0.0  ;;  %15018 = vst [vmem:[#allocation45_spill] sm:$0xff] %v10205_v40  ;;  %v15019_v24 = vld [vmem:[#allocation62_spill] sm:$0xff]  ;;  %v10221_v29 = vpop.f32.mrf.mxu2 }
 0x37f   : > { %15023 = vst [vmem:[#allocation20_spill] sm:$0xff] %v10221_v29 }
 0x380   : > { %15016 = vst [vmem:[#allocation16_spill] sm:$0xff] %v10191_v55  ;;  %2303 = vmatmul.f32.gmra.mxu2 %v10191_v55  ;;  %2529 = vmatmul.f32.gmra.mxu0 %v10191_v55  ;;  %v10219_v36 = vpop.f32.mrf.mxu0 }
 0x381   : > { %v1775_v22 = vpop.f32.mrf.mxu3  ;;  %15022 = vst [vmem:[#allocation48_spill] sm:$0xff] %v10219_v36 }
 0x382   : > { %v1776_v0 = vadd.f32 %v1775_v22, %v1663_v7  ;;  %v10202_v8 = vpop.f32.mrf.mxu1  ;;  %v1850_v7 = vadd.f32 %v9838_v34, %v10031_v44  ;;  %v15021_v22 = vld [vmem:[#allocation32_spill] sm:$0xff] }
 0x383   : > { %v2048_v55 = vadd.f32 %v1960_v20, %v15021_v22  ;;  %v1669_v20 = vadd.f32 %v10026_v14, %v9857_v23 }
 0x384   : > { %v2075_v19 = vadd.f32 %v1776_v0, %v15019_v24  ;;  %v1963_v24 = vadd.f32 %v9967_v46, %v1850_v7 }
 0x385   : > { %2600 = vmatmul.f32.gmra.mxu1 %v10205_v40 }
 0x386   : > { %2374 = vmatmul.f32.gmra.mxu3 %v10205_v40  ;;  %v10212_v35 = vmax.f32 %v2075_v19, 0.0  ;;  %v10226_v19 = vmax.f32 %v2048_v55, 0.0  ;;  %v15025_v40 = vld [vmem:[#allocation64_spill] sm:$0xff] }
 0x388   : > { %15020 = vst [vmem:[#allocation18_spill] sm:$0xff] %v10212_v35  ;;  %2306 = vmatmul.f32.gmra.mxu2 %v10212_v35  ;;  %2532 = vmatmul.f32.gmra.mxu0 %v10212_v35  ;;  %v10243_v14 = vpop.f32.mrf.mxu0 }
 0x389   : > { %v1778_v56 = vpop.f32.mrf.mxu3  ;;  %15024 = vst [vmem:[#allocation51_spill] sm:$0xff] %v10226_v19 }
 0x38a   : > { %v1779_v0 = vadd.f32 %v1778_v56, %v1666_v16  ;;  %v10223_v37 = vpop.f32.mrf.mxu1  ;;  %v1853_v16 = vadd.f32 %v9842_v32, %v10031_v44  ;;  %v15027_v56 = vld [vmem:[#allocation34_spill] sm:$0xff] }
 0x38b   : > { %v2050_v35 = vadd.f32 %v1963_v24, %v15027_v56  ;;  %v1672_v24 = vadd.f32 %v10047_v27, %v9857_v23 }
 0x38c   : > { %v2077_v34 = vadd.f32 %v1779_v0, %v15025_v40  ;;  %v1966_v7 = vadd.f32 %v9976_v25, %v1853_v16  ;;  %v1856_v25 = vadd.f32 %v9846_v52, %v10031_v44  ;;  %v15032_v16 = vld [vmem:[#allocation36_spill] sm:$0xff]  ;;  %v1675_v52 = vadd.f32 %v10070_v47, %v9857_v23 }
 0x38d   : > { %2603 = vmatmul.f32.gmra.mxu1 %v10226_v19  ;;  %v10245_v0 = vmax.f32 %v2050_v35, 0.0 }
 0x38e   : > { %2377 = vmatmul.f32.gmra.mxu3 %v10226_v19  ;;  %v10233_v22 = vmax.f32 %v2077_v34, 0.0  ;;  %v10247_v34 = vpop.f32.mrf.mxu2  ;;  %v15030_v19 = vld [vmem:[#allocation66_spill] sm:$0xff]  ;;  %v2052_v56 = vadd.f32 %v1966_v7, %v15032_v16 }
 0x38f   : > { %15028 = vst [vmem:[#allocation54_spill] sm:$0xff] %v10245_v0 }
 0x390   : > { %15026 = vst [vmem:[#allocation22_spill] sm:$0xff] %v10233_v22  ;;  %2309 = vmatmul.f32.gmra.mxu2 %v10233_v22  ;;  %2535 = vmatmul.f32.gmra.mxu0 %v10233_v22  ;;  %v10264_v27 = vmax.f32 %v2052_v56, 0.0  ;;  %v15034_v22 = vld [vmem:[#allocation68_spill] sm:$0xff] }
 0x391   : > { %v1781_v46 = vpop.f32.mrf.mxu3  ;;  %15029 = vst [vmem:[#allocation24_spill] sm:$0xff] %v10247_v34 }
 0x392   : > { %v1782_v55 = vadd.f32 %v1781_v46, %v1669_v20  ;;  %v10240_v40 = vpop.f32.mrf.mxu1  ;;  %15033 = vst [vmem:[#allocation26_spill] sm:$0xff] %v10264_v27 }
 0x394   : > { %v2079_v32 = vadd.f32 %v1782_v55, %v15030_v19  ;;  %v1969_v55 = vadd.f32 %v9989_v43, %v1856_v25  ;;  %v1859_v43 = vadd.f32 %v9850_v11, %v10031_v44  ;;  %v15037_v25 = vld [vmem:[#allocation38_spill] sm:$0xff]  ;;  %v1678_v11 = vadd.f32 %v10097_v45, %v9857_v23 }
 0x395   : > { %2606 = vmatmul.f32.gmra.mxu1 %v10245_v0 }
 0x396   : > { %2380 = vmatmul.f32.gmra.mxu3 %v10245_v0  ;;  %v10254_v20 = vmax.f32 %v2079_v32, 0.0  ;;  %v10267_v0 = vpop.f32.mrf.mxu0  ;;  %v10272_v7 = vpop.f32.mrf.mxu2  ;;  %v2054_v16 = vadd.f32 %v1969_v55, %v15037_v25  ;;  %v1972_v47 = vadd.f32 %v10002_v9, %v1859_v43  ;;  %v15041_v25 = vld [vmem:[#allocation40_spill] sm:$0xff] }
 0x397   : > { %15035 = vst [vmem:[#allocation58_spill] sm:$0xff] %v10272_v7 }
 0x398   : > { %15031 = vst [vmem:[#allocation56_spill] sm:$0xff] %v10254_v20  ;;  %2312 = vmatmul.f32.gmra.mxu2 %v10254_v20  ;;  %2538 = vmatmul.f32.gmra.mxu0 %v10254_v20  ;;  %v15039_v20 = vld [vmem:[#allocation70_spill] sm:$0xff] }
 0x399   : > { %v1784_v35 = vpop.f32.mrf.mxu3 }
 0x39a   : > { %v1785_v19 = vadd.f32 %v1784_v35, %v1672_v24  ;;  %v10261_v46 = vpop.f32.mrf.mxu1 }
 0x39c   : > { %v2081_v32 = vadd.f32 %v1785_v19, %v15034_v22  ;;  %v10285_v19 = vmax.f32 %v2054_v16, 0.0 }
 0x39d   : > { %2609 = vmatmul.f32.gmra.mxu1 %v10264_v27 }
 0x39e   : > { %2383 = vmatmul.f32.gmra.mxu3 %v10264_v27  ;;  %v10275_v24 = vmax.f32 %v2081_v32, 0.0  ;;  %15038 = vst [vmem:[#allocation60_spill] sm:$0xff] %v10285_v19  ;;  %v10299_v9 = vpop.f32.mrf.mxu2 }
 0x39f   : > { %15042 = vst [vmem:[#allocation62_spill] sm:$0xff] %v10299_v9 }
 0x3a0   : > { %15036 = vst [vmem:[#allocation28_spill] sm:$0xff] %v10275_v24  ;;  %2315 = vmatmul.f32.gmra.mxu2 %v10275_v24  ;;  %2541 = vmatmul.f32.gmra.mxu0 %v10275_v24  ;;  %v10297_v24 = vpop.f32.mrf.mxu0 }
 0x3a1   : > { %v1787_v22 = vpop.f32.mrf.mxu3 }
 0x3a2   : > { %v1788_v56 = vadd.f32 %v1787_v22, %v1675_v52  ;;  %v10282_v35 = vpop.f32.mrf.mxu1  ;;  %v1862_v52 = vadd.f32 %v9861_v31, %v10031_v44  ;;  %v2056_v22 = vadd.f32 %v1972_v47, %v15041_v25  ;;  %v1681_v47 = vadd.f32 %v10120_v48, %v9857_v23 }
 0x3a4   : > { %v2083_v32 = vadd.f32 %v1788_v56, %v15039_v20  ;;  %v1975_v16 = vadd.f32 %v10015_v53, %v1862_v52  ;;  %v10306_v56 = vmax.f32 %v2056_v22, 0.0 }
 0x3a5   : > { %2612 = vmatmul.f32.gmra.mxu1 %v10285_v19 }
 0x3a6   : > { %2386 = vmatmul.f32.gmra.mxu3 %v10285_v19  ;;  %v10292_v55 = vmax.f32 %v2083_v32, 0.0  ;;  %15043 = vst [vmem:[#allocation32_spill] sm:$0xff] %v10306_v56  ;;  %v15044_v32 = vld [vmem:[#allocation72_spill] sm:$0xff]  ;;  %v10322_v22 = vpop.f32.mrf.mxu2 }
 0x3a8   : > { %15040 = vst [vmem:[#allocation30_spill] sm:$0xff] %v10292_v55  ;;  %2318 = vmatmul.f32.gmra.mxu2 %v10292_v55  ;;  %2544 = vmatmul.f32.gmra.mxu0 %v10292_v55  ;;  %v10320_v53 = vpop.f32.mrf.mxu0 }
 0x3a9   : > { %v1790_v20 = vpop.f32.mrf.mxu3 }
 0x3aa   : > { %v1791_v43 = vadd.f32 %v1790_v20, %v1678_v11  ;;  %v10303_v45 = vpop.f32.mrf.mxu1  ;;  %v1865_v11 = vadd.f32 %v9870_v54, %v10031_v44  ;;  %v15046_v20 = vld [vmem:[#allocation42_spill] sm:$0xff] }
 0x3ab   : > { %v2058_v55 = vadd.f32 %v1975_v16, %v15046_v20  ;;  %v1684_v16 = vadd.f32 %v10146_v61, %v9857_v23 }
 0x3ac   : > { %v2085_v31 = vadd.f32 %v1791_v43, %v15044_v32  ;;  %v1978_v32 = vadd.f32 %v10028_v15, %v1865_v11 }
 0x3ad   : > { %2615 = vmatmul.f32.gmra.mxu1 %v10306_v56 }
 0x3ae   : > { %2389 = vmatmul.f32.gmra.mxu3 %v10306_v56  ;;  %v10313_v25 = vmax.f32 %v2085_v31, 0.0  ;;  %v10327_v31 = vmax.f32 %v2058_v55, 0.0  ;;  %v15048_v56 = vld [vmem:[#allocation74_spill] sm:$0xff] }
 0x3b0   : > { %15045 = vst [vmem:[#allocation64_spill] sm:$0xff] %v10313_v25  ;;  %2321 = vmatmul.f32.gmra.mxu2 %v10313_v25  ;;  %2547 = vmatmul.f32.gmra.mxu0 %v10313_v25 }
 0x3b1   : > { %v1793_v52 = vpop.f32.mrf.mxu3  ;;  %15047 = vst [vmem:[#allocation34_spill] sm:$0xff] %v10327_v31 }
 0x3b2   : > { %v1794_v43 = vadd.f32 %v1793_v52, %v1681_v47  ;;  %v10324_v48 = vpop.f32.mrf.mxu1  ;;  %v1868_v47 = vadd.f32 %v9887_v57, %v10031_v44  ;;  %v15050_v52 = vld [vmem:[#allocation44_spill] sm:$0xff] }
 0x3b3   : > { %v2060_v25 = vadd.f32 %v1978_v32, %v15050_v52  ;;  %v1687_v32 = vadd.f32 %v10171_v59, %v9857_v23 }
 0x3b4   : > { %v2087_v54 = vadd.f32 %v1794_v43, %v15048_v56  ;;  %v1981_v11 = vadd.f32 %v10042_v51, %v1868_v47  ;;  %v10346_v43 = vpop.f32.mrf.mxu0  ;;  %v1871_v51 = vadd.f32 %v9902_v33, %v10031_v44  ;;  %v1690_v33 = vadd.f32 %v10198_v30, %v9857_v23 }
 0x3b5   : > { %2618 = vmatmul.f32.gmra.mxu1 %v10327_v31  ;;  %v10344_v61 = vmax.f32 %v2060_v25, 0.0  ;;  %v15054_v25 = vld [vmem:[#allocation46_spill] sm:$0xff] }
 0x3b6   : > { %2392 = vmatmul.f32.gmra.mxu3 %v10327_v31  ;;  %v10334_v20 = vmax.f32 %v2087_v54, 0.0  ;;  %v10348_v54 = vpop.f32.mrf.mxu2  ;;  %v15052_v31 = vld [vmem:[#allocation76_spill] sm:$0xff]  ;;  %v2062_v47 = vadd.f32 %v1981_v11, %v15054_v25 }
 0x3b7   : > { %15051 = vst [vmem:[#allocation36_spill] sm:$0xff] %v10344_v61 }
 0x3b8   : > { %15049 = vst [vmem:[#allocation66_spill] sm:$0xff] %v10334_v20  ;;  %2324 = vmatmul.f32.gmra.mxu2 %v10334_v20  ;;  %2550 = vmatmul.f32.gmra.mxu0 %v10334_v20  ;;  %v10365_v59 = vmax.f32 %v2062_v47, 0.0  ;;  %v15056_v20 = vld [vmem:[#allocation78_spill] sm:$0xff] }
 0x3b9   : > { %v1796_v15 = vpop.f32.mrf.mxu3 }
 0x3ba   : > { %v1797_v55 = vadd.f32 %v1796_v15, %v1684_v16  ;;  %v10341_v56 = vpop.f32.mrf.mxu1  ;;  %15055 = vst [vmem:[#allocation38_spill] sm:$0xff] %v10365_v59 }
 0x3bc   : > { %v2089_v57 = vadd.f32 %v1797_v55, %v15052_v31  ;;  %v1984_v55 = vadd.f32 %v10059_v17, %v1871_v51  ;;  %v10371_v11 = vpop.f32.mrf.mxu0  ;;  %v1874_v17 = vadd.f32 %v9917_v26, %v10031_v44  ;;  %v15058_v51 = vld [vmem:[#allocation47_spill] sm:$0xff] }
 0x3bd   : > { %2621 = vmatmul.f32.gmra.mxu1 %v10344_v61 }
 0x3be   : > { %2395 = vmatmul.f32.gmra.mxu3 %v10344_v61  ;;  %v10355_v16 = vmax.f32 %v2089_v57, 0.0  ;;  %v10373_v25 = vpop.f32.mrf.mxu2  ;;  %v2064_v47 = vadd.f32 %v1984_v55, %v15058_v51  ;;  %v1987_v30 = vadd.f32 %v10080_v1, %v1874_v17  ;;  %v1877_v55 = vadd.f32 %v9931_v50, %v10031_v44  ;;  %v15063_v51 = vld [vmem:[#allocation52_spill] sm:$0xff] }
 0x3bf   : > { %v1880_v50 = vadd.f32 %v9948_v5, %v10031_v44  ;;  %v15069_v5 = vld [vmem:[#allocation57_spill] sm:$0xff] }
 0x3c0   : > { %15053 = vst [vmem:[#allocation68_spill] sm:$0xff] %v10355_v16  ;;  %2327 = vmatmul.f32.gmra.mxu2 %v10355_v16  ;;  %2553 = vmatmul.f32.gmra.mxu0 %v10355_v16  ;;  %v15061_v16 = vld [vmem:[#allocation80_spill] sm:$0xff]  ;;  %v1990_v17 = vadd.f32 %v10101_v63, %v1877_v55 }
 0x3c1   : > { %v1799_v52 = vpop.f32.mrf.mxu3 }
 0x3c2   : > { %v1800_v31 = vadd.f32 %v1799_v52, %v1687_v32  ;;  %v10362_v15 = vpop.f32.mrf.mxu1 }
 0x3c4   : > { %v2091_v57 = vadd.f32 %v1800_v31, %v15056_v20  ;;  %v10386_v31 = vmax.f32 %v2064_v47, 0.0 }
 0x3c5   : > { %2624 = vmatmul.f32.gmra.mxu1 %v10365_v59 }
 0x3c6   : > { %2398 = vmatmul.f32.gmra.mxu3 %v10365_v59  ;;  %v10376_v32 = vmax.f32 %v2091_v57, 0.0  ;;  %15060 = vst [vmem:[#allocation72_spill] sm:$0xff] %v10386_v31 }
 0x3c8   : > { %15057 = vst [vmem:[#allocation70_spill] sm:$0xff] %v10376_v32  ;;  %2330 = vmatmul.f32.gmra.mxu2 %v10376_v32  ;;  %2556 = vmatmul.f32.gmra.mxu0 %v10376_v32  ;;  %v2066_v32 = vadd.f32 %v1987_v30, %v15063_v51 }
 0x3c9   : > { %v1802_v20 = vpop.f32.mrf.mxu3 }
 0x3ca   : > { %v1803_v52 = vadd.f32 %v1802_v20, %v1690_v33  ;;  %v10383_v23 = vpop.f32.mrf.mxu1  ;;  %v10396_v33 = vpop.f32.mrf.mxu0  ;;  %v10407_v47 = vmax.f32 %v2066_v32, 0.0  ;;  %v1883_v32 = vadd.f32 %v9963_v6, %v10031_v44  ;;  %v1886_v6 = vadd.f32 %v9978_v4, %v10031_v44  ;;  %v15075_v4 = vld [vmem:[#allocation61_spill] sm:$0xff] }
 0x3cb   : > { %15059 = vst [vmem:[#allocation40_spill] sm:$0xff] %v10383_v23  ;;  %v10398_v20 = vpop.f32.mrf.mxu2 }
 0x3cc   : > { %v2093_v57 = vadd.f32 %v1803_v52, %v15061_v16  ;;  %15065 = vst [vmem:[#allocation44_spill] sm:$0xff] %v10407_v47  ;;  %v15066_v52 = vld [vmem:[#allocation55_spill] sm:$0xff] }
 0x3cd   : > { %2627 = vmatmul.f32.gmra.mxu1 %v10386_v31  ;;  %v2068_v30 = vadd.f32 %v1990_v17, %v15066_v52 }
 0x3ce   : > { %2401 = vmatmul.f32.gmra.mxu3 %v10386_v31  ;;  %v10391_v26 = vmax.f32 %v2093_v57, 0.0 }
 0x3cf   : > { %v10419_v31 = vmax.f32 %v2068_v30, 0.0 }
 0x3d0   : > { %15062 = vst [vmem:[#allocation42_spill] sm:$0xff] %v10391_v26  ;;  %2333 = vmatmul.f32.gmra.mxu2 %v10391_v26  ;;  %2559 = vmatmul.f32.gmra.mxu0 %v10391_v26  ;;  %v1993_v26 = vadd.f32 %v10122_v28, %v1880_v50 }
 0x3d1   : > { %v10402_v1 = vpop.f32.mrf.mxu3  ;;  %15068 = vst [vmem:[#allocation46_spill] sm:$0xff] %v10419_v31 }
 0x3d2   : > { %15064 = vst [vmem:[#allocation74_spill] sm:$0xff] %v10402_v1  ;;  %v10404_v16 = vpop.f32.mrf.mxu1  ;;  %v10421_v63 = vpop.f32.mrf.mxu0  ;;  %v2070_v55 = vadd.f32 %v1993_v26, %v15069_v5  ;;  %v15072_v26 = vld [vmem:[#allocation59_spill] sm:$0xff] }
 0x3d3   : > { %v10433_v28 = vpop.f32.mrf.mxu2 }
 0x3d4   : > { %v10435_v50 = vmax.f32 %v2070_v55, 0.0 }
 0x3d5   : > { %2630 = vmatmul.f32.gmra.mxu1 %v10407_v47 }
 0x3d6   : > { %2404 = vmatmul.f32.gmra.mxu3 %v10407_v47  ;;  %v1996_v47 = vadd.f32 %v10139_v39, %v1883_v32  ;;  %15071 = vst [vmem:[#allocation47_spill] sm:$0xff] %v10435_v50  ;;  %v1999_v39 = vadd.f32 %v10160_v49, %v1886_v6 }
 0x3d8   : > { %v2072_v5 = vadd.f32 %v1996_v47, %v15072_v26  ;;  %v2074_v61 = vadd.f32 %v1999_v39, %v15075_v4 }
 0x3d9   : > { %v10414_v57 = vpop.f32.mrf.mxu3 }
 0x3da   : > { %15067 = vst [vmem:[#allocation76_spill] sm:$0xff] %v10414_v57  ;;  %v10416_v51 = vpop.f32.mrf.mxu1  ;;  %v10438_v30 = vpop.f32.mrf.mxu0  ;;  %v10449_v32 = vmax.f32 %v2072_v5, 0.0  ;;  %v10465_v6 = vmax.f32 %v2074_v61, 0.0  ;;  %v1892_v5 = vadd.f32 %v10009_v2, %v10031_v44  ;;  %v15080_v2 = vld [vmem:[#allocation83_spill] sm:$0xff] }
 0x3db   : > { %v10451_v55 = vpop.f32.mrf.mxu2 }
 0x3dc   : > { %15074 = vst [vmem:[#allocation52_spill] sm:$0xff] %v10449_v32 }
 0x3dd   : > { %2633 = vmatmul.f32.gmra.mxu1 %v10419_v31  ;;  %15077 = vst [vmem:[#allocation57_spill] sm:$0xff] %v10465_v6 }
 0x3de   : > { %2407 = vmatmul.f32.gmra.mxu3 %v10419_v31 }
 0x3e1   : > { %v10428_v17 = vpop.f32.mrf.mxu3 }
 0x3e2   : > { %15070 = vst [vmem:[#allocation78_spill] sm:$0xff] %v10428_v17  ;;  %v10430_v52 = vpop.f32.mrf.mxu1  ;;  %v10458_v47 = vpop.f32.mrf.mxu0 }
 0x3e3   : > { %v10472_v39 = vpop.f32.mrf.mxu2 }
 0x3e5   : > { %2636 = vmatmul.f32.gmra.mxu1 %v10435_v50 }
 0x3e6   : > { %2410 = vmatmul.f32.gmra.mxu3 %v10435_v50  ;;  %v1889_v50 = vadd.f32 %v9992_v18, %v10031_v44  ;;  %v15078_v18 = vld [vmem:[#allocation63_spill] sm:$0xff] }
 0x3e8   : > { %v2002_v49 = vadd.f32 %v10181_v3, %v1889_v50  ;;  %v2005_v3 = vadd.f32 %v10202_v8, %v1892_v5  ;;  %v1895_v50 = vadd.f32 %v15080_v2, %v10031_v44  ;;  %v15083_v5 = vld [vmem:[#allocation15_spill] sm:$0xff] }
 0x3e9   : > { %v10444_v31 = vpop.f32.mrf.mxu3  ;;  %v1898_v2 = vadd.f32 %v15083_v5, %v10031_v44  ;;  %v1901_v5 = vadd.f32 %v10065_v21, %v10031_v44  ;;  %v15088_v21 = vld [vmem:[#allocation71_spill] sm:$0xff] }
 0x3ea   : > { %15073 = vst [vmem:[#allocation80_spill] sm:$0xff] %v10444_v31  ;;  %v10446_v59 = vpop.f32.mrf.mxu1  ;;  %v10476_v27 = vpop.f32.mrf.mxu0  ;;  %v2008_v38 = vadd.f32 %v10223_v37, %v1895_v50 }
 0x3eb   : > { %v2011_v29 = vadd.f32 %v10240_v40, %v1898_v2  ;;  %v2014_v40 = vadd.f32 %v10261_v46, %v1901_v5 }
 0x3ed   : > { %2639 = vmatmul.f32.gmra.mxu1 %v10449_v32  ;;  %v2084_v34 = vadd.f32 %v2014_v40, %v15088_v21 }
 0x3ee   : > { %2413 = vmatmul.f32.gmra.mxu3 %v10449_v32  ;;  %v2076_v32 = vadd.f32 %v2002_v49, %v15078_v18  ;;  %v15081_v49 = vld [vmem:[#allocation65_spill] sm:$0xff] }
 0x3ef   : > { %v2078_v18 = vadd.f32 %v2005_v3, %v15081_v49  ;;  %v15084_v3 = vld [vmem:[#allocation67_spill] sm:$0xff]  ;;  %v10539_v5 = vmax.f32 %v2084_v34, 0.0  ;;  %v1910_v34 = vadd.f32 %v10142_v12, %v10031_v44 }
 0x3f0   : > { %v10481_v61 = vmax.f32 %v2076_v32, 0.0  ;;  %v2080_v49 = vadd.f32 %v2008_v38, %v15084_v3  ;;  %v15086_v38 = vld [vmem:[#allocation69_spill] sm:$0xff] }
 0x3f1   : > { %v10460_v26 = vpop.f32.mrf.mxu3  ;;  %v10495_v8 = vmax.f32 %v2078_v18, 0.0  ;;  %v2082_v3 = vadd.f32 %v2011_v29, %v15086_v38  ;;  %15089 = vst [vmem:[#allocation65_spill] sm:$0xff] %v10539_v5 }
 0x3f2   : > { %15076 = vst [vmem:[#allocation55_spill] sm:$0xff] %v10460_v26  ;;  %v10462_v19 = vpop.f32.mrf.mxu1  ;;  %v10497_v32 = vpop.f32.mrf.mxu0  ;;  %v10511_v50 = vmax.f32 %v2080_v49, 0.0 }
 0x3f3   : > { %15079 = vst [vmem:[#allocation59_spill] sm:$0xff] %v10481_v61  ;;  %v10525_v2 = vmax.f32 %v2082_v3, 0.0  ;;  %v1907_v3 = vadd.f32 %v10118_v58, %v10031_v44 }
 0x3f4   : > { %15082 = vst [vmem:[#allocation61_spill] sm:$0xff] %v10495_v8 }
 0x3f5   : > { %2642 = vmatmul.f32.gmra.mxu1 %v10465_v6  ;;  %15085 = vst [vmem:[#allocation63_spill] sm:$0xff] %v10511_v50  ;;  %v2020_v9 = vadd.f32 %v10303_v45, %v1907_v3  ;;  %v1913_v45 = vadd.f32 %v10166_v41, %v10031_v44  ;;  %v15095_v3 = vld [vmem:[#allocation77_spill] sm:$0xff]  ;;  %v15099_v41 = vld [vmem:[#allocation79_spill] sm:$0xff] }
 0x3f6   : > { %2416 = vmatmul.f32.gmra.mxu3 %v10465_v6  ;;  %v10488_v6 = vpop.f32.mrf.mxu2  ;;  %15087 = vst [vmem:[#allocation83_spill] sm:$0xff] %v10525_v2 }
 0x3f9   : > { %v10474_v4 = vpop.f32.mrf.mxu3 }
 0x3fa   : > { %v10478_v62 = vpop.f32.mrf.mxu1  ;;  %v10514_v18 = vpop.f32.mrf.mxu0 }
 0x3fd   : > { %2645 = vmatmul.f32.gmra.mxu1 %v10481_v61 }
 0x3fe   : > { %2419 = vmatmul.f32.gmra.mxu3 %v10481_v61  ;;  %v10509_v37 = vpop.f32.mrf.mxu2 }
 0x401   : > { %v10490_v10 = vpop.f32.mrf.mxu3 }
 0x402   : > { %v10492_v42 = vpop.f32.mrf.mxu1  ;;  %v2509_v29 = vpop.f32.mrf.mxu0 }
 0x405   : > { %2648 = vmatmul.f32.gmra.mxu1 %v10495_v8 }
 0x406   : > { %2422 = vmatmul.f32.gmra.mxu3 %v10495_v8  ;;  %v10527_v49 = vpop.f32.mrf.mxu2 }
 0x409   : > { %v10504_v61 = vpop.f32.mrf.mxu3 }
 0x40a   : > { %v10506_v1 = vpop.f32.mrf.mxu1  ;;  %v2512_v21 = vpop.f32.mrf.mxu0 }
 0x40d   : > { %2651 = vmatmul.f32.gmra.mxu1 %v10511_v50 }
 0x40e   : > { %2425 = vmatmul.f32.gmra.mxu3 %v10511_v50  ;;  %v1904_v50 = vadd.f32 %v10095_v13, %v10031_v44  ;;  %v2283_v7 = vpop.f32.mrf.mxu2 }
 0x410   : > { %v2017_v46 = vadd.f32 %v10282_v35, %v1904_v50  ;;  %v15092_v35 = vld [vmem:[#allocation75_spill] sm:$0xff] }
 0x411   : > { %v10520_v8 = vpop.f32.mrf.mxu3  ;;  %v2088_v58 = vadd.f32 %v2020_v9, %v15092_v35  ;;  %v2026_v35 = vadd.f32 %v10341_v56, %v1913_v45 }
 0x412   : > { %v10522_v57 = vpop.f32.mrf.mxu1  ;;  %v10559_v26 = vpop.f32.mrf.mxu0 }
 0x413   : > { %v10557_v36 = vmax.f32 %v2088_v58, 0.0  ;;  %15094 = vst [vmem:[#allocation69_spill] sm:$0xff] %v10559_v26  ;;  %v1916_v58 = vadd.f32 %v10196_v60, %v10031_v44 }
 0x415   : > { %2654 = vmatmul.f32.gmra.mxu1 %v10525_v2  ;;  %15093 = vst [vmem:[#allocation67_spill] sm:$0xff] %v10557_v36  ;;  %v2029_v26 = vadd.f32 %v10362_v15, %v1916_v58 }
 0x416   : > { %2428 = vmatmul.f32.gmra.mxu3 %v10525_v2  ;;  %v15090_v2 = vld [vmem:[#allocation73_spill] sm:$0xff]  ;;  %v2286_v50 = vpop.f32.mrf.mxu2 }
 0x417   : > { %v2086_v13 = vadd.f32 %v2017_v46, %v15090_v2 }
 0x419   : > { %v10534_v38 = vpop.f32.mrf.mxu3  ;;  %v10549_v23 = vmax.f32 %v2086_v13, 0.0 }
 0x41a   : > { %v10536_v17 = vpop.f32.mrf.mxu1 }
 0x41b   : > { %15091 = vst [vmem:[#allocation15_spill] sm:$0xff] %v10549_v23 }
 0x41d   : > { %2657 = vmatmul.f32.gmra.mxu1 %v10539_v5 }
 0x41e   : > { %2431 = vmatmul.f32.gmra.mxu3 %v10539_v5  ;;  %v2023_v5 = vadd.f32 %v10324_v48, %v1910_v34  ;;  %v10572_v34 = vpop.f32.mrf.mxu0 }
 0x41f   : > { %15098 = vst [vmem:[#allocation75_spill] sm:$0xff] %v10572_v34 }
 0x420   : > { %v2090_v12 = vadd.f32 %v2023_v5, %v15095_v3 }
 0x421   : > { %v10546_v40 = vpop.f32.mrf.mxu3 }
 0x422   : > { %v2613_v31 = vpop.f32.mrf.mxu1  ;;  %v10569_v48 = vmax.f32 %v2090_v12, 0.0  ;;  %v15102_v12 = vld [vmem:[#allocation81_spill] sm:$0xff] }
 0x424   : > { %15097 = vst [vmem:[#allocation73_spill] sm:$0xff] %v10569_v48 }
 0x425   : > { %2660 = vmatmul.f32.gmra.mxu1 %v10549_v23 }
 0x426   : > { %2434 = vmatmul.f32.gmra.mxu3 %v10549_v23  ;;  %v10567_v23 = vpop.f32.mrf.mxu2 }
 0x427   : > { %15096 = vst [vmem:[#allocation71_spill] sm:$0xff] %v10567_v23  ;;  %v2094_v23 = vadd.f32 %v2029_v26, %v15102_v12 }
 0x429   : > { %v2387_v2 = vpop.f32.mrf.mxu3 }
 0x42a   : > { %v2616_v46 = vpop.f32.mrf.mxu1 }
 0x42b   : > { %v2617_v26 = vadd.f32 %v2616_v46, %v10497_v32  ;;  %v2608_v32 = vadd.f32 %v10522_v57, %v10438_v30  ;;  %v2602_v57 = vadd.f32 %v10492_v42, %v10396_v33  ;;  %v2379_v42 = vadd.f32 %v10520_v8, %v10433_v28 }
 0x42c   : > { %v2593_v33 = vadd.f32 %v10446_v59, %v10320_v53  ;;  %v2373_v28 = vadd.f32 %v10490_v10, %v10373_v25  ;;  %v2587_v53 = vadd.f32 %v10416_v51, %v10267_v0  ;;  %v2370_v59 = vadd.f32 %v10474_v4, %v10348_v54  ;;  %v15109_v10 = vld [vmem:[#allocation48_spill] sm:$0xff]  ;;  %v15112_v0 = vld [vmem:[#allocation62_spill] sm:$0xff] }
 0x42d   : > { %2663 = vmatmul.f32.gmra.mxu1 %v10557_v36  ;;  %v15110_v25 = vld [vmem:[#allocation40_spill] sm:$0xff] }
 0x42e   : > { %2437 = vmatmul.f32.gmra.mxu3 %v10557_v36  ;;  %v2092_v36 = vadd.f32 %v2026_v35, %v15099_v41  ;;  %v10581_v45 = vpop.f32.mrf.mxu2  ;;  %v10588_v35 = vmax.f32 %v2094_v23, 0.0  ;;  %v15113_v51 = vld [vmem:[#allocation80_spill] sm:$0xff] }
 0x42f   : > { %15101 = vst [vmem:[#allocation79_spill] sm:$0xff] %v10581_v45  ;;  %v2364_v54 = vadd.f32 %v15113_v51, %v15112_v0 }
 0x430   : > { %v10579_v56 = vmax.f32 %v2092_v36, 0.0  ;;  %15103 = vst [vmem:[#allocation81_spill] sm:$0xff] %v10588_v35 }
 0x431   : > { %v2390_v13 = vpop.f32.mrf.mxu3 }
 0x432   : > { %v2619_v9 = vpop.f32.mrf.mxu1  ;;  %15100 = vst [vmem:[#allocation77_spill] sm:$0xff] %v10579_v56 }
 0x433   : > { %v2620_v15 = vadd.f32 %v2619_v9, %v10514_v18  ;;  %v15119_v9 = vld [vmem:[#allocation74_spill] sm:$0xff] }
 0x435   : > { %2666 = vmatmul.f32.gmra.mxu1 %v10569_v48 }
 0x436   : > { %2440 = vmatmul.f32.gmra.mxu3 %v10569_v48  ;;  %v10586_v48 = vpop.f32.mrf.mxu0  ;;  %v10592_v36 = vpop.f32.mrf.mxu2 }
 0x437   : > { %15104 = vst [vmem:[#allocation94_spill] sm:$0xff] %v10592_v36 }
 0x439   : > { %v2393_v5 = vpop.f32.mrf.mxu3 }
 0x43a   : > { %v2622_v3 = vpop.f32.mrf.mxu1  ;;  %v2394_v18 = vadd.f32 %v2393_v5, %v10527_v49  ;;  %v8576_v49 = vld [vmem:[#allocation2] sm:$0xff] }
 0x43b   : > { %v2623_v41 = vadd.f32 %v2622_v3, %v2509_v29  ;;  %v2614_v29 = vadd.f32 %v2613_v31, %v10476_v27  ;;  %v2605_v27 = vadd.f32 %v10506_v1, %v10421_v63  ;;  %v2388_v31 = vadd.f32 %v2387_v2, %v10488_v6 }
 0x43c   : > { %v2599_v1 = vadd.f32 %v10478_v62, %v10371_v11  ;;  %v2382_v63 = vadd.f32 %v10534_v38, %v10451_v55  ;;  %v2596_v6 = vadd.f32 %v10462_v19, %v10346_v43  ;;  %v2376_v62 = vadd.f32 %v10504_v61, %v10398_v20  ;;  %v15116_v38 = vld [vmem:[#allocation24_spill] sm:$0xff] }
 0x43d   : > { %2669 = vmatmul.f32.gmra.mxu1 %v10579_v56  ;;  %v2590_v19 = vadd.f32 %v10430_v52, %v10297_v24  ;;  %v2584_v24 = vadd.f32 %v10404_v16, %v10243_v14  ;;  %v15108_v52 = vld [vmem:[#allocation55_spill] sm:$0xff]  ;;  %v2581_v61 = vadd.f32 %v15110_v25, %v15109_v10  ;;  %v15115_v14 = vld [vmem:[#allocation78_spill] sm:$0xff] }
 0x43e   : > { %2443 = vmatmul.f32.gmra.mxu3 %v10579_v56  ;;  %v10596_v12 = vpop.f32.mrf.mxu0  ;;  %v10607_v46 = vpop.f32.mrf.mxu2  ;;  %v2367_v55 = vadd.f32 %v15108_v52, %v10322_v22  ;;  %v8583_v25 = vld [vmem:[#allocation2 + $0x70] sm:$0xff]  ;;  %v8588_v56 = vld [vmem:[#allocation2 + $0xc0] sm:$0xff] }
 0x43f   : > { %15105 = vst [vmem:[#allocation95_spill] sm:$0xff] %v10607_v46  ;;  %v8589_v46 = vld [vmem:[#allocation2 + $0xd0] sm:$0xff] }
 0x441   : > { %v2396_v34 = vpop.f32.mrf.mxu3 }
 0x442   : > { %v2625_v44 = vpop.f32.mrf.mxu1  ;;  %v2397_v3 = vadd.f32 %v2396_v34, %v2283_v7 }
 0x443   : > { %v2626_v60 = vadd.f32 %v2625_v44, %v2512_v21  ;;  %v2611_v44 = vadd.f32 %v10536_v17, %v10458_v47  ;;  %v2385_v47 = vadd.f32 %v10546_v40, %v10472_v39  ;;  %v15117_v40 = vld [vmem:[#allocation76_spill] sm:$0xff] }
 0x444   : > { %v2358_v2 = vadd.f32 %v15117_v40, %v15116_v38  ;;  %v8585_v38 = vld [vmem:[#allocation2 + $0x90] sm:$0xff] }
 0x445   : > { %2672 = vmatmul.f32.gmra.mxu1 %v10588_v35  ;;  %2909 = vmatpush.msra.mxu0 %v2626_v60 }
 0x446   : > { %2446 = vmatmul.f32.gmra.mxu3 %v10588_v35  ;;  %v10618_v30 = vpop.f32.mrf.mxu0  ;;  %v10640_v43 = vpop.f32.mrf.mxu2 }
 0x447   : > { %2910 = vmatpush.msra.mxu0 %v2623_v41 }
 0x449   : > { %v2399_v58 = vpop.f32.mrf.mxu3  ;;  %2911 = vmatpush.msra.mxu0 %v2620_v15  ;;  %v8577_v15 = vld [vmem:[#allocation2 + $0x10] sm:$0xff] }
 0x44a   : > { %v2400_v21 = vadd.f32 %v2399_v58, %v2286_v50  ;;  %v10598_v23 = vpop.f32.mrf.mxu1  ;;  %v2391_v50 = vadd.f32 %v2390_v13, %v10509_v37  ;;  %v15114_v37 = vld [vmem:[#allocation58_spill] sm:$0xff]  ;;  %v15118_v13 = vld [vmem:[#allocation20_spill] sm:$0xff] }
 0x44b   : > { %2912 = vmatpush.msra.mxu0 %v2617_v26  ;;  %v2361_v16 = vadd.f32 %v15115_v14, %v15114_v37  ;;  %v2355_v34 = vadd.f32 %v15119_v9, %v15118_v13  ;;  %v8584_v37 = vld [vmem:[#allocation2 + $0x80] sm:$0xff] }
 0x44c   : > { %2683 = vmatpush.msra.mxu2 %v2400_v21  ;;  %v8586_v9 = vld [vmem:[#allocation2 + $0xa0] sm:$0xff] }
 0x44d   : > { %2913 = vmatpush.msra.mxu0 %v2614_v29 }
 0x44e   : > { %2684 = vmatpush.msra.mxu2 %v2397_v3  ;;  %v10648_v20 = vpop.f32.mrf.mxu0  ;;  %v10664_v22 = vpop.f32.mrf.mxu2  ;;  %v8578_v3 = vld [vmem:[#allocation2 + $0x20] sm:$0xff] }
 0x44f   : > { %2914 = vmatpush.msra.mxu0 %v2611_v44 }
 0x450   : > { %2685 = vmatpush.msra.mxu2 %v2394_v18 }
 0x451   : > { %v10611_v7 = vpop.f32.mrf.mxu3  ;;  %2915 = vmatpush.msra.mxu0 %v2608_v32 }
 0x452   : > { %15106 = vst [vmem:[#allocation96_spill] sm:$0xff] %v10611_v7  ;;  %2686 = vmatpush.msra.mxu2 %v2391_v50  ;;  %v10614_v17 = vpop.f32.mrf.mxu1 }
 0x453   : > { %2916 = vmatpush.msra.mxu0 %v2605_v27  ;;  %v8579_v27 = vld [vmem:[#allocation2 + $0x30] sm:$0xff] }
 0x454   : > { %2687 = vmatpush.msra.mxu2 %v2388_v31 }
 0x455   : > { %2917 = vmatpush.msra.mxu0 %v2602_v57 }
 0x456   : > { %2688 = vmatpush.msra.mxu2 %v2385_v47  ;;  %v10670_v5 = vpop.f32.mrf.mxu0  ;;  %v10676_v26 = vpop.f32.mrf.mxu2 }
 0x457   : > { %2918 = vmatpush.msra.mxu0 %v2599_v1  ;;  %v8580_v1 = vld [vmem:[#allocation2 + $0x40] sm:$0xff] }
 0x458   : > { %2689 = vmatpush.msra.mxu2 %v2382_v63 }
 0x459   : > { %v10632_v39 = vpop.f32.mrf.mxu3  ;;  %2919 = vmatpush.msra.mxu0 %v2596_v6 }
 0x45a   : > { %15107 = vst [vmem:[#allocation97_spill] sm:$0xff] %v10632_v39  ;;  %2690 = vmatpush.msra.mxu2 %v2379_v42  ;;  %v10636_v11 = vpop.f32.mrf.mxu1 }
 0x45b   : > { %2920 = vmatpush.msra.mxu0 %v2593_v33  ;;  %v8581_v33 = vld [vmem:[#allocation2 + $0x50] sm:$0xff] }
 0x45c   : > { %2691 = vmatpush.msra.mxu2 %v2376_v62 }
 0x45d   : > { %2921 = vmatpush.msra.mxu0 %v2590_v19 }
 0x45e   : > { %2692 = vmatpush.msra.mxu2 %v2373_v28  ;;  %v10680_v21 = vpop.f32.mrf.mxu0  ;;  %v10684_v44 = vpop.f32.mrf.mxu2 }
 0x45f   : > { %2922 = vmatpush.msra.mxu0 %v2587_v53 }
 0x460   : > { %2693 = vmatpush.msra.mxu2 %v2370_v59  ;;  %v8582_v59 = vld [vmem:[#allocation2 + $0x60] sm:$0xff] }
 0x461   : > { %v10656_v8 = vpop.f32.mrf.mxu3  ;;  %2923 = vmatpush.msra.mxu0 %v2584_v24 }
 0x462   : > { %15111 = vst [vmem:[#allocation55_spill] sm:$0xff] %v10656_v8  ;;  %2694 = vmatpush.msra.mxu2 %v2367_v55  ;;  %v10660_v4 = vpop.f32.mrf.mxu1 }
 0x463   : > { %2924 = vmatpush.msra.mxu0 %v2581_v61 }
 0x464   : > { %2695 = vmatpush.msra.mxu2 %v2364_v54  ;;  %2925 = vmatmul.f32.vlgmr.msra.gmra.mxu0 %v8576_v49 }
 0x466   : > { %2696 = vmatpush.msra.mxu2 %v2361_v16  ;;  %v10690_v50 = vpop.f32.mrf.mxu0  ;;  %v10696_v47 = vpop.f32.mrf.mxu2 }
 0x468   : > { %2697 = vmatpush.msra.mxu2 %v2358_v2 }
 0x469   : > { %v10672_v60 = vpop.f32.mrf.mxu3 }
 0x46a   : > { %15120 = vst [vmem:[#allocation48_spill] sm:$0xff] %v10672_v60  ;;  %2698 = vmatpush.msra.mxu2 %v2355_v34  ;;  %v10674_v41 = vpop.f32.mrf.mxu1 }
 0x46b   : > { %2699 = vmatmul.f32.vlgmr.msra.gmra.mxu2 %v8576_v49 }
 0x46c   : > { %2928 = vmatmul.f32.gmra.mxu0 %v8577_v15 }
 0x46e   : > { %v10698_v63 = vpop.f32.mrf.mxu0  ;;  %v10704_v62 = vpop.f32.mrf.mxu2 }
 0x471   : > { %v10678_v58 = vpop.f32.mrf.mxu3 }
 0x472   : > { %v10682_v29 = vpop.f32.mrf.mxu1 }
 0x473   : > { %2702 = vmatmul.f32.gmra.mxu2 %v8577_v15 }
 0x474   : > { %2931 = vmatmul.f32.gmra.mxu0 %v8578_v3 }
 0x476   : > { %v10706_v19 = vpop.f32.mrf.mxu0  ;;  %v10712_v24 = vpop.f32.mrf.mxu2 }
 0x479   : > { %v10686_v18 = vpop.f32.mrf.mxu3 }
 0x47a   : > { %v10688_v32 = vpop.f32.mrf.mxu1 }
 0x47b   : > { %2705 = vmatmul.f32.gmra.mxu2 %v8578_v3 }
 0x47c   : > { %2934 = vmatmul.f32.gmra.mxu0 %v8579_v27 }
 0x47e   : > { %v2548_v55 = vpop.f32.mrf.mxu0  ;;  %v2322_v61 = vpop.f32.mrf.mxu2 }
 0x481   : > { %v10692_v31 = vpop.f32.mrf.mxu3 }
 0x482   : > { %v10694_v57 = vpop.f32.mrf.mxu1 }
 0x483   : > { %2708 = vmatmul.f32.gmra.mxu2 %v8579_v27 }
 0x484   : > { %2937 = vmatmul.f32.gmra.mxu0 %v8580_v1 }
 0x486   : > { %v2551_v54 = vpop.f32.mrf.mxu0  ;;  %v2325_v49 = vpop.f32.mrf.mxu2 }
 0x489   : > { %v10700_v6 = vpop.f32.mrf.mxu3 }
 0x48a   : > { %v10702_v42 = vpop.f32.mrf.mxu1 }
 0x48b   : > { %2711 = vmatmul.f32.gmra.mxu2 %v8580_v1  ;;  %v8587_v1 = vld [vmem:[#allocation2 + $0xb0] sm:$0xff] }
 0x48c   : > { %2940 = vmatmul.f32.gmra.mxu0 %v8581_v33 }
 0x48e   : > { %v2554_v40 = vpop.f32.mrf.mxu0  ;;  %v2328_v34 = vpop.f32.mrf.mxu2 }
 0x491   : > { %v10708_v28 = vpop.f32.mrf.mxu3 }
 0x492   : > { %v10710_v53 = vpop.f32.mrf.mxu1 }
 0x493   : > { %2714 = vmatmul.f32.gmra.mxu2 %v8581_v33 }
 0x494   : > { %2943 = vmatmul.f32.gmra.mxu0 %v8582_v59 }
 0x496   : > { %v2557_v15 = vpop.f32.mrf.mxu0  ;;  %v2331_v33 = vpop.f32.mrf.mxu2 }
 0x499   : > { %v10714_v52 = vpop.f32.mrf.mxu3 }
 0x49a   : > { %v2658_v10 = vpop.f32.mrf.mxu1 }
 0x49b   : > { %2717 = vmatmul.f32.gmra.mxu2 %v8582_v59 }
 0x49c   : > { %2946 = vmatmul.f32.gmra.mxu0 %v8583_v25 }
 0x49e   : > { %v2334_v39 = vpop.f32.mrf.mxu2 }
 0x4a1   : > { %v10716_v0 = vpop.f32.mrf.mxu3 }
 0x4a2   : > { %v2661_v51 = vpop.f32.mrf.mxu1 }
 0x4a3   : > { %2720 = vmatmul.f32.gmra.mxu2 %v8583_v25  ;;  %v2560_v25 = vpop.f32.mrf.mxu0 }
 0x4a4   : > { %2949 = vmatmul.f32.gmra.mxu0 %v8584_v37 }
 0x4a9   : > { %v2435_v14 = vpop.f32.mrf.mxu3 }
 0x4aa   : > { %v2664_v16 = vpop.f32.mrf.mxu1 }
 0x4ab   : > { %2723 = vmatmul.f32.gmra.mxu2 %v8584_v37  ;;  %v2665_v45 = vadd.f32 %v2664_v16, %v2551_v54  ;;  %v8599_v16 = vld [vmem:[#allocation2 + $0x130] sm:$0xff] }
 0x4ac   : > { %2952 = vmatmul.f32.gmra.mxu0 %v8585_v38 }
 0x4b1   : > { %v2438_v2 = vpop.f32.mrf.mxu3 }
 0x4b2   : > { %v2667_v13 = vpop.f32.mrf.mxu1  ;;  %v2439_v54 = vadd.f32 %v2438_v2, %v2325_v49  ;;  %v8600_v2 = vld [vmem:[#allocation2 + $0x48] sm:$0xff] }
 0x4b3   : > { %2726 = vmatmul.f32.gmra.mxu2 %v8585_v38  ;;  %v2668_v38 = vadd.f32 %v2667_v13, %v2554_v40  ;;  %v8601_v13 = vld [vmem:[#allocation2 + $0x140] sm:$0xff] }
 0x4b4   : > { %2955 = vmatmul.f32.gmra.mxu0 %v8586_v9 }
 0x4b9   : > { %v2441_v3 = vpop.f32.mrf.mxu3 }
 0x4ba   : > { %v2670_v27 = vpop.f32.mrf.mxu1 }
 0x4bb   : > { %2729 = vmatmul.f32.gmra.mxu2 %v8586_v9  ;;  %v2671_v7 = vadd.f32 %v2670_v27, %v2557_v15  ;;  %v2662_v9 = vadd.f32 %v2661_v51, %v2548_v55  ;;  %v8603_v27 = vld [vmem:[#allocation2 + $0x150] sm:$0xff] }
 0x4bc   : > { %2958 = vmatmul.f32.gmra.mxu0 %v8587_v1 }
 0x4c1   : > { %v2444_v59 = vpop.f32.mrf.mxu3 }
 0x4c2   : > { %v2673_v35 = vpop.f32.mrf.mxu1  ;;  %v2445_v60 = vadd.f32 %v2444_v59, %v2331_v33  ;;  %v8604_v59 = vld [vmem:[#allocation2 + $0x68] sm:$0xff] }
 0x4c3   : > { %v2674_v37 = vadd.f32 %v2673_v35, %v2560_v25  ;;  %2732 = vmatmul.f32.gmra.mxu2 %v8587_v1  ;;  %v2659_v35 = vadd.f32 %v2658_v10, %v10706_v19  ;;  %v2442_v1 = vadd.f32 %v2441_v3, %v2328_v34  ;;  %v15130_v19 = vld [vmem:[#allocation96_spill] sm:$0xff]  ;;  %v8596_v10 = vld [vmem:[#allocation2 + $0x28] sm:$0xff] }
 0x4c4   : > { %2961 = vmatmul.f32.gmra.mxu0 %v8588_v56  ;;  %v8602_v3 = vld [vmem:[#allocation2 + $0x58] sm:$0xff] }
 0x4c5   : > { %3022 = vmatpush.msra.mxu1 %v2674_v37  ;;  %v8605_v37 = vld [vmem:[#allocation2 + $0x160] sm:$0xff] }
 0x4c7   : > { %3023 = vmatpush.msra.mxu1 %v2671_v7  ;;  %v2656_v7 = vadd.f32 %v10710_v53, %v10698_v63  ;;  %v2644_v63 = vadd.f32 %v10682_v29, %v10648_v20  ;;  %v2421_v20 = vadd.f32 %v10692_v31, %v10676_v26  ;;  %v8591_v29 = vld [vmem:[#allocation2 + $0xf0] sm:$0xff]  ;;  %v8594_v53 = vld [vmem:[#allocation2 + $0x18] sm:$0xff] }
 0x4c8   : > { %v15123_v31 = vld [vmem:[#allocation95_spill] sm:$0xff] }
 0x4c9   : > { %v2447_v8 = vpop.f32.mrf.mxu3  ;;  %3024 = vmatpush.msra.mxu1 %v2668_v38 }
 0x4ca   : > { %v2448_v36 = vadd.f32 %v2447_v8, %v2334_v39  ;;  %v2653_v39 = vadd.f32 %v10702_v42, %v10690_v50  ;;  %v8590_v8 = vld [vmem:[#allocation2 + $0xe0] sm:$0xff]  ;;  %v2430_v50 = vadd.f32 %v10714_v52, %v10704_v62  ;;  %v15129_v62 = vld [vmem:[#allocation71_spill] sm:$0xff] }
 0x4cb   : > { %3025 = vmatpush.msra.mxu1 %v2665_v45  ;;  %2735 = vmatmul.f32.gmra.mxu2 %v8588_v56  ;;  %v2436_v56 = vadd.f32 %v2435_v14, %v2322_v61  ;;  %v2650_v45 = vadd.f32 %v10694_v57, %v10680_v21  ;;  %v2641_v21 = vadd.f32 %v10674_v41, %v10618_v30  ;;  %v15121_v41 = vld [vmem:[#allocation75_spill] sm:$0xff]  ;;  %v15128_v42 = vld [vmem:[#allocation97_spill] sm:$0xff]  ;;  %v8598_v14 = vld [vmem:[#allocation2 + $0x38] sm:$0xff] }
 0x4cc   : > { %2796 = vmatpush.msra.mxu3 %v2448_v36  ;;  %2964 = vmatmul.f32.gmra.mxu0 %v8589_v46  ;;  %v2433_v36 = vadd.f32 %v10716_v0, %v10712_v24  ;;  %v2635_v57 = vadd.f32 %v10636_v11, %v10586_v48  ;;  %v2418_v30 = vadd.f32 %v10686_v18, %v10664_v22  ;;  %v15125_v22 = vld [vmem:[#allocation94_spill] sm:$0xff]  ;;  %v15126_v18 = vld [vmem:[#allocation55_spill] sm:$0xff]  ;;  %v8597_v61 = vld [vmem:[#allocation2 + $0x120] sm:$0xff] }
 0x4cd   : > { %3026 = vmatpush.msra.mxu1 %v2662_v9  ;;  %v8595_v52 = vld [vmem:[#allocation2 + $0x110] sm:$0xff]  ;;  %v8606_v9 = vld [vmem:[#allocation2 + $0x78] sm:$0xff] }
 0x4ce   : > { %2797 = vmatpush.msra.mxu3 %v2445_v60  ;;  %v2647_v60 = vadd.f32 %v10688_v32, %v10670_v5  ;;  %v2424_v5 = vadd.f32 %v10700_v6, %v10684_v44  ;;  %v2638_v32 = vadd.f32 %v10660_v4, %v10596_v12  ;;  %v2632_v44 = vadd.f32 %v10614_v17, %v15121_v41  ;;  %v15122_v4 = vld [vmem:[#allocation69_spill] sm:$0xff]  ;;  %v8592_v6 = vld [vmem:[#allocation2 + $0x8] sm:$0xff] }
 0x4cf   : > { %3027 = vmatpush.msra.mxu1 %v2659_v35  ;;  %v2415_v12 = vadd.f32 %v10678_v58, %v10640_v43  ;;  %v2629_v26 = vadd.f32 %v10598_v23, %v15122_v4  ;;  %v2409_v17 = vadd.f32 %v15126_v18, %v15125_v22  ;;  %v8593_v43 = vld [vmem:[#allocation2 + $0x100] sm:$0xff]  ;;  %v15127_v58 = vld [vmem:[#allocation79_spill] sm:$0xff]  ;;  %v3289_v41 = vld [vmem:[#allocation5 + $0x4c8] sm:$0xff] }
 0x4d0   : > { %2798 = vmatpush.msra.mxu3 %v2442_v1  ;;  %v2406_v23 = vadd.f32 %v15128_v42, %v15127_v58  ;;  %v8607_v35 = vld [vmem:[#allocation2 + $0x170] sm:$0xff]  ;;  %v8616_v58 = vld [vmem:[#allocation2 + $0xc8] sm:$0xff]  ;;  %v8617_v42 = vld [vmem:[#allocation2 + $0x1c0] sm:$0xff] }
 0x4d1   : > { %3028 = vmatpush.msra.mxu1 %v2656_v7  ;;  %v3282_v18 = vld [vmem:[#allocation5 + $0x490] sm:$0xff] }
 0x4d2   : > { %2799 = vmatpush.msra.mxu3 %v2439_v54  ;;  %v8608_v54 = vld [vmem:[#allocation2 + $0x88] sm:$0xff] }
 0x4d3   : > { %3029 = vmatpush.msra.mxu1 %v2653_v39  ;;  %2738 = vmatmul.f32.gmra.mxu2 %v8589_v46  ;;  %v2427_v46 = vadd.f32 %v10708_v28, %v10696_v47  ;;  %v15124_v47 = vld [vmem:[#allocation48_spill] sm:$0xff]  ;;  %v2403_v28 = vadd.f32 %v15130_v19, %v15129_v62  ;;  %v8609_v39 = vld [vmem:[#allocation2 + $0x180] sm:$0xff] }
 0x4d4   : > { %2800 = vmatpush.msra.mxu3 %v2436_v56  ;;  %2967 = vmatmul.f32.gmra.mxu0 %v8590_v8  ;;  %v2412_v48 = vadd.f32 %v15124_v47, %v15123_v31  ;;  %v3287_v31 = vld [vmem:[#allocation5 + $0x4b8] sm:$0xff]  ;;  %v3284_v47 = vld [vmem:[#allocation5 + $0x4a0] sm:$0xff] }
 0x4d5   : > { %3030 = vmatpush.msra.mxu1 %v2650_v45  ;;  %v8610_v45 = vld [vmem:[#allocation2 + $0x98] sm:$0xff]  ;;  %v3276_v19 = vld [vmem:[#allocation5 + $0x460] sm:$0xff] }
 0x4d6   : > { %2801 = vmatpush.msra.mxu3 %v2433_v36  ;;  %v3279_v62 = vld [vmem:[#allocation5 + $0x478] sm:$0xff] }
 0x4d7   : > { %3031 = vmatpush.msra.mxu1 %v2647_v60 }
 0x4d8   : > { %2802 = vmatpush.msra.mxu3 %v2430_v50  ;;  %v8612_v50 = vld [vmem:[#allocation2 + $0xa8] sm:$0xff] }
 0x4d9   : > { %3032 = vmatpush.msra.mxu1 %v2644_v63  ;;  %v3294_v63 = vld [vmem:[#allocation5 + $0x4f0] sm:$0xff] }
 0x4da   : > { %2803 = vmatpush.msra.mxu3 %v2427_v46  ;;  %v3295_v46 = vld [vmem:[#allocation5 + $0x4f8] sm:$0xff]  ;;  %3328 = vmatpush.msrb.mxu2 %v3294_v63  ;;  %v3265_v63 = vld [vmem:[#allocation5 + $0x408] sm:$0xff] }
 0x4db   : > { %3033 = vmatpush.msra.mxu1 %v2641_v21  ;;  %2741 = vmatmul.f32.gmra.mxu2 %v8590_v8  ;;  %v8611_v8 = vld [vmem:[#allocation2 + $0x190] sm:$0xff]  ;;  %v3292_v21 = vld [vmem:[#allocation5 + $0x4e0] sm:$0xff] }
 0x4dc   : > { %2804 = vmatpush.msra.mxu3 %v2424_v5  ;;  %2970 = vmatmul.f32.gmra.mxu0 %v8591_v29  ;;  %v8613_v5 = vld [vmem:[#allocation2 + $0x1a0] sm:$0xff] }
 0x4dd   : > { %3034 = vmatpush.msra.mxu1 %v2638_v32  ;;  %v3293_v32 = vld [vmem:[#allocation5 + $0x4e8] sm:$0xff]  ;;  %3554 = vmatpush.msrb.mxu0 %v3295_v46 }
 0x4de   : > { %2805 = vmatpush.msra.mxu3 %v2421_v20  ;;  %v3290_v20 = vld [vmem:[#allocation5 + $0x4d0] sm:$0xff]  ;;  %3329 = vmatpush.msrb.mxu2 %v3292_v21  ;;  %v8622_v21 = vld [vmem:[#allocation2 + $0xf8] sm:$0xff] }
 0x4df   : > { %3035 = vmatpush.msra.mxu1 %v2635_v57  ;;  %v3291_v57 = vld [vmem:[#allocation5 + $0x4d8] sm:$0xff]  ;;  %3555 = vmatpush.msrb.mxu0 %v3293_v32 }
 0x4e0   : > { %2806 = vmatpush.msra.mxu3 %v2418_v30  ;;  %3330 = vmatpush.msrb.mxu2 %v3290_v20  ;;  %v3288_v30 = vld [vmem:[#allocation5 + $0x4c0] sm:$0xff] }
 0x4e1   : > { %3036 = vmatpush.msra.mxu1 %v2632_v44  ;;  %v10755_v11 = vpop.f32.mrf.mxu0  ;;  %3556 = vmatpush.msrb.mxu0 %v3291_v57  ;;  %v8614_v44 = vld [vmem:[#allocation2 + $0xb8] sm:$0xff]  ;;  %v8624_v57 = vld [vmem:[#allocation2 + $0x108] sm:$0xff] }
 0x4e2   : > { %2807 = vmatpush.msra.mxu3 %v2415_v12  ;;  %3331 = vmatpush.msrb.mxu2 %v3288_v30  ;;  %v3286_v12 = vld [vmem:[#allocation5 + $0x4b0] sm:$0xff] }
 0x4e3   : > { %3037 = vmatpush.msra.mxu1 %v2629_v26  ;;  %2744 = vmatmul.f32.gmra.mxu2 %v8591_v29  ;;  %v8615_v26 = vld [vmem:[#allocation2 + $0x1b0] sm:$0xff] }
 0x4e4   : > { %2808 = vmatpush.msra.mxu3 %v2412_v48  ;;  %3038 = vmatmul.f32.vlgmr.msra.gmra.mxu1 %v8592_v6  ;;  %v3285_v48 = vld [vmem:[#allocation5 + $0x4a8] sm:$0xff] }
 0x4e5   : > { %2973 = vmatmul.f32.gmra.mxu0 %v8593_v43  ;;  %3332 = vmatpush.msrb.mxu2 %v3286_v12 }
 0x4e6   : > { %2809 = vmatpush.msra.mxu3 %v2409_v17  ;;  %3557 = vmatpush.msrb.mxu0 %v3289_v41  ;;  %v3283_v17 = vld [vmem:[#allocation5 + $0x498] sm:$0xff] }
 0x4e7   : > { %3333 = vmatpush.msrb.mxu2 %v3284_v47  ;;  %v10817_v41 = vld [vmem:[#allocation8 + $0x2] ss:$8 sm:$0x3] }
 0x4e8   : > { %2810 = vmatpush.msra.mxu3 %v2406_v23  ;;  %3558 = vmatpush.msrb.mxu0 %v3287_v31  ;;  %v3278_v23 = vld [vmem:[#allocation5 + $0x470] sm:$0xff]  ;;  %v8625_v47 = vld [vmem:[#allocation2 + $0x118] sm:$0xff] }
 0x4e9   : > { %v10763_v24 = vpop.f32.mrf.mxu0  ;;  %3334 = vmatpush.msrb.mxu2 %v3282_v18 }
 0x4ea   : > { %2811 = vmatpush.msra.mxu3 %v2403_v28  ;;  %3559 = vmatpush.msrb.mxu0 %v3285_v48 }
 0x4eb   : > { %2812 = vmatmul.f32.vlgmr.msra.gmra.mxu3 %v8592_v6  ;;  %2747 = vmatmul.f32.gmra.mxu2 %v8593_v43  ;;  %v3280_v6 = vld [vmem:[#allocation5 + $0x480] sm:$0xff]  ;;  %v3281_v43 = vld [vmem:[#allocation5 + $0x488] sm:$0xff] }
 0x4ec   : > { %3041 = vmatmul.f32.gmra.mxu1 %v8594_v53  ;;  %3560 = vmatpush.msrb.mxu0 %v3283_v17 }
 0x4ed   : > { %2976 = vmatmul.f32.gmra.mxu0 %v8595_v52  ;;  %3335 = vmatpush.msrb.mxu2 %v3280_v6  ;;  %v15131_v6 = vld [vmem:[#allocation49_spill] sm:$0xff] }
 0x4ee   : > { %v10765_v55 = vpop.f32.mrf.mxu2  ;;  %3561 = vmatpush.msrb.mxu0 %v3281_v43 }
 0x4ef   : > { %3336 = vmatpush.msrb.mxu2 %v3278_v23 }
 0x4f0   : > { %3562 = vmatpush.msrb.mxu0 %v3279_v62 }
 0x4f1   : > { %v10769_v51 = vpop.f32.mrf.mxu0  ;;  %3337 = vmatpush.msrb.mxu2 %v3276_v19 }
 0x4f3   : > { %2815 = vmatmul.f32.gmra.mxu3 %v8594_v53  ;;  %2750 = vmatmul.f32.gmra.mxu2 %v8595_v52  ;;  %v3277_v53 = vld [vmem:[#allocation5 + $0x468] sm:$0xff]  ;;  %v3274_v52 = vld [vmem:[#allocation5 + $0x450] sm:$0xff] }
 0x4f4   : > { %3044 = vmatmul.f32.gmra.mxu1 %v8596_v10  ;;  %3563 = vmatpush.msrb.mxu0 %v3277_v53 }
 0x4f5   : > { %2979 = vmatmul.f32.gmra.mxu0 %v8597_v61  ;;  %3338 = vmatpush.msrb.mxu2 %v3274_v52 }
 0x4f6   : > { %v10767_v0 = vpop.f32.mrf.mxu2 }
 0x4f9   : > { %v10773_v40 = vpop.f32.mrf.mxu0 }
 0x4fb   : > { %2818 = vmatmul.f32.gmra.mxu3 %v8596_v10  ;;  %2753 = vmatmul.f32.gmra.mxu2 %v8597_v61  ;;  %v3275_v61 = vld [vmem:[#allocation5 + $0x458] sm:$0xff] }
 0x4fc   : > { %3047 = vmatmul.f32.gmra.mxu1 %v8598_v14  ;;  %3564 = vmatpush.msrb.mxu0 %v3275_v61  ;;  %v15133_v61 = vld [vmem:[#allocation53_spill] sm:$0xff] }
 0x4fd   : > { %2982 = vmatmul.f32.gmra.mxu0 %v8599_v16 }
 0x4fe   : > { %v10771_v49 = vpop.f32.mrf.mxu2 }
 0x501   : > { %v10777_v15 = vpop.f32.mrf.mxu0 }
 0x503   : > { %2821 = vmatmul.f32.gmra.mxu3 %v8598_v14  ;;  %2756 = vmatmul.f32.gmra.mxu2 %v8599_v16  ;;  %v3272_v14 = vld [vmem:[#allocation5 + $0x440] sm:$0xff]  ;;  %v8618_v16 = vld [vmem:[#allocation2 + $0xd8] sm:$0xff] }
 0x504   : > { %3050 = vmatmul.f32.gmra.mxu1 %v8600_v2  ;;  %3339 = vmatpush.msrb.mxu2 %v3272_v14 }
 0x505   : > { %2985 = vmatmul.f32.gmra.mxu0 %v8601_v13 }
 0x506   : > { %v10775_v34 = vpop.f32.mrf.mxu2 }
 0x509   : > { %v10781_v25 = vpop.f32.mrf.mxu0 }
 0x50b   : > { %2824 = vmatmul.f32.gmra.mxu3 %v8600_v2  ;;  %2759 = vmatmul.f32.gmra.mxu2 %v8601_v13  ;;  %v8619_v2 = vld [vmem:[#allocation2 + $0x1d0] sm:$0xff]  ;;  %v3273_v13 = vld [vmem:[#allocation5 + $0x448] sm:$0xff] }
 0x50c   : > { %3053 = vmatmul.f32.gmra.mxu1 %v8602_v3  ;;  %3565 = vmatpush.msrb.mxu0 %v3273_v13  ;;  %v8627_v13 = vld [vmem:[#allocation2 + $0x138] sm:$0xff] }
 0x50d   : > { %2988 = vmatmul.f32.gmra.mxu0 %v8603_v27 }
 0x50e   : > { %v10779_v33 = vpop.f32.mrf.mxu2 }
 0x511   : > { %v10785_v1 = vpop.f32.mrf.mxu0 }
 0x513   : > { %2827 = vmatmul.f32.gmra.mxu3 %v8602_v3  ;;  %2762 = vmatmul.f32.gmra.mxu2 %v8603_v27  ;;  %v3270_v3 = vld [vmem:[#allocation5 + $0x430] sm:$0xff]  ;;  %v3271_v27 = vld [vmem:[#allocation5 + $0x438] sm:$0xff] }
 0x514   : > { %3056 = vmatmul.f32.gmra.mxu1 %v8604_v59  ;;  %3340 = vmatpush.msrb.mxu2 %v3270_v3 }
 0x515   : > { %2991 = vmatmul.f32.gmra.mxu0 %v8605_v37 }
 0x516   : > { %v10783_v38 = vpop.f32.mrf.mxu2  ;;  %3566 = vmatpush.msrb.mxu0 %v3271_v27 }
 0x519   : > { %v10789_v56 = vpop.f32.mrf.mxu0 }
 0x51b   : > { %2830 = vmatmul.f32.gmra.mxu3 %v8604_v59  ;;  %2765 = vmatmul.f32.gmra.mxu2 %v8605_v37  ;;  %v3268_v59 = vld [vmem:[#allocation5 + $0x420] sm:$0xff] }
 0x51c   : > { %3059 = vmatmul.f32.gmra.mxu1 %v8606_v9  ;;  %3341 = vmatpush.msrb.mxu2 %v3268_v59 }
 0x51d   : > { %2994 = vmatmul.f32.gmra.mxu0 %v8607_v35 }
 0x51e   : > { %v10787_v7 = vpop.f32.mrf.mxu2 }
 0x521   : > { %v10793_v60 = vpop.f32.mrf.mxu0 }
 0x523   : > { %2833 = vmatmul.f32.gmra.mxu3 %v8606_v9  ;;  %2768 = vmatmul.f32.gmra.mxu2 %v8607_v35  ;;  %v3269_v9 = vld [vmem:[#allocation5 + $0x428] sm:$0xff]  ;;  %v3266_v35 = vld [vmem:[#allocation5 + $0x410] sm:$0xff] }
 0x524   : > { %3062 = vmatmul.f32.gmra.mxu1 %v8608_v54  ;;  %3567 = vmatpush.msrb.mxu0 %v3269_v9  ;;  %v15135_v9 = vld [vmem:[#allocation50_spill] sm:$0xff] }
 0x525   : > { %2997 = vmatmul.f32.gmra.mxu0 %v8609_v39  ;;  %3342 = vmatpush.msrb.mxu2 %v3266_v35 }
 0x526   : > { %v10791_v36 = vpop.f32.mrf.mxu2 }
 0x529   : > { %v10797_v4 = vpop.f32.mrf.mxu0 }
 0x52b   : > { %2836 = vmatmul.f32.gmra.mxu3 %v8608_v54  ;;  %2771 = vmatmul.f32.gmra.mxu2 %v8609_v39  ;;  %v3267_v54 = vld [vmem:[#allocation5 + $0x418] sm:$0xff]  ;;  %v8620_v39 = vld [vmem:[#allocation2 + $0xe8] sm:$0xff] }
 0x52c   : > { %3065 = vmatmul.f32.gmra.mxu1 %v8610_v45  ;;  %3568 = vmatpush.msrb.mxu0 %v3267_v54 }
 0x52d   : > { %3000 = vmatmul.f32.gmra.mxu0 %v8611_v8 }
 0x52e   : > { %v10795_v29 = vpop.f32.mrf.mxu2  ;;  %3569 = vmatpush.msrb.mxu0 %v3265_v63 }
 0x531   : > { %v10801_v28 = vpop.f32.mrf.mxu0 }
 0x533   : > { %2839 = vmatmul.f32.gmra.mxu3 %v8610_v45  ;;  %2774 = vmatmul.f32.gmra.mxu2 %v8611_v8  ;;  %v3264_v45 = vld [vmem:[#allocation5 + $0x400] sm:$0xff] }
 0x534   : > { %3068 = vmatmul.f32.gmra.mxu1 %v8612_v50  ;;  %3343 = vmatpush.msrb.mxu2 %v3264_v45 }
 0x535   : > { %3003 = vmatmul.f32.gmra.mxu0 %v8613_v5 }
 0x536   : > { %v10799_v22 = vpop.f32.mrf.mxu2 }
 0x539   : > { %v10805_v37 = vpop.f32.mrf.mxu0 }
 0x53b   : > { %2842 = vmatmul.f32.gmra.mxu3 %v8612_v50  ;;  %2777 = vmatmul.f32.gmra.mxu2 %v8613_v5  ;;  %v8621_v50 = vld [vmem:[#allocation2 + $0x1e0] sm:$0xff]  ;;  %v8623_v5 = vld [vmem:[#allocation2 + $0x1f0] sm:$0xff] }
 0x53c   : > { %3071 = vmatmul.f32.gmra.mxu1 %v8614_v44 }
 0x53d   : > { %3006 = vmatmul.f32.gmra.mxu0 %v8615_v26 }
 0x53e   : > { %v10803_v10 = vpop.f32.mrf.mxu2 }
 0x541   : > { %v10809_v46 = vpop.f32.mrf.mxu0 }
 0x543   : > { %2845 = vmatmul.f32.gmra.mxu3 %v8614_v44  ;;  %2780 = vmatmul.f32.gmra.mxu2 %v8615_v26  ;;  %v10820_v44 = vperm.slane %v10817_v41, 0 }
 0x544   : > { %3074 = vmatmul.f32.gmra.mxu1 %v8616_v58 }
 0x545   : > { %3009 = vmatmul.f32.gmra.mxu0 %v8617_v42  ;;  %v2701_v31 = vadd.f32 %v10765_v55, %v10820_v44  ;;  %v8626_v55 = vld [vmem:[#allocation2 + $0x128] sm:$0xff] }
 0x546   : > { %v10807_v8 = vpop.f32.mrf.mxu2 }
 0x549   : > { %v10815_v30 = vpop.f32.mrf.mxu0 }
 0x54b   : > { %2848 = vmatmul.f32.gmra.mxu3 %v8616_v58  ;;  %2783 = vmatmul.f32.gmra.mxu2 %v8617_v42  ;;  %v2704_v42 = vadd.f32 %v10767_v0, %v10820_v44  ;;  %v2707_v0 = vadd.f32 %v10771_v49, %v10820_v44  ;;  %v2710_v49 = vadd.f32 %v10775_v34, %v10820_v44 }
 0x54c   : > { %3077 = vmatmul.f32.gmra.mxu1 %v8618_v16  ;;  %v2713_v34 = vadd.f32 %v10779_v33, %v10820_v44  ;;  %v2716_v33 = vadd.f32 %v10783_v38, %v10820_v44  ;;  %v2719_v38 = vadd.f32 %v10787_v7, %v10820_v44  ;;  %v2722_v7 = vadd.f32 %v10791_v36, %v10820_v44 }
 0x54d   : > { %3012 = vmatmul.f32.gmra.mxu0 %v8619_v2 }
 0x54e   : > { %v10811_v32 = vpop.f32.mrf.mxu2 }
 0x551   : > { %v10828_v18 = vpop.f32.mrf.mxu0 }
 0x553   : > { %2851 = vmatmul.f32.gmra.mxu3 %v8618_v16  ;;  %2786 = vmatmul.f32.gmra.mxu2 %v8619_v2 }
 0x554   : > { %3080 = vmatmul.f32.gmra.mxu1 %v8620_v39 }
 0x555   : > { %3015 = vmatmul.f32.gmra.mxu0 %v8621_v50 }
 0x556   : > { %v10822_v12 = vpop.f32.mrf.mxu2 }
 0x559   : > { %v10841_v52 = vpop.f32.mrf.mxu0 }
 0x55b   : > { %2854 = vmatmul.f32.gmra.mxu3 %v8620_v39  ;;  %2789 = vmatmul.f32.gmra.mxu2 %v8621_v50  ;;  %v8628_v50 = vld [vmem:[#allocation2 + $0x148] sm:$0xff] }
 0x55c   : > { %3083 = vmatmul.f32.gmra.mxu1 %v8622_v21 }
 0x55d   : > { %3018 = vmatmul.f32.gmra.mxu0 %v8623_v5 }
 0x55e   : > { %v10835_v23 = vpop.f32.mrf.mxu2 }
 0x561   : > { %v10813_v20 = vpop.f32.mrf.mxu1 }
 0x562   : > { %v10859_v39 = vpop.f32.mrf.mxu0 }
 0x563   : > { %2857 = vmatmul.f32.gmra.mxu3 %v8622_v21  ;;  %2792 = vmatmul.f32.gmra.mxu2 %v8623_v5 }
 0x564   : > { %3086 = vmatmul.f32.gmra.mxu1 %v8624_v57 }
 0x566   : > { %v10850_v3 = vpop.f32.mrf.mxu2 }
 0x569   : > { %v10824_v26 = vpop.f32.mrf.mxu1 }
 0x56b   : > { %2860 = vmatmul.f32.gmra.mxu3 %v8624_v57  ;;  %v15137_v57 = vld [vmem:[#allocation92_spill] sm:$0xff] }
 0x56c   : > { %3089 = vmatmul.f32.gmra.mxu1 %v8625_v47 }
 0x56e   : > { %v2813_v48 = vpop.f32.mrf.mxu3  ;;  %v10865_v21 = vpop.f32.mrf.mxu2 }
 0x56f   : > { %v2814_v17 = vadd.f32 %v2813_v48, %v2701_v31 }
 0x571   : > { %v3135_v43 = vadd.f32 %v2814_v17, %v15131_v6  ;;  %v10831_v58 = vpop.f32.mrf.mxu1  ;;  %v8629_v17 = vld [vmem:[#allocation2 + $0x158] sm:$0xff]  ;;  %v10874_v6 = vpop.f32.mrf.mxu0 }
 0x573   : > { %v10837_v62 = vmax.f32 %v3135_v43, 0.0  ;;  %2863 = vmatmul.f32.gmra.mxu3 %v8625_v47 }
 0x574   : > { %3092 = vmatmul.f32.gmra.mxu1 %v8626_v55 }
 0x575   : > { %15132 = vst [vmem:[#allocation40_spill] sm:$0xff] %v10837_v62  ;;  %3344 = vmatmul.f32.vlgmr.msrb.gmra.mxu2 %v10837_v62  ;;  %3570 = vmatmul.f32.vlgmr.msrb.gmra.mxu0 %v10837_v62 }
 0x576   : > { %v2816_v19 = vpop.f32.mrf.mxu3 }
 0x577   : > { %v2817_v53 = vadd.f32 %v2816_v19, %v2704_v42  ;;  %v15139_v19 = vld [vmem:[#allocation90_spill] sm:$0xff] }
 0x579   : > { %v3137_v14 = vadd.f32 %v2817_v53, %v15133_v61  ;;  %v10844_v16 = vpop.f32.mrf.mxu1 }
 0x57b   : > { %2866 = vmatmul.f32.gmra.mxu3 %v8626_v55  ;;  %v10848_v2 = vmax.f32 %v3137_v14, 0.0  ;;  %v10878_v55 = vpop.f32.mrf.mxu2 }
 0x57c   : > { %3095 = vmatmul.f32.gmra.mxu1 %v8627_v13 }
 0x57d   : > { %15134 = vst [vmem:[#allocation62_spill] sm:$0xff] %v10848_v2  ;;  %3347 = vmatmul.f32.gmra.mxu2 %v10848_v2  ;;  %3573 = vmatmul.f32.gmra.mxu0 %v10848_v2 }
 0x57e   : > { %v2819_v27 = vpop.f32.mrf.mxu3 }
 0x57f   : > { %v2820_v59 = vadd.f32 %v2819_v27, %v2707_v0  ;;  %v8630_v0 = vld [vmem:[#allocation2 + $0x168] sm:$0xff]  ;;  %v10889_v27 = vpop.f32.mrf.mxu0 }
 0x581   : > { %v3139_v35 = vadd.f32 %v2820_v59, %v15135_v9  ;;  %v10855_v54 = vpop.f32.mrf.mxu1  ;;  %v15141_v9 = vld [vmem:[#allocation91_spill] sm:$0xff] }
 0x583   : > { %2869 = vmatmul.f32.gmra.mxu3 %v8627_v13  ;;  %v10861_v45 = vmax.f32 %v3139_v35, 0.0 }
 0x584   : > { %3098 = vmatmul.f32.gmra.mxu1 %v8628_v50 }
 0x585   : > { %15136 = vst [vmem:[#allocation80_spill] sm:$0xff] %v10861_v45  ;;  %3350 = vmatmul.f32.gmra.mxu2 %v10861_v45  ;;  %3576 = vmatmul.f32.gmra.mxu0 %v10861_v45 }
 0x586   : > { %v2822_v63 = vpop.f32.mrf.mxu3 }
 0x587   : > { %v2823_v5 = vadd.f32 %v2822_v63, %v2710_v49 }
 0x589   : > { %v3141_v31 = vadd.f32 %v2823_v5, %v15137_v57  ;;  %v10868_v47 = vpop.f32.mrf.mxu1  ;;  %v8631_v5 = vld [vmem:[#allocation2 + $0x178] sm:$0xff] }
 0x58b   : > { %2872 = vmatmul.f32.gmra.mxu3 %v8628_v50  ;;  %v10872_v48 = vmax.f32 %v3141_v31, 0.0  ;;  %v10896_v50 = vpop.f32.mrf.mxu2 }
 0x58c   : > { %3101 = vmatmul.f32.gmra.mxu1 %v8629_v17 }
 0x58d   : > { %15138 = vst [vmem:[#allocation58_spill] sm:$0xff] %v10872_v48  ;;  %3353 = vmatmul.f32.gmra.mxu2 %v10872_v48  ;;  %3579 = vmatmul.f32.gmra.mxu0 %v10872_v48  ;;  %v3312_v48 = vld [vmem:[#allocation5 + $0x580] sm:$0xff] }
 0x58e   : > { %v2825_v43 = vpop.f32.mrf.mxu3 }
 0x58f   : > { %v2826_v42 = vadd.f32 %v2825_v43, %v2713_v34  ;;  %v10902_v34 = vpop.f32.mrf.mxu0 }
 0x591   : > { %v3143_v53 = vadd.f32 %v2826_v42, %v15139_v19  ;;  %v10881_v61 = vpop.f32.mrf.mxu1 }
 0x593   : > { %2875 = vmatmul.f32.gmra.mxu3 %v8629_v17  ;;  %v10885_v14 = vmax.f32 %v3143_v53, 0.0  ;;  %v15143_v17 = vld [vmem:[#allocation93_spill] sm:$0xff]  ;;  %v8632_v53 = vld [vmem:[#allocation2 + $0x188] sm:$0xff] }
 0x594   : > { %3104 = vmatmul.f32.gmra.mxu1 %v8630_v0 }
 0x595   : > { %15140 = vst [vmem:[#allocation78_spill] sm:$0xff] %v10885_v14  ;;  %3356 = vmatmul.f32.gmra.mxu2 %v10885_v14  ;;  %3582 = vmatmul.f32.gmra.mxu0 %v10885_v14  ;;  %v3318_v14 = vld [vmem:[#allocation5 + $0x5b0] sm:$0xff] }
 0x596   : > { %v2828_v13 = vpop.f32.mrf.mxu3 }
 0x597   : > { %v2829_v59 = vadd.f32 %v2828_v13, %v2716_v33  ;;  %v10911_v33 = vpop.f32.mrf.mxu2 }
 0x599   : > { %v3145_v35 = vadd.f32 %v2829_v59, %v15141_v9  ;;  %v10892_v49 = vpop.f32.mrf.mxu1  ;;  %v3325_v9 = vld [vmem:[#allocation5 + $0x5e8] sm:$0xff] }
 0x59b   : > { %2878 = vmatmul.f32.gmra.mxu3 %v8630_v0  ;;  %v10898_v63 = vmax.f32 %v3145_v35, 0.0  ;;  %v3327_v0 = vld [vmem:[#allocation5 + $0x5f8] sm:$0xff] }
 0x59c   : > { %3107 = vmatmul.f32.gmra.mxu1 %v8631_v5  ;;  %v15145_v35 = vld [vmem:[#allocation88_spill] sm:$0xff] }
 0x59d   : > { %15142 = vst [vmem:[#allocation24_spill] sm:$0xff] %v10898_v63  ;;  %3359 = vmatmul.f32.gmra.mxu2 %v10898_v63  ;;  %3585 = vmatmul.f32.gmra.mxu0 %v10898_v63 }
 0x59e   : > { %v2831_v57 = vpop.f32.mrf.mxu3  ;;  %3667 = vmatpush.msrb.mxu1 %v3327_v0  ;;  %v8633_v0 = vld [vmem:[#allocation2 + $0x198] sm:$0xff] }
 0x59f   : > { %v2832_v31 = vadd.f32 %v2831_v57, %v2719_v38  ;;  %v2725_v57 = vadd.f32 %v10795_v29, %v10820_v44  ;;  %v10926_v29 = vpop.f32.mrf.mxu2 }
 0x5a0   : > { %3668 = vmatpush.msrb.mxu1 %v3325_v9 }
 0x5a1   : > { %v3147_v43 = vadd.f32 %v2832_v31, %v15143_v17  ;;  %v10905_v42 = vpop.f32.mrf.mxu1  ;;  %v10920_v31 = vpop.f32.mrf.mxu0 }
 0x5a3   : > { %2881 = vmatmul.f32.gmra.mxu3 %v8631_v5  ;;  %v10909_v19 = vmax.f32 %v3147_v43, 0.0  ;;  %v3323_v5 = vld [vmem:[#allocation5 + $0x5d8] sm:$0xff]  ;;  %v3326_v43 = vld [vmem:[#allocation5 + $0x5f0] sm:$0xff] }
 0x5a4   : > { %3110 = vmatmul.f32.gmra.mxu1 %v8632_v53  ;;  %3441 = vmatpush.msrb.mxu3 %v3326_v43  ;;  %v3320_v43 = vld [vmem:[#allocation5 + $0x5c0] sm:$0xff] }
 0x5a5   : > { %15144 = vst [vmem:[#allocation76_spill] sm:$0xff] %v10909_v19  ;;  %3362 = vmatmul.f32.gmra.mxu2 %v10909_v19  ;;  %3588 = vmatmul.f32.gmra.mxu0 %v10909_v19  ;;  %v3321_v19 = vld [vmem:[#allocation5 + $0x5c8] sm:$0xff] }
 0x5a6   : > { %v2834_v13 = vpop.f32.mrf.mxu3  ;;  %3669 = vmatpush.msrb.mxu1 %v3323_v5 }
 0x5a7   : > { %v2835_v59 = vadd.f32 %v2834_v13, %v2722_v7  ;;  %v3324_v7 = vld [vmem:[#allocation5 + $0x5e0] sm:$0xff]  ;;  %v3319_v13 = vld [vmem:[#allocation5 + $0x5b8] sm:$0xff] }
 0x5a8   : > { %3670 = vmatpush.msrb.mxu1 %v3321_v19  ;;  %3442 = vmatpush.msrb.mxu3 %v3324_v7  ;;  %v3315_v7 = vld [vmem:[#allocation5 + $0x598] sm:$0xff] }
 0x5a9   : > { %v3149_v38 = vadd.f32 %v2835_v59, %v15145_v35  ;;  %v10916_v36 = vpop.f32.mrf.mxu1  ;;  %v3317_v35 = vld [vmem:[#allocation5 + $0x5a8] sm:$0xff] }
 0x5aa   : > { %3671 = vmatpush.msrb.mxu1 %v3319_v13  ;;  %v10935_v13 = vpop.f32.mrf.mxu0 }
 0x5ab   : > { %2884 = vmatmul.f32.gmra.mxu3 %v8632_v53  ;;  %v10922_v17 = vmax.f32 %v3149_v38, 0.0  ;;  %v3322_v53 = vld [vmem:[#allocation5 + $0x5d0] sm:$0xff]  ;;  %v15147_v38 = vld [vmem:[#allocation86_spill] sm:$0xff] }
 0x5ac   : > { %3113 = vmatmul.f32.gmra.mxu1 %v8633_v0  ;;  %3443 = vmatpush.msrb.mxu3 %v3322_v53 }
 0x5ad   : > { %15146 = vst [vmem:[#allocation20_spill] sm:$0xff] %v10922_v17  ;;  %3365 = vmatmul.f32.gmra.mxu2 %v10922_v17  ;;  %3591 = vmatmul.f32.gmra.mxu0 %v10922_v17  ;;  %v2728_v17 = vadd.f32 %v10799_v22, %v10820_v44 }
 0x5ae   : > { %v2837_v59 = vpop.f32.mrf.mxu3  ;;  %3672 = vmatpush.msrb.mxu1 %v3317_v35  ;;  %3444 = vmatpush.msrb.mxu3 %v3320_v43  ;;  %v3314_v35 = vld [vmem:[#allocation5 + $0x590] sm:$0xff] }
 0x5af   : > { %v2838_v9 = vadd.f32 %v2837_v59, %v2725_v57  ;;  %v8634_v57 = vld [vmem:[#allocation2 + $0x1a8] sm:$0xff] }
 0x5b0   : > { %3445 = vmatpush.msrb.mxu3 %v3318_v14  ;;  %v3313_v59 = vld [vmem:[#allocation5 + $0x588] sm:$0xff]  ;;  %3673 = vmatpush.msrb.mxu1 %v3315_v7 }
 0x5b1   : > { %v3151_v5 = vadd.f32 %v2838_v9, %v15147_v38  ;;  %v10929_v63 = vpop.f32.mrf.mxu1  ;;  %v3316_v9 = vld [vmem:[#allocation5 + $0x5a0] sm:$0xff]  ;;  %v10939_v38 = vpop.f32.mrf.mxu2 }
 0x5b2   : > { %3446 = vmatpush.msrb.mxu3 %v3316_v9  ;;  %3674 = vmatpush.msrb.mxu1 %v3313_v59  ;;  %v3310_v9 = vld [vmem:[#allocation5 + $0x570] sm:$0xff]  ;;  %v3307_v59 = vld [vmem:[#allocation5 + $0x558] sm:$0xff] }
 0x5b3   : > { %2887 = vmatmul.f32.gmra.mxu3 %v8633_v0  ;;  %v10933_v19 = vmax.f32 %v3151_v5, 0.0  ;;  %v3311_v0 = vld [vmem:[#allocation5 + $0x578] sm:$0xff]  ;;  %v15149_v5 = vld [vmem:[#allocation87_spill] sm:$0xff] }
 0x5b4   : > { %3116 = vmatmul.f32.gmra.mxu1 %v8634_v57  ;;  %3447 = vmatpush.msrb.mxu3 %v3314_v35 }
 0x5b5   : > { %15148 = vst [vmem:[#allocation74_spill] sm:$0xff] %v10933_v19  ;;  %3368 = vmatmul.f32.gmra.mxu2 %v10933_v19  ;;  %3594 = vmatmul.f32.gmra.mxu0 %v10933_v19  ;;  %v2731_v19 = vadd.f32 %v10803_v10, %v10820_v44 }
 0x5b6   : > { %v2840_v53 = vpop.f32.mrf.mxu3  ;;  %3675 = vmatpush.msrb.mxu1 %v3311_v0  ;;  %3448 = vmatpush.msrb.mxu3 %v3312_v48  ;;  %v10950_v48 = vpop.f32.mrf.mxu0  ;;  %v3306_v0 = vld [vmem:[#allocation5 + $0x550] sm:$0xff] }
 0x5b7   : > { %v2841_v22 = vadd.f32 %v2840_v53, %v2728_v17  ;;  %v3309_v17 = vld [vmem:[#allocation5 + $0x568] sm:$0xff]  ;;  %v8635_v53 = vld [vmem:[#allocation2 + $0x1b8] sm:$0xff]  ;;  %15151 = vst [vmem:[#allocation69_spill] sm:$0xff] %v10950_v48 }
 0x5b8   : > { %3449 = vmatpush.msrb.mxu3 %v3310_v9  ;;  %3676 = vmatpush.msrb.mxu1 %v3309_v17  ;;  %v3304_v9 = vld [vmem:[#allocation5 + $0x540] sm:$0xff] }
 0x5b9   : > { %v3153_v14 = vadd.f32 %v2841_v22, %v15149_v5  ;;  %v10942_v43 = vpop.f32.mrf.mxu1  ;;  %v3308_v22 = vld [vmem:[#allocation5 + $0x560] sm:$0xff]  ;;  %v10957_v2 = vpop.f32.mrf.mxu2 }
 0x5ba   : > { %3450 = vmatpush.msrb.mxu3 %v3308_v22  ;;  %3677 = vmatpush.msrb.mxu1 %v3307_v59  ;;  %v15152_v5 = vld [vmem:[#allocation89_spill] sm:$0xff]  ;;  %v3302_v22 = vld [vmem:[#allocation5 + $0x530] sm:$0xff]  ;;  %v3301_v59 = vld [vmem:[#allocation5 + $0x528] sm:$0xff] }
 0x5bb   : > { %2890 = vmatmul.f32.gmra.mxu3 %v8634_v57  ;;  %v10946_v7 = vmax.f32 %v3153_v14, 0.0  ;;  %v3305_v57 = vld [vmem:[#allocation5 + $0x548] sm:$0xff] }
 0x5bc   : > { %3119 = vmatmul.f32.gmra.mxu1 %v8635_v53  ;;  %3451 = vmatpush.msrb.mxu3 %v3306_v0  ;;  %v3299_v0 = vld [vmem:[#allocation5 + $0x518] sm:$0xff] }
 0x5bd   : > { %15150 = vst [vmem:[#allocation75_spill] sm:$0xff] %v10946_v7  ;;  %3371 = vmatmul.f32.gmra.mxu2 %v10946_v7  ;;  %3597 = vmatmul.f32.gmra.mxu0 %v10946_v7  ;;  %v2734_v7 = vadd.f32 %v10807_v8, %v10820_v44 }
 0x5be   : > { %v2843_v35 = vpop.f32.mrf.mxu3  ;;  %3678 = vmatpush.msrb.mxu1 %v3305_v57  ;;  %3452 = vmatpush.msrb.mxu3 %v3304_v9 }
 0x5bf   : > { %v2844_v10 = vadd.f32 %v2843_v35, %v2731_v19  ;;  %v3303_v19 = vld [vmem:[#allocation5 + $0x538] sm:$0xff]  ;;  %v8636_v35 = vld [vmem:[#allocation2 + $0x1c8] sm:$0xff] }
 0x5c0   : > { %3453 = vmatpush.msrb.mxu3 %v3302_v22  ;;  %3679 = vmatpush.msrb.mxu1 %v3303_v19  ;;  %v3296_v22 = vld [vmem:[#allocation5 + $0x500] sm:$0xff] }
 0x5c1   : > { %v3155_v14 = vadd.f32 %v2844_v10, %v15152_v5  ;;  %v10953_v45 = vpop.f32.mrf.mxu1  ;;  %v3300_v10 = vld [vmem:[#allocation5 + $0x520] sm:$0xff]  ;;  %v3298_v5 = vld [vmem:[#allocation5 + $0x510] sm:$0xff] }
 0x5c2   : > { %3454 = vmatpush.msrb.mxu3 %v3300_v10  ;;  %3680 = vmatpush.msrb.mxu1 %v3301_v59  ;;  %v8637_v10 = vld [vmem:[#allocation2 + $0x1d8] sm:$0xff]  ;;  %v10972_v59 = vpop.f32.mrf.mxu2 }
 0x5c3   : > { %2893 = vmatmul.f32.gmra.mxu3 %v8635_v53  ;;  %v10959_v17 = vmax.f32 %v3155_v14, 0.0  ;;  %v10963_v53 = vpop.f32.mrf.mxu0  ;;  %v15155_v14 = vld [vmem:[#allocation84_spill] sm:$0xff] }
 0x5c4   : > { %3122 = vmatmul.f32.gmra.mxu1 %v8636_v35  ;;  %3455 = vmatpush.msrb.mxu3 %v3298_v5  ;;  %15154 = vst [vmem:[#allocation48_spill] sm:$0xff] %v10963_v53  ;;  %v8638_v53 = vld [vmem:[#allocation2 + $0x1e8] sm:$0xff] }
 0x5c5   : > { %15153 = vst [vmem:[#allocation95_spill] sm:$0xff] %v10959_v17  ;;  %3374 = vmatmul.f32.gmra.mxu2 %v10959_v17  ;;  %3600 = vmatmul.f32.gmra.mxu0 %v10959_v17  ;;  %v2737_v17 = vadd.f32 %v10811_v32, %v10820_v44  ;;  %v10980_v32 = vperm.slane %v10817_v41, 1 }
 0x5c6   : > { %v2846_v57 = vpop.f32.mrf.mxu3  ;;  %3681 = vmatpush.msrb.mxu1 %v3299_v0  ;;  %3456 = vmatpush.msrb.mxu3 %v3296_v22  ;;  %v15157_v0 = vld [vmem:[#allocation82_spill] sm:$0xff] }
 0x5c7   : > { %v2847_v8 = vadd.f32 %v2846_v57, %v2734_v7  ;;  %v3297_v7 = vld [vmem:[#allocation5 + $0x508] sm:$0xff] }
 0x5c8   : > { %3682 = vmatpush.msrb.mxu1 %v3297_v7 }
 0x5c9   : > { %v3157_v9 = vadd.f32 %v2847_v8, %v15155_v14  ;;  %v10966_v62 = vpop.f32.mrf.mxu1 }
 0x5ca   : > { %v10992_v41 = vpop.f32.mrf.mxu2 }
 0x5cb   : > { %2896 = vmatmul.f32.gmra.mxu3 %v8636_v35  ;;  %v10970_v19 = vmax.f32 %v3157_v9, 0.0  ;;  %v2740_v35 = vadd.f32 %v10822_v12, %v10820_v44  ;;  %v10984_v9 = vpop.f32.mrf.mxu0 }
 0x5cc   : > { %3125 = vmatmul.f32.gmra.mxu1 %v8637_v10  ;;  %15158 = vst [vmem:[#allocation55_spill] sm:$0xff] %v10984_v9 }
 0x5cd   : > { %15156 = vst [vmem:[#allocation94_spill] sm:$0xff] %v10970_v19  ;;  %3377 = vmatmul.f32.gmra.mxu2 %v10970_v19  ;;  %3603 = vmatmul.f32.gmra.mxu0 %v10970_v19 }
 0x5ce   : > { %v2849_v57 = vpop.f32.mrf.mxu3 }
 0x5cf   : > { %v2850_v8 = vadd.f32 %v2849_v57, %v2737_v17  ;;  %v2927_v17 = vadd.f32 %v10755_v11, %v10980_v32  ;;  %v2930_v11 = vadd.f32 %v10763_v24, %v10980_v32  ;;  %v2933_v24 = vadd.f32 %v10769_v51, %v10980_v32 }
 0x5d1   : > { %v3159_v5 = vadd.f32 %v2850_v8, %v15157_v0  ;;  %v10977_v14 = vpop.f32.mrf.mxu1  ;;  %v15160_v8 = vld [vmem:[#allocation85_spill] sm:$0xff] }
 0x5d3   : > { %2899 = vmatmul.f32.gmra.mxu3 %v8637_v10  ;;  %v10986_v22 = vmax.f32 %v3159_v5, 0.0  ;;  %v3040_v10 = vadd.f32 %v10813_v20, %v2927_v17  ;;  %v2743_v5 = vadd.f32 %v10835_v23, %v10820_v44  ;;  %v11002_v9 = vpop.f32.mrf.mxu0  ;;  %v15164_v23 = vld [vmem:[#allocation17_spill] sm:$0xff] }
 0x5d4   : > { %3128 = vmatmul.f32.gmra.mxu1 %v8638_v53  ;;  %15162 = vst [vmem:[#allocation71_spill] sm:$0xff] %v11002_v9  ;;  %v3043_v9 = vadd.f32 %v10824_v26, %v2930_v11  ;;  %v15168_v11 = vld [vmem:[#allocation21_spill] sm:$0xff] }
 0x5d5   : > { %15159 = vst [vmem:[#allocation79_spill] sm:$0xff] %v10986_v22  ;;  %3380 = vmatmul.f32.gmra.mxu2 %v10986_v22  ;;  %3606 = vmatmul.f32.gmra.mxu0 %v10986_v22  ;;  %v8639_v22 = vld [vmem:[#allocation2 + $0x1f8] sm:$0xff] }
 0x5d6   : > { %v2852_v7 = vpop.f32.mrf.mxu3 }
 0x5d7   : > { %v2853_v57 = vadd.f32 %v2852_v7, %v2740_v35  ;;  %v15163_v35 = vld [vmem:[#allocation19_spill] sm:$0xff] }
 0x5d8   : > { %v3136_v7 = vadd.f32 %v3040_v10, %v15163_v35  ;;  %v15167_v10 = vld [vmem:[#allocation23_spill] sm:$0xff] }
 0x5d9   : > { %v3161_v12 = vadd.f32 %v2853_v57, %v15160_v8  ;;  %v10995_v0 = vpop.f32.mrf.mxu1  ;;  %v11009_v57 = vpop.f32.mrf.mxu2 }
 0x5db   : > { %2902 = vmatmul.f32.gmra.mxu3 %v8638_v53  ;;  %v11000_v19 = vmax.f32 %v3161_v12, 0.0  ;;  %v11014_v12 = vmax.f32 %v3136_v7, 0.0  ;;  %v11027_v7 = vpop.f32.mrf.mxu0 }
 0x5dc   : > { %3131 = vmatmul.f32.gmra.mxu1 %v8639_v22 }
 0x5dd   : > { %15161 = vst [vmem:[#allocation97_spill] sm:$0xff] %v11000_v19  ;;  %3383 = vmatmul.f32.gmra.mxu2 %v11000_v19  ;;  %3609 = vmatmul.f32.gmra.mxu0 %v11000_v19  ;;  %v2746_v19 = vadd.f32 %v10850_v3, %v10820_v44 }
 0x5de   : > { %v2855_v20 = vpop.f32.mrf.mxu3  ;;  %15165 = vst [vmem:[#allocation96_spill] sm:$0xff] %v11014_v12 }
 0x5df   : > { %v2856_v17 = vadd.f32 %v2855_v20, %v2743_v5  ;;  %v3138_v5 = vadd.f32 %v3043_v9, %v15167_v10  ;;  %v3046_v20 = vadd.f32 %v10831_v58, %v2933_v24  ;;  %v2936_v58 = vadd.f32 %v10773_v40, %v10980_v32 }
 0x5e1   : > { %v3163_v53 = vadd.f32 %v2856_v17, %v15164_v23  ;;  %v11012_v8 = vpop.f32.mrf.mxu1  ;;  %v11033_v17 = vmax.f32 %v3138_v5, 0.0  ;;  %v2749_v23 = vadd.f32 %v10865_v21, %v10820_v44  ;;  %v15172_v5 = vld [vmem:[#allocation25_spill] sm:$0xff] }
 0x5e3   : > { %2905 = vmatmul.f32.gmra.mxu3 %v8639_v22  ;;  %v11019_v48 = vmax.f32 %v3163_v53, 0.0  ;;  %15169 = vst [vmem:[#allocation53_spill] sm:$0xff] %v11033_v17  ;;  %v11037_v53 = vpop.f32.mrf.mxu2  ;;  %v11048_v21 = vpop.f32.mrf.mxu0 }
 0x5e4   : > { %3683 = vmatmul.f32.vlgmr.msrb.gmra.mxu1 %v11014_v12 }
 0x5e5   : > { %15166 = vst [vmem:[#allocation49_spill] sm:$0xff] %v11019_v48  ;;  %3386 = vmatmul.f32.gmra.mxu2 %v11019_v48  ;;  %3612 = vmatmul.f32.gmra.mxu0 %v11019_v48  ;;  %v2755_v48 = vadd.f32 %v10896_v50, %v10820_v44 }
 0x5e6   : > { %v2858_v35 = vpop.f32.mrf.mxu3 }
 0x5e7   : > { %v2859_v26 = vadd.f32 %v2858_v35, %v2746_v19  ;;  %v15171_v19 = vld [vmem:[#allocation27_spill] sm:$0xff] }
 0x5e8   : > { %v3140_v9 = vadd.f32 %v3046_v20, %v15171_v19 }
 0x5e9   : > { %v3165_v3 = vadd.f32 %v2859_v26, %v15168_v11  ;;  %v11030_v22 = vpop.f32.mrf.mxu1  ;;  %v3049_v11 = vadd.f32 %v10844_v16, %v2936_v58  ;;  %v2939_v16 = vadd.f32 %v10777_v15, %v10980_v32 }
 0x5eb   : > { %3457 = vmatmul.f32.vlgmr.msrb.gmra.mxu3 %v11014_v12  ;;  %v11040_v51 = vmax.f32 %v3165_v3, 0.0  ;;  %v11054_v3 = vmax.f32 %v3140_v9, 0.0  ;;  %v11062_v20 = vpop.f32.mrf.mxu2 }
 0x5ec   : > { %3686 = vmatmul.f32.gmra.mxu1 %v11033_v17 }
 0x5ed   : > { %15170 = vst [vmem:[#allocation50_spill] sm:$0xff] %v11040_v51  ;;  %3389 = vmatmul.f32.gmra.mxu2 %v11040_v51  ;;  %3615 = vmatmul.f32.gmra.mxu0 %v11040_v51  ;;  %v2752_v51 = vadd.f32 %v10878_v55, %v10820_v44  ;;  %v15176_v55 = vld [vmem:[#allocation29_spill] sm:$0xff] }
 0x5ee   : > { %v2861_v24 = vpop.f32.mrf.mxu3  ;;  %15173 = vst [vmem:[#allocation92_spill] sm:$0xff] %v11054_v3 }
 0x5ef   : > { %v2862_v10 = vadd.f32 %v2861_v24, %v2749_v23  ;;  %v15175_v23 = vld [vmem:[#allocation31_spill] sm:$0xff] }
 0x5f0   : > { %v3142_v58 = vadd.f32 %v3049_v11, %v15175_v23 }
 0x5f1   : > { %v3167_v35 = vadd.f32 %v2862_v10, %v15172_v5  ;;  %v11051_v26 = vpop.f32.mrf.mxu1  ;;  %v3052_v5 = vadd.f32 %v10855_v54, %v2939_v16  ;;  %v2942_v54 = vadd.f32 %v10781_v25, %v10980_v32 }
 0x5f3   : > { %3460 = vmatmul.f32.gmra.mxu3 %v11033_v17  ;;  %v11059_v40 = vmax.f32 %v3167_v35, 0.0  ;;  %v11073_v35 = vmax.f32 %v3142_v58, 0.0  ;;  %v11077_v17 = vpop.f32.mrf.mxu0  ;;  %v11088_v23 = vpop.f32.mrf.mxu2  ;;  %v15180_v58 = vld [vmem:[#allocation33_spill] sm:$0xff] }
 0x5f4   : > { %3689 = vmatmul.f32.gmra.mxu1 %v11054_v3 }
 0x5f5   : > { %15174 = vst [vmem:[#allocation90_spill] sm:$0xff] %v11059_v40  ;;  %3392 = vmatmul.f32.gmra.mxu2 %v11059_v40  ;;  %3618 = vmatmul.f32.gmra.mxu0 %v11059_v40 }
 0x5f6   : > { %v2864_v19 = vpop.f32.mrf.mxu3  ;;  %15177 = vst [vmem:[#allocation91_spill] sm:$0xff] %v11073_v35 }
 0x5f7   : > { %v2865_v9 = vadd.f32 %v2864_v19, %v2752_v51  ;;  %v15179_v51 = vld [vmem:[#allocation35_spill] sm:$0xff] }
 0x5f8   : > { %v3144_v11 = vadd.f32 %v3052_v5, %v15179_v51 }
 0x5f9   : > { %v3169_v24 = vadd.f32 %v2865_v9, %v15176_v55  ;;  %v11070_v10 = vpop.f32.mrf.mxu1  ;;  %v3055_v55 = vadd.f32 %v10868_v47, %v2942_v54  ;;  %v2945_v47 = vadd.f32 %v10785_v1, %v10980_v32 }
 0x5fb   : > { %3463 = vmatmul.f32.gmra.mxu3 %v11054_v3  ;;  %v11080_v15 = vmax.f32 %v3169_v24, 0.0  ;;  %v11094_v24 = vmax.f32 %v3144_v11, 0.0  ;;  %v11102_v5 = vpop.f32.mrf.mxu0 }
 0x5fc   : > { %3692 = vmatmul.f32.gmra.mxu1 %v11073_v35 }
 0x5fd   : > { %15178 = vst [vmem:[#allocation93_spill] sm:$0xff] %v11080_v15  ;;  %3395 = vmatmul.f32.gmra.mxu2 %v11080_v15  ;;  %3621 = vmatmul.f32.gmra.mxu0 %v11080_v15  ;;  %v2758_v15 = vadd.f32 %v10911_v33, %v10820_v44  ;;  %v11109_v33 = vpop.f32.mrf.mxu2 }
 0x5fe   : > { %v2867_v16 = vpop.f32.mrf.mxu3  ;;  %15181 = vst [vmem:[#allocation88_spill] sm:$0xff] %v11094_v24 }
 0x5ff   : > { %v2868_v50 = vadd.f32 %v2867_v16, %v2755_v48  ;;  %v15183_v48 = vld [vmem:[#allocation39_spill] sm:$0xff]  ;;  %v15184_v16 = vld [vmem:[#allocation37_spill] sm:$0xff] }
 0x600   : > { %v3146_v54 = vadd.f32 %v3055_v55, %v15183_v48  ;;  %v15187_v55 = vld [vmem:[#allocation43_spill] sm:$0xff] }
 0x601   : > { %v3171_v19 = vadd.f32 %v2868_v50, %v15180_v58  ;;  %v11091_v9 = vpop.f32.mrf.mxu1 }
 0x602   : > { %v11115_v40 = vmax.f32 %v3146_v54, 0.0 }
 0x603   : > { %3466 = vmatmul.f32.gmra.mxu3 %v11073_v35  ;;  %v11099_v25 = vmax.f32 %v3171_v19, 0.0  ;;  %v3058_v19 = vadd.f32 %v10881_v61, %v2945_v47  ;;  %v11128_v48 = vpop.f32.mrf.mxu0 }
 0x604   : > { %3695 = vmatmul.f32.gmra.mxu1 %v11094_v24  ;;  %15185 = vst [vmem:[#allocation87_spill] sm:$0xff] %v11115_v40 }
 0x605   : > { %15182 = vst [vmem:[#allocation86_spill] sm:$0xff] %v11099_v25  ;;  %3398 = vmatmul.f32.gmra.mxu2 %v11099_v25  ;;  %3624 = vmatmul.f32.gmra.mxu0 %v11099_v25  ;;  %v2761_v25 = vadd.f32 %v10926_v29, %v10820_v44  ;;  %v3148_v61 = vadd.f32 %v3058_v19, %v15187_v55  ;;  %v15188_v29 = vld [vmem:[#allocation41_spill] sm:$0xff] }
 0x606   : > { %v2870_v51 = vpop.f32.mrf.mxu3 }
 0x607   : > { %v2871_v11 = vadd.f32 %v2870_v51, %v2758_v15  ;;  %v2948_v15 = vadd.f32 %v10789_v56, %v10980_v32 }
 0x609   : > { %v3173_v50 = vadd.f32 %v2871_v11, %v15184_v16  ;;  %v11112_v58 = vpop.f32.mrf.mxu1  ;;  %v3061_v16 = vadd.f32 %v10892_v49, %v2948_v15  ;;  %v2951_v49 = vadd.f32 %v10793_v60, %v10980_v32 }
 0x60b   : > { %3469 = vmatmul.f32.gmra.mxu3 %v11094_v24  ;;  %v11120_v1 = vmax.f32 %v3173_v50, 0.0  ;;  %v11134_v50 = vmax.f32 %v3148_v61, 0.0  ;;  %v11138_v24 = vpop.f32.mrf.mxu2  ;;  %v15192_v61 = vld [vmem:[#allocation16_spill] sm:$0xff] }
 0x60c   : > { %3698 = vmatmul.f32.gmra.mxu1 %v11115_v40 }
 0x60d   : > { %15186 = vst [vmem:[#allocation89_spill] sm:$0xff] %v11120_v1  ;;  %3401 = vmatmul.f32.gmra.mxu2 %v11120_v1  ;;  %3627 = vmatmul.f32.gmra.mxu0 %v11120_v1  ;;  %v2764_v1 = vadd.f32 %v10939_v38, %v10820_v44  ;;  %v11149_v38 = vpop.f32.mrf.mxu0 }
 0x60e   : > { %v2873_v47 = vpop.f32.mrf.mxu3  ;;  %15189 = vst [vmem:[#allocation84_spill] sm:$0xff] %v11134_v50 }
 0x60f   : > { %v2874_v54 = vadd.f32 %v2873_v47, %v2761_v25  ;;  %v15191_v25 = vld [vmem:[#allocation45_spill] sm:$0xff] }
 0x610   : > { %v3150_v19 = vadd.f32 %v3061_v16, %v15191_v25  ;;  %v15195_v16 = vld [vmem:[#allocation51_spill] sm:$0xff] }
 0x611   : > { %v3175_v51 = vadd.f32 %v2874_v54, %v15188_v29  ;;  %v11131_v11 = vpop.f32.mrf.mxu1  ;;  %v3064_v29 = vadd.f32 %v10905_v42, %v2951_v49  ;;  %v2954_v42 = vadd.f32 %v10797_v4, %v10980_v32 }
 0x613   : > { %3472 = vmatmul.f32.gmra.mxu3 %v11115_v40  ;;  %v11141_v56 = vmax.f32 %v3175_v51, 0.0  ;;  %v11155_v51 = vmax.f32 %v3150_v19, 0.0  ;;  %v3152_v49 = vadd.f32 %v3064_v29, %v15195_v16 }
 0x614   : > { %3701 = vmatmul.f32.gmra.mxu1 %v11134_v50 }
 0x615   : > { %15190 = vst [vmem:[#allocation82_spill] sm:$0xff] %v11141_v56  ;;  %3404 = vmatmul.f32.gmra.mxu2 %v11141_v56  ;;  %3630 = vmatmul.f32.gmra.mxu0 %v11141_v56  ;;  %v2767_v56 = vadd.f32 %v10957_v2, %v10820_v44  ;;  %v15196_v2 = vld [vmem:[#allocation18_spill] sm:$0xff]  ;;  %v11178_v40 = vpop.f32.mrf.mxu0 }
 0x616   : > { %v2876_v15 = vpop.f32.mrf.mxu3  ;;  %15193 = vst [vmem:[#allocation85_spill] sm:$0xff] %v11155_v51 }
 0x617   : > { %v2877_v55 = vadd.f32 %v2876_v15, %v2764_v1  ;;  %v11163_v1 = vpop.f32.mrf.mxu2 }
 0x619   : > { %v3177_v47 = vadd.f32 %v2877_v55, %v15192_v61  ;;  %v11152_v54 = vpop.f32.mrf.mxu1  ;;  %v3067_v61 = vadd.f32 %v10916_v36, %v2954_v42  ;;  %v2957_v36 = vadd.f32 %v10801_v28, %v10980_v32 }
 0x61b   : > { %3475 = vmatmul.f32.gmra.mxu3 %v11134_v50  ;;  %v11160_v60 = vmax.f32 %v3177_v47, 0.0  ;;  %v11174_v47 = vmax.f32 %v3152_v49, 0.0  ;;  %v2770_v50 = vadd.f32 %v10972_v59, %v10820_v44  ;;  %v15201_v49 = vld [vmem:[#allocation22_spill] sm:$0xff] }
 0x61c   : > { %3704 = vmatmul.f32.gmra.mxu1 %v11155_v51 }
 0x61d   : > { %15194 = vst [vmem:[#allocation19_spill] sm:$0xff] %v11160_v60  ;;  %3407 = vmatmul.f32.gmra.mxu2 %v11160_v60  ;;  %3633 = vmatmul.f32.gmra.mxu0 %v11160_v60 }
 0x61e   : > { %v2879_v25 = vpop.f32.mrf.mxu3  ;;  %15197 = vst [vmem:[#allocation17_spill] sm:$0xff] %v11174_v47 }
 0x61f   : > { %v2880_v19 = vadd.f32 %v2879_v25, %v2767_v56  ;;  %v15199_v56 = vld [vmem:[#allocation54_spill] sm:$0xff]  ;;  %v11189_v16 = vpop.f32.mrf.mxu2 }
 0x620   : > { %v3154_v29 = vadd.f32 %v3067_v61, %v15199_v56  ;;  %15200 = vst [vmem:[#allocation21_spill] sm:$0xff] %v11189_v16  ;;  %v11203_v61 = vpop.f32.mrf.mxu0 }
 0x621   : > { %v3179_v15 = vadd.f32 %v2880_v19, %v15196_v2  ;;  %v11171_v55 = vpop.f32.mrf.mxu1  ;;  %v3070_v2 = vadd.f32 %v10929_v63, %v2957_v36  ;;  %v2960_v63 = vadd.f32 %v10805_v37, %v10980_v32 }
 0x623   : > { %3478 = vmatmul.f32.gmra.mxu3 %v11155_v51  ;;  %v11181_v4 = vmax.f32 %v3179_v15, 0.0  ;;  %v11195_v15 = vmax.f32 %v3154_v29, 0.0 }
 0x624   : > { %3707 = vmatmul.f32.gmra.mxu1 %v11174_v47 }
 0x625   : > { %15198 = vst [vmem:[#allocation23_spill] sm:$0xff] %v11181_v4  ;;  %3410 = vmatmul.f32.gmra.mxu2 %v11181_v4  ;;  %3636 = vmatmul.f32.gmra.mxu0 %v11181_v4  ;;  %v2773_v4 = vadd.f32 %v10992_v41, %v10820_v44 }
 0x626   : > { %v2882_v42 = vpop.f32.mrf.mxu3  ;;  %15202 = vst [vmem:[#allocation27_spill] sm:$0xff] %v11195_v15 }
 0x627   : > { %v2883_v59 = vadd.f32 %v2882_v42, %v2770_v50  ;;  %v15204_v50 = vld [vmem:[#allocation26_spill] sm:$0xff]  ;;  %v11210_v41 = vpop.f32.mrf.mxu2  ;;  %v15206_v42 = vld [vmem:[#allocation56_spill] sm:$0xff] }
 0x628   : > { %v3156_v36 = vadd.f32 %v3070_v2, %v15204_v50  ;;  %15205 = vst [vmem:[#allocation31_spill] sm:$0xff] %v11210_v41  ;;  %v15209_v2 = vld [vmem:[#allocation60_spill] sm:$0xff]  ;;  %v11229_v50 = vpop.f32.mrf.mxu0 }
 0x629   : > { %v3181_v25 = vadd.f32 %v2883_v59, %v15201_v49  ;;  %v11192_v19 = vpop.f32.mrf.mxu1 }
 0x62a   : > { %v11216_v60 = vmax.f32 %v3156_v36, 0.0 }
 0x62b   : > { %3481 = vmatmul.f32.gmra.mxu3 %v11174_v47  ;;  %v11200_v28 = vmax.f32 %v3181_v25, 0.0  ;;  %v3073_v25 = vadd.f32 %v10942_v43, %v2960_v63 }
 0x62c   : > { %3710 = vmatmul.f32.gmra.mxu1 %v11195_v15  ;;  %15207 = vst [vmem:[#allocation29_spill] sm:$0xff] %v11216_v60 }
 0x62d   : > { %15203 = vst [vmem:[#allocation25_spill] sm:$0xff] %v11200_v28  ;;  %3413 = vmatmul.f32.gmra.mxu2 %v11200_v28  ;;  %3639 = vmatmul.f32.gmra.mxu0 %v11200_v28  ;;  %v2776_v28 = vadd.f32 %v11009_v57, %v10820_v44  ;;  %v3158_v43 = vadd.f32 %v3073_v25, %v15209_v2  ;;  %v15210_v57 = vld [vmem:[#allocation28_spill] sm:$0xff] }
 0x62e   : > { %v2885_v56 = vpop.f32.mrf.mxu3 }
 0x62f   : > { %v2886_v29 = vadd.f32 %v2885_v56, %v2773_v4  ;;  %v2963_v4 = vadd.f32 %v10809_v46, %v10980_v32 }
 0x631   : > { %v3183_v59 = vadd.f32 %v2886_v29, %v15206_v42  ;;  %v11213_v49 = vpop.f32.mrf.mxu1  ;;  %v3076_v42 = vadd.f32 %v10953_v45, %v2963_v4  ;;  %v2966_v45 = vadd.f32 %v10815_v30, %v10980_v32 }
 0x633   : > { %3484 = vmatmul.f32.gmra.mxu3 %v11195_v15  ;;  %v11221_v37 = vmax.f32 %v3183_v59, 0.0  ;;  %v11235_v59 = vmax.f32 %v3158_v43, 0.0  ;;  %v11239_v15 = vpop.f32.mrf.mxu2  ;;  %v15215_v43 = vld [vmem:[#allocation30_spill] sm:$0xff] }
 0x634   : > { %3713 = vmatmul.f32.gmra.mxu1 %v11216_v60  ;;  %15212 = vst [vmem:[#allocation39_spill] sm:$0xff] %v11239_v15 }
 0x635   : > { %15208 = vst [vmem:[#allocation35_spill] sm:$0xff] %v11221_v37  ;;  %3416 = vmatmul.f32.gmra.mxu2 %v11221_v37  ;;  %3642 = vmatmul.f32.gmra.mxu0 %v11221_v37  ;;  %v2779_v37 = vadd.f32 %v11037_v53, %v10820_v44  ;;  %v11250_v53 = vpop.f32.mrf.mxu0 }
 0x636   : > { %v2888_v63 = vpop.f32.mrf.mxu3  ;;  %15211 = vst [vmem:[#allocation33_spill] sm:$0xff] %v11235_v59 }
 0x637   : > { %v2889_v36 = vadd.f32 %v2888_v63, %v2776_v28  ;;  %v15214_v28 = vld [vmem:[#allocation32_spill] sm:$0xff] }
 0x638   : > { %v3160_v25 = vadd.f32 %v3076_v42, %v15214_v28  ;;  %v15219_v42 = vld [vmem:[#allocation34_spill] sm:$0xff] }
 0x639   : > { %v3185_v56 = vadd.f32 %v2889_v36, %v15210_v57  ;;  %v11232_v29 = vpop.f32.mrf.mxu1  ;;  %v3079_v57 = vadd.f32 %v10966_v62, %v2966_v45  ;;  %v2969_v62 = vadd.f32 %v10828_v18, %v10980_v32 }
 0x63b   : > { %3487 = vmatmul.f32.gmra.mxu3 %v11216_v60  ;;  %v11242_v46 = vmax.f32 %v3185_v56, 0.0  ;;  %v11256_v56 = vmax.f32 %v3160_v25, 0.0  ;;  %v3162_v45 = vadd.f32 %v3079_v57, %v15219_v42 }
 0x63c   : > { %3716 = vmatmul.f32.gmra.mxu1 %v11235_v59 }
 0x63d   : > { %15213 = vst [vmem:[#allocation37_spill] sm:$0xff] %v11242_v46  ;;  %3419 = vmatmul.f32.gmra.mxu2 %v11242_v46  ;;  %3645 = vmatmul.f32.gmra.mxu0 %v11242_v46  ;;  %v2782_v46 = vadd.f32 %v11062_v20, %v10820_v44  ;;  %v15220_v20 = vld [vmem:[#allocation64_spill] sm:$0xff]  ;;  %v11279_v60 = vpop.f32.mrf.mxu0 }
 0x63e   : > { %v2891_v4 = vpop.f32.mrf.mxu3  ;;  %15216 = vst [vmem:[#allocation43_spill] sm:$0xff] %v11256_v56 }
 0x63f   : > { %v2892_v2 = vadd.f32 %v2891_v4, %v2779_v37  ;;  %v11264_v37 = vpop.f32.mrf.mxu2 }
 0x640   : > { %15218 = vst [vmem:[#allocation45_spill] sm:$0xff] %v11264_v37 }
 0x641   : > { %v3187_v63 = vadd.f32 %v2892_v2, %v15215_v43  ;;  %v11253_v36 = vpop.f32.mrf.mxu1  ;;  %v3082_v43 = vadd.f32 %v10977_v14, %v2969_v62  ;;  %v2972_v14 = vadd.f32 %v10841_v52, %v10980_v32 }
 0x643   : > { %3490 = vmatmul.f32.gmra.mxu3 %v11235_v59  ;;  %v11261_v30 = vmax.f32 %v3187_v63, 0.0  ;;  %v11275_v63 = vmax.f32 %v3162_v45, 0.0  ;;  %v2785_v59 = vadd.f32 %v11088_v23, %v10820_v44  ;;  %v15225_v45 = vld [vmem:[#allocation66_spill] sm:$0xff] }
 0x644   : > { %3719 = vmatmul.f32.gmra.mxu1 %v11256_v56 }
 0x645   : > { %15217 = vst [vmem:[#allocation41_spill] sm:$0xff] %v11261_v30  ;;  %3422 = vmatmul.f32.gmra.mxu2 %v11261_v30  ;;  %3648 = vmatmul.f32.gmra.mxu0 %v11261_v30 }
 0x646   : > { %v2894_v28 = vpop.f32.mrf.mxu3  ;;  %15221 = vst [vmem:[#allocation16_spill] sm:$0xff] %v11275_v63 }
 0x647   : > { %v2895_v25 = vadd.f32 %v2894_v28, %v2782_v46  ;;  %v15223_v46 = vld [vmem:[#allocation36_spill] sm:$0xff]  ;;  %v11290_v42 = vpop.f32.mrf.mxu2 }
 0x648   : > { %v3164_v57 = vadd.f32 %v3082_v43, %v15223_v46  ;;  %15224 = vst [vmem:[#allocation18_spill] sm:$0xff] %v11290_v42  ;;  %v11304_v43 = vpop.f32.mrf.mxu0 }
 0x649   : > { %v3189_v4 = vadd.f32 %v2895_v25, %v15220_v20  ;;  %v11272_v2 = vpop.f32.mrf.mxu1  ;;  %v3085_v20 = vadd.f32 %v10995_v0, %v2972_v14  ;;  %v2975_v0 = vadd.f32 %v10859_v39, %v10980_v32 }
 0x64b   : > { %3493 = vmatmul.f32.gmra.mxu3 %v11256_v56  ;;  %v11282_v18 = vmax.f32 %v3189_v4, 0.0  ;;  %v11296_v4 = vmax.f32 %v3164_v57, 0.0 }
 0x64c   : > { %3722 = vmatmul.f32.gmra.mxu1 %v11275_v63 }
 0x64d   : > { %15222 = vst [vmem:[#allocation51_spill] sm:$0xff] %v11282_v18  ;;  %3425 = vmatmul.f32.gmra.mxu2 %v11282_v18  ;;  %3651 = vmatmul.f32.gmra.mxu0 %v11282_v18  ;;  %v2788_v18 = vadd.f32 %v11109_v33, %v10820_v44 }
 0x64e   : > { %v2897_v62 = vpop.f32.mrf.mxu3  ;;  %15226 = vst [vmem:[#allocation54_spill] sm:$0xff] %v11296_v4 }
 0x64f   : > { %v2898_v23 = vadd.f32 %v2897_v62, %v2785_v59  ;;  %v15228_v59 = vld [vmem:[#allocation38_spill] sm:$0xff]  ;;  %v11311_v33 = vpop.f32.mrf.mxu2  ;;  %v15229_v62 = vld [vmem:[#allocation68_spill] sm:$0xff] }
 0x650   : > { %v3166_v14 = vadd.f32 %v3085_v20, %v15228_v59  ;;  %v15232_v20 = vld [vmem:[#allocation72_spill] sm:$0xff]  ;;  %v11330_v59 = vpop.f32.mrf.mxu0 }
 0x651   : > { %v3191_v28 = vadd.f32 %v2898_v23, %v15225_v45  ;;  %v11293_v25 = vpop.f32.mrf.mxu1 }
 0x652   : > { %v11317_v30 = vmax.f32 %v3166_v14, 0.0 }
 0x653   : > { %3496 = vmatmul.f32.gmra.mxu3 %v11275_v63  ;;  %v11301_v52 = vmax.f32 %v3191_v28, 0.0  ;;  %v3088_v28 = vadd.f32 %v11012_v8, %v2975_v0 }
 0x654   : > { %3725 = vmatmul.f32.gmra.mxu1 %v11296_v4  ;;  %15230 = vst [vmem:[#allocation26_spill] sm:$0xff] %v11317_v30 }
 0x655   : > { %15227 = vst [vmem:[#allocation22_spill] sm:$0xff] %v11301_v52  ;;  %3428 = vmatmul.f32.gmra.mxu2 %v11301_v52  ;;  %3654 = vmatmul.f32.gmra.mxu0 %v11301_v52  ;;  %v2791_v52 = vadd.f32 %v11138_v24, %v10820_v44  ;;  %v3168_v8 = vadd.f32 %v3088_v28, %v15232_v20  ;;  %v15233_v24 = vld [vmem:[#allocation70_spill] sm:$0xff] }
 0x656   : > { %v2900_v46 = vpop.f32.mrf.mxu3 }
 0x657   : > { %v2901_v57 = vadd.f32 %v2900_v46, %v2788_v18  ;;  %v2978_v18 = vadd.f32 %v10874_v6, %v10980_v32 }
 0x659   : > { %v3193_v23 = vadd.f32 %v2901_v57, %v15229_v62  ;;  %v11314_v45 = vpop.f32.mrf.mxu1  ;;  %v3091_v62 = vadd.f32 %v11030_v22, %v2978_v18  ;;  %v2981_v22 = vadd.f32 %v10889_v27, %v10980_v32 }
 0x65b   : > { %3499 = vmatmul.f32.gmra.mxu3 %v11296_v4  ;;  %v11322_v39 = vmax.f32 %v3193_v23, 0.0  ;;  %v11336_v23 = vmax.f32 %v3168_v8, 0.0  ;;  %v11340_v4 = vpop.f32.mrf.mxu2 }
 0x65c   : > { %3728 = vmatmul.f32.gmra.mxu1 %v11317_v30 }
 0x65d   : > { %15231 = vst [vmem:[#allocation56_spill] sm:$0xff] %v11322_v39  ;;  %3431 = vmatmul.f32.gmra.mxu2 %v11322_v39  ;;  %3657 = vmatmul.f32.gmra.mxu0 %v11322_v39  ;;  %v2794_v39 = vadd.f32 %v11163_v1, %v10820_v44  ;;  %v11351_v44 = vpop.f32.mrf.mxu0  ;;  %v15237_v1 = vld [vmem:[#allocation42_spill] sm:$0xff] }
 0x65e   : > { %v2903_v0 = vpop.f32.mrf.mxu3  ;;  %15234 = vst [vmem:[#allocation60_spill] sm:$0xff] %v11336_v23 }
 0x65f   : > { %v2904_v14 = vadd.f32 %v2903_v0, %v2791_v52  ;;  %v15236_v52 = vld [vmem:[#allocation44_spill] sm:$0xff] }
 0x660   : > { %v3170_v28 = vadd.f32 %v3091_v62, %v15236_v52  ;;  %v15240_v62 = vld [vmem:[#allocation46_spill] sm:$0xff] }
 0x661   : > { %v3195_v46 = vadd.f32 %v2904_v14, %v15233_v24  ;;  %v11333_v57 = vpop.f32.mrf.mxu1  ;;  %v3094_v14 = vadd.f32 %v11051_v26, %v2981_v22 }
 0x662   : > { %v11357_v24 = vmax.f32 %v3170_v28, 0.0 }
 0x663   : > { %3502 = vmatmul.f32.gmra.mxu3 %v11317_v30  ;;  %v11343_v6 = vmax.f32 %v3195_v46, 0.0  ;;  %v11363_v27 = vpop.f32.mrf.mxu2  ;;  %v3172_v52 = vadd.f32 %v3094_v14, %v15240_v62 }
 0x664   : > { %3731 = vmatmul.f32.gmra.mxu1 %v11336_v23  ;;  %15238 = vst [vmem:[#allocation32_spill] sm:$0xff] %v11357_v24 }
 0x665   : > { %15235 = vst [vmem:[#allocation28_spill] sm:$0xff] %v11343_v6  ;;  %3434 = vmatmul.f32.gmra.mxu2 %v11343_v6  ;;  %3660 = vmatmul.f32.gmra.mxu0 %v11343_v6 }
 0x666   : > { %v2906_v18 = vpop.f32.mrf.mxu3 }
 0x667   : > { %v2907_v20 = vadd.f32 %v2906_v18, %v2794_v39  ;;  %v2984_v39 = vadd.f32 %v10902_v34, %v10980_v32  ;;  %v11375_v18 = vmax.f32 %v3172_v52, 0.0  ;;  %v15243_v34 = vld [vmem:[#allocation47_spill] sm:$0xff]  ;;  %v2990_v52 = vadd.f32 %v10935_v13, %v10980_v32  ;;  %v15250_v13 = vld [vmem:[#allocation57_spill] sm:$0xff] }
 0x669   : > { %v3197_v8 = vadd.f32 %v2907_v20, %v15237_v1  ;;  %v11354_v0 = vpop.f32.mrf.mxu1  ;;  %v3097_v28 = vadd.f32 %v11070_v10, %v2984_v39  ;;  %15242 = vst [vmem:[#allocation64_spill] sm:$0xff] %v11375_v18  ;;  %v11377_v20 = vpop.f32.mrf.mxu0  ;;  %v2987_v1 = vadd.f32 %v10920_v31, %v10980_v32  ;;  %v15246_v31 = vld [vmem:[#allocation52_spill] sm:$0xff] }
 0x66b   : > { %3505 = vmatmul.f32.gmra.mxu3 %v11336_v23  ;;  %v11360_v46 = vmax.f32 %v3197_v8, 0.0  ;;  %v3174_v8 = vadd.f32 %v3097_v28, %v15243_v34  ;;  %v11400_v34 = vpop.f32.mrf.mxu2 }
 0x66c   : > { %3734 = vmatmul.f32.gmra.mxu1 %v11357_v24 }
 0x66d   : > { %15239 = vst [vmem:[#allocation30_spill] sm:$0xff] %v11360_v46  ;;  %3437 = vmatmul.f32.gmra.mxu2 %v11360_v46  ;;  %3663 = vmatmul.f32.gmra.mxu0 %v11360_v46  ;;  %v3100_v46 = vadd.f32 %v11091_v9, %v2987_v1  ;;  %v11389_v10 = vmax.f32 %v3174_v8, 0.0  ;;  %v3103_v9 = vadd.f32 %v11112_v58, %v2990_v52  ;;  %v15249_v8 = vld [vmem:[#allocation69_spill] sm:$0xff]  ;;  %v15253_v52 = vld [vmem:[#allocation48_spill] sm:$0xff] }
 0x66e   : > { %v11370_v26 = vpop.f32.mrf.mxu3 }
 0x66f   : > { %15241 = vst [vmem:[#allocation34_spill] sm:$0xff] %v11370_v26  ;;  %v3176_v6 = vadd.f32 %v3100_v46, %v15246_v31  ;;  %v3178_v23 = vadd.f32 %v3103_v9, %v15250_v13  ;;  %v15254_v9 = vld [vmem:[#allocation59_spill] sm:$0xff] }
 0x670   : > { %15245 = vst [vmem:[#allocation66_spill] sm:$0xff] %v11389_v10 }
 0x671   : > { %v11372_v22 = vpop.f32.mrf.mxu1  ;;  %v11393_v39 = vpop.f32.mrf.mxu0  ;;  %v11405_v1 = vmax.f32 %v3176_v6, 0.0  ;;  %v11421_v6 = vmax.f32 %v3178_v23, 0.0 }
 0x673   : > { %3508 = vmatmul.f32.gmra.mxu3 %v11357_v24  ;;  %15248 = vst [vmem:[#allocation68_spill] sm:$0xff] %v11405_v1  ;;  %v11419_v58 = vpop.f32.mrf.mxu2 }
 0x674   : > { %3737 = vmatmul.f32.gmra.mxu1 %v11375_v18  ;;  %15252 = vst [vmem:[#allocation70_spill] sm:$0xff] %v11421_v6 }
 0x676   : > { %v11384_v14 = vpop.f32.mrf.mxu3 }
 0x677   : > { %15244 = vst [vmem:[#allocation36_spill] sm:$0xff] %v11384_v14 }
 0x679   : > { %v11386_v62 = vpop.f32.mrf.mxu1  ;;  %v11414_v31 = vpop.f32.mrf.mxu0 }
 0x67b   : > { %3511 = vmatmul.f32.gmra.mxu3 %v11375_v18  ;;  %v2993_v18 = vadd.f32 %v15249_v8, %v10980_v32  ;;  %v2996_v8 = vadd.f32 %v15253_v52, %v10980_v32  ;;  %v11438_v23 = vpop.f32.mrf.mxu2  ;;  %v15257_v52 = vld [vmem:[#allocation55_spill] sm:$0xff] }
 0x67c   : > { %3740 = vmatmul.f32.gmra.mxu1 %v11389_v10 }
 0x67d   : > { %v3106_v63 = vadd.f32 %v11131_v11, %v2993_v18  ;;  %v3109_v11 = vadd.f32 %v11152_v54, %v2996_v8 }
 0x67e   : > { %v11398_v28 = vpop.f32.mrf.mxu3 }
 0x67f   : > { %15247 = vst [vmem:[#allocation38_spill] sm:$0xff] %v11398_v28  ;;  %v3180_v13 = vadd.f32 %v3106_v63, %v15254_v9  ;;  %v15258_v63 = vld [vmem:[#allocation61_spill] sm:$0xff] }
 0x680   : > { %v3182_v9 = vadd.f32 %v3109_v11, %v15258_v63 }
 0x681   : > { %v11402_v24 = vpop.f32.mrf.mxu1  ;;  %v11430_v56 = vpop.f32.mrf.mxu0  ;;  %v11435_v18 = vmax.f32 %v3180_v13, 0.0  ;;  %v15261_v13 = vld [vmem:[#allocation71_spill] sm:$0xff] }
 0x682   : > { %v11449_v54 = vmax.f32 %v3182_v9, 0.0 }
 0x683   : > { %3514 = vmatmul.f32.gmra.mxu3 %v11389_v10  ;;  %15256 = vst [vmem:[#allocation42_spill] sm:$0xff] %v11435_v18  ;;  %v11458_v11 = vpop.f32.mrf.mxu2 }
 0x684   : > { %3743 = vmatmul.f32.gmra.mxu1 %v11405_v1  ;;  %15260 = vst [vmem:[#allocation47_spill] sm:$0xff] %v11449_v54 }
 0x686   : > { %v11412_v46 = vpop.f32.mrf.mxu3 }
 0x687   : > { %15251 = vst [vmem:[#allocation72_spill] sm:$0xff] %v11412_v46 }
 0x689   : > { %v11416_v30 = vpop.f32.mrf.mxu1  ;;  %v11451_v8 = vpop.f32.mrf.mxu0 }
 0x68b   : > { %3517 = vmatmul.f32.gmra.mxu3 %v11405_v1  ;;  %v2999_v1 = vadd.f32 %v15257_v52, %v10980_v32  ;;  %v15262_v52 = vld [vmem:[#allocation63_spill] sm:$0xff]  ;;  %v11476_v16 = vpop.f32.mrf.mxu2 }
 0x68c   : > { %3746 = vmatmul.f32.gmra.mxu1 %v11421_v6 }
 0x68d   : > { %v3112_v3 = vadd.f32 %v11171_v55, %v2999_v1 }
 0x68e   : > { %v11428_v10 = vpop.f32.mrf.mxu3 }
 0x68f   : > { %15255 = vst [vmem:[#allocation44_spill] sm:$0xff] %v11428_v10  ;;  %v3184_v12 = vadd.f32 %v3112_v3, %v15262_v52  ;;  %v15264_v3 = vld [vmem:[#allocation83_spill] sm:$0xff] }
 0x691   : > { %v11432_v47 = vpop.f32.mrf.mxu1  ;;  %v11465_v1 = vmax.f32 %v3184_v12, 0.0  ;;  %v11469_v9 = vpop.f32.mrf.mxu0 }
 0x693   : > { %3520 = vmatmul.f32.gmra.mxu3 %v11421_v6  ;;  %v3002_v6 = vadd.f32 %v15261_v13, %v10980_v32  ;;  %15263 = vst [vmem:[#allocation52_spill] sm:$0xff] %v11465_v1  ;;  %v3005_v13 = vadd.f32 %v11027_v7, %v10980_v32  ;;  %v15266_v7 = vld [vmem:[#allocation65_spill] sm:$0xff]  ;;  %v11493_v15 = vpop.f32.mrf.mxu2 }
 0x694   : > { %3749 = vmatmul.f32.gmra.mxu1 %v11435_v18 }
 0x695   : > { %v3115_v55 = vadd.f32 %v11192_v19, %v3002_v6  ;;  %v3118_v12 = vadd.f32 %v11213_v49, %v3005_v13  ;;  %v3008_v6 = vadd.f32 %v11048_v21, %v10980_v32  ;;  %v3011_v21 = vadd.f32 %v11077_v17, %v10980_v32  ;;  %v15268_v13 = vld [vmem:[#allocation15_spill] sm:$0xff] }
 0x696   : > { %v11444_v51 = vpop.f32.mrf.mxu3 }
 0x697   : > { %15259 = vst [vmem:[#allocation46_spill] sm:$0xff] %v11444_v51  ;;  %v3186_v52 = vadd.f32 %v3115_v55, %v15264_v3  ;;  %v3121_v28 = vadd.f32 %v11232_v29, %v3008_v6  ;;  %v3124_v46 = vadd.f32 %v11253_v36, %v3011_v21  ;;  %v3014_v6 = vadd.f32 %v11102_v5, %v10980_v32 }
 0x698   : > { %v3017_v21 = vadd.f32 %v11128_v48, %v10980_v32 }
 0x699   : > { %v11446_v35 = vpop.f32.mrf.mxu1  ;;  %v11481_v19 = vmax.f32 %v3186_v52, 0.0  ;;  %v3613_v3 = vpop.f32.mrf.mxu0  ;;  %v3190_v52 = vadd.f32 %v3121_v28, %v15268_v13  ;;  %v3127_v13 = vadd.f32 %v11272_v2, %v3014_v6  ;;  %v3020_v6 = vadd.f32 %v11149_v38, %v10980_v32 }
 0x69a   : > { %v3130_v42 = vadd.f32 %v11293_v25, %v3017_v21  ;;  %v15279_v21 = vld [vmem:[#allocation81_spill] sm:$0xff] }
 0x69b   : > { %3523 = vmatmul.f32.gmra.mxu3 %v11435_v18  ;;  %15265 = vst [vmem:[#allocation69_spill] sm:$0xff] %v11481_v19  ;;  %v11505_v29 = vmax.f32 %v3190_v52, 0.0  ;;  %v15273_v52 = vld [vmem:[#allocation73_spill] sm:$0xff] }
 0x69c   : > { %3752 = vmatmul.f32.gmra.mxu1 %v11449_v54  ;;  %v3194_v5 = vadd.f32 %v3127_v13, %v15273_v52 }
 0x69d   : > { %15269 = vst [vmem:[#allocation48_spill] sm:$0xff] %v11505_v29 }
 0x69e   : > { %v11460_v63 = vpop.f32.mrf.mxu3  ;;  %v11525_v51 = vmax.f32 %v3194_v5, 0.0 }
 0x6a0   : > { %15274 = vst [vmem:[#allocation61_spill] sm:$0xff] %v11525_v51 }
 0x6a1   : > { %v11462_v26 = vpop.f32.mrf.mxu1 }
 0x6a3   : > { %3526 = vmatmul.f32.gmra.mxu3 %v11449_v54  ;;  %v3188_v54 = vadd.f32 %v3118_v12, %v15266_v7  ;;  %v3616_v7 = vpop.f32.mrf.mxu0 }
 0x6a4   : > { %3755 = vmatmul.f32.gmra.mxu1 %v11465_v1 }
 0x6a5   : > { %v11495_v49 = vmax.f32 %v3188_v54, 0.0  ;;  %v3387_v54 = vpop.f32.mrf.mxu2 }
 0x6a6   : > { %v11474_v18 = vpop.f32.mrf.mxu3 }
 0x6a7   : > { %15267 = vst [vmem:[#allocation57_spill] sm:$0xff] %v11495_v49 }
 0x6a9   : > { %v11478_v14 = vpop.f32.mrf.mxu1 }
 0x6ab   : > { %3529 = vmatmul.f32.gmra.mxu3 %v11465_v1  ;;  %v11517_v36 = vpop.f32.mrf.mxu0 }
 0x6ac   : > { %3758 = vmatmul.f32.gmra.mxu1 %v11481_v19  ;;  %15272 = vst [vmem:[#allocation55_spill] sm:$0xff] %v11517_v36  ;;  %v3133_v36 = vadd.f32 %v11314_v45, %v3020_v6 }
 0x6ae   : > { %v11488_v55 = vpop.f32.mrf.mxu3  ;;  %v3198_v5 = vadd.f32 %v3133_v36, %v15279_v21 }
 0x6b1   : > { %v11490_v41 = vpop.f32.mrf.mxu1 }
 0x6b3   : > { %3532 = vmatmul.f32.gmra.mxu3 %v11481_v19  ;;  %v15270_v19 = vld [vmem:[#allocation67_spill] sm:$0xff]  ;;  %v11529_v2 = vpop.f32.mrf.mxu0 }
 0x6b4   : > { %3761 = vmatmul.f32.gmra.mxu1 %v11495_v49  ;;  %v3192_v17 = vadd.f32 %v3124_v46, %v15270_v19  ;;  %15275 = vst [vmem:[#allocation71_spill] sm:$0xff] %v11529_v2 }
 0x6b6   : > { %v11502_v12 = vpop.f32.mrf.mxu3  ;;  %v11515_v10 = vmax.f32 %v3192_v17, 0.0  ;;  %v15276_v17 = vld [vmem:[#allocation77_spill] sm:$0xff] }
 0x6b7   : > { %v3196_v48 = vadd.f32 %v3130_v42, %v15276_v17  ;;  %v11546_v17 = vmax.f32 %v3198_v5, 0.0  ;;  %v3706_v5 = vadd.f32 %v11446_v35, %v11351_v44  ;;  %v3688_v44 = vadd.f32 %v11354_v0, %v11203_v61  ;;  %v15285_v61 = vld [vmem:[#allocation46_spill] sm:$0xff] }
 0x6b8   : > { %15271 = vst [vmem:[#allocation59_spill] sm:$0xff] %v11515_v10  ;;  %v3474_v0 = vadd.f32 %v15285_v61, %v11311_v33 }
 0x6b9   : > { %v3717_v1 = vpop.f32.mrf.mxu1  ;;  %v11537_v25 = vmax.f32 %v3196_v48, 0.0  ;;  %15281 = vst [vmem:[#allocation15_spill] sm:$0xff] %v11546_v17 }
 0x6bb   : > { %3535 = vmatmul.f32.gmra.mxu3 %v11495_v49  ;;  %v3390_v49 = vpop.f32.mrf.mxu2  ;;  %15278 = vst [vmem:[#allocation83_spill] sm:$0xff] %v11537_v25  ;;  %v11542_v2 = vpop.f32.mrf.mxu0 }
 0x6bc   : > { %3764 = vmatmul.f32.gmra.mxu1 %v11505_v29 }
 0x6be   : > { %v11512_v37 = vpop.f32.mrf.mxu3 }
 0x6c1   : > { %v3720_v28 = vpop.f32.mrf.mxu1 }
 0x6c2   : > { %v3721_v36 = vadd.f32 %v3720_v28, %v11451_v8 }
 0x6c3   : > { %3538 = vmatmul.f32.gmra.mxu3 %v11505_v29  ;;  %v11534_v13 = vpop.f32.mrf.mxu2  ;;  %v11552_v21 = vpop.f32.mrf.mxu0 }
 0x6c4   : > { %3767 = vmatmul.f32.gmra.mxu1 %v11515_v10  ;;  %15277 = vst [vmem:[#allocation63_spill] sm:$0xff] %v11534_v13 }
 0x6c6   : > { %v3491_v46 = vpop.f32.mrf.mxu3 }
 0x6c7   : > { %v3492_v35 = vadd.f32 %v3491_v46, %v11458_v11  ;;  %v15294_v46 = vld [vmem:[#allocation36_spill] sm:$0xff] }
 0x6c9   : > { %v3723_v19 = vpop.f32.mrf.mxu1 }
 0x6ca   : > { %v3724_v6 = vadd.f32 %v3723_v19, %v11469_v9  ;;  %v3712_v9 = vadd.f32 %v11478_v14, %v11393_v39  ;;  %v3709_v19 = vadd.f32 %v11462_v26, %v11377_v20  ;;  %v3703_v14 = vadd.f32 %v11432_v47, %v11330_v59 }
 0x6cb   : > { %3541 = vmatmul.f32.gmra.mxu3 %v11515_v10  ;;  %v11544_v38 = vpop.f32.mrf.mxu2  ;;  %v3700_v20 = vadd.f32 %v11416_v30, %v11304_v43  ;;  %v3489_v47 = vadd.f32 %v11512_v37, %v11438_v23  ;;  %v3694_v30 = vadd.f32 %v11386_v62, %v11250_v53  ;;  %v3486_v43 = vadd.f32 %v11502_v12, %v11419_v58  ;;  %v15287_v58 = vld [vmem:[#allocation44_spill] sm:$0xff] }
 0x6cc   : > { %3770 = vmatmul.f32.gmra.mxu1 %v11525_v51  ;;  %15280 = vst [vmem:[#allocation65_spill] sm:$0xff] %v11544_v38  ;;  %v3691_v59 = vadd.f32 %v11372_v22, %v11229_v50  ;;  %v3483_v37 = vadd.f32 %v11488_v55, %v11400_v34  ;;  %v3480_v53 = vadd.f32 %v11474_v18, %v11363_v27  ;;  %v8640_v34 = vld [vmem:[#allocation2] sm:$0xff]  ;;  %v15286_v27 = vld [vmem:[#allocation18_spill] sm:$0xff]  ;;  %v15290_v23 = vld [vmem:[#allocation72_spill] sm:$0xff] }
 0x6cd   : > { %v3685_v50 = vadd.f32 %v11333_v57, %v11178_v40  ;;  %v3477_v62 = vadd.f32 %v11460_v63, %v11340_v4  ;;  %v3471_v18 = vadd.f32 %v15287_v58, %v15286_v27  ;;  %v15289_v57 = vld [vmem:[#allocation45_spill] sm:$0xff]  ;;  %v15291_v63 = vld [vmem:[#allocation39_spill] sm:$0xff]  ;;  %v15292_v55 = vld [vmem:[#allocation38_spill] sm:$0xff] }
 0x6ce   : > { %v3494_v29 = vpop.f32.mrf.mxu3  ;;  %v3468_v11 = vadd.f32 %v15290_v23, %v15289_v57  ;;  %v3465_v12 = vadd.f32 %v15292_v55, %v15291_v63  ;;  %v8648_v23 = vld [vmem:[#allocation2 + $0x80] sm:$0xff] }
 0x6cf   : > { %v3495_v26 = vadd.f32 %v3494_v29, %v11476_v16 }
 0x6d1   : > { %v3726_v52 = vpop.f32.mrf.mxu1 }
 0x6d2   : > { %v3727_v45 = vadd.f32 %v3726_v52, %v3613_v3  ;;  %v3715_v52 = vadd.f32 %v11490_v41, %v11414_v31  ;;  %v11570_v41 = vpop.f32.mrf.mxu0 }
 0x6d3   : > { %3544 = vmatmul.f32.gmra.mxu3 %v11525_v51  ;;  %v11558_v3 = vpop.f32.mrf.mxu2 }
 0x6d4   : > { %3773 = vmatmul.f32.gmra.mxu1 %v11537_v25  ;;  %15282 = vst [vmem:[#allocation67_spill] sm:$0xff] %v11558_v3 }
 0x6d6   : > { %v3497_v10 = vpop.f32.mrf.mxu3 }
 0x6d7   : > { %v3498_v31 = vadd.f32 %v3497_v10, %v11493_v15  ;;  %v3697_v15 = vadd.f32 %v11402_v24, %v11279_v60 }
 0x6d9   : > { %v3729_v32 = vpop.f32.mrf.mxu1 }
 0x6da   : > { %v3730_v42 = vadd.f32 %v3729_v32, %v3616_v7  ;;  %v3718_v7 = vadd.f32 %v3717_v1, %v11430_v56  ;;  %v11595_v60 = vpop.f32.mrf.mxu0 }
 0x6db   : > { %3547 = vmatmul.f32.gmra.mxu3 %v11537_v25  ;;  %v11578_v39 = vpop.f32.mrf.mxu2  ;;  %v8652_v25 = vld [vmem:[#allocation2 + $0xc0] sm:$0xff] }
 0x6dc   : > { %3776 = vmatmul.f32.gmra.mxu1 %v11546_v17  ;;  %4013 = vmatpush.msra.mxu0 %v3730_v42  ;;  %v8641_v42 = vld [vmem:[#allocation2 + $0x10] sm:$0xff] }
 0x6de   : > { %v3500_v48 = vpop.f32.mrf.mxu3  ;;  %4014 = vmatpush.msra.mxu0 %v3727_v45  ;;  %v15295_v45 = vld [vmem:[#allocation21_spill] sm:$0xff] }
 0x6df   : > { %v3501_v56 = vadd.f32 %v3500_v48, %v3387_v54  ;;  %v15293_v54 = vld [vmem:[#allocation31_spill] sm:$0xff] }
 0x6e0   : > { %4015 = vmatpush.msra.mxu0 %v3724_v6  ;;  %v3462_v32 = vadd.f32 %v15294_v46, %v15293_v54  ;;  %v15296_v6 = vld [vmem:[#allocation34_spill] sm:$0xff] }
 0x6e1   : > { %v11554_v51 = vpop.f32.mrf.mxu1  ;;  %v3459_v48 = vadd.f32 %v15296_v6, %v15295_v45  ;;  %v8650_v45 = vld [vmem:[#allocation2 + $0xa0] sm:$0xff] }
 0x6e2   : > { %4016 = vmatpush.msra.mxu0 %v3721_v36  ;;  %v11621_v4 = vpop.f32.mrf.mxu0 }
 0x6e3   : > { %3550 = vmatmul.f32.gmra.mxu3 %v11546_v17  ;;  %v11607_v22 = vpop.f32.mrf.mxu2 }
 0x6e4   : > { %4017 = vmatpush.msra.mxu0 %v3718_v7 }
 0x6e6   : > { %v3503_v8 = vpop.f32.mrf.mxu3  ;;  %4018 = vmatpush.msra.mxu0 %v3715_v52 }
 0x6e7   : > { %v3504_v28 = vadd.f32 %v3503_v8, %v3390_v49 }
 0x6e8   : > { %4019 = vmatpush.msra.mxu0 %v3712_v9  ;;  %v8642_v9 = vld [vmem:[#allocation2 + $0x20] sm:$0xff] }
 0x6e9   : > { %3787 = vmatpush.msra.mxu2 %v3504_v28  ;;  %v11566_v1 = vpop.f32.mrf.mxu1 }
 0x6ea   : > { %4020 = vmatpush.msra.mxu0 %v3709_v19  ;;  %v11635_v7 = vpop.f32.mrf.mxu0 }
 0x6eb   : > { %3788 = vmatpush.msra.mxu2 %v3501_v56  ;;  %v11627_v29 = vpop.f32.mrf.mxu2 }
 0x6ec   : > { %4021 = vmatpush.msra.mxu0 %v3706_v5  ;;  %v8643_v5 = vld [vmem:[#allocation2 + $0x30] sm:$0xff] }
 0x6ed   : > { %3789 = vmatpush.msra.mxu2 %v3498_v31 }
 0x6ee   : > { %v11580_v49 = vpop.f32.mrf.mxu3  ;;  %4022 = vmatpush.msra.mxu0 %v3703_v14 }
 0x6ef   : > { %15283 = vst [vmem:[#allocation73_spill] sm:$0xff] %v11580_v49  ;;  %3790 = vmatpush.msra.mxu2 %v3495_v26 }
 0x6f0   : > { %4023 = vmatpush.msra.mxu0 %v3700_v20  ;;  %v8644_v20 = vld [vmem:[#allocation2 + $0x40] sm:$0xff] }
 0x6f1   : > { %3791 = vmatpush.msra.mxu2 %v3492_v35  ;;  %v11587_v16 = vpop.f32.mrf.mxu1 }
 0x6f2   : > { %4024 = vmatpush.msra.mxu0 %v3697_v15  ;;  %v11645_v56 = vpop.f32.mrf.mxu0 }
 0x6f3   : > { %3792 = vmatpush.msra.mxu2 %v3489_v47  ;;  %v11639_v8 = vpop.f32.mrf.mxu2 }
 0x6f4   : > { %4025 = vmatpush.msra.mxu0 %v3694_v30 }
 0x6f5   : > { %3793 = vmatpush.msra.mxu2 %v3486_v43  ;;  %v8645_v43 = vld [vmem:[#allocation2 + $0x50] sm:$0xff] }
 0x6f6   : > { %v11601_v24 = vpop.f32.mrf.mxu3  ;;  %4026 = vmatpush.msra.mxu0 %v3691_v59 }
 0x6f7   : > { %15284 = vst [vmem:[#allocation77_spill] sm:$0xff] %v11601_v24  ;;  %3794 = vmatpush.msra.mxu2 %v3483_v37 }
 0x6f8   : > { %4027 = vmatpush.msra.mxu0 %v3688_v44 }
 0x6f9   : > { %3795 = vmatpush.msra.mxu2 %v3480_v53  ;;  %v11611_v10 = vpop.f32.mrf.mxu1 }
 0x6fa   : > { %4028 = vmatpush.msra.mxu0 %v3685_v50  ;;  %v11653_v35 = vpop.f32.mrf.mxu0  ;;  %v8646_v50 = vld [vmem:[#allocation2 + $0x60] sm:$0xff] }
 0x6fb   : > { %3796 = vmatpush.msra.mxu2 %v3477_v62  ;;  %4029 = vmatmul.f32.vlgmr.msra.gmra.mxu0 %v8640_v34  ;;  %v11647_v31 = vpop.f32.mrf.mxu2 }
 0x6fd   : > { %3797 = vmatpush.msra.mxu2 %v3474_v0 }
 0x6fe   : > { %v11617_v40 = vpop.f32.mrf.mxu3 }
 0x6ff   : > { %15288 = vst [vmem:[#allocation81_spill] sm:$0xff] %v11617_v40  ;;  %3798 = vmatpush.msra.mxu2 %v3471_v18  ;;  %v8653_v40 = vld [vmem:[#allocation2 + $0xd0] sm:$0xff] }
 0x701   : > { %3799 = vmatpush.msra.mxu2 %v3468_v11  ;;  %v11625_v33 = vpop.f32.mrf.mxu1 }
 0x702   : > { %v3649_v37 = vpop.f32.mrf.mxu0 }
 0x703   : > { %3800 = vmatpush.msra.mxu2 %v3465_v12  ;;  %4032 = vmatmul.f32.gmra.mxu0 %v8641_v42  ;;  %v11657_v47 = vpop.f32.mrf.mxu2  ;;  %v8649_v12 = vld [vmem:[#allocation2 + $0x90] sm:$0xff] }
 0x705   : > { %3801 = vmatpush.msra.mxu2 %v3462_v32 }
 0x706   : > { %v11633_v36 = vpop.f32.mrf.mxu3 }
 0x707   : > { %15297 = vst [vmem:[#allocation46_spill] sm:$0xff] %v11633_v36  ;;  %3802 = vmatpush.msra.mxu2 %v3459_v48 }
 0x708   : > { %3803 = vmatmul.f32.vlgmr.msra.gmra.mxu2 %v8640_v34  ;;  %v8647_v34 = vld [vmem:[#allocation2 + $0x70] sm:$0xff] }
 0x709   : > { %v11637_v52 = vpop.f32.mrf.mxu1 }
 0x70a   : > { %v3652_v61 = vpop.f32.mrf.mxu0 }
 0x70b   : > { %4035 = vmatmul.f32.gmra.mxu0 %v8642_v9  ;;  %v11663_v53 = vpop.f32.mrf.mxu2 }
 0x70e   : > { %v11641_v28 = vpop.f32.mrf.mxu3 }
 0x710   : > { %3806 = vmatmul.f32.gmra.mxu2 %v8641_v42 }
 0x711   : > { %v11643_v19 = vpop.f32.mrf.mxu1 }
 0x712   : > { %v3655_v57 = vpop.f32.mrf.mxu0 }
 0x713   : > { %4038 = vmatmul.f32.gmra.mxu0 %v8643_v5  ;;  %v11667_v27 = vpop.f32.mrf.mxu2 }
 0x716   : > { %v11649_v14 = vpop.f32.mrf.mxu3 }
 0x718   : > { %3809 = vmatmul.f32.gmra.mxu2 %v8642_v9 }
 0x719   : > { %v11651_v26 = vpop.f32.mrf.mxu1 }
 0x71a   : > { %v3658_v54 = vpop.f32.mrf.mxu0 }
 0x71b   : > { %4041 = vmatmul.f32.gmra.mxu0 %v8644_v20  ;;  %v11671_v11 = vpop.f32.mrf.mxu2 }
 0x71e   : > { %v11655_v15 = vpop.f32.mrf.mxu3 }
 0x720   : > { %3812 = vmatmul.f32.gmra.mxu2 %v8643_v5 }
 0x721   : > { %v11659_v30 = vpop.f32.mrf.mxu1 }
 0x722   : > { %v3661_v48 = vpop.f32.mrf.mxu0 }
 0x723   : > { %4044 = vmatmul.f32.gmra.mxu0 %v8645_v43  ;;  %v3429_v32 = vpop.f32.mrf.mxu2 }
 0x726   : > { %v11661_v59 = vpop.f32.mrf.mxu3 }
 0x728   : > { %3815 = vmatmul.f32.gmra.mxu2 %v8644_v20  ;;  %v8651_v20 = vld [vmem:[#allocation2 + $0xb0] sm:$0xff] }
 0x729   : > { %v3759_v44 = vpop.f32.mrf.mxu1 }
 0x72b   : > { %4047 = vmatmul.f32.gmra.mxu0 %v8646_v50  ;;  %v3432_v5 = vpop.f32.mrf.mxu2 }
 0x72e   : > { %v11665_v62 = vpop.f32.mrf.mxu3 }
 0x730   : > { %3818 = vmatmul.f32.gmra.mxu2 %v8645_v43 }
 0x731   : > { %v3762_v0 = vpop.f32.mrf.mxu1 }
 0x732   : > { %v3763_v3 = vadd.f32 %v3762_v0, %v3649_v37  ;;  %v8654_v37 = vld [vmem:[#allocation2 + $0xe0] sm:$0xff] }
 0x733   : > { %4050 = vmatmul.f32.gmra.mxu0 %v8647_v34  ;;  %v3435_v49 = vpop.f32.mrf.mxu2 }
 0x736   : > { %v11669_v58 = vpop.f32.mrf.mxu3 }
 0x738   : > { %3821 = vmatmul.f32.gmra.mxu2 %v8646_v50  ;;  %v3664_v50 = vpop.f32.mrf.mxu0 }
 0x739   : > { %v3765_v18 = vpop.f32.mrf.mxu1 }
 0x73b   : > { %4053 = vmatmul.f32.gmra.mxu0 %v8648_v23 }
 0x73e   : > { %v11673_v63 = vpop.f32.mrf.mxu3 }
 0x740   : > { %3824 = vmatmul.f32.gmra.mxu2 %v8647_v34 }
 0x741   : > { %v3768_v55 = vpop.f32.mrf.mxu1 }
 0x742   : > { %v3769_v38 = vadd.f32 %v3768_v55, %v3655_v57  ;;  %v8664_v55 = vld [vmem:[#allocation2 + $0x48] sm:$0xff] }
 0x743   : > { %4056 = vmatmul.f32.gmra.mxu0 %v8649_v12 }
 0x746   : > { %v3539_v46 = vpop.f32.mrf.mxu3 }
 0x748   : > { %3827 = vmatmul.f32.gmra.mxu2 %v8648_v23 }
 0x749   : > { %v3771_v42 = vpop.f32.mrf.mxu1 }
 0x74a   : > { %v3772_v23 = vadd.f32 %v3771_v42, %v3658_v54  ;;  %v8666_v42 = vld [vmem:[#allocation2 + $0x58] sm:$0xff] }
 0x74b   : > { %4059 = vmatmul.f32.gmra.mxu0 %v8650_v45 }
 0x74e   : > { %v3542_v6 = vpop.f32.mrf.mxu3 }
 0x750   : > { %3830 = vmatmul.f32.gmra.mxu2 %v8649_v12  ;;  %v3766_v12 = vadd.f32 %v3765_v18, %v3652_v61  ;;  %v8662_v18 = vld [vmem:[#allocation2 + $0x38] sm:$0xff] }
 0x751   : > { %v3774_v9 = vpop.f32.mrf.mxu1 }
 0x752   : > { %v3775_v13 = vadd.f32 %v3774_v9, %v3661_v48  ;;  %v8667_v48 = vld [vmem:[#allocation2 + $0x150] sm:$0xff]  ;;  %v8668_v9 = vld [vmem:[#allocation2 + $0x68] sm:$0xff] }
 0x753   : > { %4062 = vmatmul.f32.gmra.mxu0 %v8651_v20 }
 0x756   : > { %v3545_v43 = vpop.f32.mrf.mxu3 }
 0x757   : > { %v3546_v61 = vadd.f32 %v3545_v43, %v3432_v5  ;;  %v8669_v43 = vld [vmem:[#allocation2 + $0x160] sm:$0xff] }
 0x758   : > { %3833 = vmatmul.f32.gmra.mxu2 %v8650_v45  ;;  %v3438_v45 = vpop.f32.mrf.mxu2 }
 0x759   : > { %v3777_v34 = vpop.f32.mrf.mxu1 }
 0x75a   : > { %v3778_v17 = vadd.f32 %v3777_v34, %v3664_v50  ;;  %v3760_v50 = vadd.f32 %v3759_v44, %v11653_v35  ;;  %v3751_v35 = vadd.f32 %v11643_v19, %v11621_v4  ;;  %v3742_v4 = vadd.f32 %v11611_v10, %v11552_v21  ;;  %v15299_v10 = vld [vmem:[#allocation55_spill] sm:$0xff]  ;;  %v8657_v19 = vld [vmem:[#allocation2 + $0x100] sm:$0xff] }
 0x75b   : > { %4065 = vmatmul.f32.gmra.mxu0 %v8652_v25  ;;  %v3528_v21 = vadd.f32 %v11661_v59, %v11647_v31  ;;  %v3519_v31 = vadd.f32 %v11641_v28, %v11607_v22  ;;  %v8658_v59 = vld [vmem:[#allocation2 + $0x18] sm:$0xff]  ;;  %v15305_v22 = vld [vmem:[#allocation63_spill] sm:$0xff]  ;;  %v15306_v28 = vld [vmem:[#allocation73_spill] sm:$0xff] }
 0x75c   : > { %4126 = vmatpush.msra.mxu1 %v3778_v17  ;;  %v3757_v17 = vadd.f32 %v11659_v30, %v11645_v56  ;;  %v3748_v56 = vadd.f32 %v11637_v52, %v11595_v60  ;;  %v3534_v60 = vadd.f32 %v11669_v58, %v11663_v53  ;;  %v3733_v52 = vadd.f32 %v11554_v51, %v15299_v10  ;;  %v15300_v51 = vld [vmem:[#allocation46_spill] sm:$0xff]  ;;  %v15303_v30 = vld [vmem:[#allocation65_spill] sm:$0xff]  ;;  %v8659_v53 = vld [vmem:[#allocation2 + $0x110] sm:$0xff] }
 0x75d   : > { %v328_v10 = vld [vmem:[#allocation7 + $0x118] sm:$0xff] }
 0x75e   : > { %v3548_v24 = vpop.f32.mrf.mxu3  ;;  %4127 = vmatpush.msra.mxu1 %v3775_v13 }
 0x75f   : > { %v3549_v13 = vadd.f32 %v3548_v24, %v3435_v49  ;;  %v3745_v49 = vadd.f32 %v11625_v33, %v11570_v41  ;;  %v3537_v24 = vadd.f32 %v11673_v63, %v11667_v27  ;;  %v3531_v41 = vadd.f32 %v11665_v62, %v11657_v47  ;;  %v8661_v27 = vld [vmem:[#allocation2 + $0x120] sm:$0xff] }
 0x760   : > { %4128 = vmatpush.msra.mxu1 %v3772_v23  ;;  %3836 = vmatmul.f32.gmra.mxu2 %v8651_v20  ;;  %v3507_v62 = vadd.f32 %v15306_v28, %v15305_v22  ;;  %v8670_v23 = vld [vmem:[#allocation2 + $0x78] sm:$0xff] }
 0x761   : > { %v8682_v22 = vld [vmem:[#allocation2 + $0xd8] sm:$0xff] }
 0x762   : > { %4129 = vmatpush.msra.mxu1 %v3769_v38  ;;  %v3754_v38 = vadd.f32 %v11651_v26, %v11635_v7  ;;  %v3739_v7 = vadd.f32 %v11587_v16, %v11542_v2  ;;  %v3525_v2 = vadd.f32 %v11655_v15, %v11639_v8  ;;  %v3522_v16 = vadd.f32 %v11649_v14, %v11627_v29  ;;  %v15301_v8 = vld [vmem:[#allocation67_spill] sm:$0xff]  ;;  %v15302_v15 = vld [vmem:[#allocation81_spill] sm:$0xff] }
 0x763   : > { %4068 = vmatmul.f32.gmra.mxu0 %v8653_v40  ;;  %v3516_v26 = vadd.f32 %v15300_v51, %v11578_v39  ;;  %v3513_v47 = vadd.f32 %v15302_v15, %v15301_v8  ;;  %v15304_v29 = vld [vmem:[#allocation77_spill] sm:$0xff]  ;;  %v8660_v39 = vld [vmem:[#allocation2 + $0x28] sm:$0xff]  ;;  %v319_v15 = vld [vmem:[#allocation7 + $0xd0] sm:$0xff] }
 0x764   : > { %4130 = vmatpush.msra.mxu1 %v3766_v12  ;;  %v3510_v14 = vadd.f32 %v15304_v29, %v15303_v30  ;;  %v8681_v51 = vld [vmem:[#allocation2 + $0x1c0] sm:$0xff]  ;;  %v322_v8 = vld [vmem:[#allocation7 + $0xe8] sm:$0xff]  ;;  %v320_v30 = vld [vmem:[#allocation7 + $0xd8] sm:$0xff] }
 0x765   : > { %v317_v29 = vld [vmem:[#allocation7 + $0xc0] sm:$0xff] }
 0x766   : > { %v3551_v34 = vpop.f32.mrf.mxu3  ;;  %4131 = vmatpush.msra.mxu1 %v3763_v3  ;;  %v3543_v3 = vadd.f32 %v3542_v6, %v3429_v32 }
 0x767   : > { %v3552_v36 = vadd.f32 %v3551_v34, %v3438_v45  ;;  %v8671_v45 = vld [vmem:[#allocation2 + $0x170] sm:$0xff]  ;;  %v8672_v34 = vld [vmem:[#allocation2 + $0x88] sm:$0xff] }
 0x768   : > { %4132 = vmatpush.msra.mxu1 %v3760_v50  ;;  %3839 = vmatmul.f32.gmra.mxu2 %v8652_v25  ;;  %v3540_v25 = vadd.f32 %v3539_v46, %v11671_v11  ;;  %v8663_v11 = vld [vmem:[#allocation2 + $0x130] sm:$0xff]  ;;  %v8665_v46 = vld [vmem:[#allocation2 + $0x140] sm:$0xff] }
 0x769   : > { %3900 = vmatpush.msra.mxu3 %v3552_v36  ;;  %v8655_v36 = vld [vmem:[#allocation2 + $0xf0] sm:$0xff] }
 0x76a   : > { %4133 = vmatpush.msra.mxu1 %v3757_v17 }
 0x76b   : > { %3901 = vmatpush.msra.mxu3 %v3549_v13  ;;  %4071 = vmatmul.f32.gmra.mxu0 %v8654_v37  ;;  %v8673_v13 = vld [vmem:[#allocation2 + $0x180] sm:$0xff] }
 0x76c   : > { %4134 = vmatpush.msra.mxu1 %v3754_v38 }
 0x76d   : > { %3902 = vmatpush.msra.mxu3 %v3546_v61  ;;  %v8674_v61 = vld [vmem:[#allocation2 + $0x98] sm:$0xff] }
 0x76e   : > { %4135 = vmatpush.msra.mxu1 %v3751_v35  ;;  %v8675_v35 = vld [vmem:[#allocation2 + $0x190] sm:$0xff] }
 0x76f   : > { %3903 = vmatpush.msra.mxu3 %v3543_v3 }
 0x770   : > { %4136 = vmatpush.msra.mxu1 %v3748_v56  ;;  %3842 = vmatmul.f32.gmra.mxu2 %v8653_v40  ;;  %v15298_v40 = vld [vmem:[#allocation71_spill] sm:$0xff]  ;;  %v8676_v56 = vld [vmem:[#allocation2 + $0xa8] sm:$0xff] }
 0x771   : > { %3904 = vmatpush.msra.mxu3 %v3540_v25  ;;  %v3736_v33 = vadd.f32 %v11566_v1, %v15298_v40  ;;  %v8656_v1 = vld [vmem:[#allocation2 + $0x8] sm:$0xff]  ;;  %v327_v40 = vld [vmem:[#allocation7 + $0x110] sm:$0xff] }
 0x772   : > { %4137 = vmatpush.msra.mxu1 %v3745_v49  ;;  %v8677_v49 = vld [vmem:[#allocation2 + $0x1a0] sm:$0xff] }
 0x773   : > { %3905 = vmatpush.msra.mxu3 %v3537_v24  ;;  %4074 = vmatmul.f32.gmra.mxu0 %v8655_v36  ;;  %v331_v24 = vld [vmem:[#allocation7 + $0x130] sm:$0xff] }
 0x774   : > { %4138 = vmatpush.msra.mxu1 %v3742_v4  ;;  %v332_v4 = vld [vmem:[#allocation7 + $0x138] sm:$0xff]  ;;  %4374 = vmatpush.msrb.mxu2 %v331_v24  ;;  %v302_v24 = vld [vmem:[#allocation7 + $0x48] sm:$0xff] }
 0x775   : > { %3906 = vmatpush.msra.mxu3 %v3534_v60  ;;  %4600 = vmatpush.msrb.mxu0 %v332_v4  ;;  %v8678_v60 = vld [vmem:[#allocation2 + $0xb8] sm:$0xff] }
 0x776   : > { %4139 = vmatpush.msra.mxu1 %v3739_v7  ;;  %v329_v7 = vld [vmem:[#allocation7 + $0x120] sm:$0xff]  ;;  %v8686_v4 = vld [vmem:[#allocation2 + $0xf8] sm:$0xff] }
 0x777   : > { %3907 = vmatpush.msra.mxu3 %v3531_v41  ;;  %v330_v41 = vld [vmem:[#allocation7 + $0x128] sm:$0xff]  ;;  %4375 = vmatpush.msrb.mxu2 %v329_v7  ;;  %v8687_v7 = vld [vmem:[#allocation2 + $0x1f0] sm:$0xff] }
 0x778   : > { %4140 = vmatpush.msra.mxu1 %v3736_v33  ;;  %3845 = vmatmul.f32.gmra.mxu2 %v8654_v37  ;;  %v11715_v44 = vpop.f32.mrf.mxu0 }
 0x779   : > { %3908 = vmatpush.msra.mxu3 %v3528_v21  ;;  %v8679_v21 = vld [vmem:[#allocation2 + $0x1b0] sm:$0xff]  ;;  %4601 = vmatpush.msrb.mxu0 %v330_v41 }
 0x77a   : > { %4141 = vmatpush.msra.mxu1 %v3733_v52  ;;  %4376 = vmatpush.msrb.mxu2 %v327_v40  ;;  %v325_v52 = vld [vmem:[#allocation7 + $0x100] sm:$0xff]  ;;  %v8688_v40 = vld [vmem:[#allocation2 + $0x108] sm:$0xff] }
 0x77b   : > { %3909 = vmatpush.msra.mxu3 %v3525_v2  ;;  %4142 = vmatmul.f32.vlgmr.msra.gmra.mxu1 %v8656_v1  ;;  %v326_v2 = vld [vmem:[#allocation7 + $0x108] sm:$0xff] }
 0x77c   : > { %4077 = vmatmul.f32.gmra.mxu0 %v8657_v19  ;;  %4377 = vmatpush.msrb.mxu2 %v325_v52 }
 0x77d   : > { %3910 = vmatpush.msra.mxu3 %v3522_v16  ;;  %4602 = vmatpush.msrb.mxu0 %v328_v10  ;;  %v323_v16 = vld [vmem:[#allocation7 + $0xf0] sm:$0xff] }
 0x77e   : > { %4378 = vmatpush.msrb.mxu2 %v323_v16  ;;  %v8689_v16 = vld [vmem:[#allocation2 + $0x118] sm:$0xff] }
 0x77f   : > { %3911 = vmatpush.msra.mxu3 %v3519_v31  ;;  %4603 = vmatpush.msrb.mxu0 %v326_v2  ;;  %v11777_v2 = vld [vmem:[#allocation8 + $0x3] ss:$8 sm:$0x3] }
 0x780   : > { %3848 = vmatmul.f32.gmra.mxu2 %v8655_v36  ;;  %v11721_v58 = vpop.f32.mrf.mxu0 }
 0x781   : > { %3912 = vmatpush.msra.mxu3 %v3516_v26  ;;  %v321_v26 = vld [vmem:[#allocation7 + $0xe0] sm:$0xff] }
 0x782   : > { %4379 = vmatpush.msrb.mxu2 %v321_v26 }
 0x783   : > { %3913 = vmatpush.msra.mxu3 %v3513_v47  ;;  %4145 = vmatmul.f32.gmra.mxu1 %v8658_v59 }
 0x784   : > { %4080 = vmatmul.f32.gmra.mxu0 %v8659_v53  ;;  %4380 = vmatpush.msrb.mxu2 %v319_v15 }
 0x785   : > { %3914 = vmatpush.msra.mxu3 %v3510_v14  ;;  %v318_v14 = vld [vmem:[#allocation7 + $0xc8] sm:$0xff] }
 0x786   : > { %4381 = vmatpush.msrb.mxu2 %v317_v29 }
 0x787   : > { %3915 = vmatpush.msra.mxu3 %v3507_v62  ;;  %v313_v62 = vld [vmem:[#allocation7 + $0xa0] sm:$0xff] }
 0x788   : > { %3916 = vmatmul.f32.vlgmr.msra.gmra.mxu3 %v8656_v1  ;;  %3851 = vmatmul.f32.gmra.mxu2 %v8657_v19  ;;  %v11725_v63 = vpop.f32.mrf.mxu0  ;;  %v324_v1 = vld [vmem:[#allocation7 + $0xf8] sm:$0xff]  ;;  %v8680_v19 = vld [vmem:[#allocation2 + $0xc8] sm:$0xff] }
 0x789   : > { %4604 = vmatpush.msrb.mxu0 %v324_v1 }
 0x78b   : > { %4148 = vmatmul.f32.gmra.mxu1 %v8660_v39  ;;  %v11719_v0 = vpop.f32.mrf.mxu2  ;;  %4605 = vmatpush.msrb.mxu0 %v322_v8 }
 0x78c   : > { %4083 = vmatmul.f32.gmra.mxu0 %v8661_v27 }
 0x78d   : > { %4606 = vmatpush.msrb.mxu0 %v320_v30  ;;  %v8690_v30 = vld [vmem:[#allocation2 + $0x128] sm:$0xff] }
 0x78f   : > { %4607 = vmatpush.msrb.mxu0 %v318_v14 }
 0x790   : > { %3919 = vmatmul.f32.gmra.mxu3 %v8658_v59  ;;  %3854 = vmatmul.f32.gmra.mxu2 %v8659_v53  ;;  %v11729_v32 = vpop.f32.mrf.mxu0  ;;  %v315_v59 = vld [vmem:[#allocation7 + $0xb0] sm:$0xff]  ;;  %v316_v53 = vld [vmem:[#allocation7 + $0xb8] sm:$0xff] }
 0x791   : > { %4382 = vmatpush.msrb.mxu2 %v315_v59  ;;  %4608 = vmatpush.msrb.mxu0 %v316_v53  ;;  %v15307_v59 = vld [vmem:[#allocation40_spill] sm:$0xff] }
 0x793   : > { %4151 = vmatmul.f32.gmra.mxu1 %v8662_v18  ;;  %v11723_v57 = vpop.f32.mrf.mxu2  ;;  %4383 = vmatpush.msrb.mxu2 %v313_v62 }
 0x794   : > { %4086 = vmatmul.f32.gmra.mxu0 %v8663_v11 }
 0x798   : > { %3922 = vmatmul.f32.gmra.mxu3 %v8660_v39  ;;  %3857 = vmatmul.f32.gmra.mxu2 %v8661_v27  ;;  %v11735_v20 = vpop.f32.mrf.mxu0  ;;  %v8683_v39 = vld [vmem:[#allocation2 + $0x1d0] sm:$0xff]  ;;  %v314_v27 = vld [vmem:[#allocation7 + $0xa8] sm:$0xff] }
 0x799   : > { %4609 = vmatpush.msrb.mxu0 %v314_v27 }
 0x79b   : > { %4154 = vmatmul.f32.gmra.mxu1 %v8664_v55  ;;  %v11727_v54 = vpop.f32.mrf.mxu2 }
 0x79c   : > { %4089 = vmatmul.f32.gmra.mxu0 %v8665_v46 }
 0x7a0   : > { %3925 = vmatmul.f32.gmra.mxu3 %v8662_v18  ;;  %3860 = vmatmul.f32.gmra.mxu2 %v8663_v11  ;;  %v11739_v50 = vpop.f32.mrf.mxu0  ;;  %v311_v18 = vld [vmem:[#allocation7 + $0x90] sm:$0xff]  ;;  %v312_v11 = vld [vmem:[#allocation7 + $0x98] sm:$0xff] }
 0x7a1   : > { %4384 = vmatpush.msrb.mxu2 %v311_v18  ;;  %4610 = vmatpush.msrb.mxu0 %v312_v11  ;;  %v8691_v18 = vld [vmem:[#allocation2 + $0x138] sm:$0xff] }
 0x7a3   : > { %4157 = vmatmul.f32.gmra.mxu1 %v8666_v42  ;;  %v11731_v6 = vpop.f32.mrf.mxu2 }
 0x7a4   : > { %4092 = vmatmul.f32.gmra.mxu0 %v8667_v48 }
 0x7a8   : > { %3928 = vmatmul.f32.gmra.mxu3 %v8664_v55  ;;  %3863 = vmatmul.f32.gmra.mxu2 %v8665_v46  ;;  %v11743_v38 = vpop.f32.mrf.mxu0  ;;  %v309_v46 = vld [vmem:[#allocation7 + $0x80] sm:$0xff] }
 0x7a9   : > { %4385 = vmatpush.msrb.mxu2 %v309_v46 }
 0x7ab   : > { %4160 = vmatmul.f32.gmra.mxu1 %v8668_v9  ;;  %v11733_v5 = vpop.f32.mrf.mxu2 }
 0x7ac   : > { %4095 = vmatmul.f32.gmra.mxu0 %v8669_v43 }
 0x7b0   : > { %3931 = vmatmul.f32.gmra.mxu3 %v8666_v42  ;;  %3866 = vmatmul.f32.gmra.mxu2 %v8667_v48  ;;  %v11747_v3 = vpop.f32.mrf.mxu0  ;;  %v310_v42 = vld [vmem:[#allocation7 + $0x88] sm:$0xff]  ;;  %v307_v48 = vld [vmem:[#allocation7 + $0x70] sm:$0xff] }
 0x7b1   : > { %4611 = vmatpush.msrb.mxu0 %v310_v42  ;;  %4386 = vmatpush.msrb.mxu2 %v307_v48  ;;  %v15309_v42 = vld [vmem:[#allocation62_spill] sm:$0xff] }
 0x7b3   : > { %4163 = vmatmul.f32.gmra.mxu1 %v8670_v23  ;;  %v11737_v12 = vpop.f32.mrf.mxu2 }
 0x7b4   : > { %4098 = vmatmul.f32.gmra.mxu0 %v8671_v45 }
 0x7b8   : > { %3934 = vmatmul.f32.gmra.mxu3 %v8668_v9  ;;  %3869 = vmatmul.f32.gmra.mxu2 %v8669_v43  ;;  %v11753_v33 = vpop.f32.mrf.mxu0  ;;  %v8684_v9 = vld [vmem:[#allocation2 + $0xe8] sm:$0xff] }
 0x7bb   : > { %4166 = vmatmul.f32.gmra.mxu1 %v8672_v34  ;;  %v11741_v17 = vpop.f32.mrf.mxu2 }
 0x7bc   : > { %4101 = vmatmul.f32.gmra.mxu0 %v8673_v13 }
 0x7c0   : > { %3937 = vmatmul.f32.gmra.mxu3 %v8670_v23  ;;  %3872 = vmatmul.f32.gmra.mxu2 %v8671_v45  ;;  %v11757_v47 = vpop.f32.mrf.mxu0  ;;  %v8685_v23 = vld [vmem:[#allocation2 + $0x1e0] sm:$0xff]  ;;  %v308_v45 = vld [vmem:[#allocation7 + $0x78] sm:$0xff] }
 0x7c1   : > { %4612 = vmatpush.msrb.mxu0 %v308_v45 }
 0x7c3   : > { %4169 = vmatmul.f32.gmra.mxu1 %v8674_v61  ;;  %v11745_v37 = vpop.f32.mrf.mxu2 }
 0x7c4   : > { %4104 = vmatmul.f32.gmra.mxu0 %v8675_v35 }
 0x7c8   : > { %3940 = vmatmul.f32.gmra.mxu3 %v8672_v34  ;;  %3875 = vmatmul.f32.gmra.mxu2 %v8673_v13  ;;  %v11761_v55 = vpop.f32.mrf.mxu0  ;;  %v305_v34 = vld [vmem:[#allocation7 + $0x60] sm:$0xff]  ;;  %v306_v13 = vld [vmem:[#allocation7 + $0x68] sm:$0xff] }
 0x7c9   : > { %4387 = vmatpush.msrb.mxu2 %v305_v34  ;;  %4613 = vmatpush.msrb.mxu0 %v306_v13  ;;  %v8692_v13 = vld [vmem:[#allocation2 + $0x148] sm:$0xff] }
 0x7cb   : > { %4172 = vmatmul.f32.gmra.mxu1 %v8676_v56  ;;  %v11749_v25 = vpop.f32.mrf.mxu2 }
 0x7cc   : > { %4107 = vmatmul.f32.gmra.mxu0 %v8677_v49 }
 0x7d0   : > { %3943 = vmatmul.f32.gmra.mxu3 %v8674_v61  ;;  %3878 = vmatmul.f32.gmra.mxu2 %v8675_v35  ;;  %v303_v61 = vld [vmem:[#allocation7 + $0x50] sm:$0xff]  ;;  %v304_v35 = vld [vmem:[#allocation7 + $0x58] sm:$0xff] }
 0x7d1   : > { %4388 = vmatpush.msrb.mxu2 %v303_v61  ;;  %4614 = vmatpush.msrb.mxu0 %v304_v35 }
 0x7d3   : > { %4175 = vmatmul.f32.gmra.mxu1 %v8678_v60  ;;  %v11751_v36 = vpop.f32.mrf.mxu2  ;;  %4615 = vmatpush.msrb.mxu0 %v302_v24 }
 0x7d4   : > { %4110 = vmatmul.f32.gmra.mxu0 %v8679_v21 }
 0x7d8   : > { %3946 = vmatmul.f32.gmra.mxu3 %v8676_v56  ;;  %3881 = vmatmul.f32.gmra.mxu2 %v8677_v49  ;;  %v301_v56 = vld [vmem:[#allocation7 + $0x40] sm:$0xff]  ;;  %v11765_v49 = vpop.f32.mrf.mxu0 }
 0x7d9   : > { %4389 = vmatpush.msrb.mxu2 %v301_v56  ;;  %v15311_v56 = vld [vmem:[#allocation80_spill] sm:$0xff] }
 0x7db   : > { %4178 = vmatmul.f32.gmra.mxu1 %v8680_v19  ;;  %v11755_v31 = vpop.f32.mrf.mxu2 }
 0x7dc   : > { %4113 = vmatmul.f32.gmra.mxu0 %v8681_v51 }
 0x7e0   : > { %3949 = vmatmul.f32.gmra.mxu3 %v8678_v60  ;;  %3884 = vmatmul.f32.gmra.mxu2 %v8679_v21  ;;  %v11773_v10 = vpop.f32.mrf.mxu0 }
 0x7e3   : > { %4181 = vmatmul.f32.gmra.mxu1 %v8682_v22  ;;  %v11759_v28 = vpop.f32.mrf.mxu2 }
 0x7e4   : > { %4116 = vmatmul.f32.gmra.mxu0 %v8683_v39 }
 0x7e8   : > { %3952 = vmatmul.f32.gmra.mxu3 %v8680_v19  ;;  %3887 = vmatmul.f32.gmra.mxu2 %v8681_v51  ;;  %v11782_v19 = vperm.slane %v11777_v2, 0  ;;  %v11784_v51 = vpop.f32.mrf.mxu0 }
 0x7ea   : > { %v3805_v26 = vadd.f32 %v11719_v0, %v11782_v19 }
 0x7eb   : > { %4184 = vmatmul.f32.gmra.mxu1 %v8684_v9  ;;  %v11763_v43 = vpop.f32.mrf.mxu2 }
 0x7ec   : > { %4119 = vmatmul.f32.gmra.mxu0 %v8685_v23 }
 0x7f0   : > { %3955 = vmatmul.f32.gmra.mxu3 %v8682_v22  ;;  %3890 = vmatmul.f32.gmra.mxu2 %v8683_v39  ;;  %v3808_v22 = vadd.f32 %v11723_v57, %v11782_v19  ;;  %v11795_v62 = vpop.f32.mrf.mxu0  ;;  %v3811_v57 = vadd.f32 %v11727_v54, %v11782_v19  ;;  %v3814_v54 = vadd.f32 %v11731_v6, %v11782_v19 }
 0x7f1   : > { %v3817_v6 = vadd.f32 %v11733_v5, %v11782_v19  ;;  %v3820_v5 = vadd.f32 %v11737_v12, %v11782_v19  ;;  %v3823_v12 = vadd.f32 %v11741_v17, %v11782_v19  ;;  %v15320_v17 = vld [vmem:[#allocation76_spill] sm:$0xff] }
 0x7f3   : > { %4187 = vmatmul.f32.gmra.mxu1 %v8686_v4  ;;  %v11767_v60 = vpop.f32.mrf.mxu2 }
 0x7f4   : > { %4122 = vmatmul.f32.gmra.mxu0 %v8687_v7 }
 0x7f8   : > { %3958 = vmatmul.f32.gmra.mxu3 %v8684_v9  ;;  %v11769_v41 = vpop.f32.mrf.mxu1  ;;  %3893 = vmatmul.f32.gmra.mxu2 %v8685_v23  ;;  %v11812_v45 = vpop.f32.mrf.mxu0 }
 0x7fb   : > { %4190 = vmatmul.f32.gmra.mxu1 %v8688_v40  ;;  %v11771_v21 = vpop.f32.mrf.mxu2 }
 0x800   : > { %3961 = vmatmul.f32.gmra.mxu3 %v8686_v4  ;;  %v11775_v52 = vpop.f32.mrf.mxu1  ;;  %3896 = vmatmul.f32.gmra.mxu2 %v8687_v7 }
 0x803   : > { %4193 = vmatmul.f32.gmra.mxu1 %v8689_v16  ;;  %v11779_v1 = vpop.f32.mrf.mxu2 }
 0x808   : > { %3964 = vmatmul.f32.gmra.mxu3 %v8688_v40  ;;  %v11788_v8 = vpop.f32.mrf.mxu1 }
 0x80b   : > { %v3917_v15 = vpop.f32.mrf.mxu3  ;;  %4196 = vmatmul.f32.gmra.mxu1 %v8690_v30  ;;  %v11790_v29 = vpop.f32.mrf.mxu2 }
 0x80c   : > { %v3918_v14 = vadd.f32 %v3917_v15, %v3805_v26  ;;  %v11829_v15 = vpop.f32.mrf.mxu0 }
 0x80e   : > { %v4239_v53 = vadd.f32 %v3918_v14, %v15307_v59  ;;  %v15313_v14 = vld [vmem:[#allocation58_spill] sm:$0xff] }
 0x810   : > { %v11797_v39 = vmax.f32 %v4239_v53, 0.0  ;;  %3967 = vmatmul.f32.gmra.mxu3 %v8689_v16  ;;  %v11799_v0 = vpop.f32.mrf.mxu1  ;;  %v8693_v16 = vld [vmem:[#allocation2 + $0x158] sm:$0xff] }
 0x812   : > { %15308 = vst [vmem:[#allocation18_spill] sm:$0xff] %v11797_v39  ;;  %4390 = vmatmul.f32.vlgmr.msrb.gmra.mxu2 %v11797_v39  ;;  %4616 = vmatmul.f32.vlgmr.msrb.gmra.mxu0 %v11797_v39 }
 0x813   : > { %v3920_v27 = vpop.f32.mrf.mxu3  ;;  %4199 = vmatmul.f32.gmra.mxu1 %v8691_v18  ;;  %v11803_v11 = vpop.f32.mrf.mxu2 }
 0x814   : > { %v3921_v46 = vadd.f32 %v3920_v27, %v3808_v22 }
 0x816   : > { %v4241_v48 = vadd.f32 %v3921_v46, %v15309_v42 }
 0x818   : > { %3970 = vmatmul.f32.gmra.mxu3 %v8690_v30  ;;  %v11808_v9 = vpop.f32.mrf.mxu1  ;;  %v11810_v23 = vmax.f32 %v4241_v48, 0.0  ;;  %v11842_v48 = vpop.f32.mrf.mxu0 }
 0x81a   : > { %15310 = vst [vmem:[#allocation44_spill] sm:$0xff] %v11810_v23  ;;  %4393 = vmatmul.f32.gmra.mxu2 %v11810_v23  ;;  %4619 = vmatmul.f32.gmra.mxu0 %v11810_v23  ;;  %v357_v23 = vld [vmem:[#allocation7 + $0x200] sm:$0xff] }
 0x81b   : > { %v3923_v34 = vpop.f32.mrf.mxu3  ;;  %4202 = vmatmul.f32.gmra.mxu1 %v8692_v13  ;;  %v11816_v61 = vpop.f32.mrf.mxu2 }
 0x81c   : > { %v3924_v35 = vadd.f32 %v3923_v34, %v3811_v57  ;;  %v15315_v57 = vld [vmem:[#allocation78_spill] sm:$0xff] }
 0x81e   : > { %v4243_v24 = vadd.f32 %v3924_v35, %v15311_v56 }
 0x820   : > { %3973 = vmatmul.f32.gmra.mxu3 %v8691_v18  ;;  %v11821_v4 = vpop.f32.mrf.mxu1  ;;  %v11823_v7 = vmax.f32 %v4243_v24, 0.0  ;;  %v8694_v18 = vld [vmem:[#allocation2 + $0x168] sm:$0xff]  ;;  %v8695_v24 = vld [vmem:[#allocation2 + $0x178] sm:$0xff] }
 0x822   : > { %15312 = vst [vmem:[#allocation45_spill] sm:$0xff] %v11823_v7  ;;  %4396 = vmatmul.f32.gmra.mxu2 %v11823_v7  ;;  %4622 = vmatmul.f32.gmra.mxu0 %v11823_v7  ;;  %v352_v7 = vld [vmem:[#allocation7 + $0x1d8] sm:$0xff] }
 0x823   : > { %v3926_v40 = vpop.f32.mrf.mxu3  ;;  %4205 = vmatmul.f32.gmra.mxu1 %v8693_v16  ;;  %v11827_v26 = vpop.f32.mrf.mxu2 }
 0x824   : > { %v3927_v30 = vadd.f32 %v3926_v40, %v3814_v54 }
 0x826   : > { %v4245_v59 = vadd.f32 %v3927_v30, %v15313_v14  ;;  %v15317_v30 = vld [vmem:[#allocation24_spill] sm:$0xff] }
 0x828   : > { %3976 = vmatmul.f32.gmra.mxu3 %v8692_v13  ;;  %v11834_v53 = vpop.f32.mrf.mxu1  ;;  %v11836_v22 = vmax.f32 %v4245_v59, 0.0 }
 0x82a   : > { %15314 = vst [vmem:[#allocation72_spill] sm:$0xff] %v11836_v22  ;;  %4399 = vmatmul.f32.gmra.mxu2 %v11836_v22  ;;  %4625 = vmatmul.f32.gmra.mxu0 %v11836_v22  ;;  %v363_v22 = vld [vmem:[#allocation7 + $0x230] sm:$0xff] }
 0x82b   : > { %v3929_v27 = vpop.f32.mrf.mxu3  ;;  %4208 = vmatmul.f32.gmra.mxu1 %v8694_v18  ;;  %v11840_v46 = vpop.f32.mrf.mxu2  ;;  %4487 = vmatpush.msrb.mxu3 %v363_v22  ;;  %v348_v22 = vld [vmem:[#allocation7 + $0x1b8] sm:$0xff] }
 0x82c   : > { %v3930_v42 = vadd.f32 %v3929_v27, %v3817_v6  ;;  %v8696_v27 = vld [vmem:[#allocation2 + $0x188] sm:$0xff] }
 0x82e   : > { %v4247_v34 = vadd.f32 %v3930_v42, %v15315_v57 }
 0x830   : > { %3979 = vmatmul.f32.gmra.mxu3 %v8693_v16  ;;  %v11847_v13 = vmax.f32 %v4247_v34, 0.0  ;;  %v11849_v35 = vpop.f32.mrf.mxu1  ;;  %v11858_v16 = vpop.f32.mrf.mxu0 }
 0x831   : > { %15318 = vst [vmem:[#allocation38_spill] sm:$0xff] %v11858_v16 }
 0x832   : > { %15316 = vst [vmem:[#allocation39_spill] sm:$0xff] %v11847_v13  ;;  %4402 = vmatmul.f32.gmra.mxu2 %v11847_v13  ;;  %4628 = vmatmul.f32.gmra.mxu0 %v11847_v13  ;;  %v3829_v13 = vadd.f32 %v11749_v25, %v11782_v19 }
 0x833   : > { %v3932_v56 = vpop.f32.mrf.mxu3  ;;  %4211 = vmatmul.f32.gmra.mxu1 %v8695_v24  ;;  %v11853_v54 = vpop.f32.mrf.mxu2 }
 0x834   : > { %v3933_v40 = vadd.f32 %v3932_v56, %v3820_v5  ;;  %v364_v5 = vld [vmem:[#allocation7 + $0x238] sm:$0xff] }
 0x835   : > { %4713 = vmatpush.msrb.mxu1 %v364_v5  ;;  %v8697_v5 = vld [vmem:[#allocation2 + $0x198] sm:$0xff] }
 0x836   : > { %v4249_v14 = vadd.f32 %v3933_v40, %v15317_v30  ;;  %v362_v40 = vld [vmem:[#allocation7 + $0x228] sm:$0xff] }
 0x837   : > { %4714 = vmatpush.msrb.mxu1 %v362_v40 }
 0x838   : > { %3982 = vmatmul.f32.gmra.mxu3 %v8694_v18  ;;  %v11860_v59 = vmax.f32 %v4249_v14, 0.0  ;;  %v11866_v57 = vpop.f32.mrf.mxu1  ;;  %v3826_v18 = vadd.f32 %v11745_v37, %v11782_v19  ;;  %v360_v14 = vld [vmem:[#allocation7 + $0x218] sm:$0xff] }
 0x839   : > { %4715 = vmatpush.msrb.mxu1 %v360_v14  ;;  %v356_v37 = vld [vmem:[#allocation7 + $0x1f8] sm:$0xff]  ;;  %v354_v14 = vld [vmem:[#allocation7 + $0x1e8] sm:$0xff] }
 0x83a   : > { %15319 = vst [vmem:[#allocation31_spill] sm:$0xff] %v11860_v59  ;;  %4405 = vmatmul.f32.gmra.mxu2 %v11860_v59  ;;  %4631 = vmatmul.f32.gmra.mxu0 %v11860_v59  ;;  %v11873_v59 = vpop.f32.mrf.mxu0 }
 0x83b   : > { %v3935_v6 = vpop.f32.mrf.mxu3  ;;  %4214 = vmatmul.f32.gmra.mxu1 %v8696_v27  ;;  %v11864_v42 = vpop.f32.mrf.mxu2  ;;  %15322 = vst [vmem:[#allocation21_spill] sm:$0xff] %v11873_v59 }
 0x83c   : > { %v3936_v34 = vadd.f32 %v3935_v6, %v3823_v12  ;;  %v358_v12 = vld [vmem:[#allocation7 + $0x208] sm:$0xff] }
 0x83d   : > { %4716 = vmatpush.msrb.mxu1 %v358_v12 }
 0x83e   : > { %v4251_v56 = vadd.f32 %v3936_v34, %v15320_v17 }
 0x83f   : > { %4717 = vmatpush.msrb.mxu1 %v356_v37  ;;  %v350_v37 = vld [vmem:[#allocation7 + $0x1c8] sm:$0xff] }
 0x840   : > { %3985 = vmatmul.f32.gmra.mxu3 %v8695_v24  ;;  %v11871_v30 = vmax.f32 %v4251_v56, 0.0  ;;  %v11879_v24 = vpop.f32.mrf.mxu1  ;;  %v15323_v56 = vld [vmem:[#allocation20_spill] sm:$0xff] }
 0x841   : > { %4718 = vmatpush.msrb.mxu1 %v354_v14 }
 0x842   : > { %15321 = vst [vmem:[#allocation36_spill] sm:$0xff] %v11871_v30  ;;  %4408 = vmatmul.f32.gmra.mxu2 %v11871_v30  ;;  %4634 = vmatmul.f32.gmra.mxu0 %v11871_v30  ;;  %v11890_v25 = vpop.f32.mrf.mxu0 }
 0x843   : > { %v3938_v6 = vpop.f32.mrf.mxu3  ;;  %4217 = vmatmul.f32.gmra.mxu1 %v8697_v5  ;;  %v11877_v34 = vpop.f32.mrf.mxu2  ;;  %15325 = vst [vmem:[#allocation71_spill] sm:$0xff] %v11890_v25  ;;  %v355_v25 = vld [vmem:[#allocation7 + $0x1f0] sm:$0xff] }
 0x844   : > { %v3939_v17 = vadd.f32 %v3938_v6, %v3826_v18  ;;  %v361_v18 = vld [vmem:[#allocation7 + $0x220] sm:$0xff]  ;;  %v8698_v6 = vld [vmem:[#allocation2 + $0x1a8] sm:$0xff]  ;;  %4719 = vmatpush.msrb.mxu1 %v352_v7 }
 0x845   : > { %4488 = vmatpush.msrb.mxu3 %v361_v18  ;;  %v353_v7 = vld [vmem:[#allocation7 + $0x1e0] sm:$0xff] }
 0x846   : > { %v4253_v40 = vadd.f32 %v3939_v17, %v15323_v56  ;;  %v359_v56 = vld [vmem:[#allocation7 + $0x210] sm:$0xff]  ;;  %4720 = vmatpush.msrb.mxu1 %v350_v37  ;;  %v8699_v37 = vld [vmem:[#allocation2 + $0x1b8] sm:$0xff] }
 0x847   : > { %4489 = vmatpush.msrb.mxu3 %v359_v56  ;;  %v342_v56 = vld [vmem:[#allocation7 + $0x188] sm:$0xff] }
 0x848   : > { %3988 = vmatmul.f32.gmra.mxu3 %v8696_v27  ;;  %v11884_v30 = vmax.f32 %v4253_v40, 0.0  ;;  %v15326_v40 = vld [vmem:[#allocation74_spill] sm:$0xff]  ;;  %v11895_v39 = vpop.f32.mrf.mxu1  ;;  %4721 = vmatpush.msrb.mxu1 %v348_v22 }
 0x849   : > { %4490 = vmatpush.msrb.mxu3 %v357_v23 }
 0x84a   : > { %15324 = vst [vmem:[#allocation34_spill] sm:$0xff] %v11884_v30  ;;  %4411 = vmatmul.f32.gmra.mxu2 %v11884_v30  ;;  %4637 = vmatmul.f32.gmra.mxu0 %v11884_v30  ;;  %v3832_v30 = vadd.f32 %v11751_v36, %v11782_v19  ;;  %v344_v36 = vld [vmem:[#allocation7 + $0x198] sm:$0xff]  ;;  %v11903_v22 = vpop.f32.mrf.mxu0 }
 0x84b   : > { %v3941_v12 = vpop.f32.mrf.mxu3  ;;  %4220 = vmatmul.f32.gmra.mxu1 %v8698_v6  ;;  %v11888_v17 = vpop.f32.mrf.mxu2  ;;  %4491 = vmatpush.msrb.mxu3 %v355_v25  ;;  %15328 = vst [vmem:[#allocation46_spill] sm:$0xff] %v11903_v22  ;;  %v15329_v25 = vld [vmem:[#allocation75_spill] sm:$0xff] }
 0x84c   : > { %v3942_v27 = vadd.f32 %v3941_v12, %v3829_v13  ;;  %v346_v13 = vld [vmem:[#allocation7 + $0x1a8] sm:$0xff] }
 0x84d   : > { %4492 = vmatpush.msrb.mxu3 %v353_v7  ;;  %4722 = vmatpush.msrb.mxu1 %v346_v13  ;;  %v347_v7 = vld [vmem:[#allocation7 + $0x1b0] sm:$0xff] }
 0x84e   : > { %v4255_v14 = vadd.f32 %v3942_v27, %v15326_v40 }
 0x84f   : > { %4723 = vmatpush.msrb.mxu1 %v344_v36 }
 0x850   : > { %3991 = vmatmul.f32.gmra.mxu3 %v8697_v5  ;;  %v11897_v18 = vmax.f32 %v4255_v14, 0.0  ;;  %v351_v5 = vld [vmem:[#allocation7 + $0x1d0] sm:$0xff]  ;;  %v349_v14 = vld [vmem:[#allocation7 + $0x1c0] sm:$0xff]  ;;  %v11910_v13 = vpop.f32.mrf.mxu1 }
 0x851   : > { %4493 = vmatpush.msrb.mxu3 %v351_v5  ;;  %4724 = vmatpush.msrb.mxu1 %v342_v56  ;;  %v343_v56 = vld [vmem:[#allocation7 + $0x190] sm:$0xff] }
 0x852   : > { %15327 = vst [vmem:[#allocation55_spill] sm:$0xff] %v11897_v18  ;;  %4414 = vmatmul.f32.gmra.mxu2 %v11897_v18  ;;  %4640 = vmatmul.f32.gmra.mxu0 %v11897_v18  ;;  %v3835_v18 = vadd.f32 %v11755_v31, %v11782_v19  ;;  %v338_v31 = vld [vmem:[#allocation7 + $0x168] sm:$0xff]  ;;  %v11919_v22 = vpop.f32.mrf.mxu0 }
 0x853   : > { %v3944_v12 = vpop.f32.mrf.mxu3  ;;  %4223 = vmatmul.f32.gmra.mxu1 %v8699_v37  ;;  %v11901_v23 = vpop.f32.mrf.mxu2  ;;  %4494 = vmatpush.msrb.mxu3 %v349_v14 }
 0x854   : > { %v3945_v27 = vadd.f32 %v3944_v12, %v3832_v30  ;;  %v340_v30 = vld [vmem:[#allocation7 + $0x178] sm:$0xff]  ;;  %v345_v12 = vld [vmem:[#allocation7 + $0x1a0] sm:$0xff] }
 0x855   : > { %4495 = vmatpush.msrb.mxu3 %v347_v7  ;;  %4725 = vmatpush.msrb.mxu1 %v340_v30  ;;  %v341_v7 = vld [vmem:[#allocation7 + $0x180] sm:$0xff] }
 0x856   : > { %v4257_v40 = vadd.f32 %v3945_v27, %v15329_v25  ;;  %v8700_v27 = vld [vmem:[#allocation2 + $0x1c8] sm:$0xff]  ;;  %v336_v25 = vld [vmem:[#allocation7 + $0x158] sm:$0xff]  ;;  %v337_v30 = vld [vmem:[#allocation7 + $0x160] sm:$0xff] }
 0x857   : > { %4496 = vmatpush.msrb.mxu3 %v345_v12  ;;  %4726 = vmatpush.msrb.mxu1 %v338_v31  ;;  %v339_v12 = vld [vmem:[#allocation7 + $0x170] sm:$0xff]  ;;  %v8701_v31 = vld [vmem:[#allocation2 + $0x1d8] sm:$0xff] }
 0x858   : > { %3994 = vmatmul.f32.gmra.mxu3 %v8698_v6  ;;  %v11908_v59 = vmax.f32 %v4257_v40, 0.0  ;;  %v15331_v40 = vld [vmem:[#allocation95_spill] sm:$0xff] }
 0x859   : > { %4497 = vmatpush.msrb.mxu3 %v343_v56  ;;  %4727 = vmatpush.msrb.mxu1 %v336_v25  ;;  %v11927_v56 = vpop.f32.mrf.mxu1  ;;  %v15333_v25 = vld [vmem:[#allocation94_spill] sm:$0xff] }
 0x85a   : > { %15330 = vst [vmem:[#allocation67_spill] sm:$0xff] %v11908_v59  ;;  %4417 = vmatmul.f32.gmra.mxu2 %v11908_v59  ;;  %4643 = vmatmul.f32.gmra.mxu0 %v11908_v59  ;;  %v3838_v59 = vadd.f32 %v11759_v28, %v11782_v19 }
 0x85b   : > { %v3947_v36 = vpop.f32.mrf.mxu3  ;;  %4226 = vmatmul.f32.gmra.mxu1 %v8700_v27  ;;  %v11914_v5 = vpop.f32.mrf.mxu2  ;;  %4498 = vmatpush.msrb.mxu3 %v341_v7  ;;  %v3841_v7 = vadd.f32 %v11763_v43, %v11782_v19 }
 0x85c   : > { %v3948_v6 = vadd.f32 %v3947_v36, %v3835_v18  ;;  %v334_v18 = vld [vmem:[#allocation7 + $0x148] sm:$0xff] }
 0x85d   : > { %4499 = vmatpush.msrb.mxu3 %v339_v12  ;;  %4728 = vmatpush.msrb.mxu1 %v334_v18  ;;  %v8702_v18 = vld [vmem:[#allocation2 + $0x1e8] sm:$0xff] }
 0x85e   : > { %v4259_v14 = vadd.f32 %v3948_v6, %v15331_v40 }
 0x85f   : > { %4500 = vmatpush.msrb.mxu3 %v337_v30  ;;  %v11937_v30 = vpop.f32.mrf.mxu0 }
 0x860   : > { %3997 = vmatmul.f32.gmra.mxu3 %v8699_v37  ;;  %v11921_v16 = vmax.f32 %v4259_v14, 0.0  ;;  %v335_v37 = vld [vmem:[#allocation7 + $0x150] sm:$0xff]  ;;  %v333_v14 = vld [vmem:[#allocation7 + $0x140] sm:$0xff]  ;;  %15335 = vst [vmem:[#allocation77_spill] sm:$0xff] %v11937_v30 }
 0x861   : > { %4501 = vmatpush.msrb.mxu3 %v335_v37 }
 0x862   : > { %15332 = vst [vmem:[#allocation81_spill] sm:$0xff] %v11921_v16  ;;  %4420 = vmatmul.f32.gmra.mxu2 %v11921_v16  ;;  %4646 = vmatmul.f32.gmra.mxu0 %v11921_v16  ;;  %v11935_v16 = vperm.slane %v11777_v2, 1  ;;  %v3844_v2 = vadd.f32 %v11767_v60, %v11782_v19 }
 0x863   : > { %v3950_v36 = vpop.f32.mrf.mxu3  ;;  %4229 = vmatmul.f32.gmra.mxu1 %v8701_v31  ;;  %v11925_v6 = vpop.f32.mrf.mxu2  ;;  %4502 = vmatpush.msrb.mxu3 %v333_v14 }
 0x864   : > { %v3951_v28 = vadd.f32 %v3950_v36, %v3838_v59 }
 0x866   : > { %v4261_v40 = vadd.f32 %v3951_v28, %v15333_v25  ;;  %v4031_v28 = vadd.f32 %v11715_v44, %v11935_v16  ;;  %v11946_v25 = vpop.f32.mrf.mxu1  ;;  %v8703_v44 = vld [vmem:[#allocation2 + $0x1f8] sm:$0xff] }
 0x868   : > { %4000 = vmatmul.f32.gmra.mxu3 %v8700_v27  ;;  %v11932_v12 = vmax.f32 %v4261_v40, 0.0  ;;  %v15336_v27 = vld [vmem:[#allocation79_spill] sm:$0xff]  ;;  %v4144_v14 = vadd.f32 %v11769_v41, %v4031_v28  ;;  %v3847_v41 = vadd.f32 %v11771_v21, %v11782_v19  ;;  %v4037_v21 = vadd.f32 %v11725_v63, %v11935_v16 }
 0x86a   : > { %15334 = vst [vmem:[#allocation65_spill] sm:$0xff] %v11932_v12  ;;  %4423 = vmatmul.f32.gmra.mxu2 %v11932_v12  ;;  %4649 = vmatmul.f32.gmra.mxu0 %v11932_v12  ;;  %v15339_v12 = vld [vmem:[#allocation96_spill] sm:$0xff] }
 0x86b   : > { %v3953_v59 = vpop.f32.mrf.mxu3  ;;  %4232 = vmatmul.f32.gmra.mxu1 %v8702_v18  ;;  %v11943_v43 = vpop.f32.mrf.mxu2  ;;  %v4240_v60 = vadd.f32 %v4144_v14, %v15339_v12 }
 0x86c   : > { %v3954_v36 = vadd.f32 %v3953_v59, %v3841_v7  ;;  %v11955_v59 = vpop.f32.mrf.mxu0 }
 0x86d   : > { %15338 = vst [vmem:[#allocation73_spill] sm:$0xff] %v11955_v59 }
 0x86e   : > { %v4263_v37 = vadd.f32 %v3954_v36, %v15336_v27  ;;  %v4034_v27 = vadd.f32 %v11721_v58, %v11935_v16 }
 0x870   : > { %4003 = vmatmul.f32.gmra.mxu3 %v8701_v31  ;;  %v11950_v40 = vmax.f32 %v4263_v37, 0.0  ;;  %v15340_v31 = vld [vmem:[#allocation97_spill] sm:$0xff]  ;;  %v4147_v59 = vadd.f32 %v11775_v52, %v4034_v27  ;;  %v3850_v52 = vadd.f32 %v11779_v1, %v11782_v19  ;;  %v4040_v1 = vadd.f32 %v11729_v32, %v11935_v16 }
 0x872   : > { %15337 = vst [vmem:[#allocation63_spill] sm:$0xff] %v11950_v40  ;;  %4426 = vmatmul.f32.gmra.mxu2 %v11950_v40  ;;  %4652 = vmatmul.f32.gmra.mxu0 %v11950_v40  ;;  %v11967_v40 = vmax.f32 %v4240_v60, 0.0 }
 0x873   : > { %v3956_v7 = vpop.f32.mrf.mxu3  ;;  %4235 = vmatmul.f32.gmra.mxu1 %v8703_v44  ;;  %v11961_v30 = vpop.f32.mrf.mxu2 }
 0x874   : > { %v3957_v36 = vadd.f32 %v3956_v7, %v3844_v2  ;;  %v11970_v2 = vpop.f32.mrf.mxu1  ;;  %v11978_v7 = vpop.f32.mrf.mxu0 }
 0x876   : > { %v4265_v37 = vadd.f32 %v3957_v36, %v15340_v31  ;;  %v15343_v36 = vld [vmem:[#allocation49_spill] sm:$0xff]  ;;  %v4150_v31 = vadd.f32 %v11788_v8, %v4037_v21  ;;  %v15346_v8 = vld [vmem:[#allocation50_spill] sm:$0xff] }
 0x878   : > { %4006 = vmatmul.f32.gmra.mxu3 %v8702_v18  ;;  %v11965_v28 = vmax.f32 %v4265_v37, 0.0  ;;  %v15342_v18 = vld [vmem:[#allocation53_spill] sm:$0xff] }
 0x879   : > { %v4242_v14 = vadd.f32 %v4147_v59, %v15342_v18  ;;  %v3853_v18 = vadd.f32 %v11790_v29, %v11782_v19 }
 0x87a   : > { %15341 = vst [vmem:[#allocation40_spill] sm:$0xff] %v11965_v28  ;;  %4429 = vmatmul.f32.gmra.mxu2 %v11965_v28  ;;  %4655 = vmatmul.f32.gmra.mxu0 %v11965_v28 }
 0x87b   : > { %v3959_v58 = vpop.f32.mrf.mxu3  ;;  %4729 = vmatmul.f32.vlgmr.msrb.gmra.mxu1 %v11967_v40  ;;  %v11986_v37 = vmax.f32 %v4242_v14, 0.0 }
 0x87c   : > { %v3960_v12 = vadd.f32 %v3959_v58, %v3847_v41  ;;  %v11988_v41 = vpop.f32.mrf.mxu2  ;;  %v11992_v63 = vpop.f32.mrf.mxu1 }
 0x87d   : > { %v12001_v14 = vpop.f32.mrf.mxu0 }
 0x87e   : > { %v4267_v60 = vadd.f32 %v3960_v12, %v15343_v36 }
 0x880   : > { %4009 = vmatmul.f32.gmra.mxu3 %v8703_v44  ;;  %v11983_v27 = vmax.f32 %v4267_v60, 0.0  ;;  %v15345_v44 = vld [vmem:[#allocation92_spill] sm:$0xff]  ;;  %v4153_v60 = vadd.f32 %v11799_v0, %v4040_v1  ;;  %v15349_v0 = vld [vmem:[#allocation90_spill] sm:$0xff] }
 0x881   : > { %v4244_v12 = vadd.f32 %v4150_v31, %v15345_v44  ;;  %v4043_v31 = vadd.f32 %v11735_v20, %v11935_v16 }
 0x882   : > { %15344 = vst [vmem:[#allocation62_spill] sm:$0xff] %v11983_v27  ;;  %4432 = vmatmul.f32.gmra.mxu2 %v11983_v27  ;;  %4658 = vmatmul.f32.gmra.mxu0 %v11983_v27 }
 0x883   : > { %v3962_v59 = vpop.f32.mrf.mxu3  ;;  %4732 = vmatmul.f32.gmra.mxu1 %v11986_v37  ;;  %v12007_v27 = vmax.f32 %v4244_v12, 0.0  ;;  %v3856_v12 = vadd.f32 %v11803_v11, %v11782_v19  ;;  %v4046_v11 = vadd.f32 %v11739_v50, %v11935_v16 }
 0x884   : > { %v3963_v58 = vadd.f32 %v3962_v59, %v3850_v52  ;;  %v12012_v52 = vpop.f32.mrf.mxu2  ;;  %v15348_v59 = vld [vmem:[#allocation91_spill] sm:$0xff]  ;;  %v12017_v44 = vpop.f32.mrf.mxu1 }
 0x886   : > { %v4269_v21 = vadd.f32 %v3963_v58, %v15346_v8  ;;  %v4246_v58 = vadd.f32 %v4153_v60, %v15348_v59 }
 0x888   : > { %4503 = vmatmul.f32.vlgmr.msrb.gmra.mxu3 %v11967_v40  ;;  %v12004_v36 = vmax.f32 %v4269_v21, 0.0  ;;  %v4156_v21 = vadd.f32 %v11808_v9, %v4043_v31  ;;  %v15352_v9 = vld [vmem:[#allocation93_spill] sm:$0xff] }
 0x88a   : > { %15347 = vst [vmem:[#allocation80_spill] sm:$0xff] %v12004_v36  ;;  %4435 = vmatmul.f32.gmra.mxu2 %v12004_v36  ;;  %4661 = vmatmul.f32.gmra.mxu0 %v12004_v36  ;;  %v12026_v36 = vmax.f32 %v4246_v58, 0.0 }
 0x88b   : > { %v3965_v32 = vpop.f32.mrf.mxu3  ;;  %4735 = vmatmul.f32.gmra.mxu1 %v12007_v27 }
 0x88c   : > { %v3966_v29 = vadd.f32 %v3965_v32, %v3853_v18  ;;  %v12028_v18 = vpop.f32.mrf.mxu0  ;;  %v15351_v32 = vld [vmem:[#allocation88_spill] sm:$0xff]  ;;  %v12039_v58 = vpop.f32.mrf.mxu1 }
 0x88e   : > { %v4271_v1 = vadd.f32 %v3966_v29, %v15349_v0  ;;  %v4248_v29 = vadd.f32 %v4156_v21, %v15351_v32  ;;  %v3859_v0 = vadd.f32 %v11816_v61, %v11782_v19  ;;  %v4049_v61 = vadd.f32 %v11743_v38, %v11935_v16  ;;  %v15354_v32 = vld [vmem:[#allocation87_spill] sm:$0xff] }
 0x890   : > { %4506 = vmatmul.f32.gmra.mxu3 %v11986_v37  ;;  %v12023_v8 = vmax.f32 %v4271_v1, 0.0 }
 0x892   : > { %15350 = vst [vmem:[#allocation58_spill] sm:$0xff] %v12023_v8  ;;  %4438 = vmatmul.f32.gmra.mxu2 %v12023_v8  ;;  %4664 = vmatmul.f32.gmra.mxu0 %v12023_v8  ;;  %v4162_v8 = vadd.f32 %v11834_v53, %v4049_v61  ;;  %v15359_v61 = vld [vmem:[#allocation89_spill] sm:$0xff] }
 0x893   : > { %v3968_v20 = vpop.f32.mrf.mxu3  ;;  %4738 = vmatmul.f32.gmra.mxu1 %v12026_v36 }
 0x894   : > { %v3969_v60 = vadd.f32 %v3968_v20, %v3856_v12  ;;  %v4159_v12 = vadd.f32 %v11821_v4, %v4046_v11  ;;  %v12047_v20 = vmax.f32 %v4248_v29, 0.0  ;;  %v12052_v21 = vpop.f32.mrf.mxu0  ;;  %v15355_v4 = vld [vmem:[#allocation86_spill] sm:$0xff]  ;;  %v3862_v29 = vadd.f32 %v11827_v26, %v11782_v19  ;;  %v12066_v28 = vpop.f32.mrf.mxu1 }
 0x895   : > { %v12036_v59 = vpop.f32.mrf.mxu2  ;;  %v4052_v26 = vadd.f32 %v11747_v3, %v11935_v16 }
 0x896   : > { %v4273_v31 = vadd.f32 %v3969_v60, %v15352_v9  ;;  %v4250_v9 = vadd.f32 %v4159_v12, %v15354_v32 }
 0x898   : > { %4509 = vmatmul.f32.gmra.mxu3 %v12007_v27  ;;  %v12044_v1 = vmax.f32 %v4273_v31, 0.0 }
 0x89a   : > { %15353 = vst [vmem:[#allocation78_spill] sm:$0xff] %v12044_v1  ;;  %4441 = vmatmul.f32.gmra.mxu2 %v12044_v1  ;;  %4667 = vmatmul.f32.gmra.mxu0 %v12044_v1 }
 0x89b   : > { %v3971_v50 = vpop.f32.mrf.mxu3  ;;  %4741 = vmatmul.f32.gmra.mxu1 %v12047_v20 }
 0x89c   : > { %v3972_v60 = vadd.f32 %v3971_v50, %v3859_v0  ;;  %v12068_v0 = vmax.f32 %v4250_v9, 0.0  ;;  %v15358_v50 = vld [vmem:[#allocation84_spill] sm:$0xff]  ;;  %v12078_v53 = vpop.f32.mrf.mxu0  ;;  %v12091_v3 = vpop.f32.mrf.mxu1 }
 0x89d   : > { %v12057_v31 = vpop.f32.mrf.mxu2 }
 0x89e   : > { %v4275_v11 = vadd.f32 %v3972_v60, %v15355_v4  ;;  %15357 = vst [vmem:[#allocation76_spill] sm:$0xff] %v12068_v0  ;;  %v4252_v60 = vadd.f32 %v4162_v8, %v15358_v50  ;;  %v3865_v4 = vadd.f32 %v11840_v46, %v11782_v19  ;;  %v4055_v46 = vadd.f32 %v11753_v33, %v11935_v16  ;;  %v15362_v50 = vld [vmem:[#allocation85_spill] sm:$0xff] }
 0x8a0   : > { %4512 = vmatmul.f32.gmra.mxu3 %v12026_v36  ;;  %v12063_v1 = vmax.f32 %v4275_v11, 0.0 }
 0x8a2   : > { %15356 = vst [vmem:[#allocation24_spill] sm:$0xff] %v12063_v1  ;;  %4444 = vmatmul.f32.gmra.mxu2 %v12063_v1  ;;  %4670 = vmatmul.f32.gmra.mxu0 %v12063_v1 }
 0x8a3   : > { %v3974_v38 = vpop.f32.mrf.mxu3  ;;  %4744 = vmatmul.f32.gmra.mxu1 %v12068_v0 }
 0x8a4   : > { %v3975_v12 = vadd.f32 %v3974_v38, %v3862_v29  ;;  %v4165_v29 = vadd.f32 %v11849_v35, %v4052_v26  ;;  %v12087_v38 = vmax.f32 %v4252_v60, 0.0  ;;  %v15363_v35 = vld [vmem:[#allocation82_spill] sm:$0xff]  ;;  %v3868_v60 = vadd.f32 %v11853_v54, %v11782_v19  ;;  %v12102_v1 = vpop.f32.mrf.mxu0 }
 0x8a5   : > { %v12076_v32 = vpop.f32.mrf.mxu2  ;;  %v4058_v54 = vadd.f32 %v11757_v47, %v11935_v16 }
 0x8a6   : > { %v4277_v9 = vadd.f32 %v3975_v12, %v15359_v61  ;;  %15361 = vst [vmem:[#allocation74_spill] sm:$0xff] %v12087_v38  ;;  %v4254_v61 = vadd.f32 %v4165_v29, %v15362_v50 }
 0x8a8   : > { %4515 = vmatmul.f32.gmra.mxu3 %v12047_v20  ;;  %v12084_v11 = vmax.f32 %v4277_v9, 0.0 }
 0x8aa   : > { %15360 = vst [vmem:[#allocation20_spill] sm:$0xff] %v12084_v11  ;;  %4447 = vmatmul.f32.gmra.mxu2 %v12084_v11  ;;  %4673 = vmatmul.f32.gmra.mxu0 %v12084_v11 }
 0x8ab   : > { %v3977_v8 = vpop.f32.mrf.mxu3  ;;  %4747 = vmatmul.f32.gmra.mxu1 %v12087_v38 }
 0x8ac   : > { %v3978_v12 = vadd.f32 %v3977_v8, %v3865_v4  ;;  %v4168_v4 = vadd.f32 %v11866_v57, %v4055_v46  ;;  %v12108_v8 = vmax.f32 %v4254_v61, 0.0  ;;  %v15367_v57 = vld [vmem:[#allocation19_spill] sm:$0xff]  ;;  %v3871_v61 = vadd.f32 %v11864_v42, %v11782_v19  ;;  %v12129_v47 = vpop.f32.mrf.mxu0 }
 0x8ad   : > { %v12097_v9 = vpop.f32.mrf.mxu2  ;;  %v4061_v42 = vadd.f32 %v11761_v55, %v11935_v16 }
 0x8ae   : > { %v4279_v26 = vadd.f32 %v3978_v12, %v15363_v35  ;;  %15365 = vst [vmem:[#allocation95_spill] sm:$0xff] %v12108_v8  ;;  %v15366_v12 = vld [vmem:[#allocation17_spill] sm:$0xff]  ;;  %v12116_v35 = vpop.f32.mrf.mxu1 }
 0x8af   : > { %v4256_v50 = vadd.f32 %v4168_v4, %v15366_v12  ;;  %v15370_v12 = vld [vmem:[#allocation27_spill] sm:$0xff] }
 0x8b0   : > { %4518 = vmatmul.f32.gmra.mxu3 %v12068_v0  ;;  %v12105_v11 = vmax.f32 %v4279_v26, 0.0 }
 0x8b2   : > { %15364 = vst [vmem:[#allocation75_spill] sm:$0xff] %v12105_v11  ;;  %4450 = vmatmul.f32.gmra.mxu2 %v12105_v11  ;;  %4676 = vmatmul.f32.gmra.mxu0 %v12105_v11 }
 0x8b3   : > { %v3980_v33 = vpop.f32.mrf.mxu3  ;;  %4750 = vmatmul.f32.gmra.mxu1 %v12108_v8 }
 0x8b4   : > { %v3981_v29 = vadd.f32 %v3980_v33, %v3868_v60  ;;  %v4171_v60 = vadd.f32 %v11879_v24, %v4058_v54  ;;  %v12127_v33 = vmax.f32 %v4256_v50, 0.0  ;;  %v15371_v24 = vld [vmem:[#allocation23_spill] sm:$0xff] }
 0x8b5   : > { %v12118_v26 = vpop.f32.mrf.mxu2 }
 0x8b6   : > { %v4281_v46 = vadd.f32 %v3981_v29, %v15367_v57  ;;  %15369 = vst [vmem:[#allocation79_spill] sm:$0xff] %v12127_v33  ;;  %v4258_v57 = vadd.f32 %v4171_v60, %v15370_v12  ;;  %v12140_v50 = vpop.f32.mrf.mxu1  ;;  %v12153_v60 = vpop.f32.mrf.mxu0  ;;  %v15374_v12 = vld [vmem:[#allocation29_spill] sm:$0xff] }
 0x8b8   : > { %4521 = vmatmul.f32.gmra.mxu3 %v12087_v38  ;;  %v12124_v11 = vmax.f32 %v4281_v46, 0.0  ;;  %v3874_v38 = vadd.f32 %v11877_v34, %v11782_v19  ;;  %v4064_v34 = vadd.f32 %v11765_v49, %v11935_v16 }
 0x8ba   : > { %15368 = vst [vmem:[#allocation94_spill] sm:$0xff] %v12124_v11  ;;  %4453 = vmatmul.f32.gmra.mxu2 %v12124_v11  ;;  %4679 = vmatmul.f32.gmra.mxu0 %v12124_v11 }
 0x8bb   : > { %v3983_v4 = vpop.f32.mrf.mxu3  ;;  %4753 = vmatmul.f32.gmra.mxu1 %v12127_v33 }
 0x8bc   : > { %v3984_v29 = vadd.f32 %v3983_v4, %v3871_v61  ;;  %v4174_v61 = vadd.f32 %v11895_v39, %v4061_v42  ;;  %v12148_v4 = vmax.f32 %v4258_v57, 0.0  ;;  %v15375_v39 = vld [vmem:[#allocation25_spill] sm:$0xff]  ;;  %v3877_v57 = vadd.f32 %v11888_v17, %v11782_v19 }
 0x8bd   : > { %v12137_v46 = vpop.f32.mrf.mxu2  ;;  %v4067_v17 = vadd.f32 %v11773_v10, %v11935_v16  ;;  %v380_v10 = vld [vmem:[#allocation7 + $0x330] sm:$0xff] }
 0x8be   : > { %v4283_v54 = vadd.f32 %v3984_v29, %v15371_v24  ;;  %15373 = vst [vmem:[#allocation97_spill] sm:$0xff] %v12148_v4  ;;  %v4260_v24 = vadd.f32 %v4174_v61, %v15374_v12  ;;  %v12167_v0 = vpop.f32.mrf.mxu1  ;;  %4895 = vmatpush.msra.mxu2 %v380_v10  ;;  %v377_v10 = vld [vmem:[#allocation7 + $0x300] sm:$0xff] }
 0x8c0   : > { %4524 = vmatmul.f32.gmra.mxu3 %v12108_v8  ;;  %v12145_v11 = vmax.f32 %v4283_v54, 0.0  ;;  %v4177_v8 = vadd.f32 %v11910_v13, %v4064_v34  ;;  %v12179_v13 = vpop.f32.mrf.mxu0  ;;  %v15378_v34 = vld [vmem:[#allocation35_spill] sm:$0xff] }
 0x8c2   : > { %15372 = vst [vmem:[#allocation96_spill] sm:$0xff] %v12145_v11  ;;  %4456 = vmatmul.f32.gmra.mxu2 %v12145_v11  ;;  %4682 = vmatmul.f32.gmra.mxu0 %v12145_v11 }
 0x8c3   : > { %v3986_v55 = vpop.f32.mrf.mxu3  ;;  %4756 = vmatmul.f32.gmra.mxu1 %v12148_v4 }
 0x8c4   : > { %v3987_v29 = vadd.f32 %v3986_v55, %v3874_v38  ;;  %v12169_v38 = vmax.f32 %v4260_v24, 0.0  ;;  %v15377_v55 = vld [vmem:[#allocation33_spill] sm:$0xff] }
 0x8c5   : > { %v12158_v54 = vpop.f32.mrf.mxu2 }
 0x8c6   : > { %v4285_v42 = vadd.f32 %v3987_v29, %v15375_v39  ;;  %v4262_v29 = vadd.f32 %v4177_v8, %v15377_v55  ;;  %v3880_v39 = vadd.f32 %v11901_v23, %v11782_v19  ;;  %v12192_v8 = vpop.f32.mrf.mxu1 }
 0x8c8   : > { %4527 = vmatmul.f32.gmra.mxu3 %v12127_v33  ;;  %v12164_v11 = vmax.f32 %v4285_v42, 0.0  ;;  %v12203_v33 = vpop.f32.mrf.mxu0 }
 0x8ca   : > { %15376 = vst [vmem:[#allocation53_spill] sm:$0xff] %v12164_v11  ;;  %4459 = vmatmul.f32.gmra.mxu2 %v12164_v11  ;;  %4685 = vmatmul.f32.gmra.mxu0 %v12164_v11 }
 0x8cb   : > { %v3989_v49 = vpop.f32.mrf.mxu3  ;;  %4759 = vmatmul.f32.gmra.mxu1 %v12169_v38 }
 0x8cc   : > { %v3990_v61 = vadd.f32 %v3989_v49, %v3877_v57  ;;  %v4180_v57 = vadd.f32 %v11927_v56, %v4067_v17  ;;  %v12188_v49 = vmax.f32 %v4262_v29, 0.0  ;;  %v15382_v29 = vld [vmem:[#allocation37_spill] sm:$0xff] }
 0x8cd   : > { %v12177_v12 = vpop.f32.mrf.mxu2 }
 0x8ce   : > { %v4287_v24 = vadd.f32 %v3990_v61, %v15378_v34  ;;  %15380 = vst [vmem:[#allocation92_spill] sm:$0xff] %v12188_v49  ;;  %v379_v61 = vld [vmem:[#allocation7 + $0x320] sm:$0xff]  ;;  %v4070_v34 = vadd.f32 %v11784_v51, %v11935_v16 }
 0x8cf   : > { %4896 = vmatpush.msra.mxu2 %v379_v61  ;;  %v15385_v61 = vld [vmem:[#allocation16_spill] sm:$0xff] }
 0x8d0   : > { %4530 = vmatmul.f32.gmra.mxu3 %v12148_v4  ;;  %v12185_v42 = vmax.f32 %v4287_v24, 0.0  ;;  %v15381_v24 = vld [vmem:[#allocation43_spill] sm:$0xff]  ;;  %v3883_v4 = vadd.f32 %v11914_v5, %v11782_v19  ;;  %v4183_v51 = vadd.f32 %v11946_v25, %v4070_v34  ;;  %v12217_v25 = vpop.f32.mrf.mxu1  ;;  %v15386_v34 = vld [vmem:[#allocation41_spill] sm:$0xff] }
 0x8d1   : > { %v4264_v56 = vadd.f32 %v4180_v57, %v15381_v24 }
 0x8d2   : > { %15379 = vst [vmem:[#allocation49_spill] sm:$0xff] %v12185_v42  ;;  %4462 = vmatmul.f32.gmra.mxu2 %v12185_v42  ;;  %4688 = vmatmul.f32.gmra.mxu0 %v12185_v42  ;;  %v378_v42 = vld [vmem:[#allocation7 + $0x310] sm:$0xff]  ;;  %v4266_v24 = vadd.f32 %v4183_v51, %v15385_v61  ;;  %v371_v61 = vld [vmem:[#allocation7 + $0x2a0] sm:$0xff] }
 0x8d3   : > { %v3992_v55 = vpop.f32.mrf.mxu3  ;;  %4762 = vmatmul.f32.gmra.mxu1 %v12188_v49  ;;  %4897 = vmatpush.msra.mxu2 %v378_v42  ;;  %v12209_v57 = vmax.f32 %v4264_v56, 0.0  ;;  %v376_v42 = vld [vmem:[#allocation7 + $0x2f0] sm:$0xff] }
 0x8d4   : > { %v3993_v23 = vadd.f32 %v3992_v55, %v3880_v39  ;;  %v12228_v51 = vmax.f32 %v4266_v24, 0.0  ;;  %v15390_v24 = vld [vmem:[#allocation51_spill] sm:$0xff] }
 0x8d5   : > { %v12198_v17 = vpop.f32.mrf.mxu2  ;;  %15384 = vst [vmem:[#allocation91_spill] sm:$0xff] %v12209_v57  ;;  %4898 = vmatpush.msra.mxu2 %v377_v10  ;;  %v374_v10 = vld [vmem:[#allocation7 + $0x2d0] sm:$0xff] }
 0x8d6   : > { %v4289_v11 = vadd.f32 %v3993_v23, %v15382_v29  ;;  %v375_v23 = vld [vmem:[#allocation7 + $0x2e0] sm:$0xff]  ;;  %15388 = vst [vmem:[#allocation88_spill] sm:$0xff] %v12228_v51 }
 0x8d7   : > { %4899 = vmatpush.msra.mxu2 %v376_v42  ;;  %v373_v42 = vld [vmem:[#allocation7 + $0x2c0] sm:$0xff] }
 0x8d8   : > { %4533 = vmatmul.f32.gmra.mxu3 %v12169_v38  ;;  %v12206_v39 = vmax.f32 %v4289_v11, 0.0  ;;  %v4073_v11 = vadd.f32 %v11795_v62, %v11935_v16 }
 0x8d9   : > { %4900 = vmatpush.msra.mxu2 %v375_v23 }
 0x8da   : > { %15383 = vst [vmem:[#allocation50_spill] sm:$0xff] %v12206_v39  ;;  %4465 = vmatmul.f32.gmra.mxu2 %v12206_v39  ;;  %4691 = vmatmul.f32.gmra.mxu0 %v12206_v39  ;;  %v3886_v39 = vadd.f32 %v11925_v6, %v11782_v19  ;;  %v4186_v62 = vadd.f32 %v11970_v2, %v4073_v11  ;;  %v15389_v2 = vld [vmem:[#allocation54_spill] sm:$0xff] }
 0x8db   : > { %v3995_v55 = vpop.f32.mrf.mxu3  ;;  %4765 = vmatmul.f32.gmra.mxu1 %v12209_v57  ;;  %4901 = vmatpush.msra.mxu2 %v374_v10  ;;  %v370_v10 = vld [vmem:[#allocation7 + $0x290] sm:$0xff] }
 0x8dc   : > { %v3996_v5 = vadd.f32 %v3995_v55, %v3883_v4  ;;  %v12230_v55 = vpop.f32.mrf.mxu0  ;;  %v4268_v11 = vadd.f32 %v4186_v62, %v15389_v2  ;;  %v367_v2 = vld [vmem:[#allocation7 + $0x260] sm:$0xff] }
 0x8dd   : > { %v12220_v29 = vpop.f32.mrf.mxu2  ;;  %4902 = vmatpush.msra.mxu2 %v373_v42  ;;  %v12239_v42 = vpop.f32.mrf.mxu1 }
 0x8de   : > { %v4291_v56 = vadd.f32 %v3996_v5, %v15386_v34  ;;  %v372_v5 = vld [vmem:[#allocation7 + $0x2b0] sm:$0xff]  ;;  %v4076_v34 = vadd.f32 %v11812_v45, %v11935_v16  ;;  %v12249_v62 = vmax.f32 %v4268_v11, 0.0  ;;  %v15394_v11 = vld [vmem:[#allocation22_spill] sm:$0xff] }
 0x8df   : > { %4903 = vmatpush.msra.mxu2 %v372_v5  ;;  %v369_v5 = vld [vmem:[#allocation7 + $0x280] sm:$0xff] }
 0x8e0   : > { %4536 = vmatmul.f32.gmra.mxu3 %v12188_v49  ;;  %v12225_v4 = vmax.f32 %v4291_v56, 0.0  ;;  %v4189_v45 = vadd.f32 %v11992_v63, %v4076_v34  ;;  %15392 = vst [vmem:[#allocation87_spill] sm:$0xff] %v12249_v62  ;;  %v15393_v63 = vld [vmem:[#allocation26_spill] sm:$0xff] }
 0x8e1   : > { %4904 = vmatpush.msra.mxu2 %v371_v61 }
 0x8e2   : > { %15387 = vst [vmem:[#allocation90_spill] sm:$0xff] %v12225_v4  ;;  %4468 = vmatmul.f32.gmra.mxu2 %v12225_v4  ;;  %4694 = vmatmul.f32.gmra.mxu0 %v12225_v4  ;;  %v3889_v4 = vadd.f32 %v11943_v43, %v11782_v19  ;;  %v4270_v34 = vadd.f32 %v4189_v45, %v15393_v63  ;;  %v15397_v63 = vld [vmem:[#allocation60_spill] sm:$0xff] }
 0x8e3   : > { %v3998_v23 = vpop.f32.mrf.mxu3  ;;  %4768 = vmatmul.f32.gmra.mxu1 %v12228_v51  ;;  %4905 = vmatpush.msra.mxu2 %v370_v10  ;;  %v366_v10 = vld [vmem:[#allocation7 + $0x250] sm:$0xff] }
 0x8e4   : > { %v3999_v6 = vadd.f32 %v3998_v23, %v3886_v39  ;;  %v368_v23 = vld [vmem:[#allocation7 + $0x270] sm:$0xff]  ;;  %v12254_v43 = vpop.f32.mrf.mxu0 }
 0x8e5   : > { %v12243_v49 = vpop.f32.mrf.mxu2  ;;  %4906 = vmatpush.msra.mxu2 %v369_v5  ;;  %v3892_v5 = vadd.f32 %v11961_v30, %v11782_v19 }
 0x8e6   : > { %v4293_v56 = vadd.f32 %v3999_v6, %v15390_v24  ;;  %v4079_v24 = vadd.f32 %v11829_v15, %v11935_v16  ;;  %v12268_v15 = vmax.f32 %v4270_v34, 0.0  ;;  %v15398_v34 = vld [vmem:[#allocation56_spill] sm:$0xff] }
 0x8e7   : > { %4907 = vmatpush.msra.mxu2 %v368_v23 }
 0x8e8   : > { %4539 = vmatmul.f32.gmra.mxu3 %v12209_v57  ;;  %v12246_v39 = vmax.f32 %v4293_v56, 0.0  ;;  %15396 = vst [vmem:[#allocation84_spill] sm:$0xff] %v12268_v15 }
 0x8e9   : > { %4908 = vmatpush.msra.mxu2 %v367_v2  ;;  %v4082_v2 = vadd.f32 %v11842_v48, %v11935_v16 }
 0x8ea   : > { %15391 = vst [vmem:[#allocation93_spill] sm:$0xff] %v12246_v39  ;;  %4471 = vmatmul.f32.gmra.mxu2 %v12246_v39  ;;  %4697 = vmatmul.f32.gmra.mxu0 %v12246_v39  ;;  %v365_v39 = vld [vmem:[#allocation7 + $0x240] sm:$0xff] }
 0x8eb   : > { %v4001_v6 = vpop.f32.mrf.mxu3  ;;  %4771 = vmatmul.f32.gmra.mxu1 %v12249_v62  ;;  %4909 = vmatpush.msra.mxu2 %v366_v10  ;;  %v4195_v10 = vadd.f32 %v12039_v58, %v4082_v2  ;;  %v15403_v58 = vld [vmem:[#allocation28_spill] sm:$0xff] }
 0x8ec   : > { %v4002_v61 = vadd.f32 %v4001_v6, %v3889_v4  ;;  %v4192_v4 = vadd.f32 %v12017_v44, %v4079_v24  ;;  %v12266_v6 = vpop.f32.mrf.mxu1  ;;  %v12278_v24 = vpop.f32.mrf.mxu0 }
 0x8ed   : > { %4910 = vmatpush.msra.mxu2 %v365_v39  ;;  %v12270_v45 = vpop.f32.mrf.mxu2  ;;  %v3895_v39 = vadd.f32 %v11988_v41, %v11782_v19 }
 0x8ee   : > { %v4295_v56 = vadd.f32 %v4002_v61, %v15394_v11  ;;  %v4272_v44 = vadd.f32 %v4192_v4, %v15397_v63  ;;  %v15402_v63 = vld [vmem:[#allocation32_spill] sm:$0xff] }
 0x8f0   : > { %4542 = vmatmul.f32.gmra.mxu3 %v12228_v51  ;;  %v12263_v23 = vmax.f32 %v4295_v56, 0.0 }
 0x8f2   : > { %15395 = vst [vmem:[#allocation86_spill] sm:$0xff] %v12263_v23  ;;  %4474 = vmatmul.f32.gmra.mxu2 %v12263_v23  ;;  %4700 = vmatmul.f32.gmra.mxu0 %v12263_v23  ;;  %v12287_v23 = vmax.f32 %v4272_v44, 0.0  ;;  %v3898_v44 = vadd.f32 %v12012_v52, %v11782_v19  ;;  %v15405_v19 = vld [vmem:[#allocation21_spill] sm:$0xff] }
 0x8f3   : > { %v4004_v61 = vpop.f32.mrf.mxu3  ;;  %4774 = vmatmul.f32.gmra.mxu1 %v12268_v15  ;;  %v4088_v52 = vadd.f32 %v15405_v19, %v11935_v16 }
 0x8f4   : > { %v4005_v30 = vadd.f32 %v4004_v61, %v3892_v5  ;;  %15400 = vst [vmem:[#allocation85_spill] sm:$0xff] %v12287_v23  ;;  %v12291_v48 = vpop.f32.mrf.mxu1  ;;  %v15401_v61 = vld [vmem:[#allocation38_spill] sm:$0xff] }
 0x8f5   : > { %v12294_v4 = vpop.f32.mrf.mxu2 }
 0x8f6   : > { %v4297_v11 = vadd.f32 %v4005_v30, %v15398_v34  ;;  %v4085_v30 = vadd.f32 %v15401_v61, %v11935_v16  ;;  %v4274_v34 = vadd.f32 %v4195_v10, %v15402_v63  ;;  %v12316_v61 = vld [vmem:[#allocation8 + $0x4] ss:$8 sm:$0x3] }
 0x8f8   : > { %4545 = vmatmul.f32.gmra.mxu3 %v12249_v62  ;;  %v12284_v56 = vmax.f32 %v4297_v11, 0.0  ;;  %v12302_v11 = vpop.f32.mrf.mxu0  ;;  %v4198_v62 = vadd.f32 %v12066_v28, %v4085_v30  ;;  %v12308_v51 = vmax.f32 %v4274_v34, 0.0  ;;  %v12321_v28 = vperm.slane %v12316_v61, 0  ;;  %v15407_v34 = vld [vmem:[#allocation30_spill] sm:$0xff] }
 0x8fa   : > { %15399 = vst [vmem:[#allocation89_spill] sm:$0xff] %v12284_v56  ;;  %4477 = vmatmul.f32.gmra.mxu2 %v12284_v56  ;;  %4703 = vmatmul.f32.gmra.mxu0 %v12284_v56 }
 0x8fb   : > { %v4007_v5 = vpop.f32.mrf.mxu3  ;;  %4777 = vmatmul.f32.gmra.mxu1 %v12287_v23 }
 0x8fc   : > { %v4008_v41 = vadd.f32 %v4007_v5, %v3895_v39  ;;  %v15406_v5 = vld [vmem:[#allocation64_spill] sm:$0xff]  ;;  %v12318_v63 = vpop.f32.mrf.mxu1 }
 0x8fd   : > { %v12323_v30 = vpop.f32.mrf.mxu2 }
 0x8fe   : > { %v4299_v2 = vadd.f32 %v4008_v41, %v15403_v58  ;;  %v4276_v41 = vadd.f32 %v4198_v62, %v15406_v5  ;;  %v4392_v62 = vadd.f32 %v12036_v59, %v12321_v28 }
 0x900   : > { %4548 = vmatmul.f32.gmra.mxu3 %v12268_v15  ;;  %v12305_v56 = vmax.f32 %v4299_v2, 0.0  ;;  %v12334_v19 = vpop.f32.mrf.mxu0 }
 0x902   : > { %15404 = vst [vmem:[#allocation82_spill] sm:$0xff] %v12305_v56  ;;  %4480 = vmatmul.f32.gmra.mxu2 %v12305_v56  ;;  %4706 = vmatmul.f32.gmra.mxu0 %v12305_v56  ;;  %v15410_v56 = vld [vmem:[#allocation66_spill] sm:$0xff] }
 0x903   : > { %v4010_v39 = vpop.f32.mrf.mxu3  ;;  %4780 = vmatmul.f32.gmra.mxu1 %v12308_v51 }
 0x904   : > { %v4011_v10 = vadd.f32 %v4010_v39, %v3898_v44  ;;  %v4201_v44 = vadd.f32 %v12091_v3, %v4088_v52  ;;  %v12330_v39 = vmax.f32 %v4276_v41, 0.0  ;;  %v12342_v52 = vpop.f32.mrf.mxu1 }
 0x905   : > { %v12344_v41 = vpop.f32.mrf.mxu2 }
 0x906   : > { %v4301_v58 = vadd.f32 %v4011_v10, %v15407_v34  ;;  %v15409_v34 = vld [vmem:[#allocation71_spill] sm:$0xff]  ;;  %v4278_v3 = vadd.f32 %v4201_v44, %v15410_v56  ;;  %v15412_v56 = vld [vmem:[#allocation46_spill] sm:$0xff] }
 0x907   : > { %v4094_v44 = vadd.f32 %v15412_v56, %v11935_v16 }
 0x908   : > { %4551 = vmatmul.f32.gmra.mxu3 %v12287_v23  ;;  %v12327_v2 = vmax.f32 %v4301_v58, 0.0  ;;  %v4091_v58 = vadd.f32 %v15409_v34, %v11935_v16  ;;  %v12348_v15 = vmax.f32 %v4278_v3, 0.0  ;;  %v15413_v34 = vld [vmem:[#allocation68_spill] sm:$0xff] }
 0x90a   : > { %15408 = vst [vmem:[#allocation17_spill] sm:$0xff] %v12327_v2  ;;  %4483 = vmatmul.f32.gmra.mxu2 %v12327_v2  ;;  %4709 = vmatmul.f32.gmra.mxu0 %v12327_v2  ;;  %v4204_v23 = vadd.f32 %v12116_v35, %v4091_v58  ;;  %v4395_v2 = vadd.f32 %v12057_v31, %v12321_v28 }
 0x90b   : > { %v4504_v5 = vpop.f32.mrf.mxu3  ;;  %4783 = vmatmul.f32.gmra.mxu1 %v12330_v39  ;;  %15411 = vst [vmem:[#allocation19_spill] sm:$0xff] %v12348_v15  ;;  %v4207_v35 = vadd.f32 %v12140_v50, %v4094_v44  ;;  %v4398_v31 = vadd.f32 %v12076_v32, %v12321_v28  ;;  %v4401_v32 = vadd.f32 %v12097_v9, %v12321_v28 }
 0x90c   : > { %v4505_v10 = vadd.f32 %v4504_v5, %v4392_v62  ;;  %v4280_v57 = vadd.f32 %v4204_v23, %v15413_v34  ;;  %v12358_v58 = vpop.f32.mrf.mxu1  ;;  %v4097_v23 = vadd.f32 %v11919_v22, %v11935_v16 }
 0x90e   : > { %v4826_v59 = vmax.f32 %v4505_v10, 0.0  ;;  %v12360_v3 = vmax.f32 %v4280_v57, 0.0  ;;  %v4210_v57 = vadd.f32 %v12167_v0, %v4097_v23 }
 0x910   : > { %4554 = vmatmul.f32.gmra.mxu3 %v12308_v51 }
 0x912   : > { %4911 = vmatmul.f32.vlgmr.msra.gmra.mxu2 %v4826_v59  ;;  %v12364_v59 = vpop.f32.mrf.mxu2 }
 0x913   : > { %v4507_v62 = vpop.f32.mrf.mxu3  ;;  %4786 = vmatmul.f32.gmra.mxu1 %v12348_v15 }
 0x914   : > { %v4508_v5 = vadd.f32 %v4507_v62, %v4395_v2  ;;  %v12376_v34 = vpop.f32.mrf.mxu1 }
 0x916   : > { %v4828_v10 = vmax.f32 %v4508_v5, 0.0  ;;  %v15414_v5 = vld [vmem:[#allocation70_spill] sm:$0xff] }
 0x917   : > { %v4282_v56 = vadd.f32 %v4207_v35, %v15414_v5  ;;  %v15415_v35 = vld [vmem:[#allocation77_spill] sm:$0xff] }
 0x918   : > { %4557 = vmatmul.f32.gmra.mxu3 %v12330_v39 }
 0x919   : > { %v12372_v44 = vmax.f32 %v4282_v56, 0.0  ;;  %v4404_v56 = vadd.f32 %v12118_v26, %v12321_v28 }
 0x91a   : > { %4914 = vmatmul.f32.gmra.mxu2 %v4828_v10 }
 0x91b   : > { %v4510_v2 = vpop.f32.mrf.mxu3  ;;  %4789 = vmatmul.f32.gmra.mxu1 %v12360_v3 }
 0x91c   : > { %v4511_v62 = vadd.f32 %v4510_v2, %v4398_v31  ;;  %v12379_v31 = vpop.f32.mrf.mxu2  ;;  %v4100_v2 = vadd.f32 %v15415_v35, %v11935_v16 }
 0x91e   : > { %v4830_v50 = vmax.f32 %v4511_v62, 0.0  ;;  %v15416_v62 = vld [vmem:[#allocation42_spill] sm:$0xff]  ;;  %v4213_v23 = vadd.f32 %v12192_v8, %v4100_v2 }
 0x91f   : > { %v4284_v5 = vadd.f32 %v4210_v57, %v15416_v62 }
 0x920   : > { %4560 = vmatmul.f32.gmra.mxu3 %v12348_v15  ;;  %v15418_v15 = vld [vmem:[#allocation47_spill] sm:$0xff] }
 0x921   : > { %v12386_v9 = vmax.f32 %v4284_v5, 0.0  ;;  %v4286_v57 = vadd.f32 %v4213_v23, %v15418_v15  ;;  %v4407_v5 = vadd.f32 %v12137_v46, %v12321_v28  ;;  %v4106_v15 = vadd.f32 %v11978_v7, %v11935_v16  ;;  %v15419_v23 = vld [vmem:[#allocation52_spill] sm:$0xff] }
 0x922   : > { %4917 = vmatmul.f32.gmra.mxu2 %v4830_v50 }
 0x923   : > { %v4513_v10 = vpop.f32.mrf.mxu3  ;;  %4792 = vmatmul.f32.gmra.mxu1 %v12372_v44  ;;  %v12400_v26 = vmax.f32 %v4286_v57, 0.0  ;;  %v4410_v57 = vadd.f32 %v12158_v54, %v12321_v28  ;;  %v4413_v54 = vadd.f32 %v12177_v12, %v12321_v28  ;;  %v4416_v12 = vadd.f32 %v12198_v17, %v12321_v28 }
 0x924   : > { %v4514_v22 = vadd.f32 %v4513_v10, %v4401_v32  ;;  %v15417_v10 = vld [vmem:[#allocation73_spill] sm:$0xff]  ;;  %v12396_v62 = vpop.f32.mrf.mxu2 }
 0x925   : > { %v4103_v35 = vadd.f32 %v15417_v10, %v11935_v16 }
 0x926   : > { %v4832_v0 = vmax.f32 %v4514_v22, 0.0  ;;  %v12394_v22 = vpop.f32.mrf.mxu1 }
 0x927   : > { %v4216_v2 = vadd.f32 %v12217_v25, %v4103_v35  ;;  %v4219_v35 = vadd.f32 %v12239_v42, %v4106_v15 }
 0x928   : > { %4563 = vmatmul.f32.gmra.mxu3 %v12360_v3 }
 0x92a   : > { %4920 = vmatmul.f32.gmra.mxu2 %v4832_v0 }
 0x92b   : > { %v4516_v50 = vpop.f32.mrf.mxu3  ;;  %4795 = vmatmul.f32.gmra.mxu1 %v12386_v9 }
 0x92c   : > { %v4517_v32 = vadd.f32 %v4516_v50, %v4404_v56  ;;  %v4288_v50 = vadd.f32 %v4216_v2, %v15419_v23  ;;  %v12410_v10 = vpop.f32.mrf.mxu2  ;;  %v4109_v2 = vadd.f32 %v12001_v14, %v11935_v16 }
 0x92e   : > { %v4834_v8 = vmax.f32 %v4517_v32, 0.0  ;;  %v12408_v32 = vpop.f32.mrf.mxu1  ;;  %v12414_v46 = vmax.f32 %v4288_v50, 0.0  ;;  %v4222_v42 = vadd.f32 %v12266_v6, %v4109_v2 }
 0x930   : > { %4566 = vmatmul.f32.gmra.mxu3 %v12372_v44 }
 0x932   : > { %4923 = vmatmul.f32.gmra.mxu2 %v4834_v8 }
 0x933   : > { %v4519_v0 = vpop.f32.mrf.mxu3  ;;  %4798 = vmatmul.f32.gmra.mxu1 %v12400_v26 }
 0x934   : > { %v4520_v56 = vadd.f32 %v4519_v0, %v4407_v5  ;;  %v15420_v5 = vld [vmem:[#allocation69_spill] sm:$0xff]  ;;  %v12430_v50 = vpop.f32.mrf.mxu2 }
 0x935   : > { %v4290_v0 = vadd.f32 %v4219_v35, %v15420_v5  ;;  %v4112_v35 = vadd.f32 %v12028_v18, %v11935_v16 }
 0x936   : > { %v4836_v25 = vmax.f32 %v4520_v56, 0.0  ;;  %v12424_v15 = vpop.f32.mrf.mxu1 }
 0x937   : > { %v12426_v23 = vmax.f32 %v4290_v0, 0.0  ;;  %v4225_v2 = vadd.f32 %v12291_v48, %v4112_v35  ;;  %v395_v0 = vld [vmem:[#allocation7 + $0x420] sm:$0xff]  ;;  %v4115_v48 = vadd.f32 %v12052_v21, %v11935_v16 }
 0x938   : > { %4569 = vmatmul.f32.gmra.mxu3 %v12386_v9 }
 0x93a   : > { %4926 = vmatmul.f32.gmra.mxu2 %v4836_v25 }
 0x93b   : > { %v4522_v8 = vpop.f32.mrf.mxu3  ;;  %4801 = vmatmul.f32.gmra.mxu1 %v12414_v46 }
 0x93c   : > { %v4523_v7 = vadd.f32 %v4522_v8, %v4410_v57  ;;  %v15421_v57 = vld [vmem:[#allocation57_spill] sm:$0xff]  ;;  %v12445_v18 = vpop.f32.mrf.mxu2 }
 0x93d   : > { %v4292_v8 = vadd.f32 %v4222_v42, %v15421_v57  ;;  %v393_v57 = vld [vmem:[#allocation7 + $0x400] sm:$0xff] }
 0x93e   : > { %v4838_v56 = vmax.f32 %v4523_v7, 0.0  ;;  %v396_v7 = vld [vmem:[#allocation7 + $0x430] sm:$0xff] }
 0x93f   : > { %v12438_v5 = vmax.f32 %v4292_v8, 0.0  ;;  %5008 = vmatpush.msra.mxu3 %v396_v7  ;;  %v392_v8 = vld [vmem:[#allocation7 + $0x3f0] sm:$0xff] }
 0x940   : > { %4572 = vmatmul.f32.gmra.mxu3 %v12400_v26 }
 0x941   : > { %5009 = vmatpush.msra.mxu3 %v395_v0  ;;  %v391_v0 = vld [vmem:[#allocation7 + $0x3e0] sm:$0xff] }
 0x942   : > { %4929 = vmatmul.f32.gmra.mxu2 %v4838_v56  ;;  %v12442_v56 = vpop.f32.mrf.mxu1 }
 0x943   : > { %v4525_v25 = vpop.f32.mrf.mxu3  ;;  %4804 = vmatmul.f32.gmra.mxu1 %v12426_v23 }
 0x944   : > { %v4526_v14 = vadd.f32 %v4525_v25, %v4413_v54  ;;  %v394_v25 = vld [vmem:[#allocation7 + $0x410] sm:$0xff] }
 0x945   : > { %5010 = vmatpush.msra.mxu3 %v394_v25  ;;  %v15423_v25 = vld [vmem:[#allocation59_spill] sm:$0xff] }
 0x946   : > { %v4840_v6 = vmax.f32 %v4526_v14, 0.0  ;;  %v15422_v14 = vld [vmem:[#allocation48_spill] sm:$0xff] }
 0x947   : > { %v4294_v35 = vadd.f32 %v4225_v2, %v15422_v14  ;;  %5011 = vmatpush.msra.mxu3 %v393_v57  ;;  %v388_v57 = vld [vmem:[#allocation7 + $0x3b0] sm:$0xff] }
 0x948   : > { %4575 = vmatmul.f32.gmra.mxu3 %v12414_v46 }
 0x949   : > { %v12452_v7 = vmax.f32 %v4294_v35, 0.0  ;;  %5012 = vmatpush.msra.mxu3 %v392_v8  ;;  %v389_v35 = vld [vmem:[#allocation7 + $0x3c0] sm:$0xff] }
 0x94a   : > { %4932 = vmatmul.f32.gmra.mxu2 %v4840_v6  ;;  %v4228_v6 = vadd.f32 %v12318_v63, %v4115_v48  ;;  %v12460_v63 = vpop.f32.mrf.mxu1  ;;  %v12462_v48 = vpop.f32.mrf.mxu2 }
 0x94b   : > { %v4528_v54 = vpop.f32.mrf.mxu3  ;;  %4807 = vmatmul.f32.gmra.mxu1 %v12438_v5  ;;  %5013 = vmatpush.msra.mxu3 %v391_v0 }
 0x94c   : > { %v4529_v42 = vadd.f32 %v4528_v54, %v4416_v12  ;;  %v4419_v12 = vadd.f32 %v12220_v29, %v12321_v28  ;;  %v390_v54 = vld [vmem:[#allocation7 + $0x3d0] sm:$0xff]  ;;  %v4296_v14 = vadd.f32 %v4228_v6, %v15423_v25  ;;  %v387_v6 = vld [vmem:[#allocation7 + $0x3a0] sm:$0xff] }
 0x94d   : > { %5014 = vmatpush.msra.mxu3 %v390_v54  ;;  %v15424_v54 = vld [vmem:[#allocation61_spill] sm:$0xff] }
 0x94e   : > { %v4842_v17 = vmax.f32 %v4529_v42, 0.0  ;;  %v4118_v42 = vadd.f32 %v12078_v53, %v11935_v16  ;;  %v12466_v8 = vmax.f32 %v4296_v14, 0.0  ;;  %v4422_v53 = vadd.f32 %v12243_v49, %v12321_v28 }
 0x94f   : > { %5015 = vmatpush.msra.mxu3 %v389_v35  ;;  %v384_v35 = vld [vmem:[#allocation7 + $0x370] sm:$0xff] }
 0x950   : > { %4578 = vmatmul.f32.gmra.mxu3 %v12426_v23 }
 0x951   : > { %5016 = vmatpush.msra.mxu3 %v388_v57 }
 0x952   : > { %4935 = vmatmul.f32.gmra.mxu2 %v4842_v17  ;;  %v4231_v17 = vadd.f32 %v12342_v52, %v4118_v42  ;;  %v385_v52 = vld [vmem:[#allocation7 + $0x380] sm:$0xff]  ;;  %v12474_v42 = vpop.f32.mrf.mxu1  ;;  %v12476_v14 = vpop.f32.mrf.mxu2 }
 0x953   : > { %v4531_v21 = vpop.f32.mrf.mxu3  ;;  %4810 = vmatmul.f32.gmra.mxu1 %v12452_v7  ;;  %5017 = vmatpush.msra.mxu3 %v387_v6 }
 0x954   : > { %v4532_v2 = vadd.f32 %v4531_v21, %v4419_v12  ;;  %v386_v21 = vld [vmem:[#allocation7 + $0x390] sm:$0xff]  ;;  %v4298_v25 = vadd.f32 %v4231_v17, %v15424_v54  ;;  %v383_v17 = vld [vmem:[#allocation7 + $0x360] sm:$0xff] }
 0x955   : > { %5018 = vmatpush.msra.mxu3 %v386_v21  ;;  %v15425_v21 = vld [vmem:[#allocation83_spill] sm:$0xff] }
 0x956   : > { %v4844_v29 = vmax.f32 %v4532_v2, 0.0  ;;  %v4121_v2 = vadd.f32 %v12102_v1, %v11935_v16  ;;  %v12480_v57 = vmax.f32 %v4298_v25, 0.0  ;;  %v4425_v1 = vadd.f32 %v12270_v45, %v12321_v28 }
 0x957   : > { %5019 = vmatpush.msra.mxu3 %v385_v52 }
 0x958   : > { %4581 = vmatmul.f32.gmra.mxu3 %v12438_v5 }
 0x959   : > { %5020 = vmatpush.msra.mxu3 %v384_v35 }
 0x95a   : > { %4938 = vmatmul.f32.gmra.mxu2 %v4844_v29  ;;  %v4234_v29 = vadd.f32 %v12358_v58, %v4121_v2  ;;  %v381_v58 = vld [vmem:[#allocation7 + $0x340] sm:$0xff]  ;;  %v12490_v25 = vpop.f32.mrf.mxu1  ;;  %v12496_v35 = vpop.f32.mrf.mxu2 }
 0x95b   : > { %v4534_v12 = vpop.f32.mrf.mxu3  ;;  %4813 = vmatmul.f32.gmra.mxu1 %v12466_v8  ;;  %5021 = vmatpush.msra.mxu3 %v383_v17 }
 0x95c   : > { %v4535_v0 = vadd.f32 %v4534_v12, %v4422_v53  ;;  %v382_v12 = vld [vmem:[#allocation7 + $0x350] sm:$0xff]  ;;  %v4300_v54 = vadd.f32 %v4234_v29, %v15425_v21 }
 0x95d   : > { %5022 = vmatpush.msra.mxu3 %v382_v12  ;;  %v15426_v29 = vld [vmem:[#allocation15_spill] sm:$0xff] }
 0x95e   : > { %v4846_v49 = vmax.f32 %v4535_v0, 0.0  ;;  %v4124_v0 = vadd.f32 %v12129_v47, %v11935_v16  ;;  %v12492_v52 = vmax.f32 %v4300_v54, 0.0  ;;  %v4434_v54 = vadd.f32 %v12344_v41, %v12321_v28 }
 0x95f   : > { %5023 = vmatpush.msra.mxu3 %v381_v58 }
 0x960   : > { %4584 = vmatmul.f32.gmra.mxu3 %v12452_v7  ;;  %v4237_v45 = vadd.f32 %v12376_v34, %v4124_v0 }
 0x962   : > { %4941 = vmatmul.f32.gmra.mxu2 %v4846_v49  ;;  %v4428_v49 = vadd.f32 %v12294_v4, %v12321_v28  ;;  %v12508_v12 = vpop.f32.mrf.mxu2 }
 0x963   : > { %v4537_v53 = vpop.f32.mrf.mxu3  ;;  %4816 = vmatmul.f32.gmra.mxu1 %v12480_v57 }
 0x964   : > { %v4538_v6 = vadd.f32 %v4537_v53, %v4425_v1  ;;  %v4302_v1 = vadd.f32 %v4237_v45, %v15426_v29  ;;  %v4431_v53 = vadd.f32 %v12323_v30, %v12321_v28  ;;  %v4437_v29 = vadd.f32 %v12364_v59, %v12321_v28 }
 0x966   : > { %v4848_v2 = vmax.f32 %v4538_v6, 0.0  ;;  %v12501_v34 = vmax.f32 %v4302_v1, 0.0  ;;  %v12505_v6 = vpop.f32.mrf.mxu1 }
 0x968   : > { %4587 = vmatmul.f32.gmra.mxu3 %v12466_v8  ;;  %15427 = vst [vmem:[#allocation27_spill] sm:$0xff] %v12501_v34 }
 0x96a   : > { %4944 = vmatmul.f32.gmra.mxu2 %v4848_v2  ;;  %v12514_v2 = vperm.slane %v12316_v61, 1  ;;  %v12516_v45 = vpop.f32.mrf.mxu2 }
 0x96b   : > { %v4540_v16 = vpop.f32.mrf.mxu3  ;;  %4819 = vmatmul.f32.gmra.mxu1 %v12492_v52 }
 0x96c   : > { %v4541_v47 = vadd.f32 %v4540_v16, %v4428_v49  ;;  %v4618_v49 = vadd.f32 %v12153_v60, %v12514_v2  ;;  %v4621_v61 = vadd.f32 %v12179_v13, %v12514_v2 }
 0x96e   : > { %v4850_v17 = vmax.f32 %v4541_v47, 0.0  ;;  %v4731_v47 = vadd.f32 %v12394_v22, %v4618_v49  ;;  %v4734_v60 = vadd.f32 %v12408_v32, %v4621_v61  ;;  %v12535_v13 = vpop.f32.mrf.mxu1  ;;  %v4443_v32 = vadd.f32 %v12396_v62, %v12321_v28 }
 0x970   : > { %4590 = vmatmul.f32.gmra.mxu3 %v12480_v57  ;;  %v4829_v59 = vmax.f32 %v4734_v60, 0.0 }
 0x972   : > { %4947 = vmatmul.f32.gmra.mxu2 %v4850_v17  ;;  %v4827_v17 = vmax.f32 %v4731_v47, 0.0 }
 0x973   : > { %v4543_v4 = vpop.f32.mrf.mxu3  ;;  %4822 = vmatmul.f32.gmra.mxu1 %v12501_v34 }
 0x974   : > { %v4544_v0 = vadd.f32 %v4543_v4, %v4431_v53  ;;  %v12526_v53 = vpop.f32.mrf.mxu2 }
 0x976   : > { %v4852_v21 = vmax.f32 %v4544_v0, 0.0  ;;  %v4440_v0 = vadd.f32 %v12379_v31, %v12321_v28  ;;  %v12549_v62 = vpop.f32.mrf.mxu1 }
 0x978   : > { %4593 = vmatmul.f32.gmra.mxu3 %v12492_v52 }
 0x97a   : > { %4950 = vmatmul.f32.gmra.mxu2 %v4852_v21 }
 0x97b   : > { %v4546_v58 = vpop.f32.mrf.mxu3 }
 0x97c   : > { %v4547_v30 = vadd.f32 %v4546_v58, %v4434_v54  ;;  %v12531_v54 = vpop.f32.mrf.mxu0  ;;  %v4624_v58 = vadd.f32 %v12203_v33, %v12514_v2 }
 0x97e   : > { %v4854_v16 = vmax.f32 %v4547_v30, 0.0  ;;  %v4737_v49 = vadd.f32 %v12424_v15, %v4624_v58  ;;  %v4446_v15 = vadd.f32 %v12410_v10, %v12321_v28 }
 0x980   : > { %4596 = vmatmul.f32.gmra.mxu3 %v12501_v34 }
 0x982   : > { %4953 = vmatmul.f32.gmra.mxu2 %v4854_v16  ;;  %v12540_v16 = vpop.f32.mrf.mxu2 }
 0x983   : > { %v4549_v41 = vpop.f32.mrf.mxu3 }
 0x984   : > { %v4550_v1 = vadd.f32 %v4549_v41, %v4437_v29  ;;  %v4831_v29 = vmax.f32 %v4737_v49, 0.0  ;;  %v4627_v41 = vadd.f32 %v12230_v55, %v12514_v2  ;;  %v12544_v33 = vpop.f32.mrf.mxu0  ;;  %v4630_v55 = vadd.f32 %v12254_v43, %v12514_v2 }
 0x985   : > { %v4633_v43 = vadd.f32 %v12278_v24, %v12514_v2 }
 0x986   : > { %v4856_v4 = vmax.f32 %v4550_v1, 0.0 }
 0x988   : > { %5024 = vmatmul.f32.vlgmr.msra.gmra.mxu3 %v4827_v17  ;;  %v4740_v17 = vadd.f32 %v12442_v56, %v4627_v41  ;;  %v4449_v56 = vadd.f32 %v12430_v50, %v12321_v28  ;;  %v4452_v50 = vadd.f32 %v12445_v18, %v12321_v28 }
 0x98a   : > { %4956 = vmatmul.f32.gmra.mxu2 %v4856_v4  ;;  %v12551_v4 = vpop.f32.mrf.mxu2 }
 0x98b   : > { %v4552_v22 = vpop.f32.mrf.mxu3 }
 0x98c   : > { %v4553_v21 = vadd.f32 %v4552_v22, %v4440_v0  ;;  %v4833_v0 = vmax.f32 %v4740_v17, 0.0  ;;  %v12558_v10 = vpop.f32.mrf.mxu0 }
 0x98e   : > { %v4858_v30 = vmax.f32 %v4553_v21, 0.0  ;;  %v4743_v21 = vadd.f32 %v12460_v63, %v4630_v55  ;;  %v4746_v63 = vadd.f32 %v12474_v42, %v4633_v43  ;;  %v4455_v42 = vadd.f32 %v12462_v48, %v12321_v28 }
 0x990   : > { %5027 = vmatmul.f32.gmra.mxu3 %v4829_v59  ;;  %v4835_v49 = vmax.f32 %v4743_v21, 0.0  ;;  %v4639_v21 = vadd.f32 %v12334_v19, %v12514_v2 }
 0x992   : > { %4959 = vmatmul.f32.gmra.mxu2 %v4858_v30  ;;  %v12560_v30 = vpop.f32.mrf.mxu1 }
 0x993   : > { %v4555_v31 = vpop.f32.mrf.mxu3 }
 0x994   : > { %v4556_v47 = vadd.f32 %v4555_v31, %v4443_v32  ;;  %v12562_v32 = vpop.f32.mrf.mxu2  ;;  %v4650_v41 = vpop.f32.mrf.mxu0 }
 0x996   : > { %v4860_v1 = vmax.f32 %v4556_v47, 0.0 }
 0x998   : > { %5030 = vmatmul.f32.gmra.mxu3 %v4831_v29 }
 0x99a   : > { %4962 = vmatmul.f32.gmra.mxu2 %v4860_v1  ;;  %v4837_v1 = vmax.f32 %v4746_v63, 0.0  ;;  %v4763_v17 = vpop.f32.mrf.mxu1 }
 0x99b   : > { %v4558_v61 = vpop.f32.mrf.mxu3 }
 0x99c   : > { %v4559_v60 = vadd.f32 %v4558_v61, %v4446_v15  ;;  %v4636_v15 = vadd.f32 %v12302_v11, %v12514_v2  ;;  %v12571_v61 = vpop.f32.mrf.mxu2 }
 0x99e   : > { %v4862_v22 = vmax.f32 %v4559_v60, 0.0  ;;  %v4749_v24 = vadd.f32 %v12490_v25, %v4636_v15 }
 0x9a0   : > { %5033 = vmatmul.f32.gmra.mxu3 %v4833_v0  ;;  %v4839_v55 = vmax.f32 %v4749_v24, 0.0 }
 0x9a2   : > { %4965 = vmatmul.f32.gmra.mxu2 %v4862_v22  ;;  %v4653_v22 = vpop.f32.mrf.mxu0  ;;  %v4766_v11 = vpop.f32.mrf.mxu1 }
 0x9a3   : > { %v4561_v59 = vpop.f32.mrf.mxu3 }
 0x9a4   : > { %v4562_v58 = vadd.f32 %v4561_v59, %v4449_v56  ;;  %v4752_v59 = vadd.f32 %v12505_v6, %v4639_v21  ;;  %v12581_v25 = vpop.f32.mrf.mxu2  ;;  %v4461_v6 = vadd.f32 %v12496_v35, %v12321_v28 }
 0x9a6   : > { %v4864_v31 = vmax.f32 %v4562_v58, 0.0  ;;  %v4458_v58 = vadd.f32 %v12476_v14, %v12321_v28  ;;  %v4841_v43 = vmax.f32 %v4752_v59, 0.0 }
 0x9a8   : > { %5036 = vmatmul.f32.gmra.mxu3 %v4835_v49 }
 0x9aa   : > { %4968 = vmatmul.f32.gmra.mxu2 %v4864_v31  ;;  %v4642_v31 = vadd.f32 %v12531_v54, %v12514_v2  ;;  %v4656_v19 = vpop.f32.mrf.mxu0 }
 0x9ab   : > { %v4564_v47 = vpop.f32.mrf.mxu3 }
 0x9ac   : > { %v4565_v29 = vadd.f32 %v4564_v47, %v4452_v50  ;;  %v4755_v50 = vadd.f32 %v12535_v13, %v4642_v31  ;;  %v4769_v47 = vpop.f32.mrf.mxu1  ;;  %v4464_v13 = vadd.f32 %v12508_v12, %v12321_v28  ;;  %v4651_v31 = vadd.f32 %v4650_v41, %v12514_v2 }
 0x9ad   : > { %v4473_v41 = vadd.f32 %v12540_v16, %v12321_v28 }
 0x9ae   : > { %v4866_v60 = vmax.f32 %v4565_v29, 0.0  ;;  %v12588_v29 = vpop.f32.mrf.mxu2  ;;  %v4843_v15 = vmax.f32 %v4755_v50, 0.0 }
 0x9b0   : > { %5039 = vmatmul.f32.gmra.mxu3 %v4837_v1 }
 0x9b2   : > { %4971 = vmatmul.f32.gmra.mxu2 %v4866_v60  ;;  %v4645_v60 = vadd.f32 %v12544_v33, %v12514_v2 }
 0x9b3   : > { %v4567_v18 = vpop.f32.mrf.mxu3 }
 0x9b4   : > { %v4568_v0 = vadd.f32 %v4567_v18, %v4455_v42  ;;  %v4758_v54 = vadd.f32 %v12549_v62, %v4645_v60  ;;  %v4659_v42 = vpop.f32.mrf.mxu0  ;;  %v4467_v62 = vadd.f32 %v12516_v45, %v12321_v28 }
 0x9b6   : > { %v4868_v56 = vmax.f32 %v4568_v0, 0.0  ;;  %v4772_v0 = vpop.f32.mrf.mxu1  ;;  %v12595_v21 = vpop.f32.mrf.mxu2 }
 0x9b8   : > { %5042 = vmatmul.f32.gmra.mxu3 %v4839_v55  ;;  %v4845_v55 = vmax.f32 %v4758_v54, 0.0 }
 0x9ba   : > { %4974 = vmatmul.f32.gmra.mxu2 %v4868_v56  ;;  %v4648_v56 = vadd.f32 %v12558_v10, %v12514_v2  ;;  %v4764_v10 = vadd.f32 %v4763_v17, %v4651_v31 }
 0x9bb   : > { %v4570_v48 = vpop.f32.mrf.mxu3 }
 0x9bc   : > { %v4571_v49 = vadd.f32 %v4570_v48, %v4458_v58  ;;  %v4761_v33 = vadd.f32 %v12560_v30, %v4648_v56  ;;  %v4662_v48 = vpop.f32.mrf.mxu0  ;;  %v4849_v45 = vmax.f32 %v4764_v10, 0.0 }
 0x9be   : > { %v4870_v63 = vmax.f32 %v4571_v49, 0.0  ;;  %v4847_v49 = vmax.f32 %v4761_v33, 0.0 }
 0x9c0   : > { %5045 = vmatmul.f32.gmra.mxu3 %v4841_v43  ;;  %v4775_v43 = vpop.f32.mrf.mxu1 }
 0x9c2   : > { %4977 = vmatmul.f32.gmra.mxu2 %v4870_v63  ;;  %v12603_v63 = vpop.f32.mrf.mxu2 }
 0x9c3   : > { %v4573_v14 = vpop.f32.mrf.mxu3 }
 0x9c4   : > { %v4574_v1 = vadd.f32 %v4573_v14, %v4461_v6  ;;  %v4470_v6 = vadd.f32 %v12526_v53, %v12321_v28 }
 0x9c6   : > { %v4872_v24 = vmax.f32 %v4574_v1, 0.0  ;;  %v4665_v1 = vpop.f32.mrf.mxu0 }
 0x9c8   : > { %5048 = vmatmul.f32.gmra.mxu3 %v4843_v15  ;;  %v4654_v15 = vadd.f32 %v4653_v22, %v12514_v2  ;;  %v4476_v22 = vadd.f32 %v12551_v4, %v12321_v28 }
 0x9ca   : > { %4980 = vmatmul.f32.gmra.mxu2 %v4872_v24  ;;  %v4778_v24 = vpop.f32.mrf.mxu1  ;;  %v4767_v54 = vadd.f32 %v4766_v11, %v4654_v15 }
 0x9cb   : > { %v4576_v35 = vpop.f32.mrf.mxu3 }
 0x9cc   : > { %v4577_v18 = vadd.f32 %v4576_v35, %v4464_v13  ;;  %v12610_v13 = vpop.f32.mrf.mxu2  ;;  %v4851_v53 = vmax.f32 %v4767_v54, 0.0 }
 0x9ce   : > { %v4874_v59 = vmax.f32 %v4577_v18, 0.0  ;;  %v4657_v18 = vadd.f32 %v4656_v19, %v12514_v2  ;;  %v4668_v56 = vpop.f32.mrf.mxu0  ;;  %v4479_v19 = vadd.f32 %v12562_v32, %v12321_v28 }
 0x9d0   : > { %5051 = vmatmul.f32.gmra.mxu3 %v4845_v55 }
 0x9d2   : > { %4983 = vmatmul.f32.gmra.mxu2 %v4874_v59  ;;  %v4770_v59 = vadd.f32 %v4769_v47, %v4657_v18  ;;  %v4781_v11 = vpop.f32.mrf.mxu1 }
 0x9d3   : > { %v4579_v12 = vpop.f32.mrf.mxu3 }
 0x9d4   : > { %v4580_v58 = vadd.f32 %v4579_v12, %v4467_v62  ;;  %v12615_v62 = vpop.f32.mrf.mxu2  ;;  %v4853_v12 = vmax.f32 %v4770_v59, 0.0 }
 0x9d6   : > { %v4876_v50 = vmax.f32 %v4580_v58, 0.0  ;;  %v4660_v58 = vadd.f32 %v4659_v42, %v12514_v2  ;;  %v4671_v47 = vpop.f32.mrf.mxu0  ;;  %v4482_v42 = vadd.f32 %v12571_v61, %v12321_v28 }
 0x9d8   : > { %5054 = vmatmul.f32.gmra.mxu3 %v4847_v49  ;;  %v4773_v31 = vadd.f32 %v4772_v0, %v4660_v58 }
 0x9da   : > { %4986 = vmatmul.f32.gmra.mxu2 %v4876_v50  ;;  %v4784_v4 = vpop.f32.mrf.mxu1 }
 0x9db   : > { %v4582_v30 = vpop.f32.mrf.mxu3 }
 0x9dc   : > { %v4583_v14 = vadd.f32 %v4582_v30, %v4470_v6  ;;  %v4855_v6 = vmax.f32 %v4773_v31, 0.0  ;;  %v12620_v30 = vpop.f32.mrf.mxu2 }
 0x9de   : > { %v4878_v60 = vmax.f32 %v4583_v14, 0.0  ;;  %v4663_v14 = vadd.f32 %v4662_v48, %v12514_v2  ;;  %v4674_v32 = vpop.f32.mrf.mxu0  ;;  %v4485_v48 = vadd.f32 %v12581_v25, %v12321_v28 }
 0x9e0   : > { %5057 = vmatmul.f32.gmra.mxu3 %v4849_v45  ;;  %v4776_v15 = vadd.f32 %v4775_v43, %v4663_v14  ;;  %v4891_v43 = vld [vmem:[#allocation8 + $0x5] ss:$8 sm:$0x3] }
 0x9e2   : > { %4989 = vmatmul.f32.gmra.mxu2 %v4878_v60  ;;  %v4857_v54 = vmax.f32 %v4776_v15, 0.0 }
 0x9e3   : > { %v4585_v17 = vpop.f32.mrf.mxu3 }
 0x9e4   : > { %v4586_v35 = vadd.f32 %v4585_v17, %v4473_v41  ;;  %v4787_v41 = vpop.f32.mrf.mxu1  ;;  %v4666_v17 = vadd.f32 %v4665_v1, %v12514_v2 }
 0x9e6   : > { %v4880_v55 = vmax.f32 %v4586_v35, 0.0  ;;  %v12626_v35 = vpop.f32.mrf.mxu2  ;;  %v4779_v18 = vadd.f32 %v4778_v24, %v4666_v17 }
 0x9e8   : > { %5060 = vmatmul.f32.gmra.mxu3 %v4851_v53  ;;  %v4859_v59 = vmax.f32 %v4779_v18, 0.0 }
 0x9ea   : > { %4992 = vmatmul.f32.gmra.mxu2 %v4880_v55 }
 0x9eb   : > { %v4588_v33 = vpop.f32.mrf.mxu3 }
 0x9ec   : > { %v4589_v16 = vadd.f32 %v4588_v33, %v4476_v22  ;;  %v12630_v22 = vperm.slane %v4891_v43, 0  ;;  %v4677_v33 = vpop.f32.mrf.mxu0  ;;  %v4790_v1 = vpop.f32.mrf.mxu1 }
 0x9ed   : > { %v4678_v18 = vadd.f32 %v4677_v33, %v12514_v2 }
 0x9ee   : > { %v4882_v49 = vmax.f32 %v4589_v16, 0.0  ;;  %v4669_v16 = vadd.f32 %v4668_v56, %v12514_v2  ;;  %v4913_v24 = vadd.f32 %v12588_v29, %v12630_v22  ;;  %v4672_v56 = vadd.f32 %v4671_v47, %v12514_v2 }
 0x9ef   : > { %v4916_v29 = vadd.f32 %v12595_v21, %v12630_v22  ;;  %v4919_v47 = vadd.f32 %v12603_v63, %v12630_v22  ;;  %v4925_v33 = vadd.f32 %v12615_v62, %v12630_v22 }
 0x9f0   : > { %5063 = vmatmul.f32.gmra.mxu3 %v4853_v12  ;;  %v4782_v58 = vadd.f32 %v4781_v11, %v4669_v16  ;;  %v4785_v11 = vadd.f32 %v4784_v4, %v4672_v56 }
 0x9f2   : > { %4995 = vmatmul.f32.gmra.mxu2 %v4882_v49  ;;  %v12635_v49 = vpop.f32.mrf.mxu2  ;;  %v4861_v31 = vmax.f32 %v4782_v58, 0.0 }
 0x9f3   : > { %v4591_v50 = vpop.f32.mrf.mxu3 }
 0x9f4   : > { %v4592_v10 = vadd.f32 %v4591_v50, %v4479_v19  ;;  %v4680_v50 = vpop.f32.mrf.mxu0 }
 0x9f5   : > { %v4681_v16 = vadd.f32 %v4680_v50, %v12514_v2  ;;  %v4928_v50 = vadd.f32 %v12620_v30, %v12630_v22 }
 0x9f6   : > { %v4884_v45 = vmax.f32 %v4592_v10, 0.0  ;;  %v4793_v10 = vpop.f32.mrf.mxu1 }
 0x9f8   : > { %5066 = vmatmul.f32.gmra.mxu3 %v4855_v6 }
 0x9fa   : > { %4998 = vmatmul.f32.gmra.mxu2 %v4884_v45  ;;  %v4863_v45 = vmax.f32 %v4785_v11, 0.0 }
 0x9fb   : > { %v4594_v0 = vpop.f32.mrf.mxu3 }
 0x9fc   : > { %v4595_v60 = vadd.f32 %v4594_v0, %v4482_v42  ;;  %v4675_v42 = vadd.f32 %v4674_v32, %v12514_v2  ;;  %v4683_v4 = vpop.f32.mrf.mxu0  ;;  %v4922_v32 = vadd.f32 %v12610_v13, %v12630_v22 }
 0x9fe   : > { %v4886_v53 = vmax.f32 %v4595_v60, 0.0  ;;  %v4788_v0 = vadd.f32 %v4787_v41, %v4675_v42  ;;  %v4796_v21 = vpop.f32.mrf.mxu1  ;;  %v4931_v42 = vadd.f32 %v12626_v35, %v12630_v22 }
 0xa00   : > { %5069 = vmatmul.f32.gmra.mxu3 %v4857_v54  ;;  %v4865_v17 = vmax.f32 %v4788_v0, 0.0 }
 0xa02   : > { %5001 = vmatmul.f32.gmra.mxu2 %v4886_v53 }
 0xa03   : > { %v4597_v55 = vpop.f32.mrf.mxu3 }
 0xa04   : > { %v4598_v61 = vadd.f32 %v4597_v55, %v4485_v48  ;;  %v4791_v48 = vadd.f32 %v4790_v1, %v4678_v18  ;;  %v4686_v63 = vpop.f32.mrf.mxu0 }
 0xa06   : > { %v4888_v12 = vmax.f32 %v4598_v61, 0.0  ;;  %v4867_v55 = vmax.f32 %v4791_v48, 0.0 }
 0xa08   : > { %5072 = vmatmul.f32.gmra.mxu3 %v4859_v59  ;;  %v4799_v59 = vpop.f32.mrf.mxu1 }
 0xa0a   : > { %5004 = vmatmul.f32.gmra.mxu2 %v4888_v12  ;;  %v4794_v12 = vadd.f32 %v4793_v10, %v4681_v16 }
 0xa0b   : > { %v5025_v28 = vpop.f32.mrf.mxu3 }
 0xa0c   : > { %v12637_v25 = vadd.f32 %v5025_v28, %v4913_v24  ;;  %v4869_v13 = vmax.f32 %v4794_v12, 0.0  ;;  %v4689_v28 = vpop.f32.mrf.mxu0 }
 0xa0e   : > { %v5122_v19 = vsel %vm5121_vm1, %v12637_v25, -inf }
 0xa0f   : > { %5123 = vmax.xlane.f32.xlu0 %v5122_v19 }
 0xa10   : > { %5075 = vmatmul.f32.gmra.mxu3 %v4861_v31  ;;  %v4684_v31 = vadd.f32 %v4683_v4, %v12514_v2  ;;  %v4802_v19 = vpop.f32.mrf.mxu1 }
 0xa12   : > { %v4797_v56 = vadd.f32 %v4796_v21, %v4684_v31  ;;  %v4690_v21 = vadd.f32 %v4689_v28, %v12514_v2 }
 0xa13   : > { %v5028_v6 = vpop.f32.mrf.mxu3 }
 0xa14   : > { %v12644_v14 = vadd.f32 %v5028_v6, %v4916_v29  ;;  %v4871_v62 = vmax.f32 %v4797_v56, 0.0  ;;  %v4687_v6 = vadd.f32 %v4686_v63, %v12514_v2 }
 0xa16   : > { %v5125_v15 = vsel %vm5121_vm1, %v12644_v14, -inf }
 0xa17   : > { %5126 = vmax.xlane.f32.xlu0 %v5125_v15  ;;  %v4800_v15 = vadd.f32 %v4799_v59, %v4687_v6 }
 0xa18   : > { %5078 = vmatmul.f32.gmra.mxu3 %v4863_v45  ;;  %v4692_v45 = vpop.f32.mrf.mxu0  ;;  %v4805_v0 = vpop.f32.mrf.mxu1 }
 0xa19   : > { %v4873_v30 = vmax.f32 %v4800_v15, 0.0 }
 0xa1b   : > { %v5031_v60 = vpop.f32.mrf.mxu3 }
 0xa1c   : > { %v12651_v54 = vadd.f32 %v5031_v60, %v4919_v47 }
 0xa1e   : > { %v5128_v53 = vsel %vm5121_vm1, %v12651_v54, -inf }
 0xa1f   : > { %5129 = vmax.xlane.f32.xlu1 %v5128_v53  ;;  %v4934_v53 = vadd.f32 %v12635_v49, %v12630_v22 }
 0xa20   : > { %5081 = vmatmul.f32.gmra.mxu3 %v4865_v17  ;;  %v4803_v17 = vadd.f32 %v4802_v19, %v4690_v21  ;;  %v4695_v18 = vpop.f32.mrf.mxu0  ;;  %v4808_v35 = vpop.f32.mrf.mxu1 }
 0xa23   : > { %v5034_v41 = vpop.f32.mrf.mxu3 }
 0xa24   : > { %v12658_v43 = vadd.f32 %v5034_v41, %v4922_v32  ;;  %v4875_v41 = vmax.f32 %v4803_v17, 0.0 }
 0xa26   : > { %v5131_v61 = vsel %vm5121_vm1, %v12658_v43, -inf }
 0xa27   : > { %5132 = vmax.xlane.f32.xlu1 %v5131_v61 }
 0xa28   : > { %5084 = vmatmul.f32.gmra.mxu3 %v4867_v55  ;;  %v4693_v55 = vadd.f32 %v4692_v45, %v12514_v2  ;;  %v4698_v59 = vpop.f32.mrf.mxu0  ;;  %v4811_v12 = vpop.f32.mrf.mxu1 }
 0xa2a   : > { %v4806_v61 = vadd.f32 %v4805_v0, %v4693_v55 }
 0xa2b   : > { %v5037_v1 = vpop.f32.mrf.mxu3 }
 0xa2c   : > { %v12665_v58 = vadd.f32 %v5037_v1, %v4925_v33  ;;  %v4877_v16 = vmax.f32 %v4806_v61, 0.0  ;;  %v4696_v33 = vadd.f32 %v4695_v18, %v12514_v2 }
 0xa2e   : > { %v5134_v24 = vsel %vm5121_vm1, %v12665_v58, -inf  ;;  %v4809_v49 = vadd.f32 %v4808_v35, %v4696_v33  ;;  %v4936_v35 = vpop.f32.mrf.mxu2 }
 0xa2f   : > { %5135 = vmax.xlane.f32.xlu2 %v5134_v24  ;;  %v4699_v24 = vadd.f32 %v4698_v59, %v12514_v2 }
 0xa30   : > { %5087 = vmatmul.f32.gmra.mxu3 %v4869_v13  ;;  %v4879_v1 = vmax.f32 %v4809_v49, 0.0  ;;  %v4701_v13 = vpop.f32.mrf.mxu0  ;;  %v4814_v28 = vpop.f32.mrf.mxu1 }
 0xa31   : > { %v4812_v31 = vadd.f32 %v4811_v12, %v4699_v24  ;;  %v4702_v56 = vadd.f32 %v4701_v13, %v12514_v2  ;;  %v4937_v13 = vadd.f32 %v4936_v35, %v12630_v22 }
 0xa33   : > { %v5040_v11 = vpop.f32.mrf.mxu3  ;;  %v4881_v19 = vmax.f32 %v4812_v31, 0.0 }
 0xa34   : > { %v12672_v29 = vadd.f32 %v5040_v11, %v4928_v50  ;;  %v4815_v11 = vadd.f32 %v4814_v28, %v4702_v56 }
 0xa36   : > { %v5137_v10 = vsel %vm5121_vm1, %v12672_v29, -inf  ;;  %v4939_v59 = vpop.f32.mrf.mxu2 }
 0xa37   : > { %5138 = vmax.xlane.f32.xlu2 %v5137_v10  ;;  %v4883_v10 = vmax.f32 %v4815_v11, 0.0 }
 0xa38   : > { %5090 = vmatmul.f32.gmra.mxu3 %v4871_v62  ;;  %v4704_v50 = vpop.f32.mrf.mxu0  ;;  %v4817_v62 = vpop.f32.mrf.mxu1 }
 0xa39   : > { %v4705_v6 = vadd.f32 %v4704_v50, %v12514_v2 }
 0xa3b   : > { %v5043_v47 = vpop.f32.mrf.mxu3  ;;  %v4818_v45 = vadd.f32 %v4817_v62, %v4705_v6  ;;  %v4940_v62 = vadd.f32 %v4939_v59, %v12630_v22 }
 0xa3c   : > { %v12679_v4 = vadd.f32 %v5043_v47, %v4931_v42 }
 0xa3d   : > { %v4885_v0 = vmax.f32 %v4818_v45, 0.0 }
 0xa3e   : > { %v5140_v60 = vsel %vm5121_vm1, %v12679_v4, -inf  ;;  %v4942_v28 = vpop.f32.mrf.mxu2 }
 0xa3f   : > { %5141 = vmax.xlane.f32.xlu0 %v5140_v60 }
 0xa40   : > { %5093 = vmatmul.f32.gmra.mxu3 %v4873_v30  ;;  %v4707_v15 = vpop.f32.mrf.mxu0  ;;  %v4820_v42 = vpop.f32.mrf.mxu1 }
 0xa41   : > { %v4708_v47 = vadd.f32 %v4707_v15, %v12514_v2 }
 0xa43   : > { %v5046_v48 = vpop.f32.mrf.mxu3  ;;  %v4821_v30 = vadd.f32 %v4820_v42, %v4708_v47 }
 0xa44   : > { %v12686_v32 = vadd.f32 %v5046_v48, %v4934_v53 }
 0xa45   : > { %v4887_v21 = vmax.f32 %v4821_v30, 0.0 }
 0xa46   : > { %v5143_v63 = vsel %vm5121_vm1, %v12686_v32, -inf  ;;  %v4945_v15 = vpop.f32.mrf.mxu2 }
 0xa47   : > { %5144 = vmax.xlane.f32.xlu2 %v5143_v63 }
 0xa48   : > { %5096 = vmatmul.f32.gmra.mxu3 %v4875_v41  ;;  %v4710_v60 = vpop.f32.mrf.mxu0  ;;  %v4823_v17 = vpop.f32.mrf.mxu1 }
 0xa49   : > { %v4711_v53 = vadd.f32 %v4710_v60, %v12514_v2  ;;  %v4943_v60 = vadd.f32 %v4942_v28, %v12630_v22 }
 0xa4b   : > { %v4824_v18 = vadd.f32 %v4823_v17, %v4711_v53  ;;  %v5049_v41 = vpop.f32.mrf.mxu3 }
 0xa4c   : > { %v12704_v24 = vadd.f32 %v5049_v41, %v4937_v13 }
 0xa4d   : > { %v4889_v48 = vmax.f32 %v4824_v18, 0.0 }
 0xa4e   : > { %v5146_v50 = vsel %vm5121_vm1, %v12704_v24, -inf  ;;  %v4948_v41 = vpop.f32.mrf.mxu2 }
 0xa50   : > { %5099 = vmatmul.f32.gmra.mxu3 %v4877_v16 }
 0xa53   : > { %v5052_v12 = vpop.f32.mrf.mxu3 }
 0xa56   : > { %v4951_v13 = vpop.f32.mrf.mxu2 }
 0xa58   : > { %5102 = vmatmul.f32.gmra.mxu3 %v4879_v1 }
 0xa5b   : > { %v5055_v56 = vpop.f32.mrf.mxu3 }
 0xa60   : > { %5105 = vmatmul.f32.gmra.mxu3 %v4881_v19 }
 0xa63   : > { %v5058_v30 = vpop.f32.mrf.mxu3 }
 0xa68   : > { %5108 = vmatmul.f32.gmra.mxu3 %v4883_v10  ;;  %v12714_v10 = vadd.f32 %v5052_v12, %v4940_v62  ;;  %v4952_v62 = vadd.f32 %v4951_v13, %v12630_v22 }
 0xa6a   : > { %v5149_v47 = vsel %vm5121_vm1, %v12714_v10, -inf }
 0xa70   : > { %5111 = vmatmul.f32.gmra.mxu3 %v4885_v0 }
 0xa78   : > { %5114 = vmatmul.f32.gmra.mxu3 %v4887_v21  ;;  %v12724_v21 = vadd.f32 %v5055_v56, %v4943_v60 }
 0xa80   : > { %5117 = vmatmul.f32.gmra.mxu3 %v4889_v48  ;;  %v5152_v48 = vsel %vm5121_vm1, %v12724_v21, -inf }
 0xa82   : > { %v5124_v63 = vpop.xlane.xlu0 %5123 }
 0xa83   : > { %v5218_v55 = vsub.f32 %v12637_v25, %v5124_v63  ;;  %v4946_v63 = vadd.f32 %v4945_v15, %v12630_v22  ;;  %v4954_v15 = vpop.f32.mrf.mxu2 }
 0xa85   : > { %v5250_v61 = vmul.f32 1.442695, %v5218_v55  ;;  %v5061_v55 = vpop.f32.mrf.mxu3 }
 0xa87   : > { %8320 = vpow2.f32 %v5250_v61  ;;  %v12734_v61 = vadd.f32 %v5058_v30, %v4946_v63 }
 0xa8a   : > { %v5127_v16 = vpop.xlane.xlu0 %5126 }
 0xa8b   : > { %v5219_v33 = vsub.f32 %v12644_v14, %v5127_v16 }
 0xa8d   : > { %v12699_v49 = vpop.eup %8320  ;;  %v5252_v1 = vmul.f32 1.442695, %v5219_v33  ;;  %v5155_v33 = vsel %vm5121_vm1, %v12734_v61, -inf }
 0xa8e   : > { %v5314_v2 = vsel %vm5121_vm1, %v12699_v49, 0.0 }
 0xa8f   : > { %8322 = vpow2.f32 %v5252_v1  ;;  %5315 = vadd.xlane.f32.xlu1 %v5314_v2  ;;  %v4949_v2 = vadd.f32 %v4948_v41, %v12630_v22 }
 0xa92   : > { %v5130_v25 = vpop.xlane.xlu1 %5129 }
 0xa93   : > { %v5220_v31 = vsub.f32 %v12651_v54, %v5130_v25  ;;  %v12744_v25 = vadd.f32 %v5061_v55, %v4949_v2 }
 0xa95   : > { %v12707_v19 = vpop.eup %8322  ;;  %v5254_v14 = vmul.f32 1.442695, %v5220_v31  ;;  %v5064_v31 = vpop.f32.mrf.mxu3 }
 0xa96   : > { %v5317_v11 = vsel %vm5121_vm1, %v12707_v19, 0.0 }
 0xa97   : > { %8324 = vpow2.f32 %v5254_v14  ;;  %5147 = vmax.xlane.f32.xlu1 %v5146_v50  ;;  %5318 = vadd.xlane.f32.xlu0 %v5317_v11  ;;  %v5158_v11 = vsel %vm5121_vm1, %v12744_v25, -inf }
 0xa9a   : > { %v5133_v6 = vpop.xlane.xlu1 %5132 }
 0xa9b   : > { %v5221_v54 = vsub.f32 %v12658_v43, %v5133_v6  ;;  %v12754_v6 = vadd.f32 %v5064_v31, %v4952_v62 }
 0xa9d   : > { %v12717_v45 = vpop.eup %8324  ;;  %v5256_v42 = vmul.f32 1.442695, %v5221_v54  ;;  %v5161_v30 = vsel %vm5121_vm1, %v12754_v6, -inf }
 0xa9e   : > { %v5320_v0 = vsel %vm5121_vm1, %v12717_v45, 0.0 }
 0xa9f   : > { %8326 = vpow2.f32 %v5256_v42  ;;  %5321 = vadd.xlane.f32.xlu2 %v5320_v0  ;;  %5150 = vmax.xlane.f32.xlu0 %v5149_v47  ;;  %v5067_v0 = vpop.f32.mrf.mxu3 }
 0xaa2   : > { %v5136_v17 = vpop.xlane.xlu2 %5135 }
 0xaa3   : > { %v5222_v43 = vsub.f32 %v12665_v58, %v5136_v17  ;;  %v4955_v17 = vadd.f32 %v4954_v15, %v12630_v22 }
 0xaa5   : > { %v12727_v53 = vpop.eup %8326  ;;  %v5258_v18 = vmul.f32 1.442695, %v5222_v43  ;;  %v12764_v43 = vadd.f32 %v5067_v0, %v4955_v17 }
 0xaa6   : > { %v5323_v35 = vsel %vm5121_vm1, %v12727_v53, 0.0 }
 0xaa7   : > { %8328 = vpow2.f32 %v5258_v18  ;;  %5153 = vmax.xlane.f32.xlu2 %v5152_v48  ;;  %5324 = vadd.xlane.f32.xlu1 %v5323_v35  ;;  %v5164_v35 = vsel %vm5121_vm1, %v12764_v43, -inf  ;;  %v5070_v41 = vpop.f32.mrf.mxu3 }
 0xaaa   : > { %v5139_v59 = vpop.xlane.xlu2 %5138 }
 0xaab   : > { %v5223_v58 = vsub.f32 %v12672_v29, %v5139_v59 }
 0xaad   : > { %v12737_v16 = vpop.eup %8328  ;;  %v5260_v12 = vmul.f32 1.442695, %v5223_v58  ;;  %v397_v58 = vld [vmem:[#allocation7 + $0x440] sm:$0xff] }
 0xaae   : > { %v5326_v1 = vsel %vm5121_vm1, %v12737_v16, 0.0  ;;  %5585 = vmatpush.msra.mxu0 %v397_v58 }
 0xaaf   : > { %8330 = vpow2.f32 %v5260_v12  ;;  %5156 = vmax.xlane.f32.xlu1 %v5155_v33  ;;  %5327 = vadd.xlane.f32.xlu0 %v5326_v1  ;;  %v398_v12 = vld [vmem:[#allocation7 + $0x448] sm:$0xff]  ;;  %v5073_v13 = vpop.f32.mrf.mxu3 }
 0xab0   : > { %5698 = vmatpush.msra.mxu1 %v398_v12 }
 0xab2   : > { %v5142_v28 = vpop.xlane.xlu0 %5141 }
 0xab3   : > { %v5224_v29 = vsub.f32 %v12679_v4, %v5142_v28 }
 0xab5   : > { %v12747_v56 = vpop.eup %8330  ;;  %v5262_v14 = vmul.f32 1.442695, %v5224_v29 }
 0xab6   : > { %v5329_v50 = vsel %vm5121_vm1, %v12747_v56, 0.0 }
 0xab7   : > { %8332 = vpow2.f32 %v5262_v14  ;;  %5330 = vadd.xlane.f32.xlu2 %v5329_v50  ;;  %5159 = vmax.xlane.f32.xlu0 %v5158_v11  ;;  %v5076_v0 = vpop.f32.mrf.mxu3 }
 0xaba   : > { %v5145_v54 = vpop.xlane.xlu2 %5144 }
 0xabb   : > { %v5225_v4 = vsub.f32 %v12686_v32, %v5145_v54  ;;  %v4957_v32 = vpop.f32.mrf.mxu2 }
 0xabc   : > { %v4958_v63 = vadd.f32 %v4957_v32, %v12630_v22 }
 0xabd   : > { %v12757_v42 = vpop.eup %8332  ;;  %v5264_v47 = vmul.f32 1.442695, %v5225_v4 }
 0xabe   : > { %v5332_v60 = vsel %vm5121_vm1, %v12757_v42, 0.0  ;;  %v12773_v55 = vadd.f32 %v5070_v41, %v4958_v63 }
 0xabf   : > { %8334 = vpow2.f32 %v5264_v47  ;;  %5162 = vmax.xlane.f32.xlu2 %v5161_v30  ;;  %5333 = vadd.xlane.f32.xlu1 %v5332_v60 }
 0xac0   : > { %v5167_v59 = vsel %vm5121_vm1, %v12773_v55, -inf }
 0xac3   : > { %v4960_v1 = vpop.f32.mrf.mxu2 }
 0xac4   : > { %v4961_v60 = vadd.f32 %v4960_v1, %v12630_v22 }
 0xac5   : > { %v12766_v18 = vpop.eup %8334 }
 0xac6   : > { %v5335_v48 = vsel %vm5121_vm1, %v12766_v18, 0.0 }
 0xac7   : > { %5336 = vadd.xlane.f32.xlu0 %v5335_v48  ;;  %5165 = vmax.xlane.f32.xlu1 %v5164_v35 }
 0xacb   : > { %v4963_v62 = vpop.f32.mrf.mxu2 }
 0xacf   : > { %5168 = vmax.xlane.f32.xlu0 %v5167_v59  ;;  %v5079_v59 = vpop.f32.mrf.mxu3 }
 0xad3   : > { %v4966_v35 = vpop.f32.mrf.mxu2 }
 0xb02   : > { %v5316_v33 = vpop.xlane.xlu1 %5315 }
 0xb03   : > { %8336 = vrcp.f32 %v5316_v33 }
 0xb09   : > { %v8337_v2 = vpop.eup %8336 }
 0xb0a   : > { %v5442_v28 = vmul.f32 %v8337_v2, %v12699_v49  ;;  %v5148_v31 = vpop.xlane.xlu1 %5147  ;;  %v5319_v29 = vpop.xlane.xlu0 %5318 }
 0xb0b   : > { %v5226_v14 = vsub.f32 %v12704_v24, %v5148_v31  ;;  %8338 = vrcp.f32 %v5319_v29 }
 0xb0c   : > { %8078 = vmatmul.msk.f32.vlgmr.msra.gmra.mxu0 %vm5121_vm1, %v5442_v28  ;;  %8110 = vmatmul.msk.f32.vlgmr.msra.gmra.mxu1 %vm5121_vm1, %v5442_v28 }
 0xb0d   : > { %v5266_v50 = vmul.f32 1.442695, %v5226_v14  ;;  %v4969_v14 = vpop.f32.mrf.mxu2 }
 0xb0f   : > { %8340 = vpow2.f32 %v5266_v50 }
 0xb11   : > { %v8339_v11 = vpop.eup %8338 }
 0xb12   : > { %v5322_v54 = vpop.xlane.xlu2 %5321  ;;  %v5151_v15 = vpop.xlane.xlu0 %5150  ;;  %v5443_v4 = vmul.f32 %v8339_v11, %v12707_v19  ;;  %v12790_v19 = vadd.f32 %v5073_v13, %v4961_v60 }
 0xb13   : > { %8342 = vrcp.f32 %v5322_v54  ;;  %v5227_v49 = vsub.f32 %v12714_v10, %v5151_v15  ;;  %v5082_v54 = vpop.f32.mrf.mxu3 }
 0xb14   : > { %8079 = vmatmul.msk.f32.gmra.mxu0 %vm5121_vm1, %v5443_v4  ;;  %8111 = vmatmul.msk.f32.gmra.mxu1 %vm5121_vm1, %v5443_v4  ;;  %v5170_v12 = vsel %vm5121_vm1, %v12790_v19, -inf }
 0xb15   : > { %v12785_v24 = vpop.eup %8340  ;;  %v5268_v47 = vmul.f32 1.442695, %v5227_v49 }
 0xb16   : > { %v5338_v30 = vsel %vm5121_vm1, %v12785_v24, 0.0 }
 0xb17   : > { %8344 = vpow2.f32 %v5268_v47  ;;  %5339 = vadd.xlane.f32.xlu2 %v5338_v30 }
 0xb19   : > { %v8343_v17 = vpop.eup %8342 }
 0xb1a   : > { %v5154_v32 = vpop.xlane.xlu2 %5153  ;;  %v5325_v48 = vpop.xlane.xlu1 %5324  ;;  %v5444_v10 = vmul.f32 %v8343_v17, %v12717_v45  ;;  %v4964_v45 = vadd.f32 %v4963_v62, %v12630_v22 }
 0xb1b   : > { %v5228_v41 = vsub.f32 %v12724_v21, %v5154_v32  ;;  %8346 = vrcp.f32 %v5325_v48  ;;  %v4972_v48 = vpop.f32.mrf.mxu2 }
 0xb1c   : > { %8080 = vmatmul.msk.f32.gmra.mxu0 %vm5121_vm1, %v5444_v10  ;;  %8112 = vmatmul.msk.f32.gmra.mxu1 %vm5121_vm1, %v5444_v10  ;;  %v12803_v1 = vadd.f32 %v5076_v0, %v4964_v45  ;;  %v5085_v10 = vpop.f32.mrf.mxu3 }
 0xb1d   : > { %v12796_v63 = vpop.eup %8344  ;;  %v5270_v58 = vmul.f32 1.442695, %v5228_v41 }
 0xb1e   : > { %v5341_v33 = vsel %vm5121_vm1, %v12796_v63, 0.0  ;;  %v5173_v62 = vsel %vm5121_vm1, %v12803_v1, -inf }
 0xb1f   : > { %8348 = vpow2.f32 %v5270_v58  ;;  %5171 = vmax.xlane.f32.xlu2 %v5170_v12  ;;  %5342 = vadd.xlane.f32.xlu1 %v5341_v33 }
 0xb21   : > { %v8347_v21 = vpop.eup %8346 }
 0xb22   : > { %v5157_v2 = vpop.xlane.xlu1 %5156  ;;  %v5328_v13 = vpop.xlane.xlu0 %5327  ;;  %v5445_v28 = vmul.f32 %v8347_v21, %v12727_v53  ;;  %v4967_v53 = vadd.f32 %v4966_v35, %v12630_v22 }
 0xb23   : > { %v5229_v31 = vsub.f32 %v12734_v61, %v5157_v2  ;;  %8350 = vrcp.f32 %v5328_v13  ;;  %v461_v13 = vld [vmem:[#allocation7 + $0x640] sm:$0xff] }
 0xb24   : > { %8081 = vmatmul.msk.f32.gmra.mxu0 %vm5121_vm1, %v5445_v28  ;;  %8113 = vmatmul.msk.f32.gmra.mxu1 %vm5121_vm1, %v5445_v28  ;;  %v12816_v15 = vadd.f32 %v5079_v59, %v4967_v53  ;;  %v4973_v28 = vadd.f32 %v4972_v48, %v12630_v22 }
 0xb25   : > { %v12809_v29 = vpop.eup %8348  ;;  %v5272_v50 = vmul.f32 1.442695, %v5229_v31  ;;  %5980 = vmatpush.msrb.mxu3 %v461_v13  ;;  %v459_v31 = vld [vmem:[#allocation7 + $0x630] sm:$0xff] }
 0xb26   : > { %v5344_v11 = vsel %vm5121_vm1, %v12809_v29, 0.0  ;;  %v5176_v32 = vsel %vm5121_vm1, %v12816_v15, -inf }
 0xb27   : > { %8352 = vpow2.f32 %v5272_v50  ;;  %5345 = vadd.xlane.f32.xlu0 %v5344_v11  ;;  %5174 = vmax.xlane.f32.xlu1 %v5173_v62  ;;  %v4975_v50 = vpop.f32.mrf.mxu2  ;;  %v12842_v11 = vadd.f32 %v5085_v10, %v4973_v28  ;;  %v417_v28 = vld [vmem:[#allocation7 + $0x4e0] sm:$0xff] }
 0xb28   : > { %5981 = vmatpush.msrb.mxu3 %v459_v31  ;;  %v449_v31 = vld [vmem:[#allocation7 + $0x5e0] sm:$0xff] }
 0xb29   : > { %v8351_v61 = vpop.eup %8350  ;;  %v5182_v48 = vsel %vm5121_vm1, %v12842_v11, -inf }
 0xb2a   : > { %v5331_v4 = vpop.xlane.xlu2 %5330  ;;  %v5160_v0 = vpop.xlane.xlu0 %5159  ;;  %v5446_v49 = vmul.f32 %v8351_v61, %v12737_v16  ;;  %v4970_v16 = vadd.f32 %v4969_v14, %v12630_v22  ;;  %v425_v61 = vld [vmem:[#allocation7 + $0x520] sm:$0xff] }
 0xb2b   : > { %8354 = vrcp.f32 %v5331_v4  ;;  %v5230_v47 = vsub.f32 %v12744_v25, %v5160_v0  ;;  %v457_v4 = vld [vmem:[#allocation7 + $0x620] sm:$0xff]  ;;  %v5088_v0 = vpop.f32.mrf.mxu3 }
 0xb2c   : > { %8082 = vmatmul.msk.f32.gmra.mxu0 %vm5121_vm1, %v5446_v49  ;;  %8114 = vmatmul.msk.f32.gmra.mxu1 %vm5121_vm1, %v5446_v49  ;;  %v12829_v35 = vadd.f32 %v5082_v54, %v4970_v16  ;;  %v453_v16 = vld [vmem:[#allocation7 + $0x600] sm:$0xff] }
 0xb2d   : > { %v12822_v30 = vpop.eup %8352  ;;  %v5274_v60 = vmul.f32 1.442695, %v5230_v47  ;;  %5982 = vmatpush.msrb.mxu3 %v457_v4  ;;  %v411_v4 = vld [vmem:[#allocation7 + $0x4b0] sm:$0xff] }
 0xb2e   : > { %v5347_v17 = vsel %vm5121_vm1, %v12822_v30, 0.0  ;;  %v5179_v21 = vsel %vm5121_vm1, %v12829_v35, -inf }
 0xb2f   : > { %8356 = vpow2.f32 %v5274_v60  ;;  %5348 = vadd.xlane.f32.xlu2 %v5347_v17  ;;  %5177 = vmax.xlane.f32.xlu0 %v5176_v32  ;;  %v423_v17 = vld [vmem:[#allocation7 + $0x510] sm:$0xff] }
 0xb30   : > { %v455_v32 = vld [vmem:[#allocation7 + $0x610] sm:$0xff] }
 0xb31   : > { %v8355_v25 = vpop.eup %8354  ;;  %5983 = vmatpush.msrb.mxu3 %v455_v32  ;;  %v441_v32 = vld [vmem:[#allocation7 + $0x5a0] sm:$0xff] }
 0xb32   : > { %v5163_v41 = vpop.xlane.xlu2 %5162  ;;  %v5334_v59 = vpop.xlane.xlu1 %5333  ;;  %v5447_v58 = vmul.f32 %v8355_v25, %v12747_v56  ;;  %v429_v56 = vld [vmem:[#allocation7 + $0x540] sm:$0xff]  ;;  %v4976_v25 = vadd.f32 %v4975_v50, %v12630_v22  ;;  %v447_v50 = vld [vmem:[#allocation7 + $0x5d0] sm:$0xff] }
 0xb33   : > { %v5231_v12 = vsub.f32 %v12754_v6, %v5163_v41  ;;  %8358 = vrcp.f32 %v5334_v59  ;;  %v427_v6 = vld [vmem:[#allocation7 + $0x530] sm:$0xff]  ;;  %5867 = vmatpush.msrb.mxu2 %v429_v56  ;;  %5984 = vmatpush.msrb.mxu3 %v453_v16  ;;  %v5091_v13 = vpop.f32.mrf.mxu3 }
 0xb34   : > { %8083 = vmatmul.msk.f32.gmra.mxu0 %vm5121_vm1, %v5447_v58  ;;  %8115 = vmatmul.msk.f32.gmra.mxu1 %vm5121_vm1, %v5447_v58  ;;  %v12855_v41 = vadd.f32 %v5088_v0, %v4976_v25  ;;  %v443_v0 = vld [vmem:[#allocation7 + $0x5b0] sm:$0xff] }
 0xb35   : > { %v12835_v33 = vpop.eup %8356  ;;  %v5276_v45 = vmul.f32 1.442695, %v5231_v12  ;;  %5868 = vmatpush.msrb.mxu2 %v427_v6  ;;  %v419_v12 = vld [vmem:[#allocation7 + $0x4f0] sm:$0xff] }
 0xb36   : > { %v5350_v2 = vsel %vm5121_vm1, %v12835_v33, 0.0  ;;  %v407_v16 = vld [vmem:[#allocation7 + $0x490] sm:$0xff] }
 0xb37   : > { %8360 = vpow2.f32 %v5276_v45  ;;  %5180 = vmax.xlane.f32.xlu2 %v5179_v21  ;;  %5351 = vadd.xlane.f32.xlu1 %v5350_v2  ;;  %v451_v45 = vld [vmem:[#allocation7 + $0x5f0] sm:$0xff]  ;;  %v4978_v21 = vpop.f32.mrf.mxu2 }
 0xb38   : > { %5869 = vmatpush.msrb.mxu2 %v425_v61  ;;  %5985 = vmatpush.msrb.mxu3 %v451_v45  ;;  %v439_v25 = vld [vmem:[#allocation7 + $0x590] sm:$0xff] }
 0xb39   : > { %v8359_v14 = vpop.eup %8358  ;;  %v403_v45 = vld [vmem:[#allocation7 + $0x470] sm:$0xff] }
 0xb3a   : > { %v5166_v62 = vpop.xlane.xlu1 %5165  ;;  %v5337_v54 = vpop.xlane.xlu0 %5336  ;;  %v5448_v53 = vmul.f32 %v8359_v14, %v12757_v42  ;;  %5870 = vmatpush.msrb.mxu2 %v423_v17  ;;  %5986 = vmatpush.msrb.mxu3 %v449_v31  ;;  %v409_v17 = vld [vmem:[#allocation7 + $0x4a0] sm:$0xff]  ;;  %v431_v31 = vld [vmem:[#allocation7 + $0x550] sm:$0xff] }
 0xb3b   : > { %v5232_v49 = vsub.f32 %v12764_v43, %v5166_v62  ;;  %8362 = vrcp.f32 %v5337_v54  ;;  %v421_v43 = vld [vmem:[#allocation7 + $0x500] sm:$0xff]  ;;  %v4979_v62 = vadd.f32 %v4978_v21, %v12630_v22  ;;  %v435_v21 = vld [vmem:[#allocation7 + $0x570] sm:$0xff] }
 0xb3c   : > { %8084 = vmatmul.msk.f32.gmra.mxu0 %vm5121_vm1, %v5448_v53  ;;  %8116 = vmatmul.msk.f32.gmra.mxu1 %vm5121_vm1, %v5448_v53  ;;  %v413_v54 = vld [vmem:[#allocation7 + $0x4c0] sm:$0xff] }
 0xb3d   : > { %v12848_v47 = vpop.eup %8360  ;;  %v5278_v60 = vmul.f32 1.442695, %v5232_v49  ;;  %5871 = vmatpush.msrb.mxu2 %v421_v43  ;;  %v445_v53 = vld [vmem:[#allocation7 + $0x5c0] sm:$0xff]  ;;  %v12868_v61 = vadd.f32 %v5091_v13, %v4979_v62  ;;  %5987 = vmatpush.msrb.mxu3 %v447_v50  ;;  %v5094_v43 = vpop.f32.mrf.mxu3 }
 0xb3e   : > { %v5353_v42 = vsel %vm5121_vm1, %v12848_v47, 0.0  ;;  %v401_v13 = vld [vmem:[#allocation7 + $0x460] sm:$0xff] }
 0xb3f   : > { %8364 = vpow2.f32 %v5278_v60  ;;  %5354 = vadd.xlane.f32.xlu0 %v5353_v42  ;;  %5183 = vmax.xlane.f32.xlu1 %v5182_v48  ;;  %v4981_v60 = vpop.f32.mrf.mxu2  ;;  %v5188_v42 = vsel %vm5121_vm1, %v12868_v61, -inf }
 0xb40   : > { %5872 = vmatpush.msrb.mxu2 %v419_v12  ;;  %5988 = vmatpush.msrb.mxu3 %v445_v53 }
 0xb41   : > { %v8363_v10 = vpop.eup %8362 }
 0xb42   : > { %v5169_v59 = vpop.xlane.xlu0 %5168  ;;  %v5449_v58 = vmul.f32 %v8363_v10, %v12766_v18  ;;  %v5185_v18 = vsel %vm5121_vm1, %v12855_v41, -inf  ;;  %5873 = vmatpush.msrb.mxu2 %v417_v28  ;;  %5989 = vmatpush.msrb.mxu3 %v443_v0  ;;  %v4982_v10 = vadd.f32 %v4981_v60, %v12630_v22  ;;  %v399_v28 = vld [vmem:[#allocation7 + $0x450] sm:$0xff] }
 0xb43   : > { %v5233_v2 = vsub.f32 %v12773_v55, %v5169_v59  ;;  %v415_v55 = vld [vmem:[#allocation7 + $0x4d0] sm:$0xff]  ;;  %v405_v59 = vld [vmem:[#allocation7 + $0x480] sm:$0xff] }
 0xb44   : > { %8085 = vmatmul.msk.f32.gmra.mxu0 %vm5121_vm1, %v5449_v58  ;;  %8117 = vmatmul.msk.f32.gmra.mxu1 %vm5121_vm1, %v5449_v58  ;;  %v437_v58 = vld [vmem:[#allocation7 + $0x580] sm:$0xff]  ;;  %v12877_v12 = vadd.f32 %v5094_v43, %v4982_v10 }
 0xb45   : > { %v12861_v56 = vpop.eup %8364  ;;  %v5280_v6 = vmul.f32 1.442695, %v5233_v2  ;;  %5874 = vmatpush.msrb.mxu2 %v415_v55  ;;  %5990 = vmatpush.msrb.mxu3 %v441_v32  ;;  %v15428_v55 = vld [vmem:[#allocation18_spill] sm:$0xff]  ;;  %v15431_v32 = vld [vmem:[#allocation44_spill] sm:$0xff] }
 0xb46   : > { %v5356_v14 = vsel %vm5121_vm1, %v12861_v56, 0.0  ;;  %v5191_v2 = vsel %vm5121_vm1, %v12877_v12, -inf }
 0xb47   : > { %8366 = vpow2.f32 %v5280_v6  ;;  %5186 = vmax.xlane.f32.xlu0 %v5185_v18  ;;  %5357 = vadd.xlane.f32.xlu2 %v5356_v14  ;;  %v433_v6 = vld [vmem:[#allocation7 + $0x560] sm:$0xff]  ;;  %v4984_v53 = vpop.f32.mrf.mxu2 }
 0xb48   : > { %5875 = vmatpush.msrb.mxu2 %v413_v54  ;;  %5991 = vmatpush.msrb.mxu3 %v439_v25 }
 0xb4a   : > { %5876 = vmatpush.msrb.mxu2 %v411_v4  ;;  %5992 = vmatpush.msrb.mxu3 %v437_v58  ;;  %v5097_v4 = vpop.f32.mrf.mxu3 }
 0xb4c   : > { %5877 = vmatpush.msrb.mxu2 %v409_v17  ;;  %5993 = vmatpush.msrb.mxu3 %v435_v21 }
 0xb4d   : > { %v12870_v49 = vpop.eup %8366 }
 0xb4e   : > { %v5359_v48 = vsel %vm5121_vm1, %v12870_v49, 0.0  ;;  %5878 = vmatpush.msrb.mxu2 %v407_v16  ;;  %5994 = vmatpush.msrb.mxu3 %v433_v6 }
 0xb4f   : > { %5189 = vmax.xlane.f32.xlu2 %v5188_v42  ;;  %5360 = vadd.xlane.f32.xlu1 %v5359_v48 }
 0xb50   : > { %5879 = vmatpush.msrb.mxu2 %v405_v59  ;;  %5995 = vmatpush.msrb.mxu3 %v431_v31  ;;  %v4987_v59 = vpop.f32.mrf.mxu2 }
 0xb52   : > { %5880 = vmatpush.msrb.mxu2 %v403_v45 }
 0xb54   : > { %5881 = vmatpush.msrb.mxu2 %v401_v13 }
 0xb56   : > { %5882 = vmatpush.msrb.mxu2 %v399_v28 }
 0xb57   : > { %5192 = vmax.xlane.f32.xlu1 %v5191_v2  ;;  %v15434_v2 = vld [vmem:[#allocation45_spill] sm:$0xff] }
 0xb89   : > { %v5587_v18 = vpop.f32.mrf.mxu0  ;;  %v5700_v14 = vpop.f32.mrf.mxu1 }
 0xb8a   : > { %v12882_v50 = vmul.f32 %v5587_v18, %v15428_v55  ;;  %v12885_v62 = vmul.f32 %v5700_v14, %v11967_v40  ;;  %v5340_v54 = vpop.xlane.xlu2 %5339 }
 0xb8b   : > { %8368 = vrcp.f32 %v5340_v54 }
 0xb8c   : > { %15429 = vst [vmem:[#allocation23_spill] sm:$0xff] %v12882_v50  ;;  %5883 = vmatmul.f32.vlgmr.msrb.gmra.mxu2 %v12882_v50  ;;  %5996 = vmatmul.f32.vlgmr.msrb.gmra.mxu3 %v12885_v62 }
 0xb8d   : > { %15430 = vst [vmem:[#allocation29_spill] sm:$0xff] %v12885_v62 }
 0xb91   : > { %v8369_v0 = vpop.eup %8368  ;;  %v5590_v60 = vpop.f32.mrf.mxu0 }
 0xb92   : > { %v5703_v17 = vpop.f32.mrf.mxu1  ;;  %v12890_v42 = vmul.f32 %v5590_v60, %v15431_v32  ;;  %v5172_v43 = vpop.xlane.xlu2 %5171  ;;  %v5450_v16 = vmul.f32 %v8369_v0, %v12785_v24 }
 0xb93   : > { %v12893_v48 = vmul.f32 %v5703_v17, %v11986_v37  ;;  %v5343_v40 = vpop.xlane.xlu1 %5342  ;;  %v5234_v25 = vsub.f32 %v12790_v19, %v5172_v43  ;;  %v5100_v37 = vpop.f32.mrf.mxu3  ;;  %v15437_v17 = vld [vmem:[#allocation72_spill] sm:$0xff] }
 0xb94   : > { %15432 = vst [vmem:[#allocation25_spill] sm:$0xff] %v12890_v42  ;;  %8370 = vrcp.f32 %v5343_v40  ;;  %8086 = vmatmul.msk.f32.gmra.mxu0 %vm5121_vm1, %v5450_v16  ;;  %8118 = vmatmul.msk.f32.gmra.mxu1 %vm5121_vm1, %v5450_v16 }
 0xb95   : > { %15433 = vst [vmem:[#allocation33_spill] sm:$0xff] %v12893_v48  ;;  %v5282_v10 = vmul.f32 1.442695, %v5234_v25  ;;  %5886 = vmatmul.f32.gmra.mxu2 %v12890_v42  ;;  %5999 = vmatmul.f32.gmra.mxu3 %v12893_v48 }
 0xb97   : > { %8372 = vpow2.f32 %v5282_v10 }
 0xb99   : > { %v5593_v45 = vpop.f32.mrf.mxu0 }
 0xb9a   : > { %v8371_v58 = vpop.eup %8370  ;;  %v5706_v21 = vpop.f32.mrf.mxu1  ;;  %v12902_v24 = vmul.f32 %v5593_v45, %v15434_v2 }
 0xb9b   : > { %v12905_v19 = vmul.f32 %v5706_v21, %v12007_v27  ;;  %v5175_v13 = vpop.xlane.xlu1 %5174  ;;  %v5346_v6 = vpop.xlane.xlu0 %5345  ;;  %v5451_v28 = vmul.f32 %v8371_v58, %v12796_v63  ;;  %v4985_v63 = vadd.f32 %v4984_v53, %v12630_v22 }
 0xb9c   : > { %15435 = vst [vmem:[#allocation35_spill] sm:$0xff] %v12902_v24  ;;  %v5235_v31 = vsub.f32 %v12803_v1, %v5175_v13  ;;  %8374 = vrcp.f32 %v5346_v6  ;;  %v4990_v1 = vpop.f32.mrf.mxu2  ;;  %v5103_v53 = vpop.f32.mrf.mxu3  ;;  %v15440_v6 = vld [vmem:[#allocation39_spill] sm:$0xff] }
 0xb9d   : > { %15436 = vst [vmem:[#allocation43_spill] sm:$0xff] %v12905_v19  ;;  %8087 = vmatmul.msk.f32.gmra.mxu0 %vm5121_vm1, %v5451_v28  ;;  %8119 = vmatmul.msk.f32.gmra.mxu1 %vm5121_vm1, %v5451_v28  ;;  %v12911_v18 = vpop.eup %8372  ;;  %v12918_v60 = vadd.f32 %v5097_v4, %v4985_v63 }
 0xb9e   : > { %v5284_v14 = vmul.f32 1.442695, %v5235_v31  ;;  %5889 = vmatmul.f32.gmra.mxu2 %v12902_v24  ;;  %6002 = vmatmul.f32.gmra.mxu3 %v12905_v19  ;;  %v5362_v27 = vsel %vm5121_vm1, %v12911_v18, 0.0 }
 0xb9f   : > { %5363 = vadd.xlane.f32.xlu0 %v5362_v27 }
 0xba0   : > { %8376 = vpow2.f32 %v5284_v14 }
 0xba1   : > { %v5596_v54 = vpop.f32.mrf.mxu0 }
 0xba2   : > { %v8375_v55 = vpop.eup %8374  ;;  %v5709_v0 = vpop.f32.mrf.mxu1  ;;  %v12921_v32 = vmul.f32 %v5596_v54, %v15437_v17 }
 0xba3   : > { %v12924_v43 = vmul.f32 %v5709_v0, %v12026_v36  ;;  %v5349_v40 = vpop.xlane.xlu2 %5348  ;;  %v5178_v16 = vpop.xlane.xlu0 %5177  ;;  %v5452_v25 = vmul.f32 %v8375_v55, %v12809_v29  ;;  %v5194_v36 = vsel %vm5121_vm1, %v12918_v60, -inf }
 0xba4   : > { %15438 = vst [vmem:[#allocation37_spill] sm:$0xff] %v12921_v32  ;;  %8378 = vrcp.f32 %v5349_v40  ;;  %v5236_v10 = vsub.f32 %v12816_v15, %v5178_v16  ;;  %v4988_v15 = vadd.f32 %v4987_v59, %v12630_v22  ;;  %v4993_v54 = vpop.f32.mrf.mxu2 }
 0xba5   : > { %15439 = vst [vmem:[#allocation16_spill] sm:$0xff] %v12924_v43  ;;  %8088 = vmatmul.msk.f32.gmra.mxu0 %vm5121_vm1, %v5452_v25  ;;  %8120 = vmatmul.msk.f32.gmra.mxu1 %vm5121_vm1, %v5452_v25 }
 0xba6   : > { %v12930_v4 = vpop.eup %8376  ;;  %v5286_v58 = vmul.f32 1.442695, %v5236_v10  ;;  %5892 = vmatmul.f32.gmra.mxu2 %v12921_v32  ;;  %6005 = vmatmul.f32.gmra.mxu3 %v12924_v43  ;;  %v12939_v13 = vadd.f32 %v5100_v37, %v4988_v15  ;;  %v15443_v10 = vld [vmem:[#allocation31_spill] sm:$0xff] }
 0xba7   : > { %v5365_v29 = vsel %vm5121_vm1, %v12930_v4, 0.0  ;;  %5195 = vmax.xlane.f32.xlu0 %v5194_v36  ;;  %v15445_v36 = vld [vmem:[#allocation76_spill] sm:$0xff] }
 0xba8   : > { %8380 = vpow2.f32 %v5286_v58  ;;  %5366 = vadd.xlane.f32.xlu2 %v5365_v29  ;;  %v5197_v0 = vsel %vm5121_vm1, %v12939_v13, -inf }
 0xba9   : > { %v5599_v21 = vpop.f32.mrf.mxu0 }
 0xbaa   : > { %v8379_v45 = vpop.eup %8378  ;;  %v5712_v2 = vpop.f32.mrf.mxu1  ;;  %v12942_v28 = vmul.f32 %v5599_v21, %v15440_v6 }
 0xbab   : > { %v12945_v31 = vmul.f32 %v5712_v2, %v12047_v20  ;;  %v5181_v14 = vpop.xlane.xlu2 %5180  ;;  %v5352_v27 = vpop.xlane.xlu1 %5351  ;;  %v5453_v63 = vmul.f32 %v8379_v45, %v12822_v30 }
 0xbac   : > { %15441 = vst [vmem:[#allocation41_spill] sm:$0xff] %v12942_v28  ;;  %v5237_v55 = vsub.f32 %v12829_v35, %v5181_v14  ;;  %8382 = vrcp.f32 %v5352_v27  ;;  %v5106_v20 = vpop.f32.mrf.mxu3  ;;  %v4991_v35 = vadd.f32 %v4990_v1, %v12630_v22  ;;  %v4996_v6 = vpop.f32.mrf.mxu2 }
 0xbad   : > { %15442 = vst [vmem:[#allocation54_spill] sm:$0xff] %v12945_v31  ;;  %8089 = vmatmul.msk.f32.gmra.mxu0 %vm5121_vm1, %v5453_v63  ;;  %8121 = vmatmul.msk.f32.gmra.mxu1 %vm5121_vm1, %v5453_v63 }
 0xbae   : > { %v12951_v59 = vpop.eup %8380  ;;  %v5288_v37 = vmul.f32 1.442695, %v5237_v55  ;;  %5895 = vmatmul.f32.gmra.mxu2 %v12942_v28  ;;  %6008 = vmatmul.f32.gmra.mxu3 %v12945_v31  ;;  %v12960_v25 = vadd.f32 %v5103_v53, %v4991_v35 }
 0xbaf   : > { %v5368_v30 = vsel %vm5121_vm1, %v12951_v59, 0.0 }
 0xbb0   : > { %8384 = vpow2.f32 %v5288_v37  ;;  %5198 = vmax.xlane.f32.xlu2 %v5197_v0  ;;  %5369 = vadd.xlane.f32.xlu1 %v5368_v30  ;;  %v15447_v30 = vld [vmem:[#allocation36_spill] sm:$0xff] }
 0xbb1   : > { %v5602_v40 = vpop.f32.mrf.mxu0 }
 0xbb2   : > { %v8383_v17 = vpop.eup %8382  ;;  %v5715_v16 = vpop.f32.mrf.mxu1  ;;  %v12963_v58 = vmul.f32 %v5602_v40, %v15443_v10 }
 0xbb3   : > { %v12966_v29 = vmul.f32 %v5715_v16, %v15445_v36  ;;  %v5184_v15 = vpop.xlane.xlu1 %5183  ;;  %v5355_v45 = vpop.xlane.xlu0 %5354  ;;  %v5454_v21 = vmul.f32 %v8383_v17, %v12835_v33  ;;  %v5200_v33 = vsel %vm5121_vm1, %v12960_v25, -inf  ;;  %v15449_v17 = vld [vmem:[#allocation74_spill] sm:$0xff] }
 0xbb4   : > { %15444 = vst [vmem:[#allocation51_spill] sm:$0xff] %v12963_v58  ;;  %v5238_v2 = vsub.f32 %v12842_v11, %v5184_v15  ;;  %8386 = vrcp.f32 %v5355_v45  ;;  %v4994_v11 = vadd.f32 %v4993_v54, %v12630_v22  ;;  %v5109_v27 = vpop.f32.mrf.mxu3 }
 0xbb5   : > { %15446 = vst [vmem:[#allocation26_spill] sm:$0xff] %v12966_v29  ;;  %8090 = vmatmul.msk.f32.gmra.mxu0 %vm5121_vm1, %v5454_v21  ;;  %8122 = vmatmul.msk.f32.gmra.mxu1 %vm5121_vm1, %v5454_v21  ;;  %v4999_v21 = vpop.f32.mrf.mxu2 }
 0xbb6   : > { %v12972_v1 = vpop.eup %8384  ;;  %v5290_v53 = vmul.f32 1.442695, %v5238_v2  ;;  %5898 = vmatmul.f32.gmra.mxu2 %v12963_v58  ;;  %6011 = vmatmul.f32.gmra.mxu3 %v12966_v29  ;;  %v12981_v0 = vadd.f32 %v5106_v20, %v4994_v11  ;;  %v15451_v11 = vld [vmem:[#allocation34_spill] sm:$0xff] }
 0xbb7   : > { %v5371_v14 = vsel %vm5121_vm1, %v12972_v1, 0.0 }
 0xbb8   : > { %8388 = vpow2.f32 %v5290_v53  ;;  %5372 = vadd.xlane.f32.xlu0 %v5371_v14  ;;  %5201 = vmax.xlane.f32.xlu1 %v5200_v33  ;;  %v5203_v45 = vsel %vm5121_vm1, %v12981_v0, -inf }
 0xbb9   : > { %v5605_v55 = vpop.f32.mrf.mxu0 }
 0xbba   : > { %v8387_v63 = vpop.eup %8386  ;;  %v5718_v37 = vpop.f32.mrf.mxu1  ;;  %v12984_v35 = vmul.f32 %v5605_v55, %v15447_v30  ;;  %v15453_v55 = vld [vmem:[#allocation95_spill] sm:$0xff] }
 0xbbb   : > { %v12987_v40 = vmul.f32 %v5718_v37, %v15449_v17  ;;  %v5358_v16 = vpop.xlane.xlu2 %5357  ;;  %v5187_v10 = vpop.xlane.xlu0 %5186  ;;  %v5455_v36 = vmul.f32 %v8387_v63, %v12848_v47 }
 0xbbc   : > { %15448 = vst [vmem:[#allocation22_spill] sm:$0xff] %v12984_v35  ;;  %8390 = vrcp.f32 %v5358_v16  ;;  %v5239_v15 = vsub.f32 %v12855_v41, %v5187_v10  ;;  %v4997_v41 = vadd.f32 %v4996_v6, %v12630_v22  ;;  %v5112_v10 = vpop.f32.mrf.mxu3 }
 0xbbd   : > { %15450 = vst [vmem:[#allocation60_spill] sm:$0xff] %v12987_v40  ;;  %8091 = vmatmul.msk.f32.gmra.mxu0 %vm5121_vm1, %v5455_v36  ;;  %8123 = vmatmul.msk.f32.gmra.mxu1 %vm5121_vm1, %v5455_v36 }
 0xbbe   : > { %v12993_v54 = vpop.eup %8388  ;;  %v5292_v20 = vmul.f32 1.442695, %v5239_v15  ;;  %5901 = vmatmul.f32.gmra.mxu2 %v12984_v35  ;;  %6014 = vmatmul.f32.gmra.mxu3 %v12987_v40  ;;  %v13002_v33 = vadd.f32 %v5109_v27, %v4997_v41 }
 0xbbf   : > { %v5374_v47 = vsel %vm5121_vm1, %v12993_v54, 0.0 }
 0xbc0   : > { %8392 = vpow2.f32 %v5292_v20  ;;  %5204 = vmax.xlane.f32.xlu0 %v5203_v45  ;;  %5375 = vadd.xlane.f32.xlu2 %v5374_v47  ;;  %v5206_v15 = vsel %vm5121_vm1, %v13002_v33, -inf }
 0xbc1   : > { %v5608_v53 = vpop.f32.mrf.mxu0 }
 0xbc2   : > { %v8391_v2 = vpop.eup %8390  ;;  %v5721_v14 = vpop.f32.mrf.mxu1  ;;  %v13005_v63 = vmul.f32 %v5608_v53, %v15451_v11 }
 0xbc3   : > { %v13008_v37 = vmul.f32 %v5721_v14, %v15453_v55  ;;  %v5190_v30 = vpop.xlane.xlu2 %5189  ;;  %v5361_v17 = vpop.xlane.xlu1 %5360  ;;  %v5456_v16 = vmul.f32 %v8391_v2, %v12861_v56 }
 0xbc4   : > { %15452 = vst [vmem:[#allocation56_spill] sm:$0xff] %v13005_v63  ;;  %v5240_v36 = vsub.f32 %v12868_v61, %v5190_v30  ;;  %8394 = vrcp.f32 %v5361_v17  ;;  %v5000_v61 = vadd.f32 %v4999_v21, %v12630_v22  ;;  %v5002_v2 = vpop.f32.mrf.mxu2  ;;  %v5115_v11 = vpop.f32.mrf.mxu3 }
 0xbc5   : > { %15454 = vst [vmem:[#allocation38_spill] sm:$0xff] %v13008_v37  ;;  %8092 = vmatmul.msk.f32.gmra.mxu0 %vm5121_vm1, %v5456_v16  ;;  %8124 = vmatmul.msk.f32.gmra.mxu1 %vm5121_vm1, %v5456_v16 }
 0xbc6   : > { %v13014_v6 = vpop.eup %8392  ;;  %v5294_v27 = vmul.f32 1.442695, %v5240_v36  ;;  %5904 = vmatmul.f32.gmra.mxu2 %v13005_v63  ;;  %6017 = vmatmul.f32.gmra.mxu3 %v13008_v37  ;;  %v13023_v45 = vadd.f32 %v5112_v10, %v5000_v61 }
 0xbc7   : > { %v5377_v56 = vsel %vm5121_vm1, %v13014_v6, 0.0 }
 0xbc8   : > { %8396 = vpow2.f32 %v5294_v27  ;;  %5207 = vmax.xlane.f32.xlu2 %v5206_v15  ;;  %5378 = vadd.xlane.f32.xlu1 %v5377_v56  ;;  %v5209_v30 = vsel %vm5121_vm1, %v13023_v45, -inf }
 0xbca   : > { %v8395_v20 = vpop.eup %8394 }
 0xbcb   : > { %v5193_v47 = vpop.xlane.xlu1 %5192  ;;  %v5457_v41 = vmul.f32 %v8395_v20, %v12870_v49  ;;  %v5003_v49 = vadd.f32 %v5002_v2, %v12630_v22 }
 0xbcc   : > { %v5241_v53 = vsub.f32 %v12877_v12, %v5193_v47  ;;  %v5005_v16 = vpop.f32.mrf.mxu2  ;;  %v5118_v27 = vpop.f32.mrf.mxu3 }
 0xbcd   : > { %8093 = vmatmul.msk.f32.gmra.mxu0 %vm5121_vm1, %v5457_v41  ;;  %8125 = vmatmul.msk.f32.gmra.mxu1 %vm5121_vm1, %v5457_v41  ;;  %v13036_v12 = vadd.f32 %v5115_v11, %v5003_v49  ;;  %v5006_v15 = vadd.f32 %v5005_v16, %v12630_v22  ;;  %v15455_v41 = vld [vmem:[#allocation55_spill] sm:$0xff] }
 0xbce   : > { %v13029_v14 = vpop.eup %8396  ;;  %v5296_v55 = vmul.f32 1.442695, %v5241_v53  ;;  %v15457_v53 = vld [vmem:[#allocation79_spill] sm:$0xff] }
 0xbcf   : > { %v5380_v21 = vsel %vm5121_vm1, %v13029_v14, 0.0  ;;  %v5212_v10 = vsel %vm5121_vm1, %v13036_v12, -inf  ;;  %v13045_v56 = vadd.f32 %v5118_v27, %v5006_v15  ;;  %v15459_v49 = vld [vmem:[#allocation67_spill] sm:$0xff] }
 0xbd0   : > { %8398 = vpow2.f32 %v5296_v55  ;;  %5381 = vadd.xlane.f32.xlu0 %v5380_v21  ;;  %5210 = vmax.xlane.f32.xlu1 %v5209_v30 }
 0xbd1   : > { %v5215_v61 = vsel %vm5121_vm1, %v13045_v56, -inf }
 0xbd6   : > { %v13038_v17 = vpop.eup %8398 }
 0xbd7   : > { %v5383_v36 = vsel %vm5121_vm1, %v13038_v17, 0.0 }
 0xbd8   : > { %5213 = vmax.xlane.f32.xlu0 %v5212_v10  ;;  %5384 = vadd.xlane.f32.xlu2 %v5383_v36  ;;  %v15461_v10 = vld [vmem:[#allocation97_spill] sm:$0xff] }
 0xbe0   : > { %5216 = vmax.xlane.f32.xlu2 %v5215_v61 }
 0xc11   : > { %v5611_v20 = vpop.f32.mrf.mxu0  ;;  %v5724_v47 = vpop.f32.mrf.mxu1 }
 0xc12   : > { %v13050_v2 = vmul.f32 %v5611_v20, %v15455_v41  ;;  %v13053_v11 = vmul.f32 %v5724_v47, %v15457_v53  ;;  %v5364_v55 = vpop.xlane.xlu0 %5363 }
 0xc13   : > { %8400 = vrcp.f32 %v5364_v55 }
 0xc14   : > { %15456 = vst [vmem:[#allocation32_spill] sm:$0xff] %v13050_v2  ;;  %5907 = vmatmul.f32.gmra.mxu2 %v13050_v2  ;;  %6020 = vmatmul.f32.gmra.mxu3 %v13053_v11 }
 0xc15   : > { %15458 = vst [vmem:[#allocation28_spill] sm:$0xff] %v13053_v11 }
 0xc19   : > { %v8401_v22 = vpop.eup %8400 }
 0xc1a   : > { %v5614_v21 = vpop.f32.mrf.mxu0  ;;  %v5727_v30 = vpop.f32.mrf.mxu1  ;;  %v5458_v61 = vmul.f32 %v8401_v22, %v12911_v18 }
 0xc1b   : > { %v13058_v16 = vmul.f32 %v5614_v21, %v15459_v49  ;;  %v13061_v36 = vmul.f32 %v5727_v30, %v15461_v10  ;;  %v5367_v27 = vpop.xlane.xlu2 %5366  ;;  %v5196_v15 = vpop.xlane.xlu0 %5195  ;;  %v15463_v21 = vld [vmem:[#allocation81_spill] sm:$0xff] }
 0xc1c   : > { %8402 = vrcp.f32 %v5367_v27  ;;  %v5242_v20 = vsub.f32 %v12918_v60, %v5196_v15  ;;  %8094 = vmatmul.msk.f32.gmra.mxu0 %vm5121_vm1, %v5458_v61  ;;  %8126 = vmatmul.msk.f32.gmra.mxu1 %vm5121_vm1, %v5458_v61 }
 0xc1d   : > { %15460 = vst [vmem:[#allocation21_spill] sm:$0xff] %v13058_v16  ;;  %5910 = vmatmul.f32.gmra.mxu2 %v13058_v16  ;;  %6023 = vmatmul.f32.gmra.mxu3 %v13061_v36 }
 0xc1e   : > { %15462 = vst [vmem:[#allocation64_spill] sm:$0xff] %v13061_v36  ;;  %v5298_v47 = vmul.f32 1.442695, %v5242_v20  ;;  %v15466_v20 = vld [vmem:[#allocation65_spill] sm:$0xff] }
 0xc20   : > { %8404 = vpow2.f32 %v5298_v47 }
 0xc22   : > { %v8403_v41 = vpop.eup %8402  ;;  %v5617_v53 = vpop.f32.mrf.mxu0 }
 0xc23   : > { %v5730_v55 = vpop.f32.mrf.mxu1  ;;  %v13070_v30 = vmul.f32 %v5617_v53, %v15463_v21  ;;  %v5199_v60 = vpop.xlane.xlu2 %5198  ;;  %v5459_v49 = vmul.f32 %v8403_v41, %v12930_v4  ;;  %v15468_v41 = vld [vmem:[#allocation92_spill] sm:$0xff] }
 0xc24   : > { %v13073_v18 = vmul.f32 %v5730_v55, %v12169_v38  ;;  %v5370_v22 = vpop.xlane.xlu1 %5369  ;;  %v5243_v10 = vsub.f32 %v12939_v13, %v5199_v60 }
 0xc25   : > { %15464 = vst [vmem:[#allocation30_spill] sm:$0xff] %v13070_v30  ;;  %8406 = vrcp.f32 %v5370_v22  ;;  %8095 = vmatmul.msk.f32.gmra.mxu0 %vm5121_vm1, %v5459_v49  ;;  %8127 = vmatmul.msk.f32.gmra.mxu1 %vm5121_vm1, %v5459_v49 }
 0xc26   : > { %15465 = vst [vmem:[#allocation71_spill] sm:$0xff] %v13073_v18  ;;  %v13079_v27 = vpop.eup %8404  ;;  %v5300_v15 = vmul.f32 1.442695, %v5243_v10  ;;  %5913 = vmatmul.f32.gmra.mxu2 %v13070_v30  ;;  %6026 = vmatmul.f32.gmra.mxu3 %v13073_v18 }
 0xc27   : > { %v5386_v38 = vsel %vm5121_vm1, %v13079_v27, 0.0 }
 0xc28   : > { %8408 = vpow2.f32 %v5300_v15  ;;  %5387 = vadd.xlane.f32.xlu1 %v5386_v38 }
 0xc2a   : > { %v5620_v61 = vpop.f32.mrf.mxu0 }
 0xc2b   : > { %v8407_v4 = vpop.eup %8406  ;;  %v5733_v13 = vpop.f32.mrf.mxu1  ;;  %v13086_v47 = vmul.f32 %v5620_v61, %v15466_v20 }
 0xc2c   : > { %v13089_v53 = vmul.f32 %v5733_v13, %v15468_v41  ;;  %v5202_v55 = vpop.xlane.xlu1 %5201  ;;  %v5373_v21 = vpop.xlane.xlu0 %5372  ;;  %v5460_v60 = vmul.f32 %v8407_v4, %v12951_v59  ;;  %v15470_v4 = vld [vmem:[#allocation63_spill] sm:$0xff] }
 0xc2d   : > { %15467 = vst [vmem:[#allocation66_spill] sm:$0xff] %v13086_v47  ;;  %v5244_v22 = vsub.f32 %v12960_v25, %v5202_v55  ;;  %8410 = vrcp.f32 %v5373_v21  ;;  %v15472_v13 = vld [vmem:[#allocation91_spill] sm:$0xff] }
 0xc2e   : > { %15469 = vst [vmem:[#allocation46_spill] sm:$0xff] %v13089_v53  ;;  %8096 = vmatmul.msk.f32.gmra.mxu0 %vm5121_vm1, %v5460_v60  ;;  %8128 = vmatmul.msk.f32.gmra.mxu1 %vm5121_vm1, %v5460_v60  ;;  %v13095_v49 = vpop.eup %8408 }
 0xc2f   : > { %v5302_v10 = vmul.f32 1.442695, %v5244_v22  ;;  %5916 = vmatmul.f32.gmra.mxu2 %v13086_v47  ;;  %6029 = vmatmul.f32.gmra.mxu3 %v13089_v53  ;;  %v5389_v15 = vsel %vm5121_vm1, %v13095_v49, 0.0 }
 0xc30   : > { %5390 = vadd.xlane.f32.xlu0 %v5389_v15 }
 0xc31   : > { %8412 = vpow2.f32 %v5302_v10 }
 0xc32   : > { %v5623_v38 = vpop.f32.mrf.mxu0 }
 0xc33   : > { %v8411_v59 = vpop.eup %8410  ;;  %v5736_v25 = vpop.f32.mrf.mxu1  ;;  %v13102_v61 = vmul.f32 %v5623_v38, %v15470_v4  ;;  %v15476_v4 = vld [vmem:[#allocation88_spill] sm:$0xff] }
 0xc34   : > { %v13105_v20 = vmul.f32 %v5736_v25, %v15472_v13  ;;  %v5376_v41 = vpop.xlane.xlu2 %5375  ;;  %v5205_v55 = vpop.xlane.xlu0 %5204  ;;  %v5461_v21 = vmul.f32 %v8411_v59, %v12972_v1 }
 0xc35   : > { %15471 = vst [vmem:[#allocation68_spill] sm:$0xff] %v13102_v61  ;;  %8414 = vrcp.f32 %v5376_v41  ;;  %v5245_v60 = vsub.f32 %v12981_v0, %v5205_v55  ;;  %v15474_v0 = vld [vmem:[#allocation40_spill] sm:$0xff] }
 0xc36   : > { %15473 = vst [vmem:[#allocation70_spill] sm:$0xff] %v13105_v20  ;;  %8097 = vmatmul.msk.f32.gmra.mxu0 %vm5121_vm1, %v5461_v21  ;;  %8129 = vmatmul.msk.f32.gmra.mxu1 %vm5121_vm1, %v5461_v21 }
 0xc37   : > { %v13111_v22 = vpop.eup %8412  ;;  %v5304_v10 = vmul.f32 1.442695, %v5245_v60  ;;  %5919 = vmatmul.f32.gmra.mxu2 %v13102_v61  ;;  %6032 = vmatmul.f32.gmra.mxu3 %v13105_v20 }
 0xc38   : > { %v5392_v15 = vsel %vm5121_vm1, %v13111_v22, 0.0 }
 0xc39   : > { %8416 = vpow2.f32 %v5304_v10  ;;  %5393 = vadd.xlane.f32.xlu1 %v5392_v15 }
 0xc3a   : > { %v5626_v59 = vpop.f32.mrf.mxu0 }
 0xc3b   : > { %v8415_v1 = vpop.eup %8414  ;;  %v5739_v38 = vpop.f32.mrf.mxu1  ;;  %v13118_v25 = vmul.f32 %v5626_v59, %v15474_v0 }
 0xc3c   : > { %v13121_v13 = vmul.f32 %v5739_v38, %v15476_v4  ;;  %v5208_v41 = vpop.xlane.xlu2 %5207  ;;  %v5379_v55 = vpop.xlane.xlu1 %5378  ;;  %v5462_v21 = vmul.f32 %v8415_v1, %v12993_v54  ;;  %v15478_v38 = vld [vmem:[#allocation62_spill] sm:$0xff]  ;;  %v15480_v4 = vld [vmem:[#allocation87_spill] sm:$0xff] }
 0xc3d   : > { %15475 = vst [vmem:[#allocation77_spill] sm:$0xff] %v13118_v25  ;;  %v5246_v60 = vsub.f32 %v13002_v33, %v5208_v41  ;;  %8418 = vrcp.f32 %v5379_v55 }
 0xc3e   : > { %15477 = vst [vmem:[#allocation42_spill] sm:$0xff] %v13121_v13  ;;  %8098 = vmatmul.msk.f32.gmra.mxu0 %vm5121_vm1, %v5462_v21  ;;  %8130 = vmatmul.msk.f32.gmra.mxu1 %vm5121_vm1, %v5462_v21 }
 0xc3f   : > { %v13127_v10 = vpop.eup %8416  ;;  %v5306_v15 = vmul.f32 1.442695, %v5246_v60  ;;  %5922 = vmatmul.f32.gmra.mxu2 %v13118_v25  ;;  %6035 = vmatmul.f32.gmra.mxu3 %v13121_v13 }
 0xc40   : > { %v5395_v59 = vsel %vm5121_vm1, %v13127_v10, 0.0 }
 0xc41   : > { %8420 = vpow2.f32 %v5306_v15  ;;  %5396 = vadd.xlane.f32.xlu2 %v5395_v59 }
 0xc42   : > { %v5629_v1 = vpop.f32.mrf.mxu0 }
 0xc43   : > { %v8419_v54 = vpop.eup %8418  ;;  %v5742_v33 = vpop.f32.mrf.mxu1  ;;  %v13134_v0 = vmul.f32 %v5629_v1, %v15478_v38 }
 0xc44   : > { %v13137_v41 = vmul.f32 %v5742_v33, %v15480_v4  ;;  %v5211_v55 = vpop.xlane.xlu1 %5210  ;;  %v5382_v21 = vpop.xlane.xlu0 %5381  ;;  %v5463_v60 = vmul.f32 %v8419_v54, %v13014_v6  ;;  %v15482_v33 = vld [vmem:[#allocation80_spill] sm:$0xff] }
 0xc45   : > { %15479 = vst [vmem:[#allocation73_spill] sm:$0xff] %v13134_v0  ;;  %v5247_v34 = vsub.f32 %v13023_v45, %v5211_v55  ;;  %8422 = vrcp.f32 %v5382_v21  ;;  %v15484_v4 = vld [vmem:[#allocation84_spill] sm:$0xff] }
 0xc46   : > { %15481 = vst [vmem:[#allocation47_spill] sm:$0xff] %v13137_v41  ;;  %8099 = vmatmul.msk.f32.gmra.mxu0 %vm5121_vm1, %v5463_v60  ;;  %8131 = vmatmul.msk.f32.gmra.mxu1 %vm5121_vm1, %v5463_v60 }
 0xc47   : > { %v13143_v15 = vpop.eup %8420  ;;  %v5308_v59 = vmul.f32 1.442695, %v5247_v34  ;;  %5925 = vmatmul.f32.gmra.mxu2 %v13134_v0  ;;  %6038 = vmatmul.f32.gmra.mxu3 %v13137_v41 }
 0xc48   : > { %v5398_v1 = vsel %vm5121_vm1, %v13143_v15, 0.0 }
 0xc49   : > { %8424 = vpow2.f32 %v5308_v59  ;;  %5399 = vadd.xlane.f32.xlu0 %v5398_v1 }
 0xc4a   : > { %v5632_v54 = vpop.f32.mrf.mxu0 }
 0xc4b   : > { %v8423_v6 = vpop.eup %8422  ;;  %v5745_v45 = vpop.f32.mrf.mxu1  ;;  %v13150_v38 = vmul.f32 %v5632_v54, %v15482_v33 }
 0xc4c   : > { %v13153_v55 = vmul.f32 %v5745_v45, %v15484_v4  ;;  %v5385_v21 = vpop.xlane.xlu2 %5384  ;;  %v5214_v34 = vpop.xlane.xlu0 %5213  ;;  %v5464_v60 = vmul.f32 %v8423_v6, %v13029_v14 }
 0xc4d   : > { %15483 = vst [vmem:[#allocation52_spill] sm:$0xff] %v13150_v38  ;;  %8426 = vrcp.f32 %v5385_v21  ;;  %v5248_v41 = vsub.f32 %v13036_v12, %v5214_v34 }
 0xc4e   : > { %15485 = vst [vmem:[#allocation69_spill] sm:$0xff] %v13153_v55  ;;  %8100 = vmatmul.msk.f32.gmra.mxu0 %vm5121_vm1, %v5464_v60  ;;  %8132 = vmatmul.msk.f32.gmra.mxu1 %vm5121_vm1, %v5464_v60  ;;  %v15486_v60 = vld [vmem:[#allocation58_spill] sm:$0xff] }
 0xc4f   : > { %v13159_v59 = vpop.eup %8424  ;;  %v5310_v1 = vmul.f32 1.442695, %v5248_v41  ;;  %5928 = vmatmul.f32.gmra.mxu2 %v13150_v38  ;;  %6041 = vmatmul.f32.gmra.mxu3 %v13153_v55 }
 0xc50   : > { %v5401_v54 = vsel %vm5121_vm1, %v13159_v59, 0.0 }
 0xc51   : > { %8428 = vpow2.f32 %v5310_v1  ;;  %5402 = vadd.xlane.f32.xlu1 %v5401_v54  ;;  %v15487_v54 = vld [vmem:[#allocation85_spill] sm:$0xff] }
 0xc53   : > { %v8427_v14 = vpop.eup %8426 }
 0xc54   : > { %v5217_v6 = vpop.xlane.xlu2 %5216  ;;  %v5465_v12 = vmul.f32 %v8427_v14, %v13038_v17 }
 0xc55   : > { %v5249_v45 = vsub.f32 %v13045_v56, %v5217_v6 }
 0xc56   : > { %8101 = vmatmul.msk.f32.gmra.mxu0 %vm5121_vm1, %v5465_v12  ;;  %8133 = vmatmul.msk.f32.gmra.mxu1 %vm5121_vm1, %v5465_v12 }
 0xc57   : > { %v13169_v41 = vpop.eup %8428  ;;  %v5312_v33 = vmul.f32 1.442695, %v5249_v45 }
 0xc58   : > { %v5404_v4 = vsel %vm5121_vm1, %v13169_v41, 0.0 }
 0xc59   : > { %8430 = vpow2.f32 %v5312_v33  ;;  %5405 = vadd.xlane.f32.xlu2 %v5404_v4  ;;  %v15489_v4 = vld [vmem:[#allocation78_spill] sm:$0xff] }
 0xc5f   : > { %v13173_v21 = vpop.eup %8430 }
 0xc60   : > { %v5407_v34 = vsel %vm5121_vm1, %v13173_v21, 0.0 }
 0xc61   : > { %5408 = vadd.xlane.f32.xlu0 %v5407_v34 }
 0xc99   : > { %v5635_v17 = vpop.f32.mrf.mxu0  ;;  %v5748_v56 = vpop.f32.mrf.mxu1 }
 0xc9a   : > { %v13178_v1 = vmul.f32 %v5635_v17, %v15486_v60  ;;  %v13181_v14 = vmul.f32 %v5748_v56, %v15487_v54  ;;  %v430_v56 = vld [vmem:[#allocation7 + $0x548] sm:$0xff] }
 0xc9b   : > { %v5388_v6 = vpop.xlane.xlu1 %5387  ;;  %v462_v54 = vld [vmem:[#allocation7 + $0x648] sm:$0xff]  ;;  %6093 = vmatpush.msrb.mxu0 %v430_v56  ;;  %v424_v56 = vld [vmem:[#allocation7 + $0x518] sm:$0xff] }
 0xc9c   : > { %15488 = vst [vmem:[#allocation57_spill] sm:$0xff] %v13181_v14  ;;  %8432 = vrcp.f32 %v5388_v6  ;;  %5931 = vmatmul.f32.gmra.mxu2 %v13178_v1  ;;  %6044 = vmatmul.f32.gmra.mxu3 %v13181_v14  ;;  %v428_v6 = vld [vmem:[#allocation7 + $0x538] sm:$0xff] }
 0xc9d   : > { %6206 = vmatpush.msrb.mxu1 %v462_v54  ;;  %6094 = vmatpush.msrb.mxu0 %v428_v6  ;;  %v456_v54 = vld [vmem:[#allocation7 + $0x618] sm:$0xff]  ;;  %v422_v6 = vld [vmem:[#allocation7 + $0x508] sm:$0xff] }
 0xca2   : > { %v8433_v12 = vpop.eup %8432  ;;  %v5638_v45 = vpop.f32.mrf.mxu0 }
 0xca3   : > { %v5751_v33 = vpop.f32.mrf.mxu1  ;;  %v13186_v55 = vmul.f32 %v5638_v45, %v15489_v4  ;;  %v5391_v17 = vpop.xlane.xlu0 %5390  ;;  %v5466_v60 = vmul.f32 %v8433_v12, %v13079_v27  ;;  %v460_v45 = vld [vmem:[#allocation7 + $0x638] sm:$0xff]  ;;  %v426_v12 = vld [vmem:[#allocation7 + $0x528] sm:$0xff] }
 0xca4   : > { %v13189_v34 = vmul.f32 %v5751_v33, %v12308_v51  ;;  %8434 = vrcp.f32 %v5391_v17  ;;  %6207 = vmatpush.msrb.mxu1 %v460_v45  ;;  %v458_v4 = vld [vmem:[#allocation7 + $0x628] sm:$0xff]  ;;  %v15492_v17 = vld [vmem:[#allocation24_spill] sm:$0xff]  ;;  %6095 = vmatpush.msrb.mxu0 %v426_v12 }
 0xca5   : > { %15490 = vst [vmem:[#allocation48_spill] sm:$0xff] %v13186_v55  ;;  %8102 = vmatmul.msk.f32.gmra.mxu0 %vm5121_vm1, %v5466_v60  ;;  %8134 = vmatmul.msk.f32.gmra.mxu1 %vm5121_vm1, %v5466_v60  ;;  %v454_v45 = vld [vmem:[#allocation7 + $0x608] sm:$0xff] }
 0xca6   : > { %15491 = vst [vmem:[#allocation59_spill] sm:$0xff] %v13189_v34  ;;  %5934 = vmatmul.f32.gmra.mxu2 %v13186_v55  ;;  %6047 = vmatmul.f32.gmra.mxu3 %v13189_v34 }
 0xca7   : > { %6208 = vmatpush.msrb.mxu1 %v458_v4  ;;  %6096 = vmatpush.msrb.mxu0 %v424_v56  ;;  %v15495_v4 = vld [vmem:[#allocation19_spill] sm:$0xff]  ;;  %v418_v56 = vld [vmem:[#allocation7 + $0x4e8] sm:$0xff] }
 0xca9   : > { %6209 = vmatpush.msrb.mxu1 %v456_v54  ;;  %6097 = vmatpush.msrb.mxu0 %v422_v6  ;;  %v450_v54 = vld [vmem:[#allocation7 + $0x5e8] sm:$0xff]  ;;  %v416_v6 = vld [vmem:[#allocation7 + $0x4d8] sm:$0xff] }
 0xcaa   : > { %v8435_v51 = vpop.eup %8434 }
 0xcab   : > { %v5641_v33 = vpop.f32.mrf.mxu0  ;;  %v5754_v27 = vpop.f32.mrf.mxu1  ;;  %v5467_v55 = vmul.f32 %v8435_v51, %v13095_v49  ;;  %6210 = vmatpush.msrb.mxu1 %v454_v45  ;;  %v448_v45 = vld [vmem:[#allocation7 + $0x5d8] sm:$0xff] }
 0xcac   : > { %v13197_v14 = vmul.f32 %v5641_v33, %v15492_v17  ;;  %v13200_v60 = vmul.f32 %v5754_v27, %v12330_v39  ;;  %v5394_v34 = vpop.xlane.xlu1 %5393  ;;  %v420_v39 = vld [vmem:[#allocation7 + $0x4f8] sm:$0xff] }
 0xcad   : > { %8436 = vrcp.f32 %v5394_v34  ;;  %8103 = vmatmul.msk.f32.gmra.mxu0 %vm5121_vm1, %v5467_v55  ;;  %8135 = vmatmul.msk.f32.gmra.mxu1 %vm5121_vm1, %v5467_v55  ;;  %v452_v33 = vld [vmem:[#allocation7 + $0x5f8] sm:$0xff] }
 0xcae   : > { %15493 = vst [vmem:[#allocation61_spill] sm:$0xff] %v13200_v60  ;;  %5937 = vmatmul.f32.gmra.mxu2 %v13197_v14  ;;  %6050 = vmatmul.f32.gmra.mxu3 %v13200_v60  ;;  %v15494_v27 = vld [vmem:[#allocation20_spill] sm:$0xff] }
 0xcaf   : > { %6098 = vmatpush.msrb.mxu0 %v420_v39  ;;  %6211 = vmatpush.msrb.mxu1 %v452_v33 }
 0xcb1   : > { %6099 = vmatpush.msrb.mxu0 %v418_v56  ;;  %6212 = vmatpush.msrb.mxu1 %v450_v54  ;;  %v412_v56 = vld [vmem:[#allocation7 + $0x4b8] sm:$0xff] }
 0xcb2   : > { %v444_v54 = vld [vmem:[#allocation7 + $0x5b8] sm:$0xff] }
 0xcb3   : > { %v8437_v49 = vpop.eup %8436  ;;  %v5644_v34 = vpop.f32.mrf.mxu0  ;;  %6100 = vmatpush.msrb.mxu0 %v416_v6  ;;  %6213 = vmatpush.msrb.mxu1 %v448_v45  ;;  %v442_v45 = vld [vmem:[#allocation7 + $0x5a8] sm:$0xff] }
 0xcb4   : > { %v5757_v51 = vpop.f32.mrf.mxu1  ;;  %v13208_v12 = vmul.f32 %v5644_v34, %v15494_v27  ;;  %v5397_v17 = vpop.xlane.xlu2 %5396  ;;  %v5468_v60 = vmul.f32 %v8437_v49, %v13111_v22  ;;  %v414_v34 = vld [vmem:[#allocation7 + $0x4c8] sm:$0xff]  ;;  %v15497_v49 = vld [vmem:[#allocation75_spill] sm:$0xff] }
 0xcb5   : > { %v13211_v55 = vmul.f32 %v5757_v51, %v15495_v4  ;;  %8438 = vrcp.f32 %v5397_v17  ;;  %v446_v51 = vld [vmem:[#allocation7 + $0x5c8] sm:$0xff]  ;;  %6101 = vmatpush.msrb.mxu0 %v414_v34  ;;  %v13227_v6 = vpop.f32.mrf.mxu3  ;;  %v440_v34 = vld [vmem:[#allocation7 + $0x598] sm:$0xff] }
 0xcb6   : > { %8104 = vmatmul.msk.f32.gmra.mxu0 %vm5121_vm1, %v5468_v60  ;;  %8136 = vmatmul.msk.f32.gmra.mxu1 %vm5121_vm1, %v5468_v60 }
 0xcb7   : > { %15496 = vst [vmem:[#allocation83_spill] sm:$0xff] %v13211_v55  ;;  %5940 = vmatmul.f32.gmra.mxu2 %v13208_v12  ;;  %6053 = vmatmul.f32.gmra.mxu3 %v13211_v55  ;;  %v13225_v55 = vpop.f32.mrf.mxu2 }
 0xcb8   : > { %6214 = vmatpush.msrb.mxu1 %v446_v51  ;;  %6102 = vmatpush.msrb.mxu0 %v412_v56  ;;  %v406_v56 = vld [vmem:[#allocation7 + $0x488] sm:$0xff] }
 0xcba   : > { %6215 = vmatpush.msrb.mxu1 %v444_v54  ;;  %v438_v54 = vld [vmem:[#allocation7 + $0x588] sm:$0xff] }
 0xcbb   : > { %v8439_v22 = vpop.eup %8438  ;;  %v5647_v39 = vpop.f32.mrf.mxu0 }
 0xcbc   : > { %v5760_v33 = vpop.f32.mrf.mxu1  ;;  %v13219_v27 = vmul.f32 %v5647_v39, %v15497_v49  ;;  %v5400_v4 = vpop.xlane.xlu0 %5399  ;;  %v5469_v17 = vmul.f32 %v8439_v22, %v13127_v10  ;;  %v408_v10 = vld [vmem:[#allocation7 + $0x498] sm:$0xff]  ;;  %6216 = vmatpush.msrb.mxu1 %v442_v45 }
 0xcbd   : > { %v13222_v60 = vmul.f32 %v5760_v33, %v12360_v3  ;;  %8440 = vrcp.f32 %v5400_v4  ;;  %v410_v3 = vld [vmem:[#allocation7 + $0x4a8] sm:$0xff]  ;;  %v436_v45 = vld [vmem:[#allocation7 + $0x578] sm:$0xff] }
 0xcbe   : > { %8105 = vmatmul.msk.f32.gmra.mxu0 %vm5121_vm1, %v5469_v17  ;;  %8137 = vmatmul.msk.f32.gmra.mxu1 %vm5121_vm1, %v5469_v17  ;;  %v15499_v33 = vld [vmem:[#allocation94_spill] sm:$0xff] }
 0xcbf   : > { %15498 = vst [vmem:[#allocation15_spill] sm:$0xff] %v13222_v60  ;;  %5943 = vmatmul.f32.gmra.mxu2 %v13219_v27  ;;  %6056 = vmatmul.f32.gmra.mxu3 %v13222_v60 }
 0xcc0   : > { %6103 = vmatpush.msrb.mxu0 %v410_v3  ;;  %6217 = vmatpush.msrb.mxu1 %v440_v34  ;;  %v404_v3 = vld [vmem:[#allocation7 + $0x478] sm:$0xff] }
 0xcc2   : > { %6104 = vmatpush.msrb.mxu0 %v408_v10  ;;  %6218 = vmatpush.msrb.mxu1 %v438_v54  ;;  %v434_v10 = vld [vmem:[#allocation7 + $0x568] sm:$0xff]  ;;  %v432_v54 = vld [vmem:[#allocation7 + $0x558] sm:$0xff] }
 0xcc3   : > { %v8441_v51 = vpop.eup %8440  ;;  %v5650_v22 = vpop.f32.mrf.mxu0 }
 0xcc4   : > { %v5763_v39 = vpop.f32.mrf.mxu1  ;;  %v13234_v49 = vmul.f32 %v5650_v22, %v15499_v33  ;;  %v5403_v17 = vpop.xlane.xlu1 %5402  ;;  %v5470_v60 = vmul.f32 %v8441_v51, %v13143_v15  ;;  %6105 = vmatpush.msrb.mxu0 %v406_v56  ;;  %v402_v15 = vld [vmem:[#allocation7 + $0x468] sm:$0xff]  ;;  %6219 = vmatpush.msrb.mxu1 %v436_v45  ;;  %v400_v56 = vld [vmem:[#allocation7 + $0x458] sm:$0xff] }
 0xcc5   : > { %v13237_v4 = vmul.f32 %v5763_v39, %v12372_v44  ;;  %8442 = vrcp.f32 %v5403_v17  ;;  %v13244_v44 = vpop.f32.mrf.mxu2  ;;  %v13246_v22 = vpop.f32.mrf.mxu3 }
 0xcc6   : > { %15500 = vst [vmem:[#allocation18_spill] sm:$0xff] %v13234_v49  ;;  %8106 = vmatmul.msk.f32.gmra.mxu0 %vm5121_vm1, %v5470_v60  ;;  %8138 = vmatmul.msk.f32.gmra.mxu1 %vm5121_vm1, %v5470_v60  ;;  %v15502_v60 = vld [vmem:[#allocation96_spill] sm:$0xff] }
 0xcc7   : > { %15501 = vst [vmem:[#allocation44_spill] sm:$0xff] %v13237_v4  ;;  %5946 = vmatmul.f32.gmra.mxu2 %v13234_v49  ;;  %6059 = vmatmul.f32.gmra.mxu3 %v13237_v4 }
 0xcc8   : > { %6106 = vmatpush.msrb.mxu0 %v404_v3  ;;  %6220 = vmatpush.msrb.mxu1 %v434_v10 }
 0xcca   : > { %6107 = vmatpush.msrb.mxu0 %v402_v15  ;;  %6221 = vmatpush.msrb.mxu1 %v432_v54 }
 0xccb   : > { %v8443_v34 = vpop.eup %8442  ;;  %v5653_v51 = vpop.f32.mrf.mxu0 }
 0xccc   : > { %v5766_v39 = vpop.f32.mrf.mxu1  ;;  %v13249_v33 = vmul.f32 %v5653_v51, %v15502_v60  ;;  %v5406_v4 = vpop.xlane.xlu2 %5405  ;;  %v5471_v49 = vmul.f32 %v8443_v34, %v13159_v59  ;;  %6108 = vmatpush.msrb.mxu0 %v400_v56 }
 0xccd   : > { %v13252_v17 = vmul.f32 %v5766_v39, %v12386_v9  ;;  %8444 = vrcp.f32 %v5406_v4  ;;  %v13259_v9 = vpop.f32.mrf.mxu2  ;;  %v13261_v3 = vpop.f32.mrf.mxu3  ;;  %v15503_v4 = vld [vmem:[#allocation53_spill] sm:$0xff] }
 0xcce   : > { %8107 = vmatmul.msk.f32.gmra.mxu0 %vm5121_vm1, %v5471_v49  ;;  %8139 = vmatmul.msk.f32.gmra.mxu1 %vm5121_vm1, %v5471_v49 }
 0xccf   : > { %5949 = vmatmul.f32.gmra.mxu2 %v13249_v33  ;;  %6062 = vmatmul.f32.gmra.mxu3 %v13252_v17 }
 0xcd3   : > { %v8445_v59 = vpop.eup %8444  ;;  %v5656_v45 = vpop.f32.mrf.mxu0 }
 0xcd4   : > { %v5769_v15 = vpop.f32.mrf.mxu1  ;;  %v13264_v10 = vmul.f32 %v5656_v45, %v15503_v4  ;;  %v5409_v49 = vpop.xlane.xlu0 %5408  ;;  %v5472_v51 = vmul.f32 %v8445_v59, %v13169_v41 }
 0xcd5   : > { %v13267_v34 = vmul.f32 %v5769_v15, %v12400_v26  ;;  %8446 = vrcp.f32 %v5409_v49  ;;  %v13274_v60 = vpop.f32.mrf.mxu2  ;;  %v13276_v56 = vpop.f32.mrf.mxu3 }
 0xcd6   : > { %8108 = vmatmul.msk.f32.gmra.mxu0 %vm5121_vm1, %v5472_v51  ;;  %8140 = vmatmul.msk.f32.gmra.mxu1 %vm5121_vm1, %v5472_v51 }
 0xcd7   : > { %5952 = vmatmul.f32.gmra.mxu2 %v13264_v10  ;;  %6065 = vmatmul.f32.gmra.mxu3 %v13267_v34 }
 0xcdb   : > { %v8447_v39 = vpop.eup %8446 }
 0xcdc   : > { %v5473_v26 = vmul.f32 %v8447_v39, %v13173_v21 }
 0xcdd   : > { %v13281_v41 = vpop.f32.mrf.mxu2  ;;  %v13283_v54 = vpop.f32.mrf.mxu3 }
 0xcde   : > { %8109 = vmatmul.msk.f32.gmra.mxu0 %vm5121_vm1, %v5473_v26  ;;  %8141 = vmatmul.msk.f32.gmra.mxu1 %vm5121_vm1, %v5473_v26 }
 0xce5   : > { %v13289_v59 = vpop.f32.mrf.mxu2  ;;  %v13291_v45 = vpop.f32.mrf.mxu3 }
 0xce6   : > { %6109 = vmatmul.f32.vlgmr.msrb.gmra.mxu0 %v12882_v50  ;;  %6222 = vmatmul.f32.vlgmr.msrb.gmra.mxu1 %v12885_v62  ;;  %v15510_v50 = vld [vmem:[#allocation90_spill] sm:$0xff] }
 0xced   : > { %v13295_v21 = vpop.f32.mrf.mxu2  ;;  %v13297_v15 = vpop.f32.mrf.mxu3 }
 0xcee   : > { %6112 = vmatmul.f32.gmra.mxu0 %v12890_v42  ;;  %6225 = vmatmul.f32.gmra.mxu1 %v12893_v48  ;;  %v15506_v48 = vld [vmem:[#allocation50_spill] sm:$0xff] }
 0xcf5   : > { %v13301_v4 = vpop.f32.mrf.mxu2  ;;  %v13303_v49 = vpop.f32.mrf.mxu3 }
 0xcf6   : > { %6115 = vmatmul.f32.gmra.mxu0 %v12902_v24  ;;  %6228 = vmatmul.f32.gmra.mxu1 %v12905_v19  ;;  %v15504_v19 = vld [vmem:[#allocation49_spill] sm:$0xff] }
 0xcfd   : > { %v13307_v51 = vpop.f32.mrf.mxu2  ;;  %v13309_v39 = vpop.f32.mrf.mxu3 }
 0xcfe   : > { %6118 = vmatmul.f32.gmra.mxu0 %v12921_v32  ;;  %6231 = vmatmul.f32.gmra.mxu1 %v12924_v43 }
 0xd05   : > { %v13313_v26 = vpop.f32.mrf.mxu2  ;;  %v13315_v32 = vpop.f32.mrf.mxu3 }
 0xd06   : > { %6121 = vmatmul.f32.gmra.mxu0 %v12942_v28  ;;  %6234 = vmatmul.f32.gmra.mxu1 %v12945_v31 }
 0xd0d   : > { %v13321_v31 = vpop.f32.mrf.mxu2  ;;  %v13323_v28 = vpop.f32.mrf.mxu3 }
 0xd0e   : > { %6124 = vmatmul.f32.gmra.mxu0 %v12963_v58  ;;  %6237 = vmatmul.f32.gmra.mxu1 %v12966_v29 }
 0xd16   : > { %6127 = vmatmul.f32.gmra.mxu0 %v12984_v35  ;;  %6240 = vmatmul.f32.gmra.mxu1 %v12987_v40  ;;  %v13335_v40 = vpop.f32.mrf.mxu2  ;;  %v13337_v35 = vpop.f32.mrf.mxu3 }
 0xd17   : > { %15505 = vst [vmem:[#allocation45_spill] sm:$0xff] %v13337_v35 }
 0xd1e   : > { %6130 = vmatmul.f32.gmra.mxu0 %v13005_v63  ;;  %6243 = vmatmul.f32.gmra.mxu1 %v13008_v37  ;;  %v478_v37 = vld [vmem:[#allocation7 + $0x740] sm:$0xff]  ;;  %v477_v63 = vld [vmem:[#allocation7 + $0x730] sm:$0xff] }
 0xd1f   : > { %6388 = vmatpush.msra.mxu2 %v478_v37  ;;  %v493_v37 = vld [vmem:[#allocation7 + $0x830] sm:$0xff] }
 0xd21   : > { %6389 = vmatpush.msra.mxu2 %v477_v63  ;;  %v474_v63 = vld [vmem:[#allocation7 + $0x700] sm:$0xff] }
 0xd22   : > { %v5659_v43 = vpop.f32.mrf.mxu0  ;;  %v5772_v58 = vpop.f32.mrf.mxu1 }
 0xd23   : > { %v13326_v29 = vmul.f32 %v5659_v43, %v15504_v19  ;;  %v13329_v24 = vmul.f32 %v5772_v58, %v12414_v46  ;;  %v476_v46 = vld [vmem:[#allocation7 + $0x720] sm:$0xff] }
 0xd24   : > { %v494_v58 = vld [vmem:[#allocation7 + $0x840] sm:$0xff]  ;;  %6390 = vmatpush.msra.mxu2 %v476_v46  ;;  %v13349_v46 = vpop.f32.mrf.mxu2 }
 0xd25   : > { %5955 = vmatmul.f32.gmra.mxu2 %v13326_v29  ;;  %6068 = vmatmul.f32.gmra.mxu3 %v13329_v24 }
 0xd26   : > { %6133 = vmatmul.f32.gmra.mxu0 %v13050_v2  ;;  %6246 = vmatmul.f32.gmra.mxu1 %v13053_v11  ;;  %v475_v11 = vld [vmem:[#allocation7 + $0x710] sm:$0xff]  ;;  %v492_v2 = vld [vmem:[#allocation7 + $0x820] sm:$0xff] }
 0xd27   : > { %6501 = vmatpush.msra.mxu3 %v494_v58  ;;  %6391 = vmatpush.msra.mxu2 %v475_v11  ;;  %v13351_v58 = vpop.f32.mrf.mxu3  ;;  %v472_v11 = vld [vmem:[#allocation7 + $0x6e0] sm:$0xff] }
 0xd28   : > { %15509 = vst [vmem:[#allocation31_spill] sm:$0xff] %v13351_v58 }
 0xd29   : > { %6502 = vmatpush.msra.mxu3 %v493_v37  ;;  %6392 = vmatpush.msra.mxu2 %v474_v63  ;;  %v490_v37 = vld [vmem:[#allocation7 + $0x800] sm:$0xff]  ;;  %v489_v63 = vld [vmem:[#allocation7 + $0x7f0] sm:$0xff] }
 0xd2a   : > { %v5662_v19 = vpop.f32.mrf.mxu0  ;;  %v5775_v43 = vpop.f32.mrf.mxu1 }
 0xd2b   : > { %v13340_v42 = vmul.f32 %v5662_v19, %v15506_v48  ;;  %v13343_v62 = vmul.f32 %v5775_v43, %v12426_v23  ;;  %v473_v48 = vld [vmem:[#allocation7 + $0x6f0] sm:$0xff]  ;;  %6503 = vmatpush.msra.mxu3 %v492_v2 }
 0xd2c   : > { %v491_v19 = vld [vmem:[#allocation7 + $0x810] sm:$0xff]  ;;  %6393 = vmatpush.msra.mxu2 %v473_v48  ;;  %v13369_v58 = vpop.f32.mrf.mxu2 }
 0xd2d   : > { %15507 = vst [vmem:[#allocation72_spill] sm:$0xff] %v13340_v42  ;;  %5958 = vmatmul.f32.gmra.mxu2 %v13340_v42  ;;  %6071 = vmatmul.f32.gmra.mxu3 %v13343_v62  ;;  %v471_v2 = vld [vmem:[#allocation7 + $0x6d0] sm:$0xff] }
 0xd2e   : > { %15508 = vst [vmem:[#allocation39_spill] sm:$0xff] %v13343_v62  ;;  %6136 = vmatmul.f32.gmra.mxu0 %v13058_v16  ;;  %6249 = vmatmul.f32.gmra.mxu1 %v13061_v36 }
 0xd2f   : > { %6504 = vmatpush.msra.mxu3 %v491_v19  ;;  %6394 = vmatpush.msra.mxu2 %v472_v11  ;;  %v15511_v19 = vld [vmem:[#allocation93_spill] sm:$0xff]  ;;  %v13371_v11 = vpop.f32.mrf.mxu3 }
 0xd31   : > { %6505 = vmatpush.msra.mxu3 %v490_v37  ;;  %6395 = vmatpush.msra.mxu2 %v471_v2  ;;  %v468_v37 = vld [vmem:[#allocation7 + $0x6a0] sm:$0xff] }
 0xd32   : > { %v486_v2 = vld [vmem:[#allocation7 + $0x7c0] sm:$0xff] }
 0xd33   : > { %v5665_v23 = vpop.f32.mrf.mxu0  ;;  %v5778_v43 = vpop.f32.mrf.mxu1  ;;  %6506 = vmatpush.msra.mxu3 %v489_v63  ;;  %v485_v63 = vld [vmem:[#allocation7 + $0x7b0] sm:$0xff] }
 0xd34   : > { %v13354_v35 = vmul.f32 %v5665_v23, %v15510_v50  ;;  %v13357_v16 = vmul.f32 %v5778_v43, %v12438_v5  ;;  %v470_v50 = vld [vmem:[#allocation7 + $0x6c0] sm:$0xff] }
 0xd35   : > { %v488_v23 = vld [vmem:[#allocation7 + $0x7e0] sm:$0xff]  ;;  %6396 = vmatpush.msra.mxu2 %v470_v50 }
 0xd36   : > { %5961 = vmatmul.f32.gmra.mxu2 %v13354_v35  ;;  %6074 = vmatmul.f32.gmra.mxu3 %v13357_v16 }
 0xd37   : > { %6139 = vmatmul.f32.gmra.mxu0 %v13070_v30  ;;  %6252 = vmatmul.f32.gmra.mxu1 %v13073_v18  ;;  %v469_v30 = vld [vmem:[#allocation7 + $0x6b0] sm:$0xff] }
 0xd38   : > { %6507 = vmatpush.msra.mxu3 %v488_v23  ;;  %v487_v18 = vld [vmem:[#allocation7 + $0x7d0] sm:$0xff]  ;;  %6397 = vmatpush.msra.mxu2 %v469_v30 }
 0xd39   : > { %v465_v30 = vld [vmem:[#allocation7 + $0x670] sm:$0xff] }
 0xd3a   : > { %6508 = vmatpush.msra.mxu3 %v487_v18  ;;  %6398 = vmatpush.msra.mxu2 %v468_v37  ;;  %v483_v18 = vld [vmem:[#allocation7 + $0x790] sm:$0xff]  ;;  %v13387_v37 = vpop.f32.mrf.mxu2 }
 0xd3b   : > { %v5668_v5 = vpop.f32.mrf.mxu0  ;;  %v5781_v48 = vpop.f32.mrf.mxu1  ;;  %15514 = vst [vmem:[#allocation36_spill] sm:$0xff] %v13387_v37  ;;  %v481_v37 = vld [vmem:[#allocation7 + $0x770] sm:$0xff] }
 0xd3c   : > { %v13364_v43 = vmul.f32 %v5668_v5, %v15511_v19  ;;  %v13367_v36 = vmul.f32 %v5781_v48, %v12452_v7  ;;  %v467_v7 = vld [vmem:[#allocation7 + $0x690] sm:$0xff]  ;;  %6509 = vmatpush.msra.mxu3 %v486_v2  ;;  %v15513_v5 = vld [vmem:[#allocation86_spill] sm:$0xff]  ;;  %v13389_v2 = vpop.f32.mrf.mxu3 }
 0xd3d   : > { %6399 = vmatpush.msra.mxu2 %v467_v7  ;;  %v482_v7 = vld [vmem:[#allocation7 + $0x780] sm:$0xff] }
 0xd3e   : > { %15512 = vst [vmem:[#allocation76_spill] sm:$0xff] %v13367_v36  ;;  %5964 = vmatmul.f32.gmra.mxu2 %v13364_v43  ;;  %6077 = vmatmul.f32.gmra.mxu3 %v13367_v36 }
 0xd3f   : > { %6142 = vmatmul.f32.gmra.mxu0 %v13086_v47  ;;  %6255 = vmatmul.f32.gmra.mxu1 %v13089_v53  ;;  %v466_v47 = vld [vmem:[#allocation7 + $0x680] sm:$0xff] }
 0xd40   : > { %6510 = vmatpush.msra.mxu3 %v485_v63  ;;  %v484_v53 = vld [vmem:[#allocation7 + $0x7a0] sm:$0xff]  ;;  %6400 = vmatpush.msra.mxu2 %v466_v47 }
 0xd41   : > { %v480_v47 = vld [vmem:[#allocation7 + $0x760] sm:$0xff] }
 0xd42   : > { %6511 = vmatpush.msra.mxu3 %v484_v53  ;;  %6401 = vmatpush.msra.mxu2 %v465_v30  ;;  %v479_v53 = vld [vmem:[#allocation7 + $0x750] sm:$0xff]  ;;  %v13401_v30 = vpop.f32.mrf.mxu2 }
 0xd43   : > { %v5671_v50 = vpop.f32.mrf.mxu0  ;;  %v5784_v23 = vpop.f32.mrf.mxu1 }
 0xd44   : > { %v13378_v48 = vmul.f32 %v5671_v50, %v15513_v5  ;;  %v13381_v19 = vmul.f32 %v5784_v23, %v12466_v8  ;;  %v464_v8 = vld [vmem:[#allocation7 + $0x660] sm:$0xff]  ;;  %6512 = vmatpush.msra.mxu3 %v483_v18 }
 0xd45   : > { %v15515_v23 = vld [vmem:[#allocation89_spill] sm:$0xff]  ;;  %6402 = vmatpush.msra.mxu2 %v464_v8 }
 0xd46   : > { %5967 = vmatmul.f32.gmra.mxu2 %v13378_v48  ;;  %6080 = vmatmul.f32.gmra.mxu3 %v13381_v19 }
 0xd47   : > { %6145 = vmatmul.f32.gmra.mxu0 %v13102_v61  ;;  %6258 = vmatmul.f32.gmra.mxu1 %v13105_v20  ;;  %v463_v20 = vld [vmem:[#allocation7 + $0x650] sm:$0xff] }
 0xd48   : > { %6513 = vmatpush.msra.mxu3 %v482_v7  ;;  %6403 = vmatpush.msra.mxu2 %v463_v20  ;;  %v15517_v7 = vld [vmem:[#allocation82_spill] sm:$0xff]  ;;  %v15519_v20 = vld [vmem:[#allocation47_spill] sm:$0xff] }
 0xd4a   : > { %6514 = vmatpush.msra.mxu3 %v481_v37 }
 0xd4b   : > { %v5674_v63 = vpop.f32.mrf.mxu0  ;;  %v5787_v50 = vpop.f32.mrf.mxu1 }
 0xd4c   : > { %v13392_v5 = vmul.f32 %v5674_v63, %v15515_v23  ;;  %v13395_v61 = vmul.f32 %v5787_v50, %v12480_v57  ;;  %v13403_v57 = vpop.f32.mrf.mxu3  ;;  %6515 = vmatpush.msra.mxu3 %v480_v47  ;;  %v5861_v23 = vld [vmem:[#allocation8 + $0x6] ss:$8 sm:$0x3]  ;;  %v13417_v47 = vpop.f32.mrf.mxu2 }
 0xd4d   : > { %15516 = vst [vmem:[#allocation74_spill] sm:$0xff] %v13403_v57  ;;  %v13415_v37 = vperm.slane %v5861_v23, 0 }
 0xd4e   : > { %5970 = vmatmul.f32.gmra.mxu2 %v13392_v5  ;;  %6083 = vmatmul.f32.gmra.mxu3 %v13395_v61  ;;  %15520 = vst [vmem:[#allocation95_spill] sm:$0xff] %v13417_v47 }
 0xd4f   : > { %6148 = vmatmul.f32.gmra.mxu0 %v13118_v25  ;;  %6261 = vmatmul.f32.gmra.mxu1 %v13121_v13  ;;  %v15523_v25 = vld [vmem:[#allocation27_spill] sm:$0xff] }
 0xd50   : > { %6516 = vmatpush.msra.mxu3 %v479_v53  ;;  %v15522_v53 = vld [vmem:[#allocation17_spill] sm:$0xff] }
 0xd53   : > { %v5677_v18 = vpop.f32.mrf.mxu0  ;;  %v5790_v8 = vpop.f32.mrf.mxu1 }
 0xd54   : > { %v13406_v63 = vmul.f32 %v5677_v18, %v15517_v7  ;;  %v13409_v50 = vmul.f32 %v5790_v8, %v12492_v52  ;;  %v13419_v13 = vpop.f32.mrf.mxu3  ;;  %v5885_v52 = vadd.f32 %v13225_v55, %v13415_v37 }
 0xd55   : > { %15521 = vst [vmem:[#allocation55_spill] sm:$0xff] %v13419_v13  ;;  %v13434_v13 = vperm.slane %v5861_v23, 1 }
 0xd56   : > { %15518 = vst [vmem:[#allocation34_spill] sm:$0xff] %v13409_v50  ;;  %5973 = vmatmul.f32.gmra.mxu2 %v13406_v63  ;;  %6086 = vmatmul.f32.gmra.mxu3 %v13409_v50 }
 0xd57   : > { %6151 = vmatmul.f32.gmra.mxu0 %v13134_v0  ;;  %6264 = vmatmul.f32.gmra.mxu1 %v15519_v20  ;;  %v15525_v20 = vld [vmem:[#allocation69_spill] sm:$0xff]  ;;  %v5998_v0 = vadd.f32 %v13227_v6, %v5885_v52 }
 0xd59   : > { %v6319_v50 = vmax.f32 %v5998_v0, 0.0 }
 0xd5b   : > { %v5680_v18 = vpop.f32.mrf.mxu0  ;;  %v5793_v7 = vpop.f32.mrf.mxu1 }
 0xd5c   : > { %v13424_v8 = vmul.f32 %v5680_v18, %v15522_v53  ;;  %v13427_v57 = vmul.f32 %v5793_v7, %v15523_v25  ;;  %v5888_v18 = vadd.f32 %v13244_v44, %v13415_v37  ;;  %v13438_v25 = vpop.f32.mrf.mxu2  ;;  %v13440_v7 = vpop.f32.mrf.mxu3  ;;  %v5891_v44 = vadd.f32 %v13259_v9, %v13415_v37 }
 0xd5d   : > { %15526 = vst [vmem:[#allocation67_spill] sm:$0xff] %v13438_v25  ;;  %v5894_v9 = vadd.f32 %v13274_v60, %v13415_v37  ;;  %v5897_v60 = vadd.f32 %v13281_v41, %v13415_v37  ;;  %v5900_v41 = vadd.f32 %v13289_v59, %v13415_v37 }
 0xd5e   : > { %15524 = vst [vmem:[#allocation79_spill] sm:$0xff] %v13427_v57  ;;  %5976 = vmatmul.f32.gmra.mxu2 %v13424_v8  ;;  %6089 = vmatmul.f32.gmra.mxu3 %v13427_v57  ;;  %v6001_v6 = vadd.f32 %v13246_v22, %v5888_v18  ;;  %v6004_v22 = vadd.f32 %v13261_v3, %v5891_v44 }
 0xd5f   : > { %6154 = vmatmul.f32.gmra.mxu0 %v13150_v38  ;;  %6267 = vmatmul.f32.gmra.mxu1 %v15525_v20  ;;  %15527 = vst [vmem:[#allocation97_spill] sm:$0xff] %v13440_v7  ;;  %v15528_v20 = vld [vmem:[#allocation57_spill] sm:$0xff] }
 0xd60   : > { %v6321_v38 = vmax.f32 %v6001_v6, 0.0 }
 0xd63   : > { %v6110_v47 = vpop.f32.mrf.mxu0  ;;  %v6223_v55 = vpop.f32.mrf.mxu1 }
 0xd64   : > { %v6111_v53 = vadd.f32 %v6110_v47, %v13434_v13  ;;  %v13449_v25 = vpop.f32.mrf.mxu2  ;;  %v13451_v47 = vpop.f32.mrf.mxu3 }
 0xd66   : > { %v6224_v57 = vadd.f32 %v6223_v55, %v6111_v53  ;;  %6404 = vmatmul.f32.vlgmr.msra.gmra.mxu2 %v6319_v50  ;;  %v15529_v55 = vld [vmem:[#allocation48_spill] sm:$0xff]  ;;  %v15530_v53 = vld [vmem:[#allocation59_spill] sm:$0xff] }
 0xd67   : > { %6157 = vmatmul.f32.gmra.mxu0 %v13178_v1  ;;  %6270 = vmatmul.f32.gmra.mxu1 %v15528_v20 }
 0xd68   : > { %v6320_v23 = vmax.f32 %v6224_v57, 0.0 }
 0xd6a   : > { %6517 = vmatmul.f32.vlgmr.msra.gmra.mxu3 %v6320_v23  ;;  %v6323_v23 = vmax.f32 %v6004_v22, 0.0 }
 0xd6b   : > { %v6113_v0 = vpop.f32.mrf.mxu0  ;;  %v6226_v52 = vpop.f32.mrf.mxu1 }
 0xd6c   : > { %v6114_v7 = vadd.f32 %v6113_v0, %v13434_v13  ;;  %v13464_v3 = vpop.f32.mrf.mxu3 }
 0xd6e   : > { %v6227_v50 = vadd.f32 %v6226_v52, %v6114_v7  ;;  %6407 = vmatmul.f32.gmra.mxu2 %v6321_v38  ;;  %v15531_v38 = vld [vmem:[#allocation61_spill] sm:$0xff]  ;;  %v6007_v7 = vadd.f32 %v13276_v56, %v5894_v9  ;;  %v13462_v52 = vpop.f32.mrf.mxu2  ;;  %v6010_v56 = vadd.f32 %v13283_v54, %v5897_v60  ;;  %v6013_v54 = vadd.f32 %v13291_v45, %v5900_v41 }
 0xd6f   : > { %6160 = vmatmul.f32.gmra.mxu0 %v15529_v55  ;;  %6273 = vmatmul.f32.gmra.mxu1 %v15530_v53 }
 0xd70   : > { %v6322_v57 = vmax.f32 %v6227_v50, 0.0 }
 0xd72   : > { %6520 = vmatmul.f32.gmra.mxu3 %v6322_v57  ;;  %v6325_v57 = vmax.f32 %v6007_v7, 0.0 }
 0xd73   : > { %v6116_v18 = vpop.f32.mrf.mxu0  ;;  %v6229_v6 = vpop.f32.mrf.mxu1 }
 0xd74   : > { %v6117_v0 = vadd.f32 %v6116_v18, %v13434_v13 }
 0xd76   : > { %v6230_v20 = vadd.f32 %v6229_v6, %v6117_v0  ;;  %6410 = vmatmul.f32.gmra.mxu2 %v6323_v23  ;;  %v15532_v23 = vld [vmem:[#allocation83_spill] sm:$0xff]  ;;  %v13472_v0 = vpop.f32.mrf.mxu2 }
 0xd77   : > { %6163 = vmatmul.f32.gmra.mxu0 %v13197_v14  ;;  %6276 = vmatmul.f32.gmra.mxu1 %v15531_v38  ;;  %v6327_v38 = vmax.f32 %v6010_v56, 0.0  ;;  %v5903_v56 = vadd.f32 %v13295_v21, %v13415_v37  ;;  %v5906_v21 = vadd.f32 %v13301_v4, %v13415_v37  ;;  %v5909_v4 = vadd.f32 %v13307_v51, %v13415_v37 }
 0xd78   : > { %v6324_v44 = vmax.f32 %v6230_v20, 0.0  ;;  %v13474_v20 = vpop.f32.mrf.mxu3  ;;  %v5912_v51 = vadd.f32 %v13313_v26, %v13415_v37  ;;  %v509_v26 = vld [vmem:[#allocation7 + $0x930] sm:$0xff] }
 0xd79   : > { %v6016_v45 = vadd.f32 %v13297_v15, %v5903_v56  ;;  %v6019_v15 = vadd.f32 %v13303_v49, %v5906_v21 }
 0xd7a   : > { %6523 = vmatmul.f32.gmra.mxu3 %v6324_v44 }
 0xd7b   : > { %v6119_v50 = vpop.f32.mrf.mxu0  ;;  %v6232_v22 = vpop.f32.mrf.mxu1 }
 0xd7c   : > { %v6120_v18 = vadd.f32 %v6119_v50, %v13434_v13 }
 0xd7e   : > { %v6233_v6 = vadd.f32 %v6232_v22, %v6120_v18  ;;  %6413 = vmatmul.f32.gmra.mxu2 %v6325_v57  ;;  %v15533_v57 = vld [vmem:[#allocation15_spill] sm:$0xff] }
 0xd7f   : > { %6166 = vmatmul.f32.gmra.mxu0 %v13208_v12  ;;  %6279 = vmatmul.f32.gmra.mxu1 %v15532_v23  ;;  %v13485_v23 = vpop.f32.mrf.mxu2 }
 0xd80   : > { %v6326_v9 = vmax.f32 %v6233_v6, 0.0 }
 0xd82   : > { %6526 = vmatmul.f32.gmra.mxu3 %v6326_v9  ;;  %v6329_v9 = vmax.f32 %v6013_v54, 0.0 }
 0xd83   : > { %v6122_v7 = vpop.f32.mrf.mxu0  ;;  %v6235_v44 = vpop.f32.mrf.mxu1 }
 0xd84   : > { %v6123_v50 = vadd.f32 %v6122_v7, %v13434_v13  ;;  %v13487_v7 = vpop.f32.mrf.mxu3 }
 0xd86   : > { %v6236_v22 = vadd.f32 %v6235_v44, %v6123_v50  ;;  %6416 = vmatmul.f32.gmra.mxu2 %v6327_v38  ;;  %v15534_v44 = vld [vmem:[#allocation18_spill] sm:$0xff]  ;;  %v15535_v50 = vld [vmem:[#allocation44_spill] sm:$0xff] }
 0xd87   : > { %6169 = vmatmul.f32.gmra.mxu0 %v13219_v27  ;;  %6282 = vmatmul.f32.gmra.mxu1 %v15533_v57 }
 0xd88   : > { %v6328_v60 = vmax.f32 %v6236_v22, 0.0 }
 0xd8a   : > { %6529 = vmatmul.f32.gmra.mxu3 %v6328_v60  ;;  %v6331_v60 = vmax.f32 %v6016_v45, 0.0  ;;  %v6333_v45 = vmax.f32 %v6019_v15, 0.0 }
 0xd8b   : > { %v6125_v18 = vpop.f32.mrf.mxu0  ;;  %v6238_v6 = vpop.f32.mrf.mxu1 }
 0xd8c   : > { %v6126_v59 = vadd.f32 %v6125_v18, %v13434_v13 }
 0xd8e   : > { %v6239_v38 = vadd.f32 %v6238_v6, %v6126_v59  ;;  %6419 = vmatmul.f32.gmra.mxu2 %v6329_v9  ;;  %v13495_v6 = vpop.f32.mrf.mxu2  ;;  %v13497_v9 = vpop.f32.mrf.mxu3 }
 0xd8f   : > { %6172 = vmatmul.f32.gmra.mxu0 %v15534_v44  ;;  %6285 = vmatmul.f32.gmra.mxu1 %v15535_v50 }
 0xd90   : > { %v6330_v41 = vmax.f32 %v6239_v38, 0.0 }
 0xd92   : > { %6532 = vmatmul.f32.gmra.mxu3 %v6330_v41 }
 0xd93   : > { %v6128_v22 = vpop.f32.mrf.mxu0  ;;  %v6241_v54 = vpop.f32.mrf.mxu1 }
 0xd94   : > { %v6129_v18 = vadd.f32 %v6128_v22, %v13434_v13 }
 0xd96   : > { %v6242_v57 = vadd.f32 %v6241_v54, %v6129_v18  ;;  %6422 = vmatmul.f32.gmra.mxu2 %v6331_v60  ;;  %v6022_v54 = vadd.f32 %v13309_v39, %v5909_v4  ;;  %v13508_v49 = vpop.f32.mrf.mxu2  ;;  %v510_v39 = vld [vmem:[#allocation7 + $0x940] sm:$0xff] }
 0xd97   : > { %6175 = vmatmul.f32.gmra.mxu0 %v13249_v33  ;;  %6288 = vmatmul.f32.gmra.mxu1 %v13252_v17 }
 0xd98   : > { %v6332_v56 = vmax.f32 %v6242_v57, 0.0  ;;  %v13510_v57 = vpop.f32.mrf.mxu3  ;;  %v6335_v21 = vmax.f32 %v6022_v54, 0.0  ;;  %6966 = vmatpush.msra.mxu0 %v510_v39  ;;  %v525_v54 = vld [vmem:[#allocation7 + $0xa30] sm:$0xff]  ;;  %8220 = vmatpush.msrb.mxu2 %v510_v39 }
 0xd9a   : > { %6535 = vmatmul.f32.gmra.mxu3 %v6332_v56  ;;  %6967 = vmatpush.msra.mxu0 %v509_v26 }
 0xd9b   : > { %v6131_v59 = vpop.f32.mrf.mxu0  ;;  %v6244_v38 = vpop.f32.mrf.mxu1  ;;  %8221 = vmatpush.msrb.mxu2 %v509_v26 }
 0xd9c   : > { %v6132_v41 = vadd.f32 %v6131_v59, %v13434_v13 }
 0xd9e   : > { %v6245_v22 = vadd.f32 %v6244_v38, %v6132_v41  ;;  %6425 = vmatmul.f32.gmra.mxu2 %v6333_v45  ;;  %v526_v38 = vld [vmem:[#allocation7 + $0xa40] sm:$0xff]  ;;  %v6025_v45 = vadd.f32 %v13315_v32, %v5912_v51  ;;  %v5915_v32 = vadd.f32 %v13321_v31, %v13415_v37 }
 0xd9f   : > { %6178 = vmatmul.f32.gmra.mxu0 %v13264_v10  ;;  %6291 = vmatmul.f32.gmra.mxu1 %v13267_v34  ;;  %v522_v31 = vld [vmem:[#allocation7 + $0xa00] sm:$0xff] }
 0xda0   : > { %v6334_v60 = vmax.f32 %v6245_v22, 0.0  ;;  %7079 = vmatpush.msra.mxu1 %v526_v38  ;;  %v507_v38 = vld [vmem:[#allocation7 + $0x910] sm:$0xff] }
 0xda2   : > { %6538 = vmatmul.f32.gmra.mxu3 %v6334_v60  ;;  %7080 = vmatpush.msra.mxu1 %v525_v54 }
 0xda3   : > { %v6134_v18 = vpop.f32.mrf.mxu0  ;;  %v6247_v15 = vpop.f32.mrf.mxu1 }
 0xda4   : > { %v6135_v56 = vadd.f32 %v6134_v18, %v13434_v13  ;;  %v524_v18 = vld [vmem:[#allocation7 + $0xa20] sm:$0xff] }
 0xda5   : > { %7081 = vmatpush.msra.mxu1 %v524_v18  ;;  %v505_v18 = vld [vmem:[#allocation7 + $0x8f0] sm:$0xff] }
 0xda6   : > { %6428 = vmatmul.f32.gmra.mxu2 %v6335_v21  ;;  %v6248_v59 = vadd.f32 %v6247_v15, %v6135_v56  ;;  %v508_v21 = vld [vmem:[#allocation7 + $0x920] sm:$0xff]  ;;  %v6337_v15 = vmax.f32 %v6025_v45, 0.0 }
 0xda7   : > { %6181 = vmatmul.f32.gmra.mxu0 %v13326_v29  ;;  %6294 = vmatmul.f32.gmra.mxu1 %v13329_v24  ;;  %v506_v45 = vld [vmem:[#allocation7 + $0x900] sm:$0xff] }
 0xda8   : > { %v6336_v4 = vmax.f32 %v6248_v59, 0.0  ;;  %v5956_v41 = vpop.f32.mrf.mxu2  ;;  %v6069_v22 = vpop.f32.mrf.mxu3  ;;  %6968 = vmatpush.msra.mxu0 %v508_v21  ;;  %8222 = vmatpush.msrb.mxu2 %v508_v21 }
 0xda9   : > { %v5957_v60 = vadd.f32 %v5956_v41, %v13415_v37  ;;  %v523_v41 = vld [vmem:[#allocation7 + $0xa10] sm:$0xff] }
 0xdaa   : > { %6541 = vmatmul.f32.gmra.mxu3 %v6336_v4  ;;  %6969 = vmatpush.msra.mxu0 %v507_v38 }
 0xdab   : > { %v13521_v51 = vadd.f32 %v6069_v22, %v5957_v60  ;;  %v6137_v56 = vpop.f32.mrf.mxu0  ;;  %v6250_v59 = vpop.f32.mrf.mxu1  ;;  %v6028_v22 = vadd.f32 %v13323_v28, %v5915_v32  ;;  %7082 = vmatpush.msra.mxu1 %v523_v41  ;;  %8223 = vmatpush.msrb.mxu2 %v507_v38  ;;  %v5918_v28 = vadd.f32 %v13335_v40, %v13415_v37  ;;  %v518_v40 = vld [vmem:[#allocation7 + $0x9c0] sm:$0xff] }
 0xdac   : > { %v6138_v39 = vadd.f32 %v6137_v56, %v13434_v13  ;;  %6970 = vmatpush.msra.mxu0 %v506_v45  ;;  %v521_v56 = vld [vmem:[#allocation7 + $0x9f0] sm:$0xff] }
 0xdad   : > { %7083 = vmatpush.msra.mxu1 %v522_v31  ;;  %8224 = vmatpush.msrb.mxu2 %v506_v45  ;;  %v502_v45 = vld [vmem:[#allocation7 + $0x8c0] sm:$0xff] }
 0xdae   : > { %6431 = vmatmul.f32.gmra.mxu2 %v6337_v15  ;;  %v6251_v4 = vadd.f32 %v6250_v59, %v6138_v39  ;;  %6971 = vmatpush.msra.mxu0 %v505_v18  ;;  %v504_v15 = vld [vmem:[#allocation7 + $0x8e0] sm:$0xff]  ;;  %v6339_v39 = vmax.f32 %v6028_v22, 0.0 }
 0xdaf   : > { %6184 = vmatmul.f32.gmra.mxu0 %v13340_v42  ;;  %6297 = vmatmul.f32.gmra.mxu1 %v13343_v62  ;;  %v520_v59 = vld [vmem:[#allocation7 + $0x9e0] sm:$0xff]  ;;  %v503_v62 = vld [vmem:[#allocation7 + $0x8d0] sm:$0xff] }
 0xdb0   : > { %v6338_v26 = vmax.f32 %v6251_v4, 0.0  ;;  %v5959_v54 = vpop.f32.mrf.mxu2  ;;  %v6072_v60 = vpop.f32.mrf.mxu3  ;;  %7084 = vmatpush.msra.mxu1 %v521_v56  ;;  %6972 = vmatpush.msra.mxu0 %v504_v15  ;;  %v15536_v22 = vld [vmem:[#allocation45_spill] sm:$0xff]  ;;  %v517_v42 = vld [vmem:[#allocation7 + $0x9b0] sm:$0xff] }
 0xdb1   : > { %v5960_v21 = vadd.f32 %v5959_v54, %v13415_v37  ;;  %v519_v54 = vld [vmem:[#allocation7 + $0x9d0] sm:$0xff]  ;;  %8225 = vmatpush.msrb.mxu2 %v505_v18 }
 0xdb2   : > { %6544 = vmatmul.f32.gmra.mxu3 %v6338_v26  ;;  %7085 = vmatpush.msra.mxu1 %v520_v59  ;;  %v6031_v26 = vadd.f32 %v15536_v22, %v5918_v28  ;;  %v500_v59 = vld [vmem:[#allocation7 + $0x8a0] sm:$0xff]  ;;  %v499_v22 = vld [vmem:[#allocation7 + $0x890] sm:$0xff] }
 0xdb3   : > { %v13530_v32 = vadd.f32 %v6072_v60, %v5960_v21  ;;  %6973 = vmatpush.msra.mxu0 %v503_v62  ;;  %8226 = vmatpush.msrb.mxu2 %v504_v15  ;;  %v516_v15 = vld [vmem:[#allocation7 + $0x9a0] sm:$0xff] }
 0xdb4   : > { %v6140_v41 = vpop.f32.mrf.mxu0  ;;  %v6253_v4 = vpop.f32.mrf.mxu1  ;;  %7086 = vmatpush.msra.mxu1 %v519_v54 }
 0xdb5   : > { %v6141_v38 = vadd.f32 %v6140_v41, %v13434_v13  ;;  %v501_v41 = vld [vmem:[#allocation7 + $0x8b0] sm:$0xff]  ;;  %6974 = vmatpush.msra.mxu0 %v502_v45  ;;  %8227 = vmatpush.msrb.mxu2 %v503_v62 }
 0xdb6   : > { %6434 = vmatmul.f32.gmra.mxu2 %v6339_v39  ;;  %7087 = vmatpush.msra.mxu1 %v518_v40  ;;  %v6341_v39 = vmax.f32 %v6031_v26, 0.0  ;;  %v515_v62 = vld [vmem:[#allocation7 + $0x990] sm:$0xff] }
 0xdb7   : > { %v6254_v31 = vadd.f32 %v6253_v4, %v6141_v38  ;;  %6187 = vmatmul.f32.gmra.mxu0 %v13354_v35  ;;  %6300 = vmatmul.f32.gmra.mxu1 %v13357_v16  ;;  %v5921_v4 = vadd.f32 %v13349_v46, %v13415_v37  ;;  %v498_v46 = vld [vmem:[#allocation7 + $0x880] sm:$0xff]  ;;  %v15537_v26 = vld [vmem:[#allocation31_spill] sm:$0xff] }
 0xdb8   : > { %6975 = vmatpush.msra.mxu0 %v501_v41  ;;  %7088 = vmatpush.msra.mxu1 %v517_v42 }
 0xdb9   : > { %v6340_v60 = vmax.f32 %v6254_v31, 0.0  ;;  %v5962_v56 = vpop.f32.mrf.mxu2  ;;  %v6075_v21 = vpop.f32.mrf.mxu3  ;;  %8228 = vmatpush.msrb.mxu2 %v502_v45 }
 0xdba   : > { %v5963_v18 = vadd.f32 %v5962_v56, %v13415_v37  ;;  %6976 = vmatpush.msra.mxu0 %v500_v59  ;;  %7089 = vmatpush.msra.mxu1 %v516_v15 }
 0xdbb   : > { %6547 = vmatmul.f32.gmra.mxu3 %v6340_v60  ;;  %v6034_v60 = vadd.f32 %v15537_v26, %v5921_v4  ;;  %8229 = vmatpush.msrb.mxu2 %v501_v41  ;;  %v496_v41 = vld [vmem:[#allocation7 + $0x860] sm:$0xff] }
 0xdbc   : > { %v13539_v28 = vadd.f32 %v6075_v21, %v5963_v18  ;;  %v6143_v38 = vpop.f32.mrf.mxu0  ;;  %v6256_v54 = vpop.f32.mrf.mxu1  ;;  %6977 = vmatpush.msra.mxu0 %v499_v22  ;;  %v514_v18 = vld [vmem:[#allocation7 + $0x980] sm:$0xff]  ;;  %7090 = vmatpush.msra.mxu1 %v515_v62 }
 0xdbd   : > { %v6144_v31 = vadd.f32 %v6143_v38, %v13434_v13  ;;  %v497_v38 = vld [vmem:[#allocation7 + $0x870] sm:$0xff]  ;;  %8230 = vmatpush.msrb.mxu2 %v500_v59 }
 0xdbe   : > { %6437 = vmatmul.f32.gmra.mxu2 %v6341_v39  ;;  %6978 = vmatpush.msra.mxu0 %v498_v46  ;;  %v513_v39 = vld [vmem:[#allocation7 + $0x970] sm:$0xff] }
 0xdbf   : > { %v6257_v40 = vadd.f32 %v6256_v54, %v6144_v31  ;;  %6190 = vmatmul.f32.gmra.mxu0 %v13364_v43  ;;  %6303 = vmatmul.f32.gmra.mxu1 %v13367_v36  ;;  %v6343_v54 = vmax.f32 %v6034_v60, 0.0  ;;  %v5924_v31 = vadd.f32 %v13369_v58, %v13415_v37  ;;  %v512_v36 = vld [vmem:[#allocation7 + $0x960] sm:$0xff]  ;;  %v495_v59 = vld [vmem:[#allocation7 + $0x850] sm:$0xff] }
 0xdc0   : > { %7091 = vmatpush.msra.mxu1 %v514_v18  ;;  %6979 = vmatpush.msra.mxu0 %v497_v38  ;;  %v511_v58 = vld [vmem:[#allocation7 + $0x950] sm:$0xff] }
 0xdc1   : > { %v6342_v56 = vmax.f32 %v6257_v40, 0.0  ;;  %v5965_v42 = vpop.f32.mrf.mxu2  ;;  %v6078_v21 = vpop.f32.mrf.mxu3  ;;  %8231 = vmatpush.msrb.mxu2 %v499_v22  ;;  %v6037_v60 = vadd.f32 %v13371_v11, %v5924_v31 }
 0xdc2   : > { %v5966_v45 = vadd.f32 %v5965_v42, %v13415_v37  ;;  %7092 = vmatpush.msra.mxu1 %v513_v39  ;;  %6980 = vmatpush.msra.mxu0 %v496_v41 }
 0xdc3   : > { %6550 = vmatmul.f32.gmra.mxu3 %v6342_v56  ;;  %8232 = vmatpush.msrb.mxu2 %v498_v46  ;;  %v6345_v22 = vmax.f32 %v6037_v60, 0.0  ;;  %v5930_v60 = vadd.f32 %v13401_v30, %v13415_v37 }
 0xdc4   : > { %v13548_v4 = vadd.f32 %v6078_v21, %v5966_v45  ;;  %v6146_v15 = vpop.f32.mrf.mxu0  ;;  %v6259_v40 = vpop.f32.mrf.mxu1  ;;  %7093 = vmatpush.msra.mxu1 %v512_v36  ;;  %6981 = vmatpush.msra.mxu0 %v495_v59  ;;  %v15538_v45 = vld [vmem:[#allocation36_spill] sm:$0xff] }
 0xdc5   : > { %v6147_v26 = vadd.f32 %v6146_v15, %v13434_v13  ;;  %8233 = vmatpush.msrb.mxu2 %v497_v38  ;;  %v5927_v39 = vadd.f32 %v15538_v45, %v13415_v37 }
 0xdc6   : > { %6440 = vmatmul.f32.gmra.mxu2 %v6343_v54  ;;  %7094 = vmatpush.msra.mxu1 %v511_v58 }
 0xdc7   : > { %v6260_v62 = vadd.f32 %v6259_v40, %v6147_v26  ;;  %6193 = vmatmul.f32.gmra.mxu0 %v13378_v48  ;;  %6306 = vmatmul.f32.gmra.mxu1 %v13381_v19  ;;  %v6040_v46 = vadd.f32 %v13389_v2, %v5927_v39  ;;  %v15539_v2 = vld [vmem:[#allocation34_spill] sm:$0xff] }
 0xdc8   : > { %8234 = vmatpush.msrb.mxu2 %v496_v41 }
 0xdc9   : > { %v6344_v56 = vmax.f32 %v6260_v62, 0.0  ;;  %v5968_v42 = vpop.f32.mrf.mxu2  ;;  %v6081_v21 = vpop.f32.mrf.mxu3  ;;  %v6347_v58 = vmax.f32 %v6040_v46, 0.0 }
 0xdca   : > { %v5969_v18 = vadd.f32 %v5968_v42, %v13415_v37  ;;  %8235 = vmatpush.msrb.mxu2 %v495_v59  ;;  %v15540_v59 = vld [vmem:[#allocation74_spill] sm:$0xff] }
 0xdcb   : > { %6553 = vmatmul.f32.gmra.mxu3 %v6344_v56 }
 0xdcc   : > { %v13557_v54 = vadd.f32 %v6081_v21, %v5969_v18  ;;  %v6149_v15 = vpop.f32.mrf.mxu0  ;;  %v6262_v11 = vpop.f32.mrf.mxu1 }
 0xdcd   : > { %v6150_v36 = vadd.f32 %v6149_v15, %v13434_v13 }
 0xdce   : > { %6443 = vmatmul.f32.gmra.mxu2 %v6345_v22  ;;  %v6043_v22 = vadd.f32 %v15540_v59, %v5930_v60  ;;  %v15543_v60 = vld [vmem:[#allocation55_spill] sm:$0xff] }
 0xdcf   : > { %v6263_v31 = vadd.f32 %v6262_v11, %v6150_v36  ;;  %6196 = vmatmul.f32.gmra.mxu0 %v13392_v5  ;;  %6309 = vmatmul.f32.gmra.mxu1 %v13395_v61  ;;  %v15541_v36 = vld [vmem:[#allocation95_spill] sm:$0xff] }
 0xdd0   : > { %v6349_v30 = vmax.f32 %v6043_v22, 0.0 }
 0xdd1   : > { %v6346_v38 = vmax.f32 %v6263_v31, 0.0  ;;  %v5971_v40 = vpop.f32.mrf.mxu2  ;;  %v6084_v26 = vpop.f32.mrf.mxu3  ;;  %v5933_v31 = vadd.f32 %v15541_v36, %v13415_v37 }
 0xdd2   : > { %v5972_v62 = vadd.f32 %v5971_v40, %v13415_v37 }
 0xdd3   : > { %6556 = vmatmul.f32.gmra.mxu3 %v6346_v38 }
 0xdd4   : > { %v13566_v41 = vadd.f32 %v6084_v26, %v5972_v62  ;;  %v6152_v56 = vpop.f32.mrf.mxu0  ;;  %v6265_v42 = vpop.f32.mrf.mxu1 }
 0xdd5   : > { %v6153_v21 = vadd.f32 %v6152_v56, %v13434_v13  ;;  %v6046_v56 = vadd.f32 %v15543_v60, %v5933_v31  ;;  %v15545_v31 = vld [vmem:[#allocation23_spill] sm:$0xff] }
 0xdd6   : > { %6446 = vmatmul.f32.gmra.mxu2 %v6347_v58  ;;  %v15542_v58 = vld [vmem:[#allocation79_spill] sm:$0xff] }
 0xdd7   : > { %v6266_v18 = vadd.f32 %v6265_v42, %v6153_v21  ;;  %6199 = vmatmul.f32.gmra.mxu0 %v13406_v63  ;;  %6312 = vmatmul.f32.gmra.mxu1 %v15539_v2  ;;  %v6351_v22 = vmax.f32 %v6046_v56, 0.0 }
 0xdd9   : > { %v6348_v45 = vmax.f32 %v6266_v18, 0.0  ;;  %v5974_v39 = vpop.f32.mrf.mxu2  ;;  %v6087_v15 = vpop.f32.mrf.mxu3 }
 0xdda   : > { %v5975_v11 = vadd.f32 %v5974_v39, %v13415_v37 }
 0xddb   : > { %6559 = vmatmul.f32.gmra.mxu3 %v6348_v45  ;;  %v15544_v45 = vld [vmem:[#allocation67_spill] sm:$0xff] }
 0xddc   : > { %v13575_v46 = vadd.f32 %v6087_v15, %v5975_v11  ;;  %v6155_v38 = vpop.f32.mrf.mxu0  ;;  %v6268_v40 = vpop.f32.mrf.mxu1  ;;  %v5936_v39 = vadd.f32 %v15544_v45, %v13415_v37 }
 0xddd   : > { %v6156_v26 = vadd.f32 %v6155_v38, %v13434_v13  ;;  %v6384_v38 = vld [vmem:[#allocation8 + $0x7] ss:$8 sm:$0x3] }
 0xdde   : > { %6449 = vmatmul.f32.gmra.mxu2 %v6349_v30 }
 0xddf   : > { %v6269_v62 = vadd.f32 %v6268_v40, %v6156_v26  ;;  %6202 = vmatmul.f32.gmra.mxu0 %v13424_v8  ;;  %6315 = vmatmul.f32.gmra.mxu1 %v15542_v58  ;;  %v15546_v26 = vld [vmem:[#allocation29_spill] sm:$0xff] }
 0xde1   : > { %v6350_v42 = vmax.f32 %v6269_v62, 0.0  ;;  %v5977_v21 = vpop.f32.mrf.mxu2  ;;  %v6090_v59 = vpop.f32.mrf.mxu3  ;;  %v15547_v62 = vld [vmem:[#allocation97_spill] sm:$0xff] }
 0xde2   : > { %v5978_v18 = vadd.f32 %v5977_v21, %v13415_v37  ;;  %v6049_v60 = vadd.f32 %v15547_v62, %v5936_v39 }
 0xde3   : > { %6562 = vmatmul.f32.gmra.mxu3 %v6350_v42  ;;  %v13590_v42 = vperm.slane %v6384_v38, 0  ;;  %v15548_v38 = vld [vmem:[#allocation25_spill] sm:$0xff] }
 0xde4   : > { %v13584_v15 = vadd.f32 %v6090_v59, %v5978_v18  ;;  %v6158_v11 = vpop.f32.mrf.mxu0  ;;  %v6271_v30 = vpop.f32.mrf.mxu1  ;;  %v6353_v18 = vmax.f32 %v6049_v60, 0.0  ;;  %v5939_v59 = vadd.f32 %v13449_v25, %v13415_v37 }
 0xde5   : > { %v6159_v36 = vadd.f32 %v6158_v11, %v13434_v13 }
 0xde6   : > { %6452 = vmatmul.f32.gmra.mxu2 %v6351_v22 }
 0xde7   : > { %v6272_v40 = vadd.f32 %v6271_v30, %v6159_v36  ;;  %6982 = vmatmul.f32.vlgmr.msra.gmra.mxu0 %v15545_v31  ;;  %7095 = vmatmul.f32.vlgmr.msra.gmra.mxu1 %v15546_v26  ;;  %v6052_v26 = vadd.f32 %v13451_v47, %v5939_v59  ;;  %v15550_v59 = vld [vmem:[#allocation35_spill] sm:$0xff] }
 0xde9   : > { %v6352_v56 = vmax.f32 %v6272_v40, 0.0  ;;  %v6405_v21 = vpop.f32.mrf.mxu2  ;;  %v15549_v40 = vld [vmem:[#allocation33_spill] sm:$0xff] }
 0xdea   : > { %v6406_v45 = vadd.f32 %v6405_v21, %v13590_v42  ;;  %v5942_v21 = vadd.f32 %v13462_v52, %v13415_v37 }
 0xdeb   : > { %6565 = vmatmul.f32.gmra.mxu3 %v6352_v56  ;;  %v6355_v56 = vmax.f32 %v6052_v26, 0.0 }
 0xdec   : > { %v6161_v11 = vpop.f32.mrf.mxu0  ;;  %v6274_v22 = vpop.f32.mrf.mxu1 }
 0xded   : > { %v6162_v30 = vadd.f32 %v6161_v11, %v13434_v13  ;;  %v6518_v36 = vpop.f32.mrf.mxu3 }
 0xdee   : > { %v13596_v31 = vadd.f32 %v6518_v36, %v6406_v45  ;;  %6455 = vmatmul.f32.gmra.mxu2 %v6353_v18 }
 0xdef   : > { %v6275_v39 = vadd.f32 %v6274_v22, %v6162_v30  ;;  %6985 = vmatmul.f32.gmra.mxu0 %v15548_v38  ;;  %7098 = vmatmul.f32.gmra.mxu1 %v15549_v40  ;;  %v6055_v38 = vadd.f32 %v13464_v3, %v5942_v21  ;;  %v15552_v21 = vld [vmem:[#allocation37_spill] sm:$0xff] }
 0xdf0   : > { %v6614_v25 = vsel %vm605_vm0, %v13596_v31, -inf }
 0xdf1   : > { %v6354_v62 = vmax.f32 %v6275_v39, 0.0  ;;  %v6408_v60 = vpop.f32.mrf.mxu2  ;;  %6615 = vmax.xlane.f32.xlu1 %v6614_v25  ;;  %v15551_v39 = vld [vmem:[#allocation43_spill] sm:$0xff]  ;;  %v6357_v25 = vmax.f32 %v6055_v38, 0.0 }
 0xdf2   : > { %v6409_v18 = vadd.f32 %v6408_v60, %v13590_v42 }
 0xdf3   : > { %6568 = vmatmul.f32.gmra.mxu3 %v6354_v62  ;;  %v5945_v62 = vadd.f32 %v13472_v0, %v13415_v37 }
 0xdf4   : > { %v6164_v45 = vpop.f32.mrf.mxu0  ;;  %v6277_v11 = vpop.f32.mrf.mxu1 }
 0xdf5   : > { %v6165_v22 = vadd.f32 %v6164_v45, %v13434_v13  ;;  %v6521_v30 = vpop.f32.mrf.mxu3 }
 0xdf6   : > { %v13607_v36 = vadd.f32 %v6521_v30, %v6409_v18  ;;  %6458 = vmatmul.f32.gmra.mxu2 %v6355_v56  ;;  %v15553_v30 = vld [vmem:[#allocation16_spill] sm:$0xff] }
 0xdf7   : > { %v6278_v47 = vadd.f32 %v6277_v11, %v6165_v22  ;;  %6988 = vmatmul.f32.gmra.mxu0 %v15550_v59  ;;  %7101 = vmatmul.f32.gmra.mxu1 %v15551_v39 }
 0xdf8   : > { %v6617_v52 = vsel %vm605_vm0, %v13607_v36, -inf }
 0xdf9   : > { %v6356_v40 = vmax.f32 %v6278_v47, 0.0  ;;  %v6411_v26 = vpop.f32.mrf.mxu2  ;;  %6618 = vmax.xlane.f32.xlu2 %v6617_v52  ;;  %v6058_v47 = vadd.f32 %v13474_v20, %v5945_v62  ;;  %v5948_v52 = vadd.f32 %v13485_v23, %v13415_v37  ;;  %v15554_v62 = vld [vmem:[#allocation41_spill] sm:$0xff] }
 0xdfa   : > { %v6412_v60 = vadd.f32 %v6411_v26, %v13590_v42 }
 0xdfb   : > { %6571 = vmatmul.f32.gmra.mxu3 %v6356_v40  ;;  %v6359_v38 = vmax.f32 %v6058_v47, 0.0  ;;  %v5951_v47 = vadd.f32 %v13495_v6, %v13415_v37 }
 0xdfc   : > { %v6167_v56 = vpop.f32.mrf.mxu0  ;;  %v6280_v18 = vpop.f32.mrf.mxu1 }
 0xdfd   : > { %v6168_v45 = vadd.f32 %v6167_v56, %v13434_v13  ;;  %v6524_v11 = vpop.f32.mrf.mxu3 }
 0xdfe   : > { %v13618_v22 = vadd.f32 %v6524_v11, %v6412_v60  ;;  %6461 = vmatmul.f32.gmra.mxu2 %v6357_v25  ;;  %v6061_v11 = vadd.f32 %v13487_v7, %v5948_v52  ;;  %v15556_v52 = vld [vmem:[#allocation51_spill] sm:$0xff] }
 0xdff   : > { %v6281_v3 = vadd.f32 %v6280_v18, %v6168_v45  ;;  %6991 = vmatmul.f32.gmra.mxu0 %v15552_v21  ;;  %7104 = vmatmul.f32.gmra.mxu1 %v15553_v30  ;;  %v15555_v45 = vld [vmem:[#allocation54_spill] sm:$0xff] }
 0xe00   : > { %v6620_v0 = vsel %vm605_vm0, %v13618_v22, -inf  ;;  %v6361_v30 = vmax.f32 %v6061_v11, 0.0 }
 0xe01   : > { %v6358_v59 = vmax.f32 %v6281_v3, 0.0  ;;  %v6414_v39 = vpop.f32.mrf.mxu2  ;;  %6621 = vmax.xlane.f32.xlu0 %v6620_v0 }
 0xe02   : > { %v6415_v40 = vadd.f32 %v6414_v39, %v13590_v42 }
 0xe03   : > { %6574 = vmatmul.f32.gmra.mxu3 %v6358_v59 }
 0xe04   : > { %v6170_v26 = vpop.f32.mrf.mxu0  ;;  %v6283_v25 = vpop.f32.mrf.mxu1 }
 0xe05   : > { %v6171_v60 = vadd.f32 %v6170_v26, %v13434_v13  ;;  %v6527_v56 = vpop.f32.mrf.mxu3 }
 0xe06   : > { %v13629_v18 = vadd.f32 %v6527_v56, %v6415_v40  ;;  %6464 = vmatmul.f32.gmra.mxu2 %v6359_v38 }
 0xe07   : > { %v6284_v20 = vadd.f32 %v6283_v25, %v6171_v60  ;;  %6994 = vmatmul.f32.gmra.mxu0 %v15554_v62  ;;  %7107 = vmatmul.f32.gmra.mxu1 %v15555_v45  ;;  %v15557_v25 = vld [vmem:[#allocation26_spill] sm:$0xff]  ;;  %v6064_v60 = vadd.f32 %v13497_v9, %v5951_v47  ;;  %v5954_v45 = vadd.f32 %v13508_v49, %v13415_v37 }
 0xe08   : > { %v6623_v23 = vsel %vm605_vm0, %v13629_v18, -inf  ;;  %v15558_v47 = vld [vmem:[#allocation22_spill] sm:$0xff] }
 0xe09   : > { %v6360_v3 = vmax.f32 %v6284_v20, 0.0  ;;  %v6417_v21 = vpop.f32.mrf.mxu2  ;;  %6624 = vmax.xlane.f32.xlu1 %v6623_v23  ;;  %v6363_v62 = vmax.f32 %v6064_v60, 0.0 }
 0xe0a   : > { %v6418_v0 = vadd.f32 %v6417_v21, %v13590_v42 }
 0xe0b   : > { %6577 = vmatmul.f32.gmra.mxu3 %v6360_v3 }
 0xe0c   : > { %v6173_v59 = vpop.f32.mrf.mxu0  ;;  %v6286_v39 = vpop.f32.mrf.mxu1 }
 0xe0d   : > { %v6174_v38 = vadd.f32 %v6173_v59, %v13434_v13  ;;  %v6530_v40 = vpop.f32.mrf.mxu3  ;;  %v15559_v59 = vld [vmem:[#allocation60_spill] sm:$0xff] }
 0xe0e   : > { %v13640_v26 = vadd.f32 %v6530_v40, %v6418_v0  ;;  %6467 = vmatmul.f32.gmra.mxu2 %v6361_v30 }
 0xe0f   : > { %v6287_v7 = vadd.f32 %v6286_v39, %v6174_v38  ;;  %6997 = vmatmul.f32.gmra.mxu0 %v15556_v52  ;;  %7110 = vmatmul.f32.gmra.mxu1 %v15557_v25  ;;  %v6067_v39 = vadd.f32 %v13510_v57, %v5954_v45  ;;  %v15560_v57 = vld [vmem:[#allocation56_spill] sm:$0xff] }
 0xe10   : > { %v6626_v6 = vsel %vm605_vm0, %v13640_v26, -inf }
 0xe11   : > { %v6362_v56 = vmax.f32 %v6287_v7, 0.0  ;;  %v6420_v20 = vpop.f32.mrf.mxu2  ;;  %6627 = vmax.xlane.f32.xlu2 %v6626_v6  ;;  %v6365_v40 = vmax.f32 %v6067_v39, 0.0 }
 0xe12   : > { %v6421_v11 = vadd.f32 %v6420_v20, %v13590_v42 }
 0xe13   : > { %6580 = vmatmul.f32.gmra.mxu3 %v6362_v56 }
 0xe14   : > { %v6176_v23 = vpop.f32.mrf.mxu0  ;;  %v6289_v3 = vpop.f32.mrf.mxu1 }
 0xe15   : > { %v6177_v21 = vadd.f32 %v6176_v23, %v13434_v13  ;;  %v6533_v30 = vpop.f32.mrf.mxu3 }
 0xe16   : > { %v13651_v0 = vadd.f32 %v6533_v30, %v6421_v11  ;;  %6470 = vmatmul.f32.gmra.mxu2 %v6363_v62  ;;  %v15561_v62 = vld [vmem:[#allocation38_spill] sm:$0xff] }
 0xe17   : > { %v6290_v9 = vadd.f32 %v6289_v3, %v6177_v21  ;;  %7000 = vmatmul.f32.gmra.mxu0 %v15558_v47  ;;  %7113 = vmatmul.f32.gmra.mxu1 %v15559_v59  ;;  %v6367_v3 = vmax.f32 %v13521_v51, 0.0  ;;  %v6369_v51 = vmax.f32 %v13530_v32, 0.0 }
 0xe18   : > { %v6629_v37 = vsel %vm605_vm0, %v13651_v0, -inf }
 0xe19   : > { %v6364_v49 = vmax.f32 %v6290_v9, 0.0  ;;  %v6423_v38 = vpop.f32.mrf.mxu2  ;;  %6630 = vmax.xlane.f32.xlu0 %v6629_v37 }
 0xe1a   : > { %v6424_v7 = vadd.f32 %v6423_v38, %v13590_v42  ;;  %v15563_v38 = vld [vmem:[#allocation28_spill] sm:$0xff] }
 0xe1b   : > { %6583 = vmatmul.f32.gmra.mxu3 %v6364_v49  ;;  %v15562_v49 = vld [vmem:[#allocation32_spill] sm:$0xff] }
 0xe1c   : > { %v6179_v52 = vpop.f32.mrf.mxu0  ;;  %v6292_v25 = vpop.f32.mrf.mxu1 }
 0xe1d   : > { %v6180_v60 = vadd.f32 %v6179_v52, %v13434_v13  ;;  %v6536_v6 = vpop.f32.mrf.mxu3 }
 0xe1e   : > { %v13660_v56 = vadd.f32 %v6536_v6, %v6424_v7  ;;  %6473 = vmatmul.f32.gmra.mxu2 %v6365_v40 }
 0xe1f   : > { %v6293_v20 = vadd.f32 %v6292_v25, %v6180_v60  ;;  %7003 = vmatmul.f32.gmra.mxu0 %v15560_v57  ;;  %7116 = vmatmul.f32.gmra.mxu1 %v15561_v62  ;;  %v15565_v57 = vld [vmem:[#allocation64_spill] sm:$0xff] }
 0xe20   : > { %v6632_v45 = vsel %vm605_vm0, %v13660_v56, -inf }
 0xe21   : > { %v6366_v11 = vmax.f32 %v6293_v20, 0.0  ;;  %v6426_v23 = vpop.f32.mrf.mxu2  ;;  %6633 = vmax.xlane.f32.xlu1 %v6632_v45  ;;  %v15564_v20 = vld [vmem:[#allocation21_spill] sm:$0xff]  ;;  %v6371_v45 = vmax.f32 %v13539_v28, 0.0 }
 0xe22   : > { %v6427_v21 = vadd.f32 %v6426_v23, %v13590_v42 }
 0xe23   : > { %6586 = vmatmul.f32.gmra.mxu3 %v6366_v11 }
 0xe24   : > { %v6182_v30 = vpop.f32.mrf.mxu0  ;;  %v6295_v9 = vpop.f32.mrf.mxu1 }
 0xe25   : > { %v6183_v47 = vadd.f32 %v6182_v30, %v13434_v13  ;;  %v6539_v59 = vpop.f32.mrf.mxu3  ;;  %v15567_v30 = vld [vmem:[#allocation71_spill] sm:$0xff] }
 0xe26   : > { %v13669_v39 = vadd.f32 %v6539_v59, %v6427_v21  ;;  %6476 = vmatmul.f32.gmra.mxu2 %v6367_v3  ;;  %v15566_v21 = vld [vmem:[#allocation30_spill] sm:$0xff] }
 0xe27   : > { %v6296_v37 = vadd.f32 %v6295_v9, %v6183_v47  ;;  %7006 = vmatmul.f32.gmra.mxu0 %v15562_v49  ;;  %7119 = vmatmul.f32.gmra.mxu1 %v15563_v38  ;;  %v6373_v47 = vmax.f32 %v13548_v4, 0.0  ;;  %v15568_v38 = vld [vmem:[#allocation66_spill] sm:$0xff] }
 0xe28   : > { %v6635_v40 = vsel %vm605_vm0, %v13669_v39, -inf }
 0xe29   : > { %v6368_v7 = vmax.f32 %v6296_v37, 0.0  ;;  %6636 = vmax.xlane.f32.xlu0 %v6635_v40  ;;  %v15569_v40 = vld [vmem:[#allocation46_spill] sm:$0xff] }
 0xe2b   : > { %6589 = vmatmul.f32.gmra.mxu3 %v6368_v7 }
 0xe2c   : > { %v6185_v52 = vpop.f32.mrf.mxu0  ;;  %v6298_v25 = vpop.f32.mrf.mxu1 }
 0xe2d   : > { %v6186_v60 = vadd.f32 %v6185_v52, %v13434_v13 }
 0xe2e   : > { %6479 = vmatmul.f32.gmra.mxu2 %v6369_v51  ;;  %v6375_v51 = vmax.f32 %v13557_v54, 0.0 }
 0xe2f   : > { %v6299_v6 = vadd.f32 %v6298_v25, %v6186_v60  ;;  %7009 = vmatmul.f32.gmra.mxu0 %v15564_v20  ;;  %7122 = vmatmul.f32.gmra.mxu1 %v15565_v57  ;;  %v15571_v20 = vld [vmem:[#allocation70_spill] sm:$0xff] }
 0xe31   : > { %v6370_v62 = vmax.f32 %v6299_v6, 0.0  ;;  %v15570_v6 = vld [vmem:[#allocation68_spill] sm:$0xff] }
 0xe33   : > { %6592 = vmatmul.f32.gmra.mxu3 %v6370_v62  ;;  %v6377_v62 = vmax.f32 %v13566_v41, 0.0 }
 0xe34   : > { %v6188_v11 = vpop.f32.mrf.mxu0  ;;  %v6301_v23 = vpop.f32.mrf.mxu1 }
 0xe35   : > { %v6189_v3 = vadd.f32 %v6188_v11, %v13434_v13 }
 0xe36   : > { %6482 = vmatmul.f32.gmra.mxu2 %v6371_v45 }
 0xe37   : > { %v6302_v32 = vadd.f32 %v6301_v23, %v6189_v3  ;;  %7012 = vmatmul.f32.gmra.mxu0 %v15566_v21  ;;  %7125 = vmatmul.f32.gmra.mxu1 %v15567_v30  ;;  %v15572_v3 = vld [vmem:[#allocation77_spill] sm:$0xff]  ;;  %v6379_v30 = vmax.f32 %v13575_v46, 0.0 }
 0xe39   : > { %v6372_v9 = vmax.f32 %v6302_v32, 0.0  ;;  %v15573_v32 = vld [vmem:[#allocation42_spill] sm:$0xff] }
 0xe3b   : > { %6595 = vmatmul.f32.gmra.mxu3 %v6372_v9 }
 0xe3c   : > { %v6191_v59 = vpop.f32.mrf.mxu0  ;;  %v6304_v37 = vpop.f32.mrf.mxu1 }
 0xe3d   : > { %v6192_v49 = vadd.f32 %v6191_v59, %v13434_v13 }
 0xe3e   : > { %6485 = vmatmul.f32.gmra.mxu2 %v6373_v47 }
 0xe3f   : > { %v6305_v28 = vadd.f32 %v6304_v37, %v6192_v49  ;;  %7015 = vmatmul.f32.gmra.mxu0 %v15568_v38  ;;  %7128 = vmatmul.f32.gmra.mxu1 %v15569_v40  ;;  %v15574_v37 = vld [vmem:[#allocation73_spill] sm:$0xff]  ;;  %v15575_v49 = vld [vmem:[#allocation47_spill] sm:$0xff]  ;;  %v6381_v38 = vmax.f32 %v13584_v15, 0.0 }
 0xe40   : > { %v15578_v15 = vld [vmem:[#allocation57_spill] sm:$0xff] }
 0xe41   : > { %v6374_v7 = vmax.f32 %v6305_v28, 0.0 }
 0xe43   : > { %6598 = vmatmul.f32.gmra.mxu3 %v6374_v7 }
 0xe44   : > { %v6194_v52 = vpop.f32.mrf.mxu0  ;;  %v6307_v25 = vpop.f32.mrf.mxu1 }
 0xe45   : > { %v6195_v60 = vadd.f32 %v6194_v52, %v13434_v13  ;;  %v15576_v52 = vld [vmem:[#allocation52_spill] sm:$0xff] }
 0xe46   : > { %6488 = vmatmul.f32.gmra.mxu2 %v6375_v51 }
 0xe47   : > { %v6308_v4 = vadd.f32 %v6307_v25, %v6195_v60  ;;  %7018 = vmatmul.f32.gmra.mxu0 %v15570_v6  ;;  %7131 = vmatmul.f32.gmra.mxu1 %v15571_v20  ;;  %v15577_v25 = vld [vmem:[#allocation69_spill] sm:$0xff]  ;;  %v6542_v6 = vpop.f32.mrf.mxu3 }
 0xe49   : > { %v6376_v57 = vmax.f32 %v6308_v4, 0.0  ;;  %v6429_v4 = vpop.f32.mrf.mxu2 }
 0xe4b   : > { %6601 = vmatmul.f32.gmra.mxu3 %v6376_v57 }
 0xe4c   : > { %v6197_v45 = vpop.f32.mrf.mxu0  ;;  %v6310_v11 = vpop.f32.mrf.mxu1 }
 0xe4d   : > { %v6198_v23 = vadd.f32 %v6197_v45, %v13434_v13 }
 0xe4e   : > { %6491 = vmatmul.f32.gmra.mxu2 %v6377_v62 }
 0xe4f   : > { %v6311_v54 = vadd.f32 %v6310_v11, %v6198_v23  ;;  %7021 = vmatmul.f32.gmra.mxu0 %v15572_v3  ;;  %7134 = vmatmul.f32.gmra.mxu1 %v15573_v32  ;;  %v6545_v11 = vpop.f32.mrf.mxu3 }
 0xe51   : > { %v6378_v21 = vmax.f32 %v6311_v54, 0.0  ;;  %v6432_v62 = vpop.f32.mrf.mxu2 }
 0xe53   : > { %6604 = vmatmul.f32.gmra.mxu3 %v6378_v21 }
 0xe54   : > { %v6200_v9 = vpop.f32.mrf.mxu0  ;;  %v6313_v47 = vpop.f32.mrf.mxu1 }
 0xe55   : > { %v6201_v59 = vadd.f32 %v6200_v9, %v13434_v13 }
 0xe56   : > { %6494 = vmatmul.f32.gmra.mxu2 %v6379_v30 }
 0xe57   : > { %v6314_v41 = vadd.f32 %v6313_v47, %v6201_v59  ;;  %7024 = vmatmul.f32.gmra.mxu0 %v15574_v37  ;;  %7137 = vmatmul.f32.gmra.mxu1 %v15575_v49  ;;  %v6548_v30 = vpop.f32.mrf.mxu3  ;;  %v15580_v49 = vld [vmem:[#allocation83_spill] sm:$0xff] }
 0xe59   : > { %v6380_v28 = vmax.f32 %v6314_v41, 0.0  ;;  %v6435_v21 = vpop.f32.mrf.mxu2  ;;  %v6433_v41 = vadd.f32 %v6432_v62, %v13590_v42 }
 0xe5b   : > { %6607 = vmatmul.f32.gmra.mxu3 %v6380_v28 }
 0xe5c   : > { %v6203_v40 = vpop.f32.mrf.mxu0  ;;  %v6316_v51 = vpop.f32.mrf.mxu1 }
 0xe5d   : > { %v6204_v7 = vadd.f32 %v6203_v40, %v13434_v13 }
 0xe5e   : > { %6497 = vmatmul.f32.gmra.mxu2 %v6381_v38 }
 0xe5f   : > { %v6317_v46 = vadd.f32 %v6316_v51, %v6204_v7  ;;  %7027 = vmatmul.f32.gmra.mxu0 %v15576_v52  ;;  %7140 = vmatmul.f32.gmra.mxu1 %v15577_v25 }
 0xe61   : > { %v6382_v60 = vmax.f32 %v6317_v46, 0.0  ;;  %v6438_v38 = vpop.f32.mrf.mxu2  ;;  %v6551_v46 = vpop.f32.mrf.mxu3 }
 0xe63   : > { %6610 = vmatmul.f32.gmra.mxu3 %v6382_v60  ;;  %v15581_v60 = vld [vmem:[#allocation15_spill] sm:$0xff] }
 0xe64   : > { %v6616_v20 = vpop.xlane.xlu1 %6615 }
 0xe65   : > { %v6710_v57 = vsub.f32 %v13596_v31, %v6616_v20 }
 0xe66   : > { %7075 = vmatmul.f32.vlgmr.msrb.gmra.mxu2 %v13424_v8 }
 0xe67   : > { %7030 = vmatmul.f32.gmra.mxu0 %v13178_v1  ;;  %7143 = vmatmul.f32.gmra.mxu1 %v15578_v15  ;;  %v6742_v13 = vmul.f32 1.442695, %v6710_v57  ;;  %v6430_v1 = vadd.f32 %v6429_v4, %v13590_v42 }
 0xe69   : > { %8448 = vpow2.f32 %v6742_v13  ;;  %v13715_v3 = vadd.f32 %v6542_v6, %v6430_v1  ;;  %v6441_v15 = vpop.f32.mrf.mxu2  ;;  %v6439_v13 = vadd.f32 %v6438_v38, %v13590_v42 }
 0xe6a   : > { %v6442_v1 = vadd.f32 %v6441_v15, %v13590_v42  ;;  %v15583_v15 = vld [vmem:[#allocation39_spill] sm:$0xff] }
 0xe6b   : > { %v6638_v59 = vsel %vm605_vm0, %v13715_v3, -inf  ;;  %v13751_v62 = vadd.f32 %v6551_v46, %v6439_v13 }
 0xe6c   : > { %v6619_v45 = vpop.xlane.xlu2 %6618 }
 0xe6d   : > { %v6711_v23 = vsub.f32 %v13607_v36, %v6619_v45 }
 0xe6f   : > { %7033 = vmatmul.f32.gmra.mxu0 %v15529_v55  ;;  %7146 = vmatmul.f32.gmra.mxu1 %v15530_v53  ;;  %v13710_v54 = vpop.eup %8448  ;;  %v6744_v31 = vmul.f32 1.442695, %v6711_v23  ;;  %v15579_v55 = vld [vmem:[#allocation61_spill] sm:$0xff] }
 0xe70   : > { %v6806_v8 = vsel %vm605_vm0, %v13710_v54, 0.0 }
 0xe71   : > { %8450 = vpow2.f32 %v6744_v31  ;;  %6807 = vadd.xlane.f32.xlu2 %v6806_v8  ;;  %v6647_v8 = vsel %vm605_vm0, %v13751_v62, -inf }
 0xe74   : > { %v6622_v32 = vpop.xlane.xlu0 %6621 }
 0xe75   : > { %v6712_v36 = vsub.f32 %v13618_v22, %v6622_v32  ;;  %v13727_v22 = vadd.f32 %v6545_v11, %v6433_v41  ;;  %v6444_v32 = vpop.f32.mrf.mxu2 }
 0xe77   : > { %7036 = vmatmul.f32.gmra.mxu0 %v13197_v14  ;;  %7149 = vmatmul.f32.gmra.mxu1 %v15579_v55  ;;  %v13720_v53 = vpop.eup %8450  ;;  %v6746_v9 = vmul.f32 1.442695, %v6712_v36  ;;  %v6641_v51 = vsel %vm605_vm0, %v13727_v22, -inf }
 0xe78   : > { %v6809_v47 = vsel %vm605_vm0, %v13720_v53, 0.0 }
 0xe79   : > { %8452 = vpow2.f32 %v6746_v9  ;;  %6810 = vadd.xlane.f32.xlu1 %v6809_v47  ;;  %6639 = vmax.xlane.f32.xlu2 %v6638_v59  ;;  %v13777_v59 = vpop.f32.mrf.mxu0 }
 0xe7c   : > { %v6625_v14 = vpop.xlane.xlu1 %6624 }
 0xe7d   : > { %v6713_v37 = vsub.f32 %v13629_v18, %v6625_v14  ;;  %v6436_v18 = vadd.f32 %v6435_v21, %v13590_v42  ;;  %v6447_v41 = vpop.f32.mrf.mxu2 }
 0xe7f   : > { %7039 = vmatmul.f32.gmra.mxu0 %v13208_v12  ;;  %7152 = vmatmul.f32.gmra.mxu1 %v15580_v49  ;;  %v13732_v28 = vpop.eup %8452  ;;  %v6748_v40 = vmul.f32 1.442695, %v6713_v37  ;;  %v13739_v52 = vadd.f32 %v6548_v30, %v6436_v18  ;;  %v13770_v30 = vpop.f32.mrf.mxu1 }
 0xe80   : > { %v6812_v7 = vsel %vm605_vm0, %v13732_v28, 0.0 }
 0xe81   : > { %8454 = vpow2.f32 %v6748_v40  ;;  %6813 = vadd.xlane.f32.xlu0 %v6812_v7  ;;  %6642 = vmax.xlane.f32.xlu1 %v6641_v51  ;;  %v6644_v20 = vsel %vm605_vm0, %v13739_v52, -inf  ;;  %v6448_v51 = vadd.f32 %v6447_v41, %v13590_v42 }
 0xe84   : > { %v6628_v12 = vpop.xlane.xlu2 %6627 }
 0xe85   : > { %v6714_v25 = vsub.f32 %v13640_v26, %v6628_v12  ;;  %v6554_v26 = vpop.f32.mrf.mxu3  ;;  %v6450_v18 = vpop.f32.mrf.mxu2 }
 0xe87   : > { %7042 = vmatmul.f32.gmra.mxu0 %v13219_v27  ;;  %7155 = vmatmul.f32.gmra.mxu1 %v15581_v60  ;;  %v13744_v4 = vpop.eup %8454  ;;  %v6750_v6 = vmul.f32 1.442695, %v6714_v25 }
 0xe88   : > { %v6815_v57 = vsel %vm605_vm0, %v13744_v4, 0.0 }
 0xe89   : > { %8456 = vpow2.f32 %v6750_v6  ;;  %6645 = vmax.xlane.f32.xlu0 %v6644_v20  ;;  %6816 = vadd.xlane.f32.xlu2 %v6815_v57  ;;  %v6451_v6 = vadd.f32 %v6450_v18, %v13590_v42 }
 0xe8c   : > { %v6631_v27 = vpop.xlane.xlu0 %6630 }
 0xe8d   : > { %v6715_v45 = vsub.f32 %v13651_v0, %v6631_v27  ;;  %v13763_v0 = vadd.f32 %v6554_v26, %v6442_v1  ;;  %v6557_v21 = vpop.f32.mrf.mxu3  ;;  %v534_v1 = vld [vmem:[#allocation7 + $0xa88] sm:$0xff] }
 0xe8e   : > { %7452 = vmatpush.msrb.mxu3 %v534_v1 }
 0xe8f   : > { %7045 = vmatmul.f32.gmra.mxu0 %v15534_v44  ;;  %7158 = vmatmul.f32.gmra.mxu1 %v15535_v50  ;;  %v13756_v11 = vpop.eup %8456  ;;  %v6752_v23 = vmul.f32 1.442695, %v6715_v45  ;;  %v6650_v47 = vsel %vm605_vm0, %v13763_v0, -inf  ;;  %v15584_v45 = vld [vmem:[#allocation76_spill] sm:$0xff] }
 0xe90   : > { %v6818_v31 = vsel %vm605_vm0, %v13756_v11, 0.0 }
 0xe91   : > { %8458 = vpow2.f32 %v6752_v23  ;;  %6819 = vadd.xlane.f32.xlu1 %v6818_v31  ;;  %6648 = vmax.xlane.f32.xlu2 %v6647_v8  ;;  %v533_v8 = vld [vmem:[#allocation7 + $0xa80] sm:$0xff] }
 0xe92   : > { %7339 = vmatpush.msra.mxu2 %v533_v8 }
 0xe94   : > { %v6634_v44 = vpop.xlane.xlu1 %6633 }
 0xe95   : > { %v6716_v50 = vsub.f32 %v13660_v56, %v6634_v44  ;;  %v6445_v56 = vadd.f32 %v6444_v32, %v13590_v42  ;;  %v6560_v49 = vpop.f32.mrf.mxu3  ;;  %v532_v32 = vld [vmem:[#allocation7 + $0xa78] sm:$0xff]  ;;  %v6453_v44 = vpop.f32.mrf.mxu2 }
 0xe96   : > { %7453 = vmatpush.msrb.mxu3 %v532_v32 }
 0xe97   : > { %7048 = vmatmul.f32.gmra.mxu0 %v13249_v33  ;;  %7161 = vmatmul.f32.gmra.mxu1 %v13252_v17  ;;  %v13768_v36 = vpop.eup %8458  ;;  %v6754_v55 = vmul.f32 1.442695, %v6716_v50  ;;  %v13779_v33 = vadd.f32 %v6557_v21, %v6445_v56  ;;  %v529_v21 = vld [vmem:[#allocation7 + $0xa60] sm:$0xff]  ;;  %v530_v50 = vld [vmem:[#allocation7 + $0xa68] sm:$0xff] }
 0xe98   : > { %v6821_v9 = vsel %vm605_vm0, %v13768_v36, 0.0  ;;  %7454 = vmatpush.msrb.mxu3 %v530_v50 }
 0xe99   : > { %8460 = vpow2.f32 %v6754_v55  ;;  %6822 = vadd.xlane.f32.xlu0 %v6821_v9  ;;  %6651 = vmax.xlane.f32.xlu1 %v6650_v47  ;;  %v6653_v40 = vsel %vm605_vm0, %v13779_v33, -inf }
 0xe9c   : > { %v6637_v17 = vpop.xlane.xlu0 %6636 }
 0xe9d   : > { %v6717_v14 = vsub.f32 %v13669_v39, %v6637_v17  ;;  %v13791_v39 = vpop.f32.mrf.mxu1  ;;  %v6563_v60 = vpop.f32.mrf.mxu3 }
 0xe9e   : > { %v13806_v20 = vadd.f32 %v6563_v60, %v6451_v6  ;;  %v6456_v47 = vpop.f32.mrf.mxu2 }
 0xe9f   : > { %7051 = vmatmul.f32.gmra.mxu0 %v13264_v10  ;;  %7164 = vmatmul.f32.gmra.mxu1 %v13267_v34  ;;  %v13784_v37 = vpop.eup %8460  ;;  %v6756_v38 = vmul.f32 1.442695, %v6717_v14  ;;  %v13793_v10 = vadd.f32 %v6560_v49, %v6448_v51  ;;  %v13795_v34 = vpop.f32.mrf.mxu0 }
 0xea0   : > { %v6824_v7 = vsel %vm605_vm0, %v13784_v37, 0.0  ;;  %v6659_v13 = vsel %vm605_vm0, %v13806_v20, -inf }
 0xea1   : > { %8462 = vpow2.f32 %v6756_v38  ;;  %6654 = vmax.xlane.f32.xlu0 %v6653_v40  ;;  %6825 = vadd.xlane.f32.xlu2 %v6824_v7  ;;  %v6656_v25 = vsel %vm605_vm0, %v13793_v10, -inf  ;;  %v7097_v40 = vadd.f32 %v13770_v30, %v13777_v59 }
 0xea5   : > { %v13808_v57 = vpop.f32.mrf.mxu1  ;;  %v6566_v9 = vpop.f32.mrf.mxu3 }
 0xea7   : > { %7054 = vmatmul.f32.gmra.mxu0 %v13326_v29  ;;  %7167 = vmatmul.f32.gmra.mxu1 %v13329_v24  ;;  %v13799_v46 = vpop.eup %8462  ;;  %v13810_v29 = vpop.f32.mrf.mxu0  ;;  %v15582_v24 = vld [vmem:[#allocation72_spill] sm:$0xff] }
 0xea8   : > { %v6827_v12 = vsel %vm605_vm0, %v13799_v46, 0.0 }
 0xea9   : > { %6828 = vadd.xlane.f32.xlu1 %v6827_v12  ;;  %6657 = vmax.xlane.f32.xlu2 %v6656_v25 }
 0xead   : > { %v13816_v26 = vpop.f32.mrf.mxu1 }
 0xeaf   : > { %7057 = vmatmul.f32.gmra.mxu0 %v15582_v24  ;;  %7170 = vmatmul.f32.gmra.mxu1 %v15583_v15  ;;  %v13820_v27 = vpop.f32.mrf.mxu0 }
 0xeb1   : > { %6660 = vmax.xlane.f32.xlu1 %v6659_v13 }
 0xeb5   : > { %v13824_v23 = vpop.f32.mrf.mxu1 }
 0xeb7   : > { %7060 = vmatmul.f32.gmra.mxu0 %v13354_v35  ;;  %7173 = vmatmul.f32.gmra.mxu1 %v13357_v16  ;;  %v13826_v31 = vpop.f32.mrf.mxu0  ;;  %v531_v16 = vld [vmem:[#allocation7 + $0xa70] sm:$0xff] }
 0xeb8   : > { %7340 = vmatpush.msra.mxu2 %v531_v16 }
 0xeba   : > { %7341 = vmatpush.msra.mxu2 %v529_v21 }
 0xebd   : > { %v13830_v35 = vpop.f32.mrf.mxu1 }
 0xebf   : > { %7063 = vmatmul.f32.gmra.mxu0 %v13364_v43  ;;  %7176 = vmatmul.f32.gmra.mxu1 %v15584_v45  ;;  %v13832_v43 = vpop.f32.mrf.mxu0 }
 0xec5   : > { %v13836_v55 = vpop.f32.mrf.mxu1 }
 0xec7   : > { %7066 = vmatmul.f32.gmra.mxu0 %v13378_v48  ;;  %7179 = vmatmul.f32.gmra.mxu1 %v13381_v19  ;;  %v527_v48 = vld [vmem:[#allocation7 + $0xa50] sm:$0xff]  ;;  %v528_v19 = vld [vmem:[#allocation7 + $0xa58] sm:$0xff]  ;;  %v13838_v56 = vpop.f32.mrf.mxu0 }
 0xec8   : > { %7342 = vmatpush.msra.mxu2 %v527_v48  ;;  %7455 = vmatpush.msrb.mxu3 %v528_v19 }
 0xecd   : > { %v13842_v17 = vpop.f32.mrf.mxu1 }
 0xecf   : > { %7069 = vmatmul.f32.gmra.mxu0 %v13392_v5  ;;  %7182 = vmatmul.f32.gmra.mxu1 %v13395_v61  ;;  %v6569_v5 = vpop.f32.mrf.mxu3  ;;  %v13845_v61 = vpop.f32.mrf.mxu2 }
 0xed7   : > { %7072 = vmatmul.f32.gmra.mxu0 %v13406_v63  ;;  %7185 = vmatmul.f32.gmra.mxu1 %v15539_v2  ;;  %v13847_v14 = vpop.f32.mrf.mxu3  ;;  %v13849_v49 = vpop.f32.mrf.mxu2 }
 0xedf   : > { %7188 = vmatmul.f32.gmra.mxu1 %v15542_v58  ;;  %v13857_v25 = vpop.f32.mrf.mxu3  ;;  %v13859_v60 = vpop.f32.mrf.mxu2 }
 0xee4   : > { %v6808_v41 = vpop.xlane.xlu2 %6807 }
 0xee5   : > { %8464 = vrcp.f32 %v6808_v41  ;;  %v13893_v41 = vpop.f32.mrf.mxu1 }
 0xee7   : > { %v13877_v32 = vpop.f32.mrf.mxu3  ;;  %v13879_v21 = vpop.f32.mrf.mxu2 }
 0xeeb   : > { %v8465_v38 = vpop.eup %8464 }
 0xeec   : > { %v6934_v63 = vmul.f32 %v8465_v38, %v13710_v54  ;;  %v6640_v2 = vpop.xlane.xlu2 %6639  ;;  %v6811_v7 = vpop.xlane.xlu1 %6810  ;;  %v7100_v54 = vadd.f32 %v13791_v39, %v13795_v34 }
 0xeed   : > { %v6718_v51 = vsub.f32 %v13715_v3, %v6640_v2  ;;  %8466 = vrcp.f32 %v6811_v7 }
 0xeee   : > { %v7192_v58 = vmul.f32 %v7097_v40, %v6934_v63  ;;  %v7106_v40 = vadd.f32 %v13816_v26, %v13820_v27 }
 0xeef   : > { %v6758_v18 = vmul.f32 1.442695, %v6718_v51 }
 0xef0   : > { %8142 = vmatmul.msk.f32.vlgmr.msra.gmra.mxu2 %vm605_vm0, %v7192_v58  ;;  %8174 = vmatmul.msk.f32.vlgmr.msrb.gmra.mxu3 %vm605_vm0, %v7192_v58 }
 0xef1   : > { %8468 = vpow2.f32 %v6758_v18 }
 0xef3   : > { %v8467_v12 = vpop.eup %8466 }
 0xef4   : > { %v6935_v30 = vmul.f32 %v8467_v12, %v13720_v53  ;;  %v6814_v59 = vpop.xlane.xlu0 %6813  ;;  %v6643_v3 = vpop.xlane.xlu1 %6642  ;;  %v6454_v53 = vadd.f32 %v6453_v44, %v13590_v42 }
 0xef5   : > { %8470 = vrcp.f32 %v6814_v59  ;;  %v6719_v6 = vsub.f32 %v13727_v22, %v6643_v3  ;;  %v7103_v22 = vadd.f32 %v13808_v57, %v13810_v29  ;;  %v13905_v12 = vpop.f32.mrf.mxu2 }
 0xef6   : > { %v7193_v24 = vmul.f32 %v7100_v54, %v6935_v30  ;;  %v13872_v34 = vadd.f32 %v6566_v9, %v6454_v53  ;;  %v13891_v9 = vpop.f32.mrf.mxu0  ;;  %v7109_v30 = vadd.f32 %v13824_v23, %v13826_v31 }
 0xef7   : > { %v13865_v15 = vpop.eup %8468  ;;  %v6760_v13 = vmul.f32 1.442695, %v6719_v6 }
 0xef8   : > { %8143 = vmatmul.msk.f32.gmra.mxu2 %vm605_vm0, %v7193_v24  ;;  %8175 = vmatmul.msk.f32.gmra.mxu3 %vm605_vm0, %v7193_v24  ;;  %v6830_v45 = vsel %vm605_vm0, %v13865_v15, 0.0 }
 0xef9   : > { %8472 = vpow2.f32 %v6760_v13  ;;  %6831 = vadd.xlane.f32.xlu0 %v6830_v45  ;;  %v13924_v45 = vpop.f32.mrf.mxu1 }
 0xefb   : > { %v8471_v39 = vpop.eup %8470 }
 0xefc   : > { %v6936_v8 = vmul.f32 %v8471_v39, %v13732_v28  ;;  %v6646_v1 = vpop.xlane.xlu0 %6645  ;;  %v6817_v16 = vpop.xlane.xlu2 %6816  ;;  %v6662_v28 = vsel %vm605_vm0, %v13872_v34, -inf }
 0xefd   : > { %v6720_v50 = vsub.f32 %v13739_v52, %v6646_v1  ;;  %8474 = vrcp.f32 %v6817_v16  ;;  %v6457_v52 = vadd.f32 %v6456_v47, %v13590_v42  ;;  %v13903_v47 = vpop.f32.mrf.mxu3  ;;  %v7112_v1 = vadd.f32 %v13830_v35, %v13832_v43 }
 0xefe   : > { %v7194_v48 = vmul.f32 %v7103_v22, %v6936_v8  ;;  %v13922_v13 = vpop.f32.mrf.mxu0 }
 0xeff   : > { %v13882_v19 = vpop.eup %8472  ;;  %v6762_v44 = vmul.f32 1.442695, %v6720_v50  ;;  %v13895_v38 = vadd.f32 %v6569_v5, %v6457_v52 }
 0xf00   : > { %8144 = vmatmul.msk.f32.gmra.mxu2 %vm605_vm0, %v7194_v48  ;;  %8176 = vmatmul.msk.f32.gmra.mxu3 %vm605_vm0, %v7194_v48  ;;  %v6833_v57 = vsel %vm605_vm0, %v13882_v19, 0.0 }
 0xf01   : > { %8476 = vpow2.f32 %v6762_v44  ;;  %6663 = vmax.xlane.f32.xlu0 %v6662_v28  ;;  %6834 = vadd.xlane.f32.xlu2 %v6833_v57  ;;  %v6665_v26 = vsel %vm605_vm0, %v13895_v38, -inf }
 0xf03   : > { %v8475_v29 = vpop.eup %8474 }
 0xf04   : > { %v6937_v63 = vmul.f32 %v8475_v29, %v13744_v4  ;;  %v6649_v2 = vpop.xlane.xlu2 %6648  ;;  %v6820_v7 = vpop.xlane.xlu1 %6819 }
 0xf05   : > { %v6721_v51 = vsub.f32 %v13751_v62, %v6649_v2  ;;  %8478 = vrcp.f32 %v6820_v7  ;;  %v6460_v62 = vadd.f32 %v13845_v61, %v13590_v42  ;;  %v13934_v31 = vpop.f32.mrf.mxu3  ;;  %v7115_v2 = vadd.f32 %v13836_v55, %v13838_v56 }
 0xf06   : > { %v7195_v58 = vmul.f32 %v7106_v40, %v6937_v63  ;;  %v13949_v29 = vpop.f32.mrf.mxu0 }
 0xf07   : > { %v13901_v18 = vpop.eup %8476  ;;  %v6764_v54 = vmul.f32 1.442695, %v6721_v51  ;;  %v13916_v5 = vadd.f32 %v13847_v14, %v6460_v62  ;;  %v6463_v14 = vadd.f32 %v13849_v49, %v13590_v42  ;;  %v13951_v49 = vpop.f32.mrf.mxu1 }
 0xf08   : > { %8145 = vmatmul.msk.f32.gmra.mxu2 %vm605_vm0, %v7195_v58  ;;  %8177 = vmatmul.msk.f32.gmra.mxu3 %vm605_vm0, %v7195_v58  ;;  %v6836_v4 = vsel %vm605_vm0, %v13901_v18, 0.0 }
 0xf09   : > { %8480 = vpow2.f32 %v6764_v54  ;;  %6837 = vadd.xlane.f32.xlu1 %v6836_v4  ;;  %6666 = vmax.xlane.f32.xlu2 %v6665_v26  ;;  %v13941_v8 = vadd.f32 %v13857_v25, %v6463_v14 }
 0xf0b   : > { %v8479_v27 = vpop.eup %8478 }
 0xf0c   : > { %v6938_v59 = vmul.f32 %v8479_v27, %v13756_v11  ;;  %v6823_v3 = vpop.xlane.xlu0 %6822  ;;  %v6652_v6 = vpop.xlane.xlu1 %6651  ;;  %v6668_v11 = vsel %vm605_vm0, %v13916_v5, -inf }
 0xf0d   : > { %8482 = vrcp.f32 %v6823_v3  ;;  %v6722_v24 = vsub.f32 %v13763_v0, %v6652_v6  ;;  %v13936_v0 = vpop.f32.mrf.mxu2  ;;  %v6587_v25 = vpop.f32.mrf.mxu3 }
 0xf0e   : > { %v7196_v53 = vmul.f32 %v7109_v30, %v6938_v59  ;;  %v7118_v30 = vadd.f32 %v13842_v17, %v13891_v9 }
 0xf0f   : > { %v13926_v61 = vpop.eup %8480  ;;  %v6766_v39 = vmul.f32 1.442695, %v6722_v24  ;;  %v13982_v56 = vpop.f32.mrf.mxu1 }
 0xf10   : > { %8146 = vmatmul.msk.f32.gmra.mxu2 %vm605_vm0, %v7196_v53  ;;  %8178 = vmatmul.msk.f32.gmra.mxu3 %vm605_vm0, %v7196_v53  ;;  %v6839_v23 = vsel %vm605_vm0, %v13926_v61, 0.0 }
 0xf11   : > { %8484 = vpow2.f32 %v6766_v39  ;;  %6669 = vmax.xlane.f32.xlu1 %v6668_v11  ;;  %6840 = vadd.xlane.f32.xlu0 %v6839_v23 }
 0xf13   : > { %v8483_v22 = vpop.eup %8482 }
 0xf14   : > { %v6939_v16 = vmul.f32 %v8483_v22, %v13768_v36  ;;  %v6655_v50 = vpop.xlane.xlu0 %6654  ;;  %v6826_v48 = vpop.xlane.xlu2 %6825  ;;  %v6671_v36 = vsel %vm605_vm0, %v13941_v8, -inf }
 0xf15   : > { %v6723_v44 = vsub.f32 %v13779_v33, %v6655_v50  ;;  %8486 = vrcp.f32 %v6826_v48  ;;  %v6466_v33 = vadd.f32 %v13859_v60, %v13590_v42  ;;  %v13961_v40 = vpop.f32.mrf.mxu2  ;;  %v13990_v6 = vpop.f32.mrf.mxu3  ;;  %v550_v48 = vld [vmem:[#allocation7 + $0xb80] sm:$0xff] }
 0xf16   : > { %v7197_v28 = vmul.f32 %v7112_v1, %v6939_v16  ;;  %7622 = vmatpush.msrb.mxu0 %v550_v48 }
 0xf17   : > { %v13947_v57 = vpop.eup %8484  ;;  %v6768_v52 = vmul.f32 1.442695, %v6723_v44  ;;  %v13964_v63 = vadd.f32 %v13877_v32, %v6466_v33  ;;  %v14010_v23 = vpop.f32.mrf.mxu1  ;;  %v566_v44 = vld [vmem:[#allocation7 + $0xc80] sm:$0xff] }
 0xf18   : > { %8147 = vmatmul.msk.f32.gmra.mxu2 %vm605_vm0, %v7197_v28  ;;  %8179 = vmatmul.msk.f32.gmra.mxu3 %vm605_vm0, %v7197_v28  ;;  %v6842_v35 = vsel %vm605_vm0, %v13947_v57, 0.0 }
 0xf19   : > { %8488 = vpow2.f32 %v6768_v52  ;;  %6672 = vmax.xlane.f32.xlu0 %v6671_v36  ;;  %6843 = vadd.xlane.f32.xlu2 %v6842_v35  ;;  %v6674_v55 = vsel %vm605_vm0, %v13964_v63, -inf }
 0xf1a   : > { %7735 = vmatpush.msrb.mxu1 %v566_v44 }
 0xf1b   : > { %v8487_v43 = vpop.eup %8486 }
 0xf1c   : > { %v6940_v7 = vmul.f32 %v8487_v43, %v13784_v37  ;;  %v6658_v51 = vpop.xlane.xlu2 %6657  ;;  %v6829_v58 = vpop.xlane.xlu1 %6828  ;;  %v6469_v37 = vadd.f32 %v13879_v21, %v13590_v42  ;;  %v549_v43 = vld [vmem:[#allocation7 + $0xb70] sm:$0xff] }
 0xf1d   : > { %v6724_v54 = vsub.f32 %v13793_v10, %v6658_v51  ;;  %8490 = vrcp.f32 %v6829_v58  ;;  %v13980_v10 = vpop.f32.mrf.mxu0  ;;  %v13992_v24 = vpop.f32.mrf.mxu2  ;;  %7623 = vmatpush.msrb.mxu0 %v549_v43  ;;  %v563_v51 = vld [vmem:[#allocation7 + $0xc50] sm:$0xff]  ;;  %v546_v58 = vld [vmem:[#allocation7 + $0xb40] sm:$0xff] }
 0xf1e   : > { %v7198_v4 = vmul.f32 %v7115_v2, %v6940_v7  ;;  %v13985_v27 = vadd.f32 %v13903_v47, %v6469_v37  ;;  %v14014_v22 = vpop.f32.mrf.mxu3  ;;  %v564_v2 = vld [vmem:[#allocation7 + $0xc60] sm:$0xff]  ;;  %v547_v7 = vld [vmem:[#allocation7 + $0xb50] sm:$0xff] }
 0xf1f   : > { %v13970_v26 = vpop.eup %8488  ;;  %v6770_v60 = vmul.f32 1.442695, %v6724_v54  ;;  %v14028_v52 = vpop.f32.mrf.mxu1  ;;  %v562_v54 = vld [vmem:[#allocation7 + $0xc40] sm:$0xff]  ;;  %v555_v43 = vld [vmem:[#allocation7 + $0xbd0] sm:$0xff] }
 0xf20   : > { %8148 = vmatmul.msk.f32.gmra.mxu2 %vm605_vm0, %v7198_v4  ;;  %8180 = vmatmul.msk.f32.gmra.mxu3 %vm605_vm0, %v7198_v4  ;;  %v6845_v32 = vsel %vm605_vm0, %v13970_v26, 0.0  ;;  %v6677_v17 = vsel %vm605_vm0, %v13985_v27, -inf  ;;  %v544_v37 = vld [vmem:[#allocation7 + $0xb20] sm:$0xff] }
 0xf21   : > { %8492 = vpow2.f32 %v6770_v60  ;;  %6846 = vadd.xlane.f32.xlu1 %v6845_v32  ;;  %6675 = vmax.xlane.f32.xlu2 %v6674_v55  ;;  %v545_v32 = vld [vmem:[#allocation7 + $0xb30] sm:$0xff] }
 0xf22   : > { %v561_v55 = vld [vmem:[#allocation7 + $0xc30] sm:$0xff] }
 0xf23   : > { %v8491_v62 = vpop.eup %8490 }
 0xf24   : > { %v6941_v59 = vmul.f32 %v8491_v62, %v13799_v46  ;;  %v6661_v3 = vpop.xlane.xlu1 %6660  ;;  %v560_v62 = vld [vmem:[#allocation7 + $0xc20] sm:$0xff] }
 0xf25   : > { %v6725_v21 = vsub.f32 %v13806_v20, %v6661_v3  ;;  %v6472_v20 = vadd.f32 %v13905_v12, %v13590_v42  ;;  %v14008_v47 = vpop.f32.mrf.mxu0  ;;  %v14016_v1 = vpop.f32.mrf.mxu2  ;;  %v6475_v12 = vadd.f32 %v13936_v0, %v13590_v42  ;;  %v565_v0 = vld [vmem:[#allocation7 + $0xc70] sm:$0xff] }
 0xf26   : > { %v7199_v53 = vmul.f32 %v7118_v30, %v6941_v59  ;;  %v14032_v35 = vpop.f32.mrf.mxu3  ;;  %7736 = vmatpush.msrb.mxu1 %v565_v0  ;;  %v543_v3 = vld [vmem:[#allocation7 + $0xb10] sm:$0xff]  ;;  %v538_v0 = vld [vmem:[#allocation7 + $0xac0] sm:$0xff] }
 0xf27   : > { %v13995_v39 = vpop.eup %8492  ;;  %v6772_v11 = vmul.f32 1.442695, %v6725_v21  ;;  %v14006_v9 = vadd.f32 %v13934_v31, %v6472_v20  ;;  %v14024_v31 = vadd.f32 %v6587_v25, %v6475_v12  ;;  %v548_v25 = vld [vmem:[#allocation7 + $0xb60] sm:$0xff]  ;;  %v14038_v60 = vpop.f32.mrf.mxu1  ;;  %v559_v21 = vld [vmem:[#allocation7 + $0xc10] sm:$0xff] }
 0xf28   : > { %8149 = vmatmul.msk.f32.gmra.mxu2 %vm605_vm0, %v7199_v53  ;;  %8181 = vmatmul.msk.f32.gmra.mxu3 %vm605_vm0, %v7199_v53  ;;  %v6848_v46 = vsel %vm605_vm0, %v13995_v39, 0.0  ;;  %v542_v53 = vld [vmem:[#allocation7 + $0xb00] sm:$0xff] }
 0xf29   : > { %8494 = vpow2.f32 %v6772_v11  ;;  %6678 = vmax.xlane.f32.xlu1 %v6677_v17  ;;  %6849 = vadd.xlane.f32.xlu0 %v6848_v46  ;;  %v6680_v16 = vsel %vm605_vm0, %v14006_v9, -inf  ;;  %v6683_v36 = vsel %vm605_vm0, %v14024_v31, -inf  ;;  %v558_v11 = vld [vmem:[#allocation7 + $0xc00] sm:$0xff]  ;;  %v541_v17 = vld [vmem:[#allocation7 + $0xaf0] sm:$0xff] }
 0xf2a   : > { %7624 = vmatpush.msrb.mxu0 %v548_v25  ;;  %7737 = vmatpush.msrb.mxu1 %v564_v2  ;;  %v557_v46 = vld [vmem:[#allocation7 + $0xbf0] sm:$0xff]  ;;  %v556_v12 = vld [vmem:[#allocation7 + $0xbe0] sm:$0xff] }
 0xf2b   : > { %v554_v25 = vld [vmem:[#allocation7 + $0xbc0] sm:$0xff]  ;;  %v537_v2 = vld [vmem:[#allocation7 + $0xab0] sm:$0xff] }
 0xf2c   : > { %7625 = vmatpush.msrb.mxu0 %v547_v7  ;;  %7738 = vmatpush.msrb.mxu1 %v563_v51  ;;  %v553_v7 = vld [vmem:[#allocation7 + $0xbb0] sm:$0xff] }
 0xf2d   : > { %v14026_v28 = vpop.f32.mrf.mxu0  ;;  %v14034_v33 = vpop.f32.mrf.mxu2 }
 0xf2e   : > { %7626 = vmatpush.msrb.mxu0 %v546_v58  ;;  %7739 = vmatpush.msrb.mxu1 %v562_v54  ;;  %v14040_v30 = vpop.f32.mrf.mxu3  ;;  %v536_v54 = vld [vmem:[#allocation7 + $0xaa0] sm:$0xff] }
 0xf2f   : > { %v14012_v14 = vpop.eup %8494 }
 0xf30   : > { %v6851_v50 = vsel %vm605_vm0, %v14012_v14, 0.0  ;;  %7627 = vmatpush.msrb.mxu0 %v545_v32  ;;  %7740 = vmatpush.msrb.mxu1 %v561_v55  ;;  %v552_v32 = vld [vmem:[#allocation7 + $0xba0] sm:$0xff]  ;;  %v535_v55 = vld [vmem:[#allocation7 + $0xa90] sm:$0xff] }
 0xf31   : > { %6681 = vmax.xlane.f32.xlu0 %v6680_v16  ;;  %6852 = vadd.xlane.f32.xlu2 %v6851_v50  ;;  %v14046_v16 = vpop.f32.mrf.mxu1  ;;  %v540_v50 = vld [vmem:[#allocation7 + $0xae0] sm:$0xff] }
 0xf32   : > { %7628 = vmatpush.msrb.mxu0 %v544_v37  ;;  %7741 = vmatpush.msrb.mxu1 %v560_v62  ;;  %v551_v37 = vld [vmem:[#allocation7 + $0xb90] sm:$0xff] }
 0xf34   : > { %7629 = vmatpush.msrb.mxu0 %v543_v3  ;;  %7742 = vmatpush.msrb.mxu1 %v559_v21 }
 0xf35   : > { %v14036_v4 = vpop.f32.mrf.mxu0  ;;  %v14042_v59 = vpop.f32.mrf.mxu2 }
 0xf36   : > { %7630 = vmatpush.msrb.mxu0 %v542_v53  ;;  %7743 = vmatpush.msrb.mxu1 %v558_v11  ;;  %v14048_v48 = vpop.f32.mrf.mxu3 }
 0xf38   : > { %7631 = vmatpush.msrb.mxu0 %v541_v17  ;;  %7744 = vmatpush.msrb.mxu1 %v557_v46 }
 0xf39   : > { %6684 = vmax.xlane.f32.xlu2 %v6683_v36  ;;  %v539_v36 = vld [vmem:[#allocation7 + $0xad0] sm:$0xff]  ;;  %v14054_v58 = vpop.f32.mrf.mxu1 }
 0xf3a   : > { %7632 = vmatpush.msrb.mxu0 %v540_v50  ;;  %7745 = vmatpush.msrb.mxu1 %v556_v12  ;;  %15585 = vst [vmem:[#allocation81_spill] sm:$0xff] %v14054_v58 }
 0xf3c   : > { %7633 = vmatpush.msrb.mxu0 %v539_v36  ;;  %7746 = vmatpush.msrb.mxu1 %v555_v43 }
 0xf3d   : > { %v14044_v20 = vpop.f32.mrf.mxu0  ;;  %v14050_v44 = vpop.f32.mrf.mxu2 }
 0xf3e   : > { %7634 = vmatpush.msrb.mxu0 %v538_v0  ;;  %7747 = vmatpush.msrb.mxu1 %v554_v25  ;;  %v14056_v62 = vpop.f32.mrf.mxu3  ;;  %v7225_v0 = vld [vmem:[#allocation8 + $0x10] ss:$8 sm:$0x3] }
 0xf3f   : > { %v14076_v25 = vperm.slane %v7225_v0, 0 }
 0xf40   : > { %7635 = vmatpush.msrb.mxu0 %v537_v2  ;;  %7748 = vmatpush.msrb.mxu1 %v553_v7  ;;  %v14078_v2 = vperm.slane %v7225_v0, 1 }
 0xf41   : > { %v14062_v53 = vpop.f32.mrf.mxu1 }
 0xf42   : > { %7636 = vmatpush.msrb.mxu0 %v536_v54  ;;  %7749 = vmatpush.msrb.mxu1 %v552_v32  ;;  %15587 = vst [vmem:[#allocation92_spill] sm:$0xff] %v14062_v53 }
 0xf44   : > { %7637 = vmatpush.msrb.mxu0 %v535_v55  ;;  %7750 = vmatpush.msrb.mxu1 %v551_v37 }
 0xf45   : > { %v14052_v51 = vpop.f32.mrf.mxu0  ;;  %v14058_v3 = vpop.f32.mrf.mxu2 }
 0xf46   : > { %v14064_v11 = vpop.f32.mrf.mxu3 }
 0xf49   : > { %v14070_v50 = vpop.f32.mrf.mxu1 }
 0xf4a   : > { %15589 = vst [vmem:[#allocation91_spill] sm:$0xff] %v14070_v50  ;;  %v7121_v50 = vadd.f32 %v13893_v41, %v13922_v13 }
 0xf4d   : > { %v14060_v21 = vpop.f32.mrf.mxu0  ;;  %v14066_v17 = vpop.f32.mrf.mxu2 }
 0xf4e   : > { %15586 = vst [vmem:[#allocation65_spill] sm:$0xff] %v14060_v21  ;;  %v14072_v12 = vpop.f32.mrf.mxu3 }
 0xf4f   : > { %15590 = vst [vmem:[#allocation40_spill] sm:$0xff] %v14072_v12 }
 0xf51   : > { %v14082_v54 = vpop.f32.mrf.mxu1 }
 0xf52   : > { %15593 = vst [vmem:[#allocation87_spill] sm:$0xff] %v14082_v54 }
 0xf55   : > { %v14068_v46 = vpop.f32.mrf.mxu0  ;;  %v14074_v36 = vpop.f32.mrf.mxu2 }
 0xf56   : > { %15588 = vst [vmem:[#allocation63_spill] sm:$0xff] %v14068_v46 }
 0xf57   : > { %15591 = vst [vmem:[#allocation88_spill] sm:$0xff] %v14074_v36 }
 0xf5d   : > { %v14080_v7 = vpop.f32.mrf.mxu0 }
 0xf5e   : > { %15592 = vst [vmem:[#allocation62_spill] sm:$0xff] %v14080_v7 }
 0xf6c   : > { %v6832_v43 = vpop.xlane.xlu0 %6831 }
 0xf6d   : > { %8496 = vrcp.f32 %v6832_v43 }
 0xf73   : > { %v8497_v32 = vpop.eup %8496  ;;  %v7344_v55 = vpop.f32.mrf.mxu2 }
 0xf74   : > { %v7457_v37 = vpop.f32.mrf.mxu3  ;;  %v6942_v53 = vmul.f32 %v8497_v32, %v13865_v15  ;;  %v7345_v36 = vadd.f32 %v7344_v55, %v14076_v25  ;;  %v6664_v46 = vpop.xlane.xlu0 %6663  ;;  %v7124_v32 = vadd.f32 %v13924_v45, %v13949_v29  ;;  %v6478_v29 = vadd.f32 %v13961_v40, %v13590_v42 }
 0xf75   : > { %v7458_v43 = vadd.f32 %v7457_v37, %v14078_v2  ;;  %v6835_v58 = vpop.xlane.xlu2 %6834  ;;  %v6726_v0 = vsub.f32 %v13872_v34, %v6664_v46 }
 0xf76   : > { %8498 = vrcp.f32 %v6835_v58  ;;  %v7553_v7 = vmax.f32 %v7345_v36, 0.0  ;;  %v7200_v54 = vmul.f32 %v7121_v50, %v6942_v53 }
 0xf77   : > { %v7554_v21 = vmax.f32 %v7458_v43, 0.0  ;;  %v6774_v12 = vmul.f32 1.442695, %v6726_v0 }
 0xf78   : > { %8150 = vmatmul.msk.f32.gmra.mxu2 %vm605_vm0, %v7200_v54  ;;  %8182 = vmatmul.msk.f32.gmra.mxu3 %vm605_vm0, %v7200_v54 }
 0xf79   : > { %8500 = vpow2.f32 %v6774_v12  ;;  %7638 = vmatmul.f32.vlgmr.msrb.gmra.mxu0 %v7553_v7  ;;  %7751 = vmatmul.f32.vlgmr.msrb.gmra.mxu1 %v7554_v21  ;;  %v14098_v12 = vpop.f32.mrf.mxu0  ;;  %v14100_v21 = vpop.f32.mrf.mxu1 }
 0xf7b   : > { %v7347_v41 = vpop.f32.mrf.mxu2 }
 0xf7c   : > { %v8499_v15 = vpop.eup %8498  ;;  %v7460_v13 = vpop.f32.mrf.mxu3  ;;  %v7348_v58 = vadd.f32 %v7347_v41, %v14076_v25 }
 0xf7d   : > { %v6943_v34 = vmul.f32 %v8499_v15, %v13882_v19  ;;  %v7461_v53 = vadd.f32 %v7460_v13, %v14078_v2  ;;  %v6667_v46 = vpop.xlane.xlu2 %6666  ;;  %v6838_v50 = vpop.xlane.xlu1 %6837  ;;  %v7127_v15 = vadd.f32 %v13951_v49, %v13980_v10 }
 0xf7e   : > { %v6727_v36 = vsub.f32 %v13895_v38, %v6667_v46  ;;  %8502 = vrcp.f32 %v6838_v50  ;;  %v7555_v7 = vmax.f32 %v7348_v58, 0.0 }
 0xf7f   : > { %v7556_v54 = vmax.f32 %v7461_v53, 0.0  ;;  %v7201_v55 = vmul.f32 %v7124_v32, %v6943_v34  ;;  %v14102_v37 = vpop.eup %8500  ;;  %v14116_v53 = vadd.f32 %v13990_v6, %v6478_v29 }
 0xf80   : > { %v6776_v45 = vmul.f32 1.442695, %v6727_v36  ;;  %v6854_v19 = vsel %vm605_vm0, %v14102_v37, 0.0 }
 0xf81   : > { %8151 = vmatmul.msk.f32.gmra.mxu2 %vm605_vm0, %v7201_v55  ;;  %8183 = vmatmul.msk.f32.gmra.mxu3 %vm605_vm0, %v7201_v55  ;;  %v14121_v10 = vpop.f32.mrf.mxu0  ;;  %v6481_v55 = vadd.f32 %v13992_v24, %v13590_v42 }
 0xf82   : > { %8504 = vpow2.f32 %v6776_v45  ;;  %7641 = vmatmul.f32.gmra.mxu0 %v7555_v7  ;;  %7754 = vmatmul.f32.gmra.mxu1 %v7556_v54 }
 0xf83   : > { %6855 = vadd.xlane.f32.xlu1 %v6854_v19  ;;  %v7350_v43 = vpop.f32.mrf.mxu2 }
 0xf84   : > { %v8503_v38 = vpop.eup %8502  ;;  %v7463_v0 = vpop.f32.mrf.mxu3  ;;  %v7351_v13 = vadd.f32 %v7350_v43, %v14076_v25 }
 0xf85   : > { %v6944_v41 = vmul.f32 %v8503_v38, %v13901_v18  ;;  %v7464_v32 = vadd.f32 %v7463_v0, %v14078_v2  ;;  %v6841_v34 = vpop.xlane.xlu0 %6840  ;;  %v6670_v58 = vpop.xlane.xlu1 %6669  ;;  %v7130_v38 = vadd.f32 %v13982_v56, %v14008_v47 }
 0xf86   : > { %8506 = vrcp.f32 %v6841_v34  ;;  %v6728_v46 = vsub.f32 %v13916_v5, %v6670_v58  ;;  %v7557_v40 = vmax.f32 %v7351_v13, 0.0  ;;  %v14123_v18 = vpop.f32.mrf.mxu1  ;;  %v6686_v5 = vsel %vm605_vm0, %v14116_v53, -inf }
 0xf87   : > { %v7558_v50 = vmax.f32 %v7464_v32, 0.0  ;;  %v7202_v36 = vmul.f32 %v7127_v15, %v6944_v41  ;;  %v14139_v13 = vadd.f32 %v14014_v22, %v6481_v55 }
 0xf88   : > { %v14119_v7 = vpop.eup %8504  ;;  %v6778_v49 = vmul.f32 1.442695, %v6728_v46 }
 0xf89   : > { %8152 = vmatmul.msk.f32.gmra.mxu2 %vm605_vm0, %v7202_v36  ;;  %8184 = vmatmul.msk.f32.gmra.mxu3 %vm605_vm0, %v7202_v36  ;;  %v6857_v6 = vsel %vm605_vm0, %v14119_v7, 0.0  ;;  %v14150_v47 = vpop.f32.mrf.mxu0 }
 0xf8a   : > { %8508 = vpow2.f32 %v6778_v49  ;;  %7644 = vmatmul.f32.gmra.mxu0 %v7557_v40  ;;  %7757 = vmatmul.f32.gmra.mxu1 %v7558_v50  ;;  %v6484_v50 = vadd.f32 %v14016_v1, %v13590_v42 }
 0xf8b   : > { %6687 = vmax.xlane.f32.xlu1 %v6686_v5  ;;  %6858 = vadd.xlane.f32.xlu0 %v6857_v6  ;;  %v7353_v45 = vpop.f32.mrf.mxu2  ;;  %v7133_v6 = vadd.f32 %v14010_v23, %v14026_v28 }
 0xf8c   : > { %v8507_v54 = vpop.eup %8506  ;;  %v7466_v19 = vpop.f32.mrf.mxu3  ;;  %v7354_v43 = vadd.f32 %v7353_v45, %v14076_v25 }
 0xf8d   : > { %v6945_v29 = vmul.f32 %v8507_v54, %v13926_v61  ;;  %v7467_v0 = vadd.f32 %v7466_v19, %v14078_v2  ;;  %v6673_v15 = vpop.xlane.xlu0 %6672  ;;  %v6844_v41 = vpop.xlane.xlu2 %6843 }
 0xf8e   : > { %v6729_v32 = vsub.f32 %v13941_v8, %v6673_v15  ;;  %8510 = vrcp.f32 %v6844_v41  ;;  %v7559_v24 = vmax.f32 %v7354_v43, 0.0  ;;  %v6689_v8 = vsel %vm605_vm0, %v14139_v13, -inf  ;;  %v14152_v22 = vpop.f32.mrf.mxu1 }
 0xf8f   : > { %v7560_v34 = vmax.f32 %v7467_v0, 0.0  ;;  %v7203_v58 = vmul.f32 %v7130_v38, %v6945_v29  ;;  %v14162_v38 = vadd.f32 %v14032_v35, %v6484_v50  ;;  %v6487_v35 = vadd.f32 %v14034_v33, %v13590_v42 }
 0xf90   : > { %v14142_v46 = vpop.eup %8508  ;;  %v6780_v56 = vmul.f32 1.442695, %v6729_v32 }
 0xf91   : > { %8153 = vmatmul.msk.f32.gmra.mxu2 %vm605_vm0, %v7203_v58  ;;  %8185 = vmatmul.msk.f32.gmra.mxu3 %vm605_vm0, %v7203_v58  ;;  %v6860_v61 = vsel %vm605_vm0, %v14142_v46, 0.0  ;;  %v14184_v33 = vpop.f32.mrf.mxu0 }
 0xf92   : > { %8512 = vpow2.f32 %v6780_v56  ;;  %7647 = vmatmul.f32.gmra.mxu0 %v7559_v24  ;;  %7760 = vmatmul.f32.gmra.mxu1 %v7560_v34  ;;  %v7136_v24 = vadd.f32 %v14028_v52, %v14036_v4 }
 0xf93   : > { %6690 = vmax.xlane.f32.xlu0 %v6689_v8  ;;  %6861 = vadd.xlane.f32.xlu2 %v6860_v61  ;;  %v7356_v36 = vpop.f32.mrf.mxu2 }
 0xf94   : > { %v8511_v40 = vpop.eup %8510  ;;  %v7469_v49 = vpop.f32.mrf.mxu3  ;;  %v7357_v54 = vadd.f32 %v7356_v36, %v14076_v25 }
 0xf95   : > { %v6946_v5 = vmul.f32 %v8511_v40, %v13947_v57  ;;  %v7470_v55 = vadd.f32 %v7469_v49, %v14078_v2  ;;  %v6676_v45 = vpop.xlane.xlu2 %6675  ;;  %v6847_v19 = vpop.xlane.xlu1 %6846  ;;  %v14181_v40 = vadd.f32 %v14040_v30, %v6487_v35 }
 0xf96   : > { %v6730_v29 = vsub.f32 %v13964_v63, %v6676_v45  ;;  %8514 = vrcp.f32 %v6847_v19  ;;  %v7561_v1 = vmax.f32 %v7357_v54, 0.0  ;;  %v6692_v63 = vsel %vm605_vm0, %v14162_v38, -inf  ;;  %v14186_v36 = vpop.f32.mrf.mxu1 }
 0xf97   : > { %v7562_v43 = vmax.f32 %v7470_v55, 0.0  ;;  %v7204_v0 = vmul.f32 %v7133_v6, %v6946_v5  ;;  %v6490_v54 = vadd.f32 %v14042_v59, %v13590_v42  ;;  %v7139_v19 = vadd.f32 %v14038_v60, %v14044_v20 }
 0xf98   : > { %v14165_v15 = vpop.eup %8512  ;;  %v6782_v23 = vmul.f32 1.442695, %v6730_v29 }
 0xf99   : > { %8154 = vmatmul.msk.f32.gmra.mxu2 %vm605_vm0, %v7204_v0  ;;  %8186 = vmatmul.msk.f32.gmra.mxu3 %vm605_vm0, %v7204_v0  ;;  %v6863_v57 = vsel %vm605_vm0, %v14165_v15, 0.0  ;;  %v14209_v20 = vpop.f32.mrf.mxu0 }
 0xf9a   : > { %8516 = vpow2.f32 %v6782_v23  ;;  %7650 = vmatmul.f32.gmra.mxu0 %v7561_v1  ;;  %7763 = vmatmul.f32.gmra.mxu1 %v7562_v43 }
 0xf9b   : > { %6864 = vadd.xlane.f32.xlu1 %v6863_v57  ;;  %6693 = vmax.xlane.f32.xlu2 %v6692_v63  ;;  %v7359_v41 = vpop.f32.mrf.mxu2  ;;  %v14204_v57 = vadd.f32 %v14048_v48, %v6490_v54 }
 0xf9c   : > { %v8515_v28 = vpop.eup %8514  ;;  %v7472_v32 = vpop.f32.mrf.mxu3  ;;  %v7360_v58 = vadd.f32 %v7359_v41, %v14076_v25 }
 0xf9d   : > { %v6947_v34 = vmul.f32 %v8515_v28, %v13970_v26  ;;  %v7473_v56 = vadd.f32 %v7472_v32, %v14078_v2  ;;  %v6850_v61 = vpop.xlane.xlu0 %6849  ;;  %v6679_v8 = vpop.xlane.xlu1 %6678 }
 0xf9e   : > { %8518 = vrcp.f32 %v6850_v61  ;;  %v6731_v50 = vsub.f32 %v13985_v27, %v6679_v8  ;;  %v7563_v49 = vmax.f32 %v7360_v58, 0.0  ;;  %v6695_v27 = vsel %vm605_vm0, %v14181_v40, -inf }
 0xf9f   : > { %v7564_v52 = vmax.f32 %v7473_v56, 0.0  ;;  %v7205_v4 = vmul.f32 %v7136_v24, %v6947_v34  ;;  %v6493_v24 = vadd.f32 %v14050_v44, %v13590_v42  ;;  %v7142_v56 = vadd.f32 %v14046_v16, %v14052_v51 }
 0xfa0   : > { %v14188_v26 = vpop.eup %8516  ;;  %v6784_v6 = vmul.f32 1.442695, %v6731_v50 }
 0xfa1   : > { %8155 = vmatmul.msk.f32.gmra.mxu2 %vm605_vm0, %v7205_v4  ;;  %8187 = vmatmul.msk.f32.gmra.mxu3 %vm605_vm0, %v7205_v4  ;;  %v6866_v30 = vsel %vm605_vm0, %v14188_v26, 0.0 }
 0xfa2   : > { %8520 = vpow2.f32 %v6784_v6  ;;  %7653 = vmatmul.f32.gmra.mxu0 %v7563_v49  ;;  %7766 = vmatmul.f32.gmra.mxu1 %v7564_v52  ;;  %v14227_v52 = vadd.f32 %v14056_v62, %v6493_v24  ;;  %v6496_v62 = vadd.f32 %v14058_v3, %v13590_v42 }
 0xfa3   : > { %6696 = vmax.xlane.f32.xlu1 %v6695_v27  ;;  %6867 = vadd.xlane.f32.xlu0 %v6866_v30  ;;  %v7362_v55 = vpop.f32.mrf.mxu2 }
 0xfa4   : > { %v8519_v5 = vpop.eup %8518  ;;  %v7475_v45 = vpop.f32.mrf.mxu3  ;;  %v7363_v1 = vadd.f32 %v7362_v55, %v14076_v25  ;;  %v6701_v16 = vsel %vm605_vm0, %v14227_v52, -inf  ;;  %v14245_v54 = vadd.f32 %v14064_v11, %v6496_v62 }
 0xfa5   : > { %v6948_v29 = vmul.f32 %v8519_v5, %v13995_v39  ;;  %v7476_v43 = vadd.f32 %v7475_v45, %v14078_v2  ;;  %v6682_v0 = vpop.xlane.xlu0 %6681  ;;  %v6853_v23 = vpop.xlane.xlu2 %6852 }
 0xfa6   : > { %v6732_v63 = vsub.f32 %v14006_v9, %v6682_v0  ;;  %8522 = vrcp.f32 %v6853_v23  ;;  %v7565_v59 = vmax.f32 %v7363_v1, 0.0  ;;  %v14211_v39 = vpop.f32.mrf.mxu1  ;;  %v6698_v9 = vsel %vm605_vm0, %v14204_v57, -inf  ;;  %v15594_v1 = vld [vmem:[#allocation40_spill] sm:$0xff] }
 0xfa7   : > { %v7566_v28 = vmax.f32 %v7476_v43, 0.0  ;;  %v7206_v35 = vmul.f32 %v7139_v19, %v6948_v29  ;;  %v6704_v19 = vsel %vm605_vm0, %v14245_v54, -inf  ;;  %v6499_v29 = vadd.f32 %v14066_v17, %v13590_v42 }
 0xfa8   : > { %v14207_v41 = vpop.eup %8520  ;;  %v6786_v60 = vmul.f32 1.442695, %v6732_v63 }
 0xfa9   : > { %8156 = vmatmul.msk.f32.gmra.mxu2 %vm605_vm0, %v7206_v35  ;;  %8188 = vmatmul.msk.f32.gmra.mxu3 %vm605_vm0, %v7206_v35  ;;  %v6869_v48 = vsel %vm605_vm0, %v14207_v41, 0.0  ;;  %v14256_v43 = vadd.f32 %v15594_v1, %v6499_v29 }
 0xfaa   : > { %8524 = vpow2.f32 %v6786_v60  ;;  %7656 = vmatmul.f32.gmra.mxu0 %v7565_v59  ;;  %7769 = vmatmul.f32.gmra.mxu1 %v7566_v28 }
 0xfab   : > { %6699 = vmax.xlane.f32.xlu0 %v6698_v9  ;;  %6870 = vadd.xlane.f32.xlu2 %v6869_v48  ;;  %v7365_v34 = vpop.f32.mrf.mxu2  ;;  %v6707_v0 = vsel %vm605_vm0, %v14256_v43, -inf }
 0xfac   : > { %v8523_v32 = vpop.eup %8522  ;;  %v7478_v58 = vpop.f32.mrf.mxu3  ;;  %v7366_v8 = vadd.f32 %v7365_v34, %v14076_v25 }
 0xfad   : > { %v6949_v61 = vmul.f32 %v8523_v32, %v14012_v14  ;;  %v7479_v50 = vadd.f32 %v7478_v58, %v14078_v2  ;;  %v6685_v49 = vpop.xlane.xlu2 %6684  ;;  %v7618_v32 = vld [vmem:[#allocation8 + $0x11] ss:$8 sm:$0x3] }
 0xfae   : > { %v6733_v4 = vsub.f32 %v14024_v31, %v6685_v49  ;;  %v7567_v6 = vmax.f32 %v7366_v8, 0.0  ;;  %v14238_v31 = vpop.f32.mrf.mxu0  ;;  %v14240_v51 = vpop.f32.mrf.mxu1  ;;  %v14285_v24 = vperm.slane %v7618_v32, 0 }
 0xfaf   : > { %v7568_v30 = vmax.f32 %v7479_v50, 0.0  ;;  %v7207_v44 = vmul.f32 %v7142_v56, %v6949_v61 }
 0xfb0   : > { %v14230_v27 = vpop.eup %8524  ;;  %v6788_v5 = vmul.f32 1.442695, %v6733_v4 }
 0xfb1   : > { %8157 = vmatmul.msk.f32.gmra.mxu2 %vm605_vm0, %v7207_v44  ;;  %8189 = vmatmul.msk.f32.gmra.mxu3 %vm605_vm0, %v7207_v44  ;;  %v6872_v14 = vsel %vm605_vm0, %v14230_v27, 0.0  ;;  %v15595_v44 = vld [vmem:[#allocation65_spill] sm:$0xff] }
 0xfb2   : > { %8526 = vpow2.f32 %v6788_v5  ;;  %7659 = vmatmul.f32.gmra.mxu0 %v7567_v6  ;;  %7772 = vmatmul.f32.gmra.mxu1 %v7568_v30  ;;  %v15596_v5 = vld [vmem:[#allocation81_spill] sm:$0xff] }
 0xfb3   : > { %6873 = vadd.xlane.f32.xlu1 %v6872_v14  ;;  %6702 = vmax.xlane.f32.xlu2 %v6701_v16  ;;  %v7145_v14 = vadd.f32 %v15596_v5, %v15595_v44 }
 0xfb6   : > { %v14258_v3 = vpop.f32.mrf.mxu0  ;;  %v14260_v11 = vpop.f32.mrf.mxu1 }
 0xfb8   : > { %v14247_v55 = vpop.eup %8526 }
 0xfb9   : > { %v6875_v45 = vsel %vm605_vm0, %v14247_v55, 0.0 }
 0xfba   : > { %6876 = vadd.xlane.f32.xlu0 %v6875_v45 }
 0xfbb   : > { %6705 = vmax.xlane.f32.xlu1 %v6704_v19 }
 0xfbe   : > { %v14264_v23 = vpop.f32.mrf.mxu0  ;;  %v14266_v63 = vpop.f32.mrf.mxu1 }
 0xfc2   : > { %6708 = vmax.xlane.f32.xlu0 %v6707_v0 }
 0xfc6   : > { %v14268_v59 = vpop.f32.mrf.mxu0  ;;  %v14270_v42 = vpop.f32.mrf.mxu1 }
 0xfce   : > { %v14272_v17 = vpop.f32.mrf.mxu0  ;;  %v14274_v28 = vpop.f32.mrf.mxu1 }
 0xfd6   : > { %v14276_v35 = vpop.f32.mrf.mxu0  ;;  %v14278_v60 = vpop.f32.mrf.mxu1 }
 0xfde   : > { %v14280_v48 = vpop.f32.mrf.mxu0  ;;  %v14282_v9 = vpop.f32.mrf.mxu1 }
 0xff6   : > { %v6856_v34 = vpop.xlane.xlu1 %6855  ;;  %v7639_v58 = vpop.f32.mrf.mxu0 }
 0xff7   : > { %8528 = vrcp.f32 %v6856_v34  ;;  %v7752_v56 = vpop.f32.mrf.mxu1  ;;  %v7640_v61 = vadd.f32 %v7639_v58, %v14285_v24 }
 0xff9   : > { %v7753_v8 = vadd.f32 %v7752_v56, %v7640_v61 }
 0xffb   : > { %7848 = vst [vmem:[%s14290_s23] sm:$0xff] %v7753_v8  ;;  %v7368_v50 = vpop.f32.mrf.mxu2  ;;  %v7481_v49 = vpop.f32.mrf.mxu3 }
 0xffc   : > { %v7369_v6 = vadd.f32 %v7368_v50, %v14076_v25  ;;  %v7482_v30 = vadd.f32 %v7481_v49, %v14078_v2 }
 0xffd   : > { %v8529_v4 = vpop.eup %8528 }
 0xffe   : > { %v6950_v16 = vmul.f32 %v8529_v4, %v14102_v37  ;;  %v6859_v62 = vpop.xlane.xlu0 %6858  ;;  %v6688_v45 = vpop.xlane.xlu1 %6687  ;;  %v7569_v19 = vmax.f32 %v7369_v6, 0.0  ;;  %v7570_v29 = vmax.f32 %v7482_v30, 0.0  ;;  %v15597_v4 = vld [vmem:[#allocation63_spill] sm:$0xff]  ;;  %v15598_v6 = vld [vmem:[#allocation92_spill] sm:$0xff] }
 0xfff   : > { %8530 = vrcp.f32 %v6859_v62  ;;  %v6734_v1 = vsub.f32 %v14116_v53, %v6688_v45  ;;  %v7642_v0 = vpop.f32.mrf.mxu0  ;;  %v7755_v32 = vpop.f32.mrf.mxu1  ;;  %v7148_v30 = vadd.f32 %v15598_v6, %v15597_v4 }
0x1000   : > { %v7643_v34 = vadd.f32 %v7642_v0, %v14285_v24  ;;  %v7208_v58 = vmul.f32 %v7145_v14, %v6950_v16  ;;  %7662 = vmatmul.f32.gmra.mxu0 %v7569_v19  ;;  %7775 = vmatmul.f32.gmra.mxu1 %v7570_v29 }
0x1001   : > { %v6790_v56 = vmul.f32 1.442695, %v6734_v1 }
0x1002   : > { %v7756_v61 = vadd.f32 %v7755_v32, %v7643_v34  ;;  %8158 = vmatmul.msk.f32.gmra.mxu2 %vm605_vm0, %v7208_v58  ;;  %8190 = vmatmul.msk.f32.gmra.mxu3 %vm605_vm0, %v7208_v58 }
0x1003   : > { %8532 = vpow2.f32 %v6790_v56 }
0x1004   : > { %7849 = vst [vmem:[%s14290_s23 + $0x8] sm:$0xff] %v7756_v61  ;;  %v7371_v37 = vpop.f32.mrf.mxu2  ;;  %v7484_v8 = vpop.f32.mrf.mxu3 }
0x1005   : > { %v8531_v50 = vpop.eup %8530  ;;  %v7372_v53 = vadd.f32 %v7371_v37, %v14076_v25  ;;  %v7485_v49 = vadd.f32 %v7484_v8, %v14078_v2 }
0x1006   : > { %v6951_v44 = vmul.f32 %v8531_v50, %v14119_v7  ;;  %v6691_v5 = vpop.xlane.xlu0 %6690  ;;  %v6862_v14 = vpop.xlane.xlu2 %6861  ;;  %v15599_v50 = vld [vmem:[#allocation62_spill] sm:$0xff] }
0x1007   : > { %v7571_v16 = vmax.f32 %v7372_v53, 0.0  ;;  %v7572_v62 = vmax.f32 %v7485_v49, 0.0  ;;  %v6735_v45 = vsub.f32 %v14139_v13, %v6691_v5  ;;  %8534 = vrcp.f32 %v6862_v14  ;;  %v7645_v19 = vpop.f32.mrf.mxu0  ;;  %v7758_v29 = vpop.f32.mrf.mxu1  ;;  %v15600_v53 = vld [vmem:[#allocation91_spill] sm:$0xff] }
0x1008   : > { %v7646_v1 = vadd.f32 %v7645_v19, %v14285_v24  ;;  %v7209_v0 = vmul.f32 %v7148_v30, %v6951_v44  ;;  %v7151_v49 = vadd.f32 %v15600_v53, %v15599_v50 }
0x1009   : > { %v14310_v32 = vpop.eup %8532  ;;  %v6792_v34 = vmul.f32 1.442695, %v6735_v45  ;;  %7665 = vmatmul.f32.gmra.mxu0 %v7571_v16  ;;  %7778 = vmatmul.f32.gmra.mxu1 %v7572_v62 }
0x100a   : > { %v7759_v58 = vadd.f32 %v7758_v29, %v7646_v1  ;;  %8159 = vmatmul.msk.f32.gmra.mxu2 %vm605_vm0, %v7209_v0  ;;  %8191 = vmatmul.msk.f32.gmra.mxu3 %vm605_vm0, %v7209_v0  ;;  %v6878_v7 = vsel %vm605_vm0, %v14310_v32, 0.0 }
0x100b   : > { %8536 = vpow2.f32 %v6792_v34  ;;  %6879 = vadd.xlane.f32.xlu2 %v6878_v7 }
0x100c   : > { %7850 = vst [vmem:[%s14290_s23 + $0x10] sm:$0xff] %v7759_v58  ;;  %v7374_v13 = vpop.f32.mrf.mxu2  ;;  %v7487_v56 = vpop.f32.mrf.mxu3 }
0x100d   : > { %v8535_v61 = vpop.eup %8534  ;;  %v7375_v37 = vadd.f32 %v7374_v13, %v14076_v25  ;;  %v7488_v8 = vadd.f32 %v7487_v56, %v14078_v2  ;;  %v15601_v56 = vld [vmem:[#allocation87_spill] sm:$0xff] }
0x100e   : > { %v6952_v4 = vmul.f32 %v8535_v61, %v14142_v46  ;;  %v6694_v6 = vpop.xlane.xlu2 %6693  ;;  %v6865_v30 = vpop.xlane.xlu1 %6864  ;;  %v7154_v61 = vadd.f32 %v15601_v56, %v14098_v12 }
0x100f   : > { %v7573_v44 = vmax.f32 %v7375_v37, 0.0  ;;  %v7574_v5 = vmax.f32 %v7488_v8, 0.0  ;;  %v6736_v14 = vsub.f32 %v14162_v38, %v6694_v6  ;;  %8538 = vrcp.f32 %v6865_v30  ;;  %v7648_v16 = vpop.f32.mrf.mxu0  ;;  %v7761_v62 = vpop.f32.mrf.mxu1 }
0x1010   : > { %v7649_v45 = vadd.f32 %v7648_v16, %v14285_v24  ;;  %v7210_v19 = vmul.f32 %v7151_v49, %v6952_v4 }
0x1011   : > { %v14324_v29 = vpop.eup %8536  ;;  %v6794_v1 = vmul.f32 1.442695, %v6736_v14  ;;  %7668 = vmatmul.f32.gmra.mxu0 %v7573_v44  ;;  %7781 = vmatmul.f32.gmra.mxu1 %v7574_v5 }
0x1012   : > { %v7762_v0 = vadd.f32 %v7761_v62, %v7649_v45  ;;  %8160 = vmatmul.msk.f32.gmra.mxu2 %vm605_vm0, %v7210_v19  ;;  %8192 = vmatmul.msk.f32.gmra.mxu3 %vm605_vm0, %v7210_v19  ;;  %v6881_v46 = vsel %vm605_vm0, %v14324_v29, 0.0 }
0x1013   : > { %8540 = vpow2.f32 %v6794_v1  ;;  %6882 = vadd.xlane.f32.xlu1 %v6881_v46 }
0x1014   : > { %7851 = vst [vmem:[%s14290_s23 + $0x18] sm:$0xff] %v7762_v0  ;;  %v7377_v38 = vpop.f32.mrf.mxu2  ;;  %v7490_v34 = vpop.f32.mrf.mxu3  ;;  %v7157_v0 = vadd.f32 %v14100_v21, %v14121_v10 }
0x1015   : > { %v8539_v58 = vpop.eup %8538  ;;  %v7378_v7 = vadd.f32 %v7377_v38, %v14076_v25  ;;  %v7491_v13 = vadd.f32 %v7490_v34, %v14078_v2 }
0x1016   : > { %v6953_v37 = vmul.f32 %v8539_v58, %v14165_v15  ;;  %v6868_v8 = vpop.xlane.xlu0 %6867  ;;  %v6697_v50 = vpop.xlane.xlu1 %6696 }
0x1017   : > { %v7575_v53 = vmax.f32 %v7378_v7, 0.0  ;;  %v7576_v49 = vmax.f32 %v7491_v13, 0.0  ;;  %8542 = vrcp.f32 %v6868_v8  ;;  %v6737_v4 = vsub.f32 %v14181_v40, %v6697_v50  ;;  %v7651_v6 = vpop.f32.mrf.mxu0  ;;  %v7764_v30 = vpop.f32.mrf.mxu1 }
0x1018   : > { %v7652_v44 = vadd.f32 %v7651_v6, %v14285_v24  ;;  %v7211_v5 = vmul.f32 %v7154_v61, %v6953_v37 }
0x1019   : > { %v14338_v14 = vpop.eup %8540  ;;  %v6796_v16 = vmul.f32 1.442695, %v6737_v4  ;;  %7671 = vmatmul.f32.gmra.mxu0 %v7575_v53  ;;  %7784 = vmatmul.f32.gmra.mxu1 %v7576_v49 }
0x101a   : > { %v7765_v12 = vadd.f32 %v7764_v30, %v7652_v44  ;;  %8161 = vmatmul.msk.f32.gmra.mxu2 %vm605_vm0, %v7211_v5  ;;  %8193 = vmatmul.msk.f32.gmra.mxu3 %vm605_vm0, %v7211_v5  ;;  %v6884_v15 = vsel %vm605_vm0, %v14338_v14, 0.0  ;;  %v7160_v30 = vadd.f32 %v14123_v18, %v14150_v47 }
0x101b   : > { %8544 = vpow2.f32 %v6796_v16  ;;  %6885 = vadd.xlane.f32.xlu2 %v6884_v15 }
0x101c   : > { %7852 = vst [vmem:[%s14290_s23 + $0x20] sm:$0xff] %v7765_v12  ;;  %v7380_v40 = vpop.f32.mrf.mxu2  ;;  %v7493_v62 = vpop.f32.mrf.mxu3 }
0x101d   : > { %v8543_v45 = vpop.eup %8542  ;;  %v7381_v19 = vadd.f32 %v7380_v40, %v14076_v25  ;;  %v7494_v1 = vadd.f32 %v7493_v62, %v14078_v2 }
0x101e   : > { %v6954_v46 = vmul.f32 %v8543_v45, %v14188_v26  ;;  %v6700_v38 = vpop.xlane.xlu0 %6699  ;;  %v6871_v34 = vpop.xlane.xlu2 %6870 }
0x101f   : > { %v7577_v58 = vmax.f32 %v7381_v19, 0.0  ;;  %v7578_v7 = vmax.f32 %v7494_v1, 0.0  ;;  %v6738_v13 = vsub.f32 %v14204_v57, %v6700_v38  ;;  %8546 = vrcp.f32 %v6871_v34  ;;  %v7654_v56 = vpop.f32.mrf.mxu0  ;;  %v7767_v61 = vpop.f32.mrf.mxu1 }
0x1020   : > { %v7655_v37 = vadd.f32 %v7654_v56, %v14285_v24  ;;  %v7212_v8 = vmul.f32 %v7157_v0, %v6954_v46 }
0x1021   : > { %v14352_v50 = vpop.eup %8544  ;;  %v6798_v53 = vmul.f32 1.442695, %v6738_v13  ;;  %7674 = vmatmul.f32.gmra.mxu0 %v7577_v58  ;;  %7787 = vmatmul.f32.gmra.mxu1 %v7578_v7  ;;  %v7163_v13 = vadd.f32 %v14152_v22, %v14184_v33 }
0x1022   : > { %v7768_v21 = vadd.f32 %v7767_v61, %v7655_v37  ;;  %8162 = vmatmul.msk.f32.gmra.mxu2 %vm605_vm0, %v7212_v8  ;;  %8194 = vmatmul.msk.f32.gmra.mxu3 %vm605_vm0, %v7212_v8  ;;  %v6887_v10 = vsel %vm605_vm0, %v14352_v50, 0.0 }
0x1023   : > { %8548 = vpow2.f32 %v6798_v53  ;;  %6888 = vadd.xlane.f32.xlu0 %v6887_v10 }
0x1024   : > { %7853 = vst [vmem:[%s14290_s23 + $0x28] sm:$0xff] %v7768_v21  ;;  %v7383_v26 = vpop.f32.mrf.mxu2  ;;  %v7496_v57 = vpop.f32.mrf.mxu3 }
0x1025   : > { %v8547_v49 = vpop.eup %8546  ;;  %v7384_v4 = vadd.f32 %v7383_v26, %v14076_v25  ;;  %v7497_v6 = vadd.f32 %v7496_v57, %v14078_v2 }
0x1026   : > { %v6955_v44 = vmul.f32 %v8547_v49, %v14207_v41  ;;  %v6703_v5 = vpop.xlane.xlu2 %6702  ;;  %v6874_v16 = vpop.xlane.xlu1 %6873 }
0x1027   : > { %v7579_v12 = vmax.f32 %v7384_v4, 0.0  ;;  %v7580_v15 = vmax.f32 %v7497_v6, 0.0  ;;  %v6739_v40 = vsub.f32 %v14227_v52, %v6703_v5  ;;  %8550 = vrcp.f32 %v6874_v16  ;;  %v7657_v62 = vpop.f32.mrf.mxu0  ;;  %v7770_v45 = vpop.f32.mrf.mxu1 }
0x1028   : > { %v7658_v19 = vadd.f32 %v7657_v62, %v14285_v24  ;;  %v7213_v1 = vmul.f32 %v7160_v30, %v6955_v44  ;;  %v7166_v30 = vadd.f32 %v14186_v36, %v14209_v20 }
0x1029   : > { %v14366_v0 = vpop.eup %8548  ;;  %v6800_v46 = vmul.f32 1.442695, %v6739_v40  ;;  %7677 = vmatmul.f32.gmra.mxu0 %v7579_v12  ;;  %7790 = vmatmul.f32.gmra.mxu1 %v7580_v15 }
0x102a   : > { %v7771_v18 = vadd.f32 %v7770_v45, %v7658_v19  ;;  %8163 = vmatmul.msk.f32.gmra.mxu2 %vm605_vm0, %v7213_v1  ;;  %8195 = vmatmul.msk.f32.gmra.mxu3 %vm605_vm0, %v7213_v1  ;;  %v6890_v47 = vsel %vm605_vm0, %v14366_v0, 0.0 }
0x102b   : > { %8552 = vpow2.f32 %v6800_v46  ;;  %6891 = vadd.xlane.f32.xlu1 %v6890_v47 }
0x102c   : > { %7854 = vst [vmem:[%s14290_s23 + $0x30] sm:$0xff] %v7771_v18  ;;  %v7386_v41 = vpop.f32.mrf.mxu2  ;;  %v7499_v52 = vpop.f32.mrf.mxu3 }
0x102d   : > { %v8551_v38 = vpop.eup %8550  ;;  %v7387_v34 = vadd.f32 %v7386_v41, %v14076_v25  ;;  %v7500_v58 = vadd.f32 %v7499_v52, %v14078_v2  ;;  %v6877_v7 = vpop.xlane.xlu0 %6876 }
0x102e   : > { %v6956_v56 = vmul.f32 %v8551_v38, %v14230_v27  ;;  %8554 = vrcp.f32 %v6877_v7  ;;  %v6706_v61 = vpop.xlane.xlu1 %6705 }
0x102f   : > { %v7581_v37 = vmax.f32 %v7387_v34, 0.0  ;;  %v7582_v8 = vmax.f32 %v7500_v58, 0.0  ;;  %v6740_v53 = vsub.f32 %v14245_v54, %v6706_v61  ;;  %v7660_v21 = vpop.f32.mrf.mxu0  ;;  %v7773_v4 = vpop.f32.mrf.mxu1  ;;  %v7169_v58 = vadd.f32 %v14211_v39, %v14238_v31 }
0x1030   : > { %v7661_v10 = vadd.f32 %v7660_v21, %v14285_v24  ;;  %v7214_v26 = vmul.f32 %v7163_v13, %v6956_v56 }
0x1031   : > { %v14380_v57 = vpop.eup %8552  ;;  %v6802_v49 = vmul.f32 1.442695, %v6740_v53  ;;  %7680 = vmatmul.f32.gmra.mxu0 %v7581_v37  ;;  %7793 = vmatmul.f32.gmra.mxu1 %v7582_v8 }
0x1032   : > { %v7774_v22 = vadd.f32 %v7773_v4, %v7661_v10  ;;  %8164 = vmatmul.msk.f32.gmra.mxu2 %vm605_vm0, %v7214_v26  ;;  %8196 = vmatmul.msk.f32.gmra.mxu3 %vm605_vm0, %v7214_v26  ;;  %v6893_v33 = vsel %vm605_vm0, %v14380_v57, 0.0  ;;  %v7172_v4 = vadd.f32 %v14240_v51, %v14258_v3 }
0x1033   : > { %8556 = vpow2.f32 %v6802_v49  ;;  %6894 = vadd.xlane.f32.xlu2 %v6893_v33 }
0x1034   : > { %v8555_v27 = vpop.eup %8554  ;;  %7855 = vst [vmem:[%s14290_s23 + $0x38] sm:$0xff] %v7774_v22  ;;  %v7389_v54 = vpop.f32.mrf.mxu2 }
0x1035   : > { %v7502_v6 = vpop.f32.mrf.mxu3  ;;  %v6957_v44 = vmul.f32 %v8555_v27, %v14247_v55  ;;  %v7390_v5 = vadd.f32 %v7389_v54, %v14076_v25  ;;  %v6709_v12 = vpop.xlane.xlu0 %6708 }
0x1036   : > { %v7503_v16 = vadd.f32 %v7502_v6, %v14078_v2  ;;  %v6741_v15 = vsub.f32 %v14256_v43, %v6709_v12 }
0x1037   : > { %v7583_v40 = vmax.f32 %v7390_v5, 0.0  ;;  %v7215_v45 = vmul.f32 %v7166_v30, %v6957_v44 }
0x1038   : > { %v7584_v62 = vmax.f32 %v7503_v16, 0.0  ;;  %v6804_v19 = vmul.f32 1.442695, %v6741_v15 }
0x1039   : > { %v14393_v1 = vpop.eup %8556  ;;  %7683 = vmatmul.f32.gmra.mxu0 %v7583_v40  ;;  %v7175_v40 = vadd.f32 %v14260_v11, %v14264_v23 }
0x103a   : > { %7796 = vmatmul.f32.gmra.mxu1 %v7584_v62  ;;  %8558 = vpow2.f32 %v6804_v19  ;;  %8165 = vmatmul.msk.f32.gmra.mxu2 %vm605_vm0, %v7215_v45  ;;  %v6896_v36 = vsel %vm605_vm0, %v14393_v1, 0.0 }
0x103b   : > { %8197 = vmatmul.msk.f32.gmra.mxu3 %vm605_vm0, %v7215_v45  ;;  %6897 = vadd.xlane.f32.xlu0 %v6896_v36 }
0x1040   : > { %v14399_v20 = vpop.eup %8558 }
0x1041   : > { %v6899_v55 = vsel %vm605_vm0, %v14399_v20, 0.0 }
0x1042   : > { %6900 = vadd.xlane.f32.xlu1 %v6899_v55 }
0x107d   : > { %v7663_v46 = vpop.f32.mrf.mxu0  ;;  %v7776_v47 = vpop.f32.mrf.mxu1 }
0x107e   : > { %v6880_v43 = vpop.xlane.xlu2 %6879  ;;  %v7664_v18 = vadd.f32 %v7663_v46, %v14285_v24 }
0x107f   : > { %8560 = vrcp.f32 %v6880_v43 }
0x1080   : > { %v7777_v41 = vadd.f32 %v7776_v47, %v7664_v18 }
0x1082   : > { %7856 = vst [vmem:[%s14290_s23 + $0x40] sm:$0xff] %v7777_v41 }
0x1085   : > { %v8561_v52 = vpop.eup %8560  ;;  %v7392_v38 = vpop.f32.mrf.mxu2 }
0x1086   : > { %v7505_v34 = vpop.f32.mrf.mxu3  ;;  %v6958_v7 = vmul.f32 %v8561_v52, %v14310_v32  ;;  %v7393_v13 = vadd.f32 %v7392_v38, %v14076_v25  ;;  %v6883_v61 = vpop.xlane.xlu1 %6882  ;;  %v7178_v38 = vadd.f32 %v14266_v63, %v14268_v59 }
0x1087   : > { %v7506_v56 = vadd.f32 %v7505_v34, %v14078_v2  ;;  %v7666_v37 = vpop.f32.mrf.mxu0  ;;  %8562 = vrcp.f32 %v6883_v61  ;;  %v7779_v53 = vpop.f32.mrf.mxu1 }
0x1088   : > { %v7667_v8 = vadd.f32 %v7666_v37, %v14285_v24  ;;  %v7585_v21 = vmax.f32 %v7393_v13, 0.0  ;;  %v7216_v26 = vmul.f32 %v7169_v58, %v6958_v7 }
0x1089   : > { %v7586_v10 = vmax.f32 %v7506_v56, 0.0 }
0x108a   : > { %v7780_v49 = vadd.f32 %v7779_v53, %v7667_v8  ;;  %8166 = vmatmul.msk.f32.gmra.mxu2 %vm605_vm0, %v7216_v26  ;;  %8198 = vmatmul.msk.f32.gmra.mxu3 %vm605_vm0, %v7216_v26  ;;  %v7181_v26 = vadd.f32 %v14270_v42, %v14272_v17 }
0x108b   : > { %7686 = vmatmul.f32.gmra.mxu0 %v7585_v21  ;;  %7799 = vmatmul.f32.gmra.mxu1 %v7586_v10 }
0x108c   : > { %7857 = vst [vmem:[%s14290_s23 + $0x48] sm:$0xff] %v7780_v49 }
0x108d   : > { %v8563_v39 = vpop.eup %8562  ;;  %v7395_v31 = vpop.f32.mrf.mxu2 }
0x108e   : > { %v7508_v32 = vpop.f32.mrf.mxu3  ;;  %v6959_v22 = vmul.f32 %v8563_v39, %v14324_v29  ;;  %v7396_v33 = vadd.f32 %v7395_v31, %v14076_v25  ;;  %v6886_v54 = vpop.xlane.xlu2 %6885 }
0x108f   : > { %v7509_v27 = vadd.f32 %v7508_v32, %v14078_v2  ;;  %v7669_v6 = vpop.f32.mrf.mxu0  ;;  %8564 = vrcp.f32 %v6886_v54  ;;  %v7782_v44 = vpop.f32.mrf.mxu1 }
0x1090   : > { %v7670_v30 = vadd.f32 %v7669_v6, %v14285_v24  ;;  %v7587_v5 = vmax.f32 %v7396_v33, 0.0  ;;  %v7217_v12 = vmul.f32 %v7172_v4, %v6959_v22 }
0x1091   : > { %v7588_v16 = vmax.f32 %v7509_v27, 0.0 }
0x1092   : > { %v7783_v15 = vadd.f32 %v7782_v44, %v7670_v30  ;;  %8167 = vmatmul.msk.f32.gmra.mxu2 %vm605_vm0, %v7217_v12  ;;  %8199 = vmatmul.msk.f32.gmra.mxu3 %vm605_vm0, %v7217_v12  ;;  %v7184_v44 = vadd.f32 %v14274_v28, %v14276_v35 }
0x1093   : > { %7689 = vmatmul.f32.gmra.mxu0 %v7587_v5  ;;  %7802 = vmatmul.f32.gmra.mxu1 %v7588_v16 }
0x1094   : > { %7858 = vst [vmem:[%s14290_s23 + $0x50] sm:$0xff] %v7783_v15 }
0x1095   : > { %v8565_v51 = vpop.eup %8564  ;;  %v7398_v3 = vpop.f32.mrf.mxu2 }
0x1096   : > { %v7511_v29 = vpop.f32.mrf.mxu3  ;;  %v6960_v62 = vmul.f32 %v8565_v51, %v14338_v14  ;;  %v7399_v45 = vadd.f32 %v7398_v3, %v14076_v25  ;;  %v6889_v36 = vpop.xlane.xlu0 %6888 }
0x1097   : > { %v7512_v19 = vadd.f32 %v7511_v29, %v14078_v2  ;;  %v7672_v55 = vpop.f32.mrf.mxu0  ;;  %8566 = vrcp.f32 %v6889_v36  ;;  %v7785_v46 = vpop.f32.mrf.mxu1  ;;  %v7187_v36 = vadd.f32 %v14278_v60, %v14280_v48 }
0x1098   : > { %v7673_v43 = vadd.f32 %v7672_v55, %v14285_v24  ;;  %v7589_v18 = vmax.f32 %v7399_v45, 0.0  ;;  %v7218_v41 = vmul.f32 %v7175_v40, %v6960_v62 }
0x1099   : > { %v7590_v47 = vmax.f32 %v7512_v19, 0.0 }
0x109a   : > { %v7786_v52 = vadd.f32 %v7785_v46, %v7673_v43  ;;  %8168 = vmatmul.msk.f32.gmra.mxu2 %vm605_vm0, %v7218_v41  ;;  %8200 = vmatmul.msk.f32.gmra.mxu3 %vm605_vm0, %v7218_v41 }
0x109b   : > { %7692 = vmatmul.f32.gmra.mxu0 %v7589_v18  ;;  %7805 = vmatmul.f32.gmra.mxu1 %v7590_v47 }
0x109c   : > { %7859 = vst [vmem:[%s14290_s23 + $0x58] sm:$0xff] %v7786_v52 }
0x109d   : > { %v8567_v11 = vpop.eup %8566  ;;  %v7401_v23 = vpop.f32.mrf.mxu2 }
0x109e   : > { %v7514_v14 = vpop.f32.mrf.mxu3  ;;  %v6961_v34 = vmul.f32 %v8567_v11, %v14352_v50  ;;  %v7402_v58 = vadd.f32 %v7401_v23, %v14076_v25  ;;  %v6892_v13 = vpop.xlane.xlu1 %6891 }
0x109f   : > { %v7515_v7 = vadd.f32 %v7514_v14, %v14078_v2  ;;  %v7675_v56 = vpop.f32.mrf.mxu0  ;;  %8568 = vrcp.f32 %v6892_v13  ;;  %v7788_v37 = vpop.f32.mrf.mxu1 }
0x10a0   : > { %v7676_v61 = vadd.f32 %v7675_v56, %v14285_v24  ;;  %v7591_v8 = vmax.f32 %v7402_v58, 0.0  ;;  %v7219_v21 = vmul.f32 %v7178_v38, %v6961_v34  ;;  %v15602_v34 = vld [vmem:[#allocation88_spill] sm:$0xff] }
0x10a1   : > { %v7592_v53 = vmax.f32 %v7515_v7, 0.0  ;;  %v7190_v58 = vadd.f32 %v14282_v9, %v15602_v34 }
0x10a2   : > { %v7789_v10 = vadd.f32 %v7788_v37, %v7676_v61  ;;  %8169 = vmatmul.msk.f32.gmra.mxu2 %vm605_vm0, %v7219_v21  ;;  %8201 = vmatmul.msk.f32.gmra.mxu3 %vm605_vm0, %v7219_v21 }
0x10a3   : > { %7695 = vmatmul.f32.gmra.mxu0 %v7591_v8  ;;  %7808 = vmatmul.f32.gmra.mxu1 %v7592_v53 }
0x10a4   : > { %7860 = vst [vmem:[%s14290_s23 + $0x60] sm:$0xff] %v7789_v10 }
0x10a5   : > { %v8569_v63 = vpop.eup %8568  ;;  %v7404_v59 = vpop.f32.mrf.mxu2 }
0x10a6   : > { %v7517_v50 = vpop.f32.mrf.mxu3  ;;  %v6962_v49 = vmul.f32 %v8569_v63, %v14366_v0  ;;  %v7405_v39 = vadd.f32 %v7404_v59, %v14076_v25  ;;  %v6895_v32 = vpop.xlane.xlu2 %6894 }
0x10a7   : > { %v7518_v31 = vadd.f32 %v7517_v50, %v14078_v2  ;;  %v7678_v4 = vpop.f32.mrf.mxu0  ;;  %8570 = vrcp.f32 %v6895_v32  ;;  %v7791_v33 = vpop.f32.mrf.mxu1 }
0x10a8   : > { %v7679_v22 = vadd.f32 %v7678_v4, %v14285_v24  ;;  %v7593_v27 = vmax.f32 %v7405_v39, 0.0  ;;  %v7220_v6 = vmul.f32 %v7181_v26, %v6962_v49 }
0x10a9   : > { %v7594_v54 = vmax.f32 %v7518_v31, 0.0 }
0x10aa   : > { %v7792_v30 = vadd.f32 %v7791_v33, %v7679_v22  ;;  %8170 = vmatmul.msk.f32.gmra.mxu2 %vm605_vm0, %v7220_v6  ;;  %8202 = vmatmul.msk.f32.gmra.mxu3 %vm605_vm0, %v7220_v6 }
0x10ab   : > { %7698 = vmatmul.f32.gmra.mxu0 %v7593_v27  ;;  %7811 = vmatmul.f32.gmra.mxu1 %v7594_v54 }
0x10ac   : > { %7861 = vst [vmem:[%s14290_s23 + $0x68] sm:$0xff] %v7792_v30 }
0x10ad   : > { %v8571_v42 = vpop.eup %8570  ;;  %v7407_v17 = vpop.f32.mrf.mxu2 }
0x10ae   : > { %v7520_v0 = vpop.f32.mrf.mxu3  ;;  %v6963_v5 = vmul.f32 %v8571_v42, %v14380_v57  ;;  %v7408_v16 = vadd.f32 %v7407_v17, %v14076_v25  ;;  %v6898_v15 = vpop.xlane.xlu0 %6897 }
0x10af   : > { %v7521_v12 = vadd.f32 %v7520_v0, %v14078_v2  ;;  %v7681_v51 = vpop.f32.mrf.mxu0  ;;  %8572 = vrcp.f32 %v6898_v15  ;;  %v7794_v29 = vpop.f32.mrf.mxu1 }
0x10b0   : > { %v7682_v3 = vadd.f32 %v7681_v51, %v14285_v24  ;;  %v7595_v40 = vmax.f32 %v7408_v16, 0.0  ;;  %v7221_v45 = vmul.f32 %v7184_v44, %v6963_v5 }
0x10b1   : > { %v7596_v62 = vmax.f32 %v7521_v12, 0.0 }
0x10b2   : > { %v7795_v19 = vadd.f32 %v7794_v29, %v7682_v3  ;;  %8171 = vmatmul.msk.f32.gmra.mxu2 %vm605_vm0, %v7221_v45  ;;  %8203 = vmatmul.msk.f32.gmra.mxu3 %vm605_vm0, %v7221_v45 }
0x10b3   : > { %7701 = vmatmul.f32.gmra.mxu0 %v7595_v40  ;;  %7814 = vmatmul.f32.gmra.mxu1 %v7596_v62 }
0x10b4   : > { %7862 = vst [vmem:[%s14290_s23 + $0x70] sm:$0xff] %v7795_v19 }
0x10b5   : > { %v8573_v28 = vpop.eup %8572  ;;  %v7410_v35 = vpop.f32.mrf.mxu2 }
0x10b6   : > { %v7523_v57 = vpop.f32.mrf.mxu3  ;;  %v6964_v55 = vmul.f32 %v8573_v28, %v14393_v1  ;;  %v7411_v43 = vadd.f32 %v7410_v35, %v14076_v25  ;;  %v6901_v18 = vpop.xlane.xlu1 %6900 }
0x10b7   : > { %v7524_v46 = vadd.f32 %v7523_v57, %v14078_v2  ;;  %v7684_v47 = vpop.f32.mrf.mxu0  ;;  %8574 = vrcp.f32 %v6901_v18  ;;  %v7797_v23 = vpop.f32.mrf.mxu1 }
0x10b8   : > { %v7685_v41 = vadd.f32 %v7684_v47, %v14285_v24  ;;  %v7597_v52 = vmax.f32 %v7411_v43, 0.0  ;;  %v7222_v14 = vmul.f32 %v7187_v36, %v6964_v55 }
0x10b9   : > { %v7598_v11 = vmax.f32 %v7524_v46, 0.0 }
0x10ba   : > { %v7798_v38 = vadd.f32 %v7797_v23, %v7685_v41  ;;  %8172 = vmatmul.msk.f32.gmra.mxu2 %vm605_vm0, %v7222_v14  ;;  %8204 = vmatmul.msk.f32.gmra.mxu3 %vm605_vm0, %v7222_v14 }
0x10bb   : > { %7704 = vmatmul.f32.gmra.mxu0 %v7597_v52  ;;  %7817 = vmatmul.f32.gmra.mxu1 %v7598_v11 }
0x10bc   : > { %7863 = vst [vmem:[%s14290_s23 + $0x78] sm:$0xff] %v7798_v38 }
0x10bd   : > { %v8575_v60 = vpop.eup %8574  ;;  %v7413_v48 = vpop.f32.mrf.mxu2 }
0x10be   : > { %v7526_v1 = vpop.f32.mrf.mxu3  ;;  %v6965_v7 = vmul.f32 %v8575_v60, %v14399_v20  ;;  %v7414_v13 = vadd.f32 %v7413_v48, %v14076_v25 }
0x10bf   : > { %v7527_v56 = vadd.f32 %v7526_v1, %v14078_v2 }
0x10c0   : > { %v7599_v61 = vmax.f32 %v7414_v13, 0.0  ;;  %v7223_v8 = vmul.f32 %v7190_v58, %v6965_v7 }
0x10c1   : > { %v7600_v37 = vmax.f32 %v7527_v56, 0.0 }
0x10c2   : > { %8173 = vmatmul.msk.f32.gmra.mxu2 %vm605_vm0, %v7223_v8  ;;  %8205 = vmatmul.msk.f32.gmra.mxu3 %vm605_vm0, %v7223_v8 }
0x10c3   : > { %7707 = vmatmul.f32.gmra.mxu0 %v7599_v61  ;;  %7820 = vmatmul.f32.gmra.mxu1 %v7600_v37 }
0x1108   : > { %v7687_v53 = vpop.f32.mrf.mxu0  ;;  %v7800_v21 = vpop.f32.mrf.mxu1 }
0x1109   : > { %v7688_v9 = vadd.f32 %v7687_v53, %v14285_v24 }
0x110b   : > { %v7801_v10 = vadd.f32 %v7800_v21, %v7688_v9 }
0x110d   : > { %7864 = vst [vmem:[%s14290_s23 + $0x80] sm:$0xff] %v7801_v10  ;;  %v7416_v20 = vpop.f32.mrf.mxu2  ;;  %v7529_v63 = vpop.f32.mrf.mxu3 }
0x110e   : > { %v7417_v59 = vadd.f32 %v7416_v20, %v14076_v25  ;;  %v7530_v50 = vadd.f32 %v7529_v63, %v14078_v2 }
0x1110   : > { %v7601_v26 = vmax.f32 %v7417_v59, 0.0  ;;  %v7602_v49 = vmax.f32 %v7530_v50, 0.0  ;;  %v7690_v39 = vpop.f32.mrf.mxu0  ;;  %v7803_v31 = vpop.f32.mrf.mxu1 }
0x1111   : > { %v7691_v32 = vadd.f32 %v7690_v39, %v14285_v24 }
0x1112   : > { %7710 = vmatmul.f32.gmra.mxu0 %v7601_v26  ;;  %7823 = vmatmul.f32.gmra.mxu1 %v7602_v49 }
0x1113   : > { %v7804_v4 = vadd.f32 %v7803_v31, %v7691_v32 }
0x1115   : > { %7865 = vst [vmem:[%s14290_s23 + $0x88] sm:$0xff] %v7804_v4  ;;  %v7419_v22 = vpop.f32.mrf.mxu2  ;;  %v7532_v33 = vpop.f32.mrf.mxu3 }
0x1116   : > { %v7420_v27 = vadd.f32 %v7419_v22, %v14076_v25  ;;  %v7533_v54 = vadd.f32 %v7532_v33, %v14078_v2 }
0x1118   : > { %v7603_v6 = vmax.f32 %v7420_v27, 0.0  ;;  %v7604_v30 = vmax.f32 %v7533_v54, 0.0  ;;  %v7693_v42 = vpop.f32.mrf.mxu0  ;;  %v7806_v17 = vpop.f32.mrf.mxu1 }
0x1119   : > { %v7694_v0 = vadd.f32 %v7693_v42, %v14285_v24 }
0x111a   : > { %7713 = vmatmul.f32.gmra.mxu0 %v7603_v6  ;;  %7826 = vmatmul.f32.gmra.mxu1 %v7604_v30 }
0x111b   : > { %v7807_v44 = vadd.f32 %v7806_v17, %v7694_v0 }
0x111d   : > { %7866 = vst [vmem:[%s14290_s23 + $0x90] sm:$0xff] %v7807_v44  ;;  %v7422_v5 = vpop.f32.mrf.mxu2  ;;  %v7535_v16 = vpop.f32.mrf.mxu3 }
0x111e   : > { %v7423_v12 = vadd.f32 %v7422_v5, %v14076_v25  ;;  %v7536_v15 = vadd.f32 %v7535_v16, %v14078_v2 }
0x1120   : > { %v7605_v51 = vmax.f32 %v7423_v12, 0.0  ;;  %v7606_v3 = vmax.f32 %v7536_v15, 0.0  ;;  %v7696_v29 = vpop.f32.mrf.mxu0  ;;  %v7809_v40 = vpop.f32.mrf.mxu1 }
0x1121   : > { %v7697_v62 = vadd.f32 %v7696_v29, %v14285_v24 }
0x1122   : > { %7716 = vmatmul.f32.gmra.mxu0 %v7605_v51  ;;  %7829 = vmatmul.f32.gmra.mxu1 %v7606_v3 }
0x1123   : > { %v7810_v45 = vadd.f32 %v7809_v40, %v7697_v62 }
0x1125   : > { %7867 = vst [vmem:[%s14290_s23 + $0x98] sm:$0xff] %v7810_v45  ;;  %v7425_v19 = vpop.f32.mrf.mxu2  ;;  %v7538_v28 = vpop.f32.mrf.mxu3 }
0x1126   : > { %v7426_v35 = vadd.f32 %v7425_v19, %v14076_v25  ;;  %v7539_v57 = vadd.f32 %v7538_v28, %v14078_v2 }
0x1128   : > { %v7607_v36 = vmax.f32 %v7426_v35, 0.0  ;;  %v7608_v55 = vmax.f32 %v7539_v57, 0.0  ;;  %v7699_v43 = vpop.f32.mrf.mxu0  ;;  %v7812_v46 = vpop.f32.mrf.mxu1 }
0x1129   : > { %v7700_v18 = vadd.f32 %v7699_v43, %v14285_v24 }
0x112a   : > { %7719 = vmatmul.f32.gmra.mxu0 %v7607_v36  ;;  %7832 = vmatmul.f32.gmra.mxu1 %v7608_v55 }
0x112b   : > { %v7813_v47 = vadd.f32 %v7812_v46, %v7700_v18 }
0x112d   : > { %7868 = vst [vmem:[%s14290_s23 + $0xa0] sm:$0xff] %v7813_v47  ;;  %v7428_v41 = vpop.f32.mrf.mxu2  ;;  %v7541_v52 = vpop.f32.mrf.mxu3 }
0x112e   : > { %v7429_v11 = vadd.f32 %v7428_v41, %v14076_v25  ;;  %v7542_v23 = vadd.f32 %v7541_v52, %v14078_v2 }
0x1130   : > { %v7609_v14 = vmax.f32 %v7429_v11, 0.0  ;;  %v7610_v38 = vmax.f32 %v7542_v23, 0.0  ;;  %v7702_v60 = vpop.f32.mrf.mxu0  ;;  %v7815_v48 = vpop.f32.mrf.mxu1 }
0x1131   : > { %v7703_v1 = vadd.f32 %v7702_v60, %v14285_v24 }
0x1132   : > { %7722 = vmatmul.f32.gmra.mxu0 %v7609_v14  ;;  %7835 = vmatmul.f32.gmra.mxu1 %v7610_v38 }
0x1133   : > { %v7816_v34 = vadd.f32 %v7815_v48, %v7703_v1 }
0x1135   : > { %7869 = vst [vmem:[%s14290_s23 + $0xa8] sm:$0xff] %v7816_v34  ;;  %v7431_v58 = vpop.f32.mrf.mxu2  ;;  %v7544_v7 = vpop.f32.mrf.mxu3 }
0x1136   : > { %v7432_v13 = vadd.f32 %v7431_v58, %v14076_v25  ;;  %v7545_v56 = vadd.f32 %v7544_v7, %v14078_v2 }
0x1138   : > { %v7611_v61 = vmax.f32 %v7432_v13, 0.0  ;;  %v7612_v37 = vmax.f32 %v7545_v56, 0.0  ;;  %v7705_v8 = vpop.f32.mrf.mxu0  ;;  %v7818_v53 = vpop.f32.mrf.mxu1 }
0x1139   : > { %v7706_v21 = vadd.f32 %v7705_v8, %v14285_v24 }
0x113a   : > { %7725 = vmatmul.f32.gmra.mxu0 %v7611_v61  ;;  %7838 = vmatmul.f32.gmra.mxu1 %v7612_v37 }
0x113b   : > { %v7819_v9 = vadd.f32 %v7818_v53, %v7706_v21 }
0x113d   : > { %7870 = vst [vmem:[%s14290_s23 + $0xb0] sm:$0xff] %v7819_v9  ;;  %v7434_v10 = vpop.f32.mrf.mxu2  ;;  %v7547_v20 = vpop.f32.mrf.mxu3 }
0x113e   : > { %v7435_v63 = vadd.f32 %v7434_v10, %v14076_v25  ;;  %v7548_v59 = vadd.f32 %v7547_v20, %v14078_v2 }
0x1140   : > { %v7613_v50 = vmax.f32 %v7435_v63, 0.0  ;;  %v7614_v26 = vmax.f32 %v7548_v59, 0.0  ;;  %v7708_v49 = vpop.f32.mrf.mxu0  ;;  %v7821_v31 = vpop.f32.mrf.mxu1 }
0x1141   : > { %v7709_v39 = vadd.f32 %v7708_v49, %v14285_v24 }
0x1142   : > { %7728 = vmatmul.f32.gmra.mxu0 %v7613_v50  ;;  %7841 = vmatmul.f32.gmra.mxu1 %v7614_v26 }
0x1143   : > { %v7822_v32 = vadd.f32 %v7821_v31, %v7709_v39 }
0x1145   : > { %7871 = vst [vmem:[%s14290_s23 + $0xb8] sm:$0xff] %v7822_v32  ;;  %v7437_v4 = vpop.f32.mrf.mxu2  ;;  %v7550_v22 = vpop.f32.mrf.mxu3 }
0x1146   : > { %v7438_v33 = vadd.f32 %v7437_v4, %v14076_v25  ;;  %v7551_v27 = vadd.f32 %v7550_v22, %v14078_v2 }
0x1148   : > { %v7615_v54 = vmax.f32 %v7438_v33, 0.0  ;;  %v7616_v6 = vmax.f32 %v7551_v27, 0.0 }
0x114a   : > { %7731 = vmatmul.f32.gmra.mxu0 %v7615_v54  ;;  %7844 = vmatmul.f32.gmra.mxu1 %v7616_v6 }
0x118f   : > { %v7711_v30 = vpop.f32.mrf.mxu0  ;;  %v7824_v42 = vpop.f32.mrf.mxu1 }
0x1190   : > { %v7712_v17 = vadd.f32 %v7711_v30, %v14285_v24 }
0x1192   : > { %v7825_v0 = vadd.f32 %v7824_v42, %v7712_v17 }
0x1194   : > { %7872 = vst [vmem:[%s14290_s23 + $0xc0] sm:$0xff] %v7825_v0 }
0x1197   : > { %v7714_v44 = vpop.f32.mrf.mxu0  ;;  %v7827_v5 = vpop.f32.mrf.mxu1 }
0x1198   : > { %v7715_v16 = vadd.f32 %v7714_v44, %v14285_v24 }
0x119a   : > { %v7828_v12 = vadd.f32 %v7827_v5, %v7715_v16 }
0x119c   : > { %7873 = vst [vmem:[%s14290_s23 + $0xc8] sm:$0xff] %v7828_v12 }
0x119f   : > { %v7717_v25 = vpop.f32.mrf.mxu0  ;;  %v7830_v2 = vpop.f32.mrf.mxu1 }
0x11a0   : > { %v7718_v15 = vadd.f32 %v7717_v25, %v14285_v24 }
0x11a2   : > { %v7831_v51 = vadd.f32 %v7830_v2, %v7718_v15 }
0x11a4   : > { %7874 = vst [vmem:[%s14290_s23 + $0xd0] sm:$0xff] %v7831_v51 }
0x11a7   : > { %v7720_v3 = vpop.f32.mrf.mxu0  ;;  %v7833_v29 = vpop.f32.mrf.mxu1 }
0x11a8   : > { %v7721_v40 = vadd.f32 %v7720_v3, %v14285_v24 }
0x11aa   : > { %v7834_v62 = vadd.f32 %v7833_v29, %v7721_v40 }
0x11ac   : > { %7875 = vst [vmem:[%s14290_s23 + $0xd8] sm:$0xff] %v7834_v62 }
0x11af   : > { %v7723_v45 = vpop.f32.mrf.mxu0  ;;  %v7836_v19 = vpop.f32.mrf.mxu1 }
0x11b0   : > { %v7724_v28 = vadd.f32 %v7723_v45, %v14285_v24 }
0x11b2   : > { %v7837_v35 = vadd.f32 %v7836_v19, %v7724_v28 }
0x11b4   : > { %7876 = vst [vmem:[%s14290_s23 + $0xe0] sm:$0xff] %v7837_v35 }
0x11b7   : > { %v7726_v57 = vpop.f32.mrf.mxu0  ;;  %v7839_v36 = vpop.f32.mrf.mxu1 }
0x11b8   : > { %v7727_v55 = vadd.f32 %v7726_v57, %v14285_v24 }
0x11ba   : > { %v7840_v43 = vadd.f32 %v7839_v36, %v7727_v55 }
0x11bc   : > { %7877 = vst [vmem:[%s14290_s23 + $0xe8] sm:$0xff] %v7840_v43 }
0x11bf   : > { %v7729_v46 = vpop.f32.mrf.mxu0  ;;  %v7842_v18 = vpop.f32.mrf.mxu1 }
0x11c0   : > { %v7730_v47 = vadd.f32 %v7729_v46, %v14285_v24 }
0x11c2   : > { %v7843_v41 = vadd.f32 %v7842_v18, %v7730_v47 }
0x11c4   : > { %7878 = vst [vmem:[%s14290_s23 + $0xf0] sm:$0xff] %v7843_v41 }
0x11c7   : > { %v7732_v52 = vpop.f32.mrf.mxu0  ;;  %v7845_v23 = vpop.f32.mrf.mxu1 }
0x11c8   : > { %v7733_v11 = vadd.f32 %v7732_v52, %v14285_v24 }
0x11ca   : > { %v7846_v14 = vadd.f32 %v7845_v23, %v7733_v11 }
0x11cc   : > { %7879 = vst [vmem:[%s14290_s23 + $0xf8] sm:$0xff] %v7846_v14 }
0x11cd   : > { %8851 = shalt.err (!%p8848_p8)
}
0x11ce   : > { %s8906_s15 = smov 128   ;;  %s8907_s16 = smov 8  }
0x11cf   : > { %8252 = dma.vmem_to_hbm [thread:$0]  (%p8976_p5), %s7894_s9, 4096, %s7896_s10, %s7881_s13, %s8906_s15, %s8906_s15, %s8907_s16  }
0x11d0 PF: > { %p8279_p9 = scmp.ge.s32.totalorder %s8898_s21, 2  ;;  %s7910_s17 = sand.u32 1, %s8886_s18  }
0x11d1   : > { %s7911_s23 = scalar_lea.sflag [#allocation4], %s7910_s17 }
0x11d2   : > { %p8268_p10 = pnand %p8279_p9, %p8980_p6 }
0x11d4   : > { %p8269_p11 = pneg %p8268_p10 }
0x11d6   : > { %8881 = dma.done.wait (%p8269_p11), %s7911_s23, 4096  }
0x11d7   : > { %8883 = vsyncadd (%p8269_p11), %s7911_s23, 4294963200  ;;  %p18_p12 = scmp.ge.s32.totalorder %s8963_s24, 6   ;;  %s15603_s18 = smov %s8890_s19 }
0x11d8   : > { %s15604_s19 = smov %s8894_s20  ;;  %s15605_s20 = smov %s8974_s27 }
0x11d9   : > { %s15606_s21 = smov %s8963_s24  ;;  %20 = sbr.rel (!%p18_p12) target bundleno = 8 (0x8), region = 103 }
0x11de   :  { %7917 = vsyncpa [#allocation3], 1 }
0x11df   :  { %7919 = vsyncpa [#allocation3 + $0x1], 1 }
0x11e0   :  { %7920 = vsyncpa [#allocation6], 1 }
0x11e1   :  { %7921 = vsyncpa [#allocation9], 1 }
0x11e2   :  { %7922 = vsyncpa [#allocation4], 1 }
0x11e3   :  { %7924 = vsyncpa [#allocation4 + $0x1], 1 }

</bundles_post_ra>
